<compile_context>
chip_gen: v5e
topology: v5e:2x2
jax: 0.10.0
libtpu: 0.0.40
codegen_flags: <defaults>
</compile_context>

<pallas_src>
import math
import functools

import jax
import jax.numpy as jnp
from jax.experimental import pallas as pl
from jax.experimental.pallas import tpu as pltpu


# bf16 operands + f32 accumulation: MXU fast path, half the weight DMA bytes.
# Element-wise math, norms and residuals stay f32.
MATMUL_DTYPE = jnp.bfloat16


# ---------------------------------------------------------------------------
# in-kernel helpers (pure value functions)
# ---------------------------------------------------------------------------
def _sigmoid_exact(x):
    e = jnp.exp(-jnp.abs(x))
    r = 1.0 / (1.0 + e)
    return jnp.where(x >= 0, r, e * r)


def _sigmoid_fast(x):
    # exp lands on the EUP slot; approx reciprocal (vrcp) replaces the divide.
    e = jnp.exp(-jnp.abs(x))
    r = pl.reciprocal(1.0 + e, approx=True)
    return jnp.where(x >= 0, r, e * r)


def _layer_norm(x, w, b, eps=1e-6):
    # eps=1e-6 matches yet-another-retnet's layer_norm_eps default (not torch's 1e-5).
    mu = jnp.mean(x, axis=-1, keepdims=True)
    xc = x - mu
    var = jnp.mean(xc * xc, axis=-1, keepdims=True)
    return xc * jax.lax.rsqrt(var + eps) * w + b


# ---------------------------------------------------------------------------
# fused Pallas kernel: grid = (batch blocks, layers)
# ---------------------------------------------------------------------------
def retnet_fused_kernel(num_heads,
                        x_ref, pos_ref, cos_ref, sin_ref,
                        ln1w_ref, ln1b_ref, ln2w_ref, ln2b_ref,
                        wqkvg_ref, bqkvg_ref, wo_ref, bo_ref,
                        w1_ref, b1_ref, w2_ref, b2_ref,
                        outw_ref, outb_ref,
                        out_ref,
                        x_scr, decay_scr):
    Bblk, T, D = x_ref.shape
    H = num_heads
    Dh = D // H
    D2 = D // 2
    Dh2 = Dh // 2
    M = Bblk * T
    l = pl.program_id(1)

    # compile-time decay bases: gammas = 1 - exp(linspace(log(1/32), log(1/512), H))
    lo, hi = math.log(1.0 / 32.0), math.log(1.0 / 512.0)
    if H > 1:
        gammas = [1.0 - math.exp(lo + (hi - lo) * i / (H - 1)) for i in range(H)]
    else:
        gammas = [1.0 - math.exp(lo)]

    # ---- first layer step of this batch block: positional add + decay masks ----
    # (x accumulator lives in VMEM scratch across the layer grid axis.)
    @pl.when(l == 0)
    def _init():
        # mirrors `x + position_enc.weight[:x.shape[0]]` (wrapper asserts B == T so the
        # reference right-aligned broadcast over dim -2 is well defined).
        x_scr[...] = (x_ref[...] + pos_ref[...]).reshape(M, D)
        n_idx = jax.lax.broadcasted_iota(jnp.int32, (T, T), 0)   # query position
        m_idx = jax.lax.broadcasted_iota(jnp.int32, (T, T), 1)   # key position
        causal = n_idx >= m_idx
        dist = jnp.maximum(n_idx - m_idx, 0).astype(jnp.float32)
        for h in range(H):
            decay_scr[h] = jnp.where(causal, jnp.exp(dist * math.log(gammas[h])), 0.0)

    # --------------------------- one decoder layer ---------------------------
    x = x_scr[...]                                              # (M, D) f32

    # ----------------- multi-scale retention block (pre-norm) -----------------
    h1 = _layer_norm(x, ln1w_ref[...], ln1b_ref[...])
    hb = h1.astype(MATMUL_DTYPE)
    # fused q|k|v|g projection: one (M, D) x (D, 4D) matmul
    qkvg = jnp.dot(hb, wqkvg_ref[...],
                   preferred_element_type=jnp.float32) + bqkvg_ref[...]
    q = qkvg[:, 0 * D:1 * D].reshape(Bblk, T, D)
    k = qkvg[:, 1 * D:2 * D].reshape(Bblk, T, D)
    v = qkvg[:, 2 * D:3 * D].reshape(Bblk, T, D)
    g = qkvg[:, 3 * D:4 * D]

    # xPos rotation.  wq/wk (and biases) were column-permuted on the host into an
    # [even components | odd components] layout (heads contiguous inside each half), so
    #   out_even = e*cos - o*sin ; out_odd = o*cos + e*sin
    # is pure VPU math.  The two halves are kept separate (no lane concat); per-head
    # sim is the sum of the even-half and odd-half contractions.
    cos2 = cos_ref[...]                                         # (T, D/2)
    sin2 = sin_ref[...]
    qe, qo = q[..., :D2], q[..., D2:]
    ke, ko = k[..., :D2], k[..., D2:]
    qre = (qe * cos2 - qo * sin2).astype(MATMUL_DTYPE)
    qro = (qo * cos2 + qe * sin2).astype(MATMUL_DTYPE)
    kre = (ke * cos2 - ko * sin2).astype(MATMUL_DTYPE)
    kro = (ko * cos2 + ke * sin2).astype(MATMUL_DTYPE)
    vb = v.astype(MATMUL_DTYPE)

    ret_heads = []
    for h in range(H):
        s2 = slice(h * Dh2, (h + 1) * Dh2)   # head h columns inside each split half
        sd = slice(h * Dh, (h + 1) * Dh)     # head h columns in natural layout (v)
        sim = (jnp.einsum('btd,bsd->bts', qre[..., s2], kre[..., s2],
                          preferred_element_type=jnp.float32)
               + jnp.einsum('btd,bsd->bts', qro[..., s2], kro[..., s2],
                            preferred_element_type=jnp.float32))
        sim = sim * decay_scr[h]                                 # causal decay
        rh = jnp.einsum('bts,bsd->btd', sim.astype(MATMUL_DTYPE), vb[..., sd],
                        preferred_element_type=jnp.float32)      # (Bblk, T, Dh)
        # GroupNorm(affine=False, eps=1e-6): per-(position, head) over head_dim.
        mu = jnp.mean(rh, axis=-1, keepdims=True)
        ctr = rh - mu
        var = jnp.mean(ctr * ctr, axis=-1, keepdims=True)
        ret_heads.append(ctr * jax.lax.rsqrt(var + 1e-6))
    ret = jnp.concatenate(ret_heads, axis=-1)                    # (Bblk, T, D)

    gate = g * _sigmoid_fast(g)                                  # swish gate
    gated = (ret.reshape(M, D) * gate).astype(MATMUL_DTYPE)
    msr = jnp.dot(gated, wo_ref[...],
                  preferred_element_type=jnp.float32) + bo_ref[...]
    x = x + msr                                                  # residual

    # ----------------------- feed-forward block (pre-norm) --------------------
    h2 = _layer_norm(x, ln2w_ref[...], ln2b_ref[...])
    ff = jnp.dot(h2.astype(MATMUL_DTYPE), w1_ref[...],
                 preferred_element_type=jnp.float32) + b1_ref[...]
    ff = ff * _sigmoid_fast(ff)                                  # swish
    ff = jnp.dot(ff.astype(MATMUL_DTYPE), w2_ref[...],
                 preferred_element_type=jnp.float32) + b2_ref[...]
    x = x + ff

    x_scr[...] = x

    # ---- last layer: head Linear(D -> 1) + sigmoid, lane-dense (1, M) store ----
    @pl.when(l == pl.num_programs(1) - 1)
    def _finish():
        logits = jnp.sum(x.reshape(1, M, D) * outw_ref[...], axis=-1) + outb_ref[...]
        out_ref[...] = _sigmoid_exact(logits)                    # (1, M)


# ---------------------------------------------------------------------------
# wrappers (glue): constants, weight packing, specs
# ---------------------------------------------------------------------------
def _const_spec(a):
    nd = a.ndim
    return pl.BlockSpec(a.shape, lambda b, l, nd=nd: (0,) * nd)


def _layer_spec(a):
    tail = a.shape[1:]
    return pl.BlockSpec((None,) + tail, lambda b, l, n=len(tail): (l,) + (0,) * n)


def _vmem_limit_bytes():
    cap = 64 * 1024 * 1024
    try:
        cap = int(getattr(pltpu.get_tpu_info(), "vmem_capacity_bytes", cap))
    except Exception:
        pass
    # ~0.8 of the part (≈51 MiB on v7x, ≈102 MiB on v5e/v6e), capped at 112 MiB.
    return int(max(32 * 1024 * 1024, min(0.8 * cap, 112 * 1024 * 1024)))


def _pick_batch_block(B, T, D, dim_ff, min_grid=2):
    """Batch rows per grid step: cap live (M, dim_ff)/(M, 4D) intermediates (~12 MiB so
    weights + double buffering still fit v7x's 64 MiB), and keep >= min_grid batch
    blocks so the 'parallel' axis can shard across v7x's two TensorCores."""
    row_bytes = 6 * dim_ff + 48 * D              # f32 + bf16 FFN act + ~dozen D-wide tmps
    row_cap = max(T, (12 << 20) // max(row_bytes, 1))
    best = 1
    for c in range(1, B + 1):
        if B % c:
            continue
        if c * T > row_cap:
            continue
        if B >= min_grid and (B // c) < min_grid:
            continue
        best = c
    return best


def build_xpos_constants(seq_len, d_model, num_heads):
    """Per-pair xPos cos/sin in the [even | odd] split layout: (T, D/2) each."""
    Dh = d_model // num_heads
    Dh2 = Dh // 2
    D2 = d_model // 2
    pos = jnp.arange(seq_len, dtype=jnp.float32)
    pair = (jnp.arange(D2) % Dh2).astype(jnp.float32)   # pair index within each head
    theta = 1.0 / (10000.0 ** (2.0 * pair / Dh))
    ang = pos[:, None] * theta[None, :]                 # (T, D/2)
    return jnp.cos(ang), jnp.sin(ang)


def _split_even_odd_cols(w):
    """Column permutation [:, 0::2] ++ [:, 1::2]; heads stay contiguous in each half."""
    return jnp.concatenate([w[..., 0::2], w[..., 1::2]], axis=-1)


def _stack_layer_params(layers, head_dim):
    """Stack per-layer params on a leading L axis; fold 1/sqrt(head_dim) into k_proj;
    column-permute q/k into the split layout; fuse q|k|v|g; cast weights to bf16."""
    sc = 1.0 / math.sqrt(head_dim)

    def stk(i):
        return jnp.stack([lp[i] for lp in layers], axis=0)

    ln1w, ln1b, ln2w, ln2b = stk(0), stk(1), stk(2), stk(3)
    wq = _split_even_odd_cols(stk(4))
    bq = _split_even_odd_cols(stk(5))
    wk = _split_even_odd_cols(stk(6)) * sc
    bk = _split_even_odd_cols(stk(7)) * sc
    wv, bv = stk(8), stk(9)
    wg, bg = stk(10), stk(11)
    wqkvg = jnp.concatenate([wq, wk, wv, wg], axis=-1).astype(MATMUL_DTYPE)  # (L, D, 4D)
    bqkvg = jnp.concatenate([bq, bk, bv, bg], axis=-1)                       # (L, 1, 4D)
    wo = stk(12).astype(MATMUL_DTYPE)
    bo = stk(13)
    w1 = stk(14).astype(MATMUL_DTYPE)
    b1 = stk(15)
    w2 = stk(16).astype(MATMUL_DTYPE)
    b2 = stk(17)
    return (ln1w, ln1b, ln2w, ln2b, wqkvg, bqkvg, wo, bo, w1, b1, w2, b2)


def init_params(key, d_model, num_heads, num_layers, dim_ff, num_tokens=1, max_pos=64):
    ks = iter(jax.random.split(key, 4 + num_layers * 14))

    def dense(shape, scale=0.02):
        return scale * jax.random.normal(next(ks), shape, dtype=jnp.float32)

    params = {
        "pos": dense((max_pos, d_model), scale=1.0),     # position_enc.weight (truncated)
        "out_w": dense((d_model, num_tokens)),           # model.out weight (transposed)
        "out_b": dense((1, num_tokens)),
    }
    layers = []
    for _ in range(num_layers):
        D = d_model
        layers.append((
            jnp.ones((1, D), jnp.float32), jnp.zeros((1, D), jnp.float32),   # norm1 w, b
            jnp.ones((1, D), jnp.float32), jnp.zeros((1, D), jnp.float32),   # norm2 w, b
            dense((D, D)), dense((1, D)),                                    # q_proj
            dense((D, D)), dense((1, D)),                                    # k_proj
            dense((D, D)), dense((1, D)),                                    # v_proj
            dense((D, D)), dense((1, D)),                                    # g_proj
            dense((D, D)), dense((1, D)),                                    # MSR out_proj
            dense((D, dim_ff)), dense((1, dim_ff)),                          # linear1
            dense((dim_ff, D)), dense((1, D)),                               # linear2
        ))
    params["layers"] = layers
    return params


def retnet_forward(x, params, num_heads):
    """Full RetNet wrapper forward (eval mode). x: (B, T, in_channels) float32."""
    B, T, D = x.shape
    assert D % num_heads == 0
    Dh = D // num_heads
    assert Dh % 2 == 0, "head_dim must be even for the xPos pair rotation"
    assert T % 8 == 0, "fused layout assumes T is a multiple of 8 (sublane tile)"
    # The reference computes `x + position_enc.weight[:x.shape[0]]`; its right-aligned
    # broadcast over dim -2 is only well defined when B == T.
    assert B == T, "reference positional-add broadcast requires B == T"
    assert params["out_w"].shape[1] == 1, "module is built with num_tokens=1"

    L = len(params["layers"])
    dim_ff = params["layers"][0][14].shape[1]

    # preprocess: identity (in_channels % 8 == 0 in this configuration)
    pos = params["pos"][:B]                              # (T, D)
    cos2, sin2 = build_xpos_constants(T, D, num_heads)
    stacked = _stack_layer_params(params["layers"], Dh)
    out_w = params["out_w"].T                            # (1, D) row for lane reduction
    out_b = params["out_b"]                              # (1, 1)

    bblk = _pick_batch_block(B, T, D, dim_ff)
    nblk = B // bblk
    M = bblk * T

    ins = (x, pos, cos2, sin2) + stacked + (out_w, out_b)
    in_specs = [pl.BlockSpec((bblk, T, D), lambda b, l: (b, 0, 0)),
                _const_spec(pos), _const_spec(cos2), _const_spec(sin2)]
    in_specs += [_layer_spec(a) for a in stacked]
    in_specs += [_const_spec(out_w), _const_spec(out_b)]

    out3 = pl.pallas_call(
        functools.partial(retnet_fused_kernel, num_heads),
        out_shape=jax.ShapeDtypeStruct((nblk, 1, M), jnp.float32),
        grid_spec=pltpu.PrefetchScalarGridSpec(
            num_scalar_prefetch=0,
            grid=(nblk, L),                              # batch blocks x layers
            in_specs=in_specs,
            out_specs=pl.BlockSpec((None, 1, M), lambda b, l: (b, 0, 0)),
            scratch_shapes=[pltpu.VMEM((M, D), jnp.float32),            # resident x
                            pltpu.VMEM((num_heads, T, T), jnp.float32)],  # decay masks
        ),
        compiler_params=pltpu.CompilerParams(
            dimension_semantics=("parallel", "arbitrary"),   # batch parallel, layers seq
            vmem_limit_bytes=_vmem_limit_bytes(),
        ),
    )(*ins)
    return out3.reshape(B, T, 1)                         # (B, T, 1) like the module


# ---------------------------------------------------------------------------
if __name__ == "__main__":
    key = jax.random.PRNGKey(0)
    B = 8             # == T so the reference positional-add broadcast is well defined
    T = 8
    in_channels = 64  # divisible by 8 -> preprocess is identity; d_model = 64
    num_heads = 8     # head_dim = 8
    num_layers = 2
    dim_feedforward = 2048

    pkey, xkey = jax.random.split(key)
    params = init_params(pkey, in_channels, num_heads, num_layers, dim_feedforward)
    x = jax.random.normal(xkey, (B, T, in_channels), dtype=jnp.float32)

    out = retnet_forward(x, params, num_heads)
    out = jax.block_until_ready(out)

    assert out.shape == (B, T, 1), out.shape
    assert bool(jnp.all(jnp.isfinite(out)))
    assert bool(jnp.all((out >= 0.0) & (out <= 1.0)))
    print("KERNEL_OK")
</pallas_src>

<mosaic_0001>
module attributes {stable_mosaic.version = 11 : i64} {
  func.func @retnet_fused_kernel(%arg0: i32, %arg1: i32, %arg2: memref<4x8x64xf32, #tpu.memory_space<vmem>>, %arg3: memref<8x64xf32, #tpu.memory_space<vmem>>, %arg4: memref<8x32xf32, #tpu.memory_space<vmem>>, %arg5: memref<8x32xf32, #tpu.memory_space<vmem>>, %arg6: memref<1x1x64xf32, #tpu.memory_space<vmem>>, %arg7: memref<1x1x64xf32, #tpu.memory_space<vmem>>, %arg8: memref<1x1x64xf32, #tpu.memory_space<vmem>>, %arg9: memref<1x1x64xf32, #tpu.memory_space<vmem>>, %arg10: memref<1x64x256xbf16, #tpu.memory_space<vmem>>, %arg11: memref<1x1x256xf32, #tpu.memory_space<vmem>>, %arg12: memref<1x64x64xbf16, #tpu.memory_space<vmem>>, %arg13: memref<1x1x64xf32, #tpu.memory_space<vmem>>, %arg14: memref<1x64x2048xbf16, #tpu.memory_space<vmem>>, %arg15: memref<1x1x2048xf32, #tpu.memory_space<vmem>>, %arg16: memref<1x2048x64xbf16, #tpu.memory_space<vmem>>, %arg17: memref<1x1x64xf32, #tpu.memory_space<vmem>>, %arg18: memref<1x64xf32, #tpu.memory_space<vmem>>, %arg19: memref<1x1xf32, #tpu.memory_space<vmem>>, %arg20: memref<1x1x32xf32, #tpu.memory_space<vmem>>, %arg21: memref<32x64xf32, #tpu.memory_space<vmem>>, %arg22: memref<8x8x8xf32, #tpu.memory_space<vmem>>) attributes {dimension_semantics = [#tpu.dimension_semantics<parallel>, #tpu.dimension_semantics<arbitrary>], iteration_bounds = array<i64: 2, 2>, scalar_prefetch = 0 : i64, scratch_operands = 2 : i64, tpu.core_type = #tpu.core_type<tc>, window_params = [{transform_indices = @transform_0, window_bounds = array<i64: 4, 8, 64>}, {pipeline_mode = #tpu.pipeline_mode<synchronous>, transform_indices = @transform_1, window_bounds = array<i64: 8, 64>}, {pipeline_mode = #tpu.pipeline_mode<synchronous>, transform_indices = @transform_2, window_bounds = array<i64: 8, 32>}, {pipeline_mode = #tpu.pipeline_mode<synchronous>, transform_indices = @transform_3, window_bounds = array<i64: 8, 32>}, {transform_indices = @transform_4, window_bounds = array<i64: 1, 1, 64>}, {transform_indices = @transform_5, window_bounds = array<i64: 1, 1, 64>}, {transform_indices = @transform_6, window_bounds = array<i64: 1, 1, 64>}, {transform_indices = @transform_7, window_bounds = array<i64: 1, 1, 64>}, {transform_indices = @transform_8, window_bounds = array<i64: 1, 64, 256>}, {transform_indices = @transform_9, window_bounds = array<i64: 1, 1, 256>}, {transform_indices = @transform_10, window_bounds = array<i64: 1, 64, 64>}, {transform_indices = @transform_11, window_bounds = array<i64: 1, 1, 64>}, {transform_indices = @transform_12, window_bounds = array<i64: 1, 64, 2048>}, {transform_indices = @transform_13, window_bounds = array<i64: 1, 1, 2048>}, {transform_indices = @transform_14, window_bounds = array<i64: 1, 2048, 64>}, {transform_indices = @transform_15, window_bounds = array<i64: 1, 1, 64>}, {pipeline_mode = #tpu.pipeline_mode<synchronous>, transform_indices = @transform_16, window_bounds = array<i64: 1, 64>}, {pipeline_mode = #tpu.pipeline_mode<synchronous>, transform_indices = @transform_17, window_bounds = array<i64: 1, 1>}, {transform_indices = @transform_18, window_bounds = array<i64: 1, 1, 32>}]} {
    %c0_i32 = arith.constant 0 : i32
    %0 = arith.cmpi eq, %arg1, %c0_i32 : i32
    %1 = arith.extui %0 : i1 to i32
    %c0_i32_0 = arith.constant 0 : i32
    %2 = arith.cmpi ne, %1, %c0_i32_0 : i32
    scf.if %2 {
      %c0_145 = arith.constant 0 : index
      %c0_146 = arith.constant 0 : index
      %c0_147 = arith.constant 0 : index
      %411 = vector.load %arg2[%c0_145, %c0_146, %c0_147] : memref<4x8x64xf32, #tpu.memory_space<vmem>>, vector<4x8x64xf32>
      %c0_148 = arith.constant 0 : index
      %c0_149 = arith.constant 0 : index
      %412 = vector.load %arg3[%c0_148, %c0_149] : memref<8x64xf32, #tpu.memory_space<vmem>>, vector<8x64xf32>
      %413 = vector.shape_cast %412 : vector<8x64xf32> to vector<1x8x64xf32>
      %414 = vector.broadcast %413 : vector<1x8x64xf32> to vector<4x8x64xf32>
      %415 = arith.addf %411, %414 : vector<4x8x64xf32>
      %416 = vector.shape_cast %415 : vector<4x8x64xf32> to vector<32x64xf32>
      %c0_150 = arith.constant 0 : index
      %c0_151 = arith.constant 0 : index
      %417 = vector.load %arg21[%c0_150, %c0_151] : memref<32x64xf32, #tpu.memory_space<vmem>>, vector<32x64xf32>
      tpu.vector_store %arg21[%c0_150, %c0_151], %416 {strides = array<i32>} : memref<32x64xf32, #tpu.memory_space<vmem>>, vector<32x64xf32>,
      %418 = tpu.iota {dimensions = array<i32: 0>} : vector<8x8xi32>
      %419 = tpu.iota {dimensions = array<i32: 1>} : vector<8x8xi32>
      %420 = arith.cmpi sge, %418, %419 : vector<8x8xi32>
      %421 = arith.subi %418, %419 : vector<8x8xi32>
      %c0_i32_152 = arith.constant 0 : i32
      %422 = vector.broadcast %c0_i32_152 : i32 to vector<8x8xi32>
      %423 = arith.maxsi %421, %422 : vector<8x8xi32>
      %424 = arith.sitofp %423 : vector<8x8xi32> to vector<8x8xf32>
      %cst_153 = arith.constant -0.0317486972 : f32
      %425 = vector.broadcast %cst_153 : f32 to vector<8x8xf32>
      %426 = arith.mulf %424, %425 : vector<8x8xf32>
      %427 = math.exp %426 : vector<8x8xf32>
      %cst_154 = arith.constant 0.000000e+00 : f32
      %428 = vector.broadcast %cst_154 : f32 to vector<8x8xf32>
      %429 = arith.select %420, %427, %428 : vector<8x8xi1>, vector<8x8xf32>
      %c0_155 = arith.constant 0 : index
      %c0_156 = arith.constant 0 : index
      %c0_157 = arith.constant 0 : index
      %430 = vector.load %arg22[%c0_155, %c0_156, %c0_157] : memref<8x8x8xf32, #tpu.memory_space<vmem>>, vector<1x8x8xf32>
      %431 = vector.shape_cast %430 : vector<1x8x8xf32> to vector<8x8xf32>
      %432 = vector.shape_cast %429 : vector<8x8xf32> to vector<1x8x8xf32>
      tpu.vector_store %arg22[%c0_155, %c0_156, %c0_157], %432 {strides = array<i32>} : memref<8x8x8xf32, #tpu.memory_space<vmem>>, vector<1x8x8xf32>,
      %cst_158 = arith.constant -0.0212539639 : f32
      %433 = vector.broadcast %cst_158 : f32 to vector<8x8xf32>
      %434 = arith.mulf %424, %433 : vector<8x8xf32>
      %435 = math.exp %434 : vector<8x8xf32>
      %cst_159 = arith.constant 0.000000e+00 : f32
      %436 = vector.broadcast %cst_159 : f32 to vector<8x8xf32>
      %437 = arith.select %420, %435, %436 : vector<8x8xi1>, vector<8x8xf32>
      %c1_160 = arith.constant 1 : index
      %c0_161 = arith.constant 0 : index
      %c0_162 = arith.constant 0 : index
      %438 = vector.load %arg22[%c1_160, %c0_161, %c0_162] : memref<8x8x8xf32, #tpu.memory_space<vmem>>, vector<1x8x8xf32>
      %439 = vector.shape_cast %438 : vector<1x8x8xf32> to vector<8x8xf32>
      %440 = vector.shape_cast %437 : vector<8x8xf32> to vector<1x8x8xf32>
      tpu.vector_store %arg22[%c1_160, %c0_161, %c0_162], %440 {strides = array<i32>} : memref<8x8x8xf32, #tpu.memory_space<vmem>>, vector<1x8x8xf32>,
      %cst_163 = arith.constant -0.0142530259 : f32
      %441 = vector.broadcast %cst_163 : f32 to vector<8x8xf32>
      %442 = arith.mulf %424, %441 : vector<8x8xf32>
      %443 = math.exp %442 : vector<8x8xf32>
      %cst_164 = arith.constant 0.000000e+00 : f32
      %444 = vector.broadcast %cst_164 : f32 to vector<8x8xf32>
      %445 = arith.select %420, %443, %444 : vector<8x8xi1>, vector<8x8xf32>
      %c2_165 = arith.constant 2 : index
      %c0_166 = arith.constant 0 : index
      %c0_167 = arith.constant 0 : index
      %446 = vector.load %arg22[%c2_165, %c0_166, %c0_167] : memref<8x8x8xf32, #tpu.memory_space<vmem>>, vector<1x8x8xf32>
      %447 = vector.shape_cast %446 : vector<1x8x8xf32> to vector<8x8xf32>
      %448 = vector.shape_cast %445 : vector<8x8xf32> to vector<1x8x8xf32>
      tpu.vector_store %arg22[%c2_165, %c0_166, %c0_167], %448 {strides = array<i32>} : memref<8x8x8xf32, #tpu.memory_space<vmem>>, vector<1x8x8xf32>,
      %cst_168 = arith.constant -0.00956918299 : f32
      %449 = vector.broadcast %cst_168 : f32 to vector<8x8xf32>
      %450 = arith.mulf %424, %449 : vector<8x8xf32>
      %451 = math.exp %450 : vector<8x8xf32>
      %cst_169 = arith.constant 0.000000e+00 : f32
      %452 = vector.broadcast %cst_169 : f32 to vector<8x8xf32>
      %453 = arith.select %420, %451, %452 : vector<8x8xi1>, vector<8x8xf32>
      %c3_170 = arith.constant 3 : index
      %c0_171 = arith.constant 0 : index
      %c0_172 = arith.constant 0 : index
      %454 = vector.load %arg22[%c3_170, %c0_171, %c0_172] : memref<8x8x8xf32, #tpu.memory_space<vmem>>, vector<1x8x8xf32>
      %455 = vector.shape_cast %454 : vector<1x8x8xf32> to vector<8x8xf32>
      %456 = vector.shape_cast %453 : vector<8x8xf32> to vector<1x8x8xf32>
      tpu.vector_store %arg22[%c3_170, %c0_171, %c0_172], %456 {strides = array<i32>} : memref<8x8x8xf32, #tpu.memory_space<vmem>>, vector<1x8x8xf32>,
      %cst_173 = arith.constant -0.00642949482 : f32
      %457 = vector.broadcast %cst_173 : f32 to vector<8x8xf32>
      %458 = arith.mulf %424, %457 : vector<8x8xf32>
      %459 = math.exp %458 : vector<8x8xf32>
      %cst_174 = arith.constant 0.000000e+00 : f32
      %460 = vector.broadcast %cst_174 : f32 to vector<8x8xf32>
      %461 = arith.select %420, %459, %460 : vector<8x8xi1>, vector<8x8xf32>
      %c4_175 = arith.constant 4 : index
      %c0_176 = arith.constant 0 : index
      %c0_177 = arith.constant 0 : index
      %462 = vector.load %arg22[%c4_175, %c0_176, %c0_177] : memref<8x8x8xf32, #tpu.memory_space<vmem>>, vector<1x8x8xf32>
      %463 = vector.shape_cast %462 : vector<1x8x8xf32> to vector<8x8xf32>
      %464 = vector.shape_cast %461 : vector<8x8xf32> to vector<1x8x8xf32>
      tpu.vector_store %arg22[%c4_175, %c0_176, %c0_177], %464 {strides = array<i32>} : memref<8x8x8xf32, #tpu.memory_space<vmem>>, vector<1x8x8xf32>,
      %cst_178 = arith.constant -0.0043221768 : f32
      %465 = vector.broadcast %cst_178 : f32 to vector<8x8xf32>
      %466 = arith.mulf %424, %465 : vector<8x8xf32>
      %467 = math.exp %466 : vector<8x8xf32>
      %cst_179 = arith.constant 0.000000e+00 : f32
      %468 = vector.broadcast %cst_179 : f32 to vector<8x8xf32>
      %469 = arith.select %420, %467, %468 : vector<8x8xi1>, vector<8x8xf32>
      %c5_180 = arith.constant 5 : index
      %c0_181 = arith.constant 0 : index
      %c0_182 = arith.constant 0 : index
      %470 = vector.load %arg22[%c5_180, %c0_181, %c0_182] : memref<8x8x8xf32, #tpu.memory_space<vmem>>, vector<1x8x8xf32>
      %471 = vector.shape_cast %470 : vector<1x8x8xf32> to vector<8x8xf32>
      %472 = vector.shape_cast %469 : vector<8x8xf32> to vector<1x8x8xf32>
      tpu.vector_store %arg22[%c5_180, %c0_181, %c0_182], %472 {strides = array<i32>} : memref<8x8x8xf32, #tpu.memory_space<vmem>>, vector<1x8x8xf32>,
      %cst_183 = arith.constant -0.00290655252 : f32
      %473 = vector.broadcast %cst_183 : f32 to vector<8x8xf32>
      %474 = arith.mulf %424, %473 : vector<8x8xf32>
      %475 = math.exp %474 : vector<8x8xf32>
      %cst_184 = arith.constant 0.000000e+00 : f32
      %476 = vector.broadcast %cst_184 : f32 to vector<8x8xf32>
      %477 = arith.select %420, %475, %476 : vector<8x8xi1>, vector<8x8xf32>
      %c6_185 = arith.constant 6 : index
      %c0_186 = arith.constant 0 : index
      %c0_187 = arith.constant 0 : index
      %478 = vector.load %arg22[%c6_185, %c0_186, %c0_187] : memref<8x8x8xf32, #tpu.memory_space<vmem>>, vector<1x8x8xf32>
      %479 = vector.shape_cast %478 : vector<1x8x8xf32> to vector<8x8xf32>
      %480 = vector.shape_cast %477 : vector<8x8xf32> to vector<1x8x8xf32>
      tpu.vector_store %arg22[%c6_185, %c0_186, %c0_187], %480 {strides = array<i32>} : memref<8x8x8xf32, #tpu.memory_space<vmem>>, vector<1x8x8xf32>,
      %cst_188 = arith.constant -0.00195503491 : f32
      %481 = vector.broadcast %cst_188 : f32 to vector<8x8xf32>
      %482 = arith.mulf %424, %481 : vector<8x8xf32>
      %483 = math.exp %482 : vector<8x8xf32>
      %cst_189 = arith.constant 0.000000e+00 : f32
      %484 = vector.broadcast %cst_189 : f32 to vector<8x8xf32>
      %485 = arith.select %420, %483, %484 : vector<8x8xi1>, vector<8x8xf32>
      %c7_190 = arith.constant 7 : index
      %c0_191 = arith.constant 0 : index
      %c0_192 = arith.constant 0 : index
      %486 = vector.load %arg22[%c7_190, %c0_191, %c0_192] : memref<8x8x8xf32, #tpu.memory_space<vmem>>, vector<1x8x8xf32>
      %487 = vector.shape_cast %486 : vector<1x8x8xf32> to vector<8x8xf32>
      %488 = vector.shape_cast %485 : vector<8x8xf32> to vector<1x8x8xf32>
      tpu.vector_store %arg22[%c7_190, %c0_191, %c0_192], %488 {strides = array<i32>} : memref<8x8x8xf32, #tpu.memory_space<vmem>>, vector<1x8x8xf32>,
    } else {
    }
    %c0 = arith.constant 0 : index
    %c0_1 = arith.constant 0 : index
    %3 = vector.load %arg21[%c0, %c0_1] : memref<32x64xf32, #tpu.memory_space<vmem>>, vector<32x64xf32>
    %c0_2 = arith.constant 0 : index
    %c0_3 = arith.constant 0 : index
    %c0_4 = arith.constant 0 : index
    %4 = vector.load %arg6[%c0_2, %c0_3, %c0_4] : memref<1x1x64xf32, #tpu.memory_space<vmem>>, vector<1x1x64xf32>
    %5 = vector.shape_cast %4 : vector<1x1x64xf32> to vector<1x64xf32>
    %c0_5 = arith.constant 0 : index
    %c0_6 = arith.constant 0 : index
    %c0_7 = arith.constant 0 : index
    %6 = vector.load %arg7[%c0_5, %c0_6, %c0_7] : memref<1x1x64xf32, #tpu.memory_space<vmem>>, vector<1x1x64xf32>
    %7 = vector.shape_cast %6 : vector<1x1x64xf32> to vector<1x64xf32>
    %cst = arith.constant dense<0.000000e+00> : vector<32xf32>
    %8 = vector.multi_reduction <add>, %3, %cst [1] : vector<32x64xf32> to vector<32xf32>
    %9 = vector.shape_cast %8 : vector<32xf32> to vector<32x1xf32>
    %cst_8 = arith.constant 6.400000e+01 : f32
    %10 = vector.broadcast %cst_8 : f32 to vector<32x1xf32>
    %11 = arith.divf %9, %10 : vector<32x1xf32>
    %12 = vector.broadcast %11 : vector<32x1xf32> to vector<32x64xf32>
    %13 = arith.subf %3, %12 : vector<32x64xf32>
    %14 = arith.mulf %13, %13 : vector<32x64xf32>
    %cst_9 = arith.constant dense<0.000000e+00> : vector<32xf32>
    %15 = vector.multi_reduction <add>, %14, %cst_9 [1] : vector<32x64xf32> to vector<32xf32>
    %16 = vector.shape_cast %15 : vector<32xf32> to vector<32x1xf32>
    %cst_10 = arith.constant 6.400000e+01 : f32
    %17 = vector.broadcast %cst_10 : f32 to vector<32x1xf32>
    %18 = arith.divf %16, %17 : vector<32x1xf32>
    %cst_11 = arith.constant 9.99999997E-7 : f32
    %19 = vector.broadcast %cst_11 : f32 to vector<32x1xf32>
    %20 = arith.addf %18, %19 : vector<32x1xf32>
    %21 = math.rsqrt %20 : vector<32x1xf32>
    %22 = vector.broadcast %21 : vector<32x1xf32> to vector<32x64xf32>
    %23 = arith.mulf %13, %22 : vector<32x64xf32>
    %24 = vector.broadcast %5 : vector<1x64xf32> to vector<32x64xf32>
    %25 = arith.mulf %23, %24 : vector<32x64xf32>
    %26 = vector.broadcast %7 : vector<1x64xf32> to vector<32x64xf32>
    %27 = arith.addf %25, %26 : vector<32x64xf32>
    %28 = arith.truncf %27 : vector<32x64xf32> to vector<32x64xbf16>
    %c0_12 = arith.constant 0 : index
    %c0_13 = arith.constant 0 : index
    %c0_14 = arith.constant 0 : index
    %29 = vector.load %arg10[%c0_12, %c0_13, %c0_14] : memref<1x64x256xbf16, #tpu.memory_space<vmem>>, vector<1x64x256xbf16>
    %30 = vector.shape_cast %29 : vector<1x64x256xbf16> to vector<64x256xbf16>
    %cst_15 = arith.constant dense<0.000000e+00> : vector<32x256xf32>
    %31 = tpu.matmul %28, %30, %cst_15 {dimension_numbers = #tpu.dot_dimension_numbers<[1], [0], [0], [1], [0, 0, 1, 1], [], []>} : vector<32x64xbf16>, vector<64x256xbf16>, vector<32x256xf32> -> vector<32x256xf32>
    %c0_16 = arith.constant 0 : index
    %c0_17 = arith.constant 0 : index
    %c0_18 = arith.constant 0 : index
    %32 = vector.load %arg11[%c0_16, %c0_17, %c0_18] : memref<1x1x256xf32, #tpu.memory_space<vmem>>, vector<1x1x256xf32>
    %33 = vector.shape_cast %32 : vector<1x1x256xf32> to vector<1x256xf32>
    %34 = vector.broadcast %33 : vector<1x256xf32> to vector<32x256xf32>
    %35 = arith.addf %31, %34 : vector<32x256xf32>
    %36 = vector.extract_strided_slice %35 {offsets = [0, 0], sizes = [32, 64], strides = [1, 1]} : vector<32x256xf32> to vector<32x64xf32>
    %37 = vector.shape_cast %36 : vector<32x64xf32> to vector<4x8x64xf32>
    %38 = vector.extract_strided_slice %35 {offsets = [0, 64], sizes = [32, 64], strides = [1, 1]} : vector<32x256xf32> to vector<32x64xf32>
    %39 = vector.shape_cast %38 : vector<32x64xf32> to vector<4x8x64xf32>
    %40 = vector.extract_strided_slice %35 {offsets = [0, 128], sizes = [32, 64], strides = [1, 1]} : vector<32x256xf32> to vector<32x64xf32>
    %41 = vector.shape_cast %40 : vector<32x64xf32> to vector<4x8x64xf32>
    %42 = vector.extract_strided_slice %35 {offsets = [0, 192], sizes = [32, 64], strides = [1, 1]} : vector<32x256xf32> to vector<32x64xf32>
    %c0_19 = arith.constant 0 : index
    %c0_20 = arith.constant 0 : index
    %43 = vector.load %arg4[%c0_19, %c0_20] : memref<8x32xf32, #tpu.memory_space<vmem>>, vector<8x32xf32>
    %c0_21 = arith.constant 0 : index
    %c0_22 = arith.constant 0 : index
    %44 = vector.load %arg5[%c0_21, %c0_22] : memref<8x32xf32, #tpu.memory_space<vmem>>, vector<8x32xf32>
    %45 = vector.extract_strided_slice %37 {offsets = [0, 0, 0], sizes = [4, 8, 32], strides = [1, 1, 1]} : vector<4x8x64xf32> to vector<4x8x32xf32>
    %46 = vector.extract_strided_slice %37 {offsets = [0, 0, 32], sizes = [4, 8, 32], strides = [1, 1, 1]} : vector<4x8x64xf32> to vector<4x8x32xf32>
    %47 = vector.extract_strided_slice %39 {offsets = [0, 0, 0], sizes = [4, 8, 32], strides = [1, 1, 1]} : vector<4x8x64xf32> to vector<4x8x32xf32>
    %48 = vector.extract_strided_slice %39 {offsets = [0, 0, 32], sizes = [4, 8, 32], strides = [1, 1, 1]} : vector<4x8x64xf32> to vector<4x8x32xf32>
    %49 = vector.shape_cast %43 : vector<8x32xf32> to vector<1x8x32xf32>
    %50 = vector.broadcast %49 : vector<1x8x32xf32> to vector<4x8x32xf32>
    %51 = arith.mulf %45, %50 : vector<4x8x32xf32>
    %52 = vector.shape_cast %44 : vector<8x32xf32> to vector<1x8x32xf32>
    %53 = vector.broadcast %52 : vector<1x8x32xf32> to vector<4x8x32xf32>
    %54 = arith.mulf %46, %53 : vector<4x8x32xf32>
    %55 = arith.subf %51, %54 : vector<4x8x32xf32>
    %56 = arith.truncf %55 : vector<4x8x32xf32> to vector<4x8x32xbf16>
    %57 = vector.shape_cast %43 : vector<8x32xf32> to vector<1x8x32xf32>
    %58 = vector.broadcast %57 : vector<1x8x32xf32> to vector<4x8x32xf32>
    %59 = arith.mulf %46, %58 : vector<4x8x32xf32>
    %60 = vector.shape_cast %44 : vector<8x32xf32> to vector<1x8x32xf32>
    %61 = vector.broadcast %60 : vector<1x8x32xf32> to vector<4x8x32xf32>
    %62 = arith.mulf %45, %61 : vector<4x8x32xf32>
    %63 = arith.addf %59, %62 : vector<4x8x32xf32>
    %64 = arith.truncf %63 : vector<4x8x32xf32> to vector<4x8x32xbf16>
    %65 = vector.shape_cast %43 : vector<8x32xf32> to vector<1x8x32xf32>
    %66 = vector.broadcast %65 : vector<1x8x32xf32> to vector<4x8x32xf32>
    %67 = arith.mulf %47, %66 : vector<4x8x32xf32>
    %68 = vector.shape_cast %44 : vector<8x32xf32> to vector<1x8x32xf32>
    %69 = vector.broadcast %68 : vector<1x8x32xf32> to vector<4x8x32xf32>
    %70 = arith.mulf %48, %69 : vector<4x8x32xf32>
    %71 = arith.subf %67, %70 : vector<4x8x32xf32>
    %72 = arith.truncf %71 : vector<4x8x32xf32> to vector<4x8x32xbf16>
    %73 = vector.shape_cast %43 : vector<8x32xf32> to vector<1x8x32xf32>
    %74 = vector.broadcast %73 : vector<1x8x32xf32> to vector<4x8x32xf32>
    %75 = arith.mulf %48, %74 : vector<4x8x32xf32>
    %76 = vector.shape_cast %44 : vector<8x32xf32> to vector<1x8x32xf32>
    %77 = vector.broadcast %76 : vector<1x8x32xf32> to vector<4x8x32xf32>
    %78 = arith.mulf %47, %77 : vector<4x8x32xf32>
    %79 = arith.addf %75, %78 : vector<4x8x32xf32>
    %80 = arith.truncf %79 : vector<4x8x32xf32> to vector<4x8x32xbf16>
    %81 = arith.truncf %41 : vector<4x8x64xf32> to vector<4x8x64xbf16>
    %82 = vector.extract_strided_slice %56 {offsets = [0, 0, 0], sizes = [4, 8, 4], strides = [1, 1, 1]} : vector<4x8x32xbf16> to vector<4x8x4xbf16>
    %83 = vector.extract_strided_slice %72 {offsets = [0, 0, 0], sizes = [4, 8, 4], strides = [1, 1, 1]} : vector<4x8x32xbf16> to vector<4x8x4xbf16>
    "tpu.trace_start"() <{level = 10 : i32, message = "btd,bsd->bts"}> : () -> ()
    %cst_23 = arith.constant dense<0.000000e+00> : vector<4x8x8xf32>
    %84 = tpu.matmul %82, %83, %cst_23 {dimension_numbers = #tpu.dot_dimension_numbers<[2], [2], [1], [1], [0, 0, 0, 1, 1, 1], [0], [0]>} : vector<4x8x4xbf16>, vector<4x8x4xbf16>, vector<4x8x8xf32> -> vector<4x8x8xf32>
    "tpu.trace_stop"() : () -> ()
    %85 = vector.extract_strided_slice %64 {offsets = [0, 0, 0], sizes = [4, 8, 4], strides = [1, 1, 1]} : vector<4x8x32xbf16> to vector<4x8x4xbf16>
    %86 = vector.extract_strided_slice %80 {offsets = [0, 0, 0], sizes = [4, 8, 4], strides = [1, 1, 1]} : vector<4x8x32xbf16> to vector<4x8x4xbf16>
    "tpu.trace_start"() <{level = 10 : i32, message = "btd,bsd->bts"}> : () -> ()
    %cst_24 = arith.constant dense<0.000000e+00> : vector<4x8x8xf32>
    %87 = tpu.matmul %85, %86, %cst_24 {dimension_numbers = #tpu.dot_dimension_numbers<[2], [2], [1], [1], [0, 0, 0, 1, 1, 1], [0], [0]>} : vector<4x8x4xbf16>, vector<4x8x4xbf16>, vector<4x8x8xf32> -> vector<4x8x8xf32>
    "tpu.trace_stop"() : () -> ()
    %88 = arith.addf %84, %87 : vector<4x8x8xf32>
    %c0_25 = arith.constant 0 : index
    %c0_26 = arith.constant 0 : index
    %c0_27 = arith.constant 0 : index
    %89 = vector.load %arg22[%c0_25, %c0_26, %c0_27] : memref<8x8x8xf32, #tpu.memory_space<vmem>>, vector<1x8x8xf32>
    %90 = vector.shape_cast %89 : vector<1x8x8xf32> to vector<8x8xf32>
    %91 = vector.shape_cast %90 : vector<8x8xf32> to vector<1x8x8xf32>
    %92 = vector.broadcast %91 : vector<1x8x8xf32> to vector<4x8x8xf32>
    %93 = arith.mulf %88, %92 : vector<4x8x8xf32>
    %94 = arith.truncf %93 : vector<4x8x8xf32> to vector<4x8x8xbf16>
    %95 = vector.extract_strided_slice %81 {offsets = [0, 0, 0], sizes = [4, 8, 8], strides = [1, 1, 1]} : vector<4x8x64xbf16> to vector<4x8x8xbf16>
    "tpu.trace_start"() <{level = 10 : i32, message = "bts,bsd->btd"}> : () -> ()
    %cst_28 = arith.constant dense<0.000000e+00> : vector<4x8x8xf32>
    %96 = tpu.matmul %94, %95, %cst_28 {dimension_numbers = #tpu.dot_dimension_numbers<[2], [1], [1], [2], [0, 0, 0, 1, 1, 2], [0], [0]>} : vector<4x8x8xbf16>, vector<4x8x8xbf16>, vector<4x8x8xf32> -> vector<4x8x8xf32>
    "tpu.trace_stop"() : () -> ()
    %cst_29 = arith.constant dense<0.000000e+00> : vector<4x8xf32>
    %97 = vector.multi_reduction <add>, %96, %cst_29 [2] : vector<4x8x8xf32> to vector<4x8xf32>
    %98 = vector.shape_cast %97 : vector<4x8xf32> to vector<4x8x1xf32>
    %cst_30 = arith.constant 8.000000e+00 : f32
    %99 = vector.broadcast %cst_30 : f32 to vector<4x8x1xf32>
    %100 = arith.divf %98, %99 : vector<4x8x1xf32>
    %101 = vector.broadcast %100 : vector<4x8x1xf32> to vector<4x8x8xf32>
    %102 = arith.subf %96, %101 : vector<4x8x8xf32>
    %103 = arith.mulf %102, %102 : vector<4x8x8xf32>
    %cst_31 = arith.constant dense<0.000000e+00> : vector<4x8xf32>
    %104 = vector.multi_reduction <add>, %103, %cst_31 [2] : vector<4x8x8xf32> to vector<4x8xf32>
    %105 = vector.shape_cast %104 : vector<4x8xf32> to vector<4x8x1xf32>
    %cst_32 = arith.constant 8.000000e+00 : f32
    %106 = vector.broadcast %cst_32 : f32 to vector<4x8x1xf32>
    %107 = arith.divf %105, %106 : vector<4x8x1xf32>
    %cst_33 = arith.constant 9.99999997E-7 : f32
    %108 = vector.broadcast %cst_33 : f32 to vector<4x8x1xf32>
    %109 = arith.addf %107, %108 : vector<4x8x1xf32>
    %110 = math.rsqrt %109 : vector<4x8x1xf32>
    %111 = vector.broadcast %110 : vector<4x8x1xf32> to vector<4x8x8xf32>
    %112 = arith.mulf %102, %111 : vector<4x8x8xf32>
    %113 = vector.extract_strided_slice %56 {offsets = [0, 0, 4], sizes = [4, 8, 4], strides = [1, 1, 1]} : vector<4x8x32xbf16> to vector<4x8x4xbf16>
    %114 = vector.extract_strided_slice %72 {offsets = [0, 0, 4], sizes = [4, 8, 4], strides = [1, 1, 1]} : vector<4x8x32xbf16> to vector<4x8x4xbf16>
    "tpu.trace_start"() <{level = 10 : i32, message = "btd,bsd->bts"}> : () -> ()
    %cst_34 = arith.constant dense<0.000000e+00> : vector<4x8x8xf32>
    %115 = tpu.matmul %113, %114, %cst_34 {dimension_numbers = #tpu.dot_dimension_numbers<[2], [2], [1], [1], [0, 0, 0, 1, 1, 1], [0], [0]>} : vector<4x8x4xbf16>, vector<4x8x4xbf16>, vector<4x8x8xf32> -> vector<4x8x8xf32>
    "tpu.trace_stop"() : () -> ()
    %116 = vector.extract_strided_slice %64 {offsets = [0, 0, 4], sizes = [4, 8, 4], strides = [1, 1, 1]} : vector<4x8x32xbf16> to vector<4x8x4xbf16>
    %117 = vector.extract_strided_slice %80 {offsets = [0, 0, 4], sizes = [4, 8, 4], strides = [1, 1, 1]} : vector<4x8x32xbf16> to vector<4x8x4xbf16>
    "tpu.trace_start"() <{level = 10 : i32, message = "btd,bsd->bts"}> : () -> ()
    %cst_35 = arith.constant dense<0.000000e+00> : vector<4x8x8xf32>
    %118 = tpu.matmul %116, %117, %cst_35 {dimension_numbers = #tpu.dot_dimension_numbers<[2], [2], [1], [1], [0, 0, 0, 1, 1, 1], [0], [0]>} : vector<4x8x4xbf16>, vector<4x8x4xbf16>, vector<4x8x8xf32> -> vector<4x8x8xf32>
    "tpu.trace_stop"() : () -> ()
    %119 = arith.addf %115, %118 : vector<4x8x8xf32>
    %c1 = arith.constant 1 : index
    %c0_36 = arith.constant 0 : index
    %c0_37 = arith.constant 0 : index
    %120 = vector.load %arg22[%c1, %c0_36, %c0_37] : memref<8x8x8xf32, #tpu.memory_space<vmem>>, vector<1x8x8xf32>
    %121 = vector.shape_cast %120 : vector<1x8x8xf32> to vector<8x8xf32>
    %122 = vector.shape_cast %121 : vector<8x8xf32> to vector<1x8x8xf32>
    %123 = vector.broadcast %122 : vector<1x8x8xf32> to vector<4x8x8xf32>
    %124 = arith.mulf %119, %123 : vector<4x8x8xf32>
    %125 = arith.truncf %124 : vector<4x8x8xf32> to vector<4x8x8xbf16>
    %126 = vector.extract_strided_slice %81 {offsets = [0, 0, 8], sizes = [4, 8, 8], strides = [1, 1, 1]} : vector<4x8x64xbf16> to vector<4x8x8xbf16>
    "tpu.trace_start"() <{level = 10 : i32, message = "bts,bsd->btd"}> : () -> ()
    %cst_38 = arith.constant dense<0.000000e+00> : vector<4x8x8xf32>
    %127 = tpu.matmul %125, %126, %cst_38 {dimension_numbers = #tpu.dot_dimension_numbers<[2], [1], [1], [2], [0, 0, 0, 1, 1, 2], [0], [0]>} : vector<4x8x8xbf16>, vector<4x8x8xbf16>, vector<4x8x8xf32> -> vector<4x8x8xf32>
    "tpu.trace_stop"() : () -> ()
    %cst_39 = arith.constant dense<0.000000e+00> : vector<4x8xf32>
    %128 = vector.multi_reduction <add>, %127, %cst_39 [2] : vector<4x8x8xf32> to vector<4x8xf32>
    %129 = vector.shape_cast %128 : vector<4x8xf32> to vector<4x8x1xf32>
    %cst_40 = arith.constant 8.000000e+00 : f32
    %130 = vector.broadcast %cst_40 : f32 to vector<4x8x1xf32>
    %131 = arith.divf %129, %130 : vector<4x8x1xf32>
    %132 = vector.broadcast %131 : vector<4x8x1xf32> to vector<4x8x8xf32>
    %133 = arith.subf %127, %132 : vector<4x8x8xf32>
    %134 = arith.mulf %133, %133 : vector<4x8x8xf32>
    %cst_41 = arith.constant dense<0.000000e+00> : vector<4x8xf32>
    %135 = vector.multi_reduction <add>, %134, %cst_41 [2] : vector<4x8x8xf32> to vector<4x8xf32>
    %136 = vector.shape_cast %135 : vector<4x8xf32> to vector<4x8x1xf32>
    %cst_42 = arith.constant 8.000000e+00 : f32
    %137 = vector.broadcast %cst_42 : f32 to vector<4x8x1xf32>
    %138 = arith.divf %136, %137 : vector<4x8x1xf32>
    %cst_43 = arith.constant 9.99999997E-7 : f32
    %139 = vector.broadcast %cst_43 : f32 to vector<4x8x1xf32>
    %140 = arith.addf %138, %139 : vector<4x8x1xf32>
    %141 = math.rsqrt %140 : vector<4x8x1xf32>
    %142 = vector.broadcast %141 : vector<4x8x1xf32> to vector<4x8x8xf32>
    %143 = arith.mulf %133, %142 : vector<4x8x8xf32>
    %144 = vector.extract_strided_slice %56 {offsets = [0, 0, 8], sizes = [4, 8, 4], strides = [1, 1, 1]} : vector<4x8x32xbf16> to vector<4x8x4xbf16>
    %145 = vector.extract_strided_slice %72 {offsets = [0, 0, 8], sizes = [4, 8, 4], strides = [1, 1, 1]} : vector<4x8x32xbf16> to vector<4x8x4xbf16>
    "tpu.trace_start"() <{level = 10 : i32, message = "btd,bsd->bts"}> : () -> ()
    %cst_44 = arith.constant dense<0.000000e+00> : vector<4x8x8xf32>
    %146 = tpu.matmul %144, %145, %cst_44 {dimension_numbers = #tpu.dot_dimension_numbers<[2], [2], [1], [1], [0, 0, 0, 1, 1, 1], [0], [0]>} : vector<4x8x4xbf16>, vector<4x8x4xbf16>, vector<4x8x8xf32> -> vector<4x8x8xf32>
    "tpu.trace_stop"() : () -> ()
    %147 = vector.extract_strided_slice %64 {offsets = [0, 0, 8], sizes = [4, 8, 4], strides = [1, 1, 1]} : vector<4x8x32xbf16> to vector<4x8x4xbf16>
    %148 = vector.extract_strided_slice %80 {offsets = [0, 0, 8], sizes = [4, 8, 4], strides = [1, 1, 1]} : vector<4x8x32xbf16> to vector<4x8x4xbf16>
    "tpu.trace_start"() <{level = 10 : i32, message = "btd,bsd->bts"}> : () -> ()
    %cst_45 = arith.constant dense<0.000000e+00> : vector<4x8x8xf32>
    %149 = tpu.matmul %147, %148, %cst_45 {dimension_numbers = #tpu.dot_dimension_numbers<[2], [2], [1], [1], [0, 0, 0, 1, 1, 1], [0], [0]>} : vector<4x8x4xbf16>, vector<4x8x4xbf16>, vector<4x8x8xf32> -> vector<4x8x8xf32>
    "tpu.trace_stop"() : () -> ()
    %150 = arith.addf %146, %149 : vector<4x8x8xf32>
    %c2 = arith.constant 2 : index
    %c0_46 = arith.constant 0 : index
    %c0_47 = arith.constant 0 : index
    %151 = vector.load %arg22[%c2, %c0_46, %c0_47] : memref<8x8x8xf32, #tpu.memory_space<vmem>>, vector<1x8x8xf32>
    %152 = vector.shape_cast %151 : vector<1x8x8xf32> to vector<8x8xf32>
    %153 = vector.shape_cast %152 : vector<8x8xf32> to vector<1x8x8xf32>
    %154 = vector.broadcast %153 : vector<1x8x8xf32> to vector<4x8x8xf32>
    %155 = arith.mulf %150, %154 : vector<4x8x8xf32>
    %156 = arith.truncf %155 : vector<4x8x8xf32> to vector<4x8x8xbf16>
    %157 = vector.extract_strided_slice %81 {offsets = [0, 0, 16], sizes = [4, 8, 8], strides = [1, 1, 1]} : vector<4x8x64xbf16> to vector<4x8x8xbf16>
    "tpu.trace_start"() <{level = 10 : i32, message = "bts,bsd->btd"}> : () -> ()
    %cst_48 = arith.constant dense<0.000000e+00> : vector<4x8x8xf32>
    %158 = tpu.matmul %156, %157, %cst_48 {dimension_numbers = #tpu.dot_dimension_numbers<[2], [1], [1], [2], [0, 0, 0, 1, 1, 2], [0], [0]>} : vector<4x8x8xbf16>, vector<4x8x8xbf16>, vector<4x8x8xf32> -> vector<4x8x8xf32>
    "tpu.trace_stop"() : () -> ()
    %cst_49 = arith.constant dense<0.000000e+00> : vector<4x8xf32>
    %159 = vector.multi_reduction <add>, %158, %cst_49 [2] : vector<4x8x8xf32> to vector<4x8xf32>
    %160 = vector.shape_cast %159 : vector<4x8xf32> to vector<4x8x1xf32>
    %cst_50 = arith.constant 8.000000e+00 : f32
    %161 = vector.broadcast %cst_50 : f32 to vector<4x8x1xf32>
    %162 = arith.divf %160, %161 : vector<4x8x1xf32>
    %163 = vector.broadcast %162 : vector<4x8x1xf32> to vector<4x8x8xf32>
    %164 = arith.subf %158, %163 : vector<4x8x8xf32>
    %165 = arith.mulf %164, %164 : vector<4x8x8xf32>
    %cst_51 = arith.constant dense<0.000000e+00> : vector<4x8xf32>
    %166 = vector.multi_reduction <add>, %165, %cst_51 [2] : vector<4x8x8xf32> to vector<4x8xf32>
    %167 = vector.shape_cast %166 : vector<4x8xf32> to vector<4x8x1xf32>
    %cst_52 = arith.constant 8.000000e+00 : f32
    %168 = vector.broadcast %cst_52 : f32 to vector<4x8x1xf32>
    %169 = arith.divf %167, %168 : vector<4x8x1xf32>
    %cst_53 = arith.constant 9.99999997E-7 : f32
    %170 = vector.broadcast %cst_53 : f32 to vector<4x8x1xf32>
    %171 = arith.addf %169, %170 : vector<4x8x1xf32>
    %172 = math.rsqrt %171 : vector<4x8x1xf32>
    %173 = vector.broadcast %172 : vector<4x8x1xf32> to vector<4x8x8xf32>
    %174 = arith.mulf %164, %173 : vector<4x8x8xf32>
    %175 = vector.extract_strided_slice %56 {offsets = [0, 0, 12], sizes = [4, 8, 4], strides = [1, 1, 1]} : vector<4x8x32xbf16> to vector<4x8x4xbf16>
    %176 = vector.extract_strided_slice %72 {offsets = [0, 0, 12], sizes = [4, 8, 4], strides = [1, 1, 1]} : vector<4x8x32xbf16> to vector<4x8x4xbf16>
    "tpu.trace_start"() <{level = 10 : i32, message = "btd,bsd->bts"}> : () -> ()
    %cst_54 = arith.constant dense<0.000000e+00> : vector<4x8x8xf32>
    %177 = tpu.matmul %175, %176, %cst_54 {dimension_numbers = #tpu.dot_dimension_numbers<[2], [2], [1], [1], [0, 0, 0, 1, 1, 1], [0], [0]>} : vector<4x8x4xbf16>, vector<4x8x4xbf16>, vector<4x8x8xf32> -> vector<4x8x8xf32>
    "tpu.trace_stop"() : () -> ()
    %178 = vector.extract_strided_slice %64 {offsets = [0, 0, 12], sizes = [4, 8, 4], strides = [1, 1, 1]} : vector<4x8x32xbf16> to vector<4x8x4xbf16>
    %179 = vector.extract_strided_slice %80 {offsets = [0, 0, 12], sizes = [4, 8, 4], strides = [1, 1, 1]} : vector<4x8x32xbf16> to vector<4x8x4xbf16>
    "tpu.trace_start"() <{level = 10 : i32, message = "btd,bsd->bts"}> : () -> ()
    %cst_55 = arith.constant dense<0.000000e+00> : vector<4x8x8xf32>
    %180 = tpu.matmul %178, %179, %cst_55 {dimension_numbers = #tpu.dot_dimension_numbers<[2], [2], [1], [1], [0, 0, 0, 1, 1, 1], [0], [0]>} : vector<4x8x4xbf16>, vector<4x8x4xbf16>, vector<4x8x8xf32> -> vector<4x8x8xf32>
    "tpu.trace_stop"() : () -> ()
    %181 = arith.addf %177, %180 : vector<4x8x8xf32>
    %c3 = arith.constant 3 : index
    %c0_56 = arith.constant 0 : index
    %c0_57 = arith.constant 0 : index
    %182 = vector.load %arg22[%c3, %c0_56, %c0_57] : memref<8x8x8xf32, #tpu.memory_space<vmem>>, vector<1x8x8xf32>
    %183 = vector.shape_cast %182 : vector<1x8x8xf32> to vector<8x8xf32>
    %184 = vector.shape_cast %183 : vector<8x8xf32> to vector<1x8x8xf32>
    %185 = vector.broadcast %184 : vector<1x8x8xf32> to vector<4x8x8xf32>
    %186 = arith.mulf %181, %185 : vector<4x8x8xf32>
    %187 = arith.truncf %186 : vector<4x8x8xf32> to vector<4x8x8xbf16>
    %188 = vector.extract_strided_slice %81 {offsets = [0, 0, 24], sizes = [4, 8, 8], strides = [1, 1, 1]} : vector<4x8x64xbf16> to vector<4x8x8xbf16>
    "tpu.trace_start"() <{level = 10 : i32, message = "bts,bsd->btd"}> : () -> ()
    %cst_58 = arith.constant dense<0.000000e+00> : vector<4x8x8xf32>
    %189 = tpu.matmul %187, %188, %cst_58 {dimension_numbers = #tpu.dot_dimension_numbers<[2], [1], [1], [2], [0, 0, 0, 1, 1, 2], [0], [0]>} : vector<4x8x8xbf16>, vector<4x8x8xbf16>, vector<4x8x8xf32> -> vector<4x8x8xf32>
    "tpu.trace_stop"() : () -> ()
    %cst_59 = arith.constant dense<0.000000e+00> : vector<4x8xf32>
    %190 = vector.multi_reduction <add>, %189, %cst_59 [2] : vector<4x8x8xf32> to vector<4x8xf32>
    %191 = vector.shape_cast %190 : vector<4x8xf32> to vector<4x8x1xf32>
    %cst_60 = arith.constant 8.000000e+00 : f32
    %192 = vector.broadcast %cst_60 : f32 to vector<4x8x1xf32>
    %193 = arith.divf %191, %192 : vector<4x8x1xf32>
    %194 = vector.broadcast %193 : vector<4x8x1xf32> to vector<4x8x8xf32>
    %195 = arith.subf %189, %194 : vector<4x8x8xf32>
    %196 = arith.mulf %195, %195 : vector<4x8x8xf32>
    %cst_61 = arith.constant dense<0.000000e+00> : vector<4x8xf32>
    %197 = vector.multi_reduction <add>, %196, %cst_61 [2] : vector<4x8x8xf32> to vector<4x8xf32>
    %198 = vector.shape_cast %197 : vector<4x8xf32> to vector<4x8x1xf32>
    %cst_62 = arith.constant 8.000000e+00 : f32
    %199 = vector.broadcast %cst_62 : f32 to vector<4x8x1xf32>
    %200 = arith.divf %198, %199 : vector<4x8x1xf32>
    %cst_63 = arith.constant 9.99999997E-7 : f32
    %201 = vector.broadcast %cst_63 : f32 to vector<4x8x1xf32>
    %202 = arith.addf %200, %201 : vector<4x8x1xf32>
    %203 = math.rsqrt %202 : vector<4x8x1xf32>
    %204 = vector.broadcast %203 : vector<4x8x1xf32> to vector<4x8x8xf32>
    %205 = arith.mulf %195, %204 : vector<4x8x8xf32>
    %206 = vector.extract_strided_slice %56 {offsets = [0, 0, 16], sizes = [4, 8, 4], strides = [1, 1, 1]} : vector<4x8x32xbf16> to vector<4x8x4xbf16>
    %207 = vector.extract_strided_slice %72 {offsets = [0, 0, 16], sizes = [4, 8, 4], strides = [1, 1, 1]} : vector<4x8x32xbf16> to vector<4x8x4xbf16>
    "tpu.trace_start"() <{level = 10 : i32, message = "btd,bsd->bts"}> : () -> ()
    %cst_64 = arith.constant dense<0.000000e+00> : vector<4x8x8xf32>
    %208 = tpu.matmul %206, %207, %cst_64 {dimension_numbers = #tpu.dot_dimension_numbers<[2], [2], [1], [1], [0, 0, 0, 1, 1, 1], [0], [0]>} : vector<4x8x4xbf16>, vector<4x8x4xbf16>, vector<4x8x8xf32> -> vector<4x8x8xf32>
    "tpu.trace_stop"() : () -> ()
    %209 = vector.extract_strided_slice %64 {offsets = [0, 0, 16], sizes = [4, 8, 4], strides = [1, 1, 1]} : vector<4x8x32xbf16> to vector<4x8x4xbf16>
    %210 = vector.extract_strided_slice %80 {offsets = [0, 0, 16], sizes = [4, 8, 4], strides = [1, 1, 1]} : vector<4x8x32xbf16> to vector<4x8x4xbf16>
    "tpu.trace_start"() <{level = 10 : i32, message = "btd,bsd->bts"}> : () -> ()
    %cst_65 = arith.constant dense<0.000000e+00> : vector<4x8x8xf32>
    %211 = tpu.matmul %209, %210, %cst_65 {dimension_numbers = #tpu.dot_dimension_numbers<[2], [2], [1], [1], [0, 0, 0, 1, 1, 1], [0], [0]>} : vector<4x8x4xbf16>, vector<4x8x4xbf16>, vector<4x8x8xf32> -> vector<4x8x8xf32>
    "tpu.trace_stop"() : () -> ()
    %212 = arith.addf %208, %211 : vector<4x8x8xf32>
    %c4 = arith.constant 4 : index
    %c0_66 = arith.constant 0 : index
    %c0_67 = arith.constant 0 : index
    %213 = vector.load %arg22[%c4, %c0_66, %c0_67] : memref<8x8x8xf32, #tpu.memory_space<vmem>>, vector<1x8x8xf32>
    %214 = vector.shape_cast %213 : vector<1x8x8xf32> to vector<8x8xf32>
    %215 = vector.shape_cast %214 : vector<8x8xf32> to vector<1x8x8xf32>
    %216 = vector.broadcast %215 : vector<1x8x8xf32> to vector<4x8x8xf32>
    %217 = arith.mulf %212, %216 : vector<4x8x8xf32>
    %218 = arith.truncf %217 : vector<4x8x8xf32> to vector<4x8x8xbf16>
    %219 = vector.extract_strided_slice %81 {offsets = [0, 0, 32], sizes = [4, 8, 8], strides = [1, 1, 1]} : vector<4x8x64xbf16> to vector<4x8x8xbf16>
    "tpu.trace_start"() <{level = 10 : i32, message = "bts,bsd->btd"}> : () -> ()
    %cst_68 = arith.constant dense<0.000000e+00> : vector<4x8x8xf32>
    %220 = tpu.matmul %218, %219, %cst_68 {dimension_numbers = #tpu.dot_dimension_numbers<[2], [1], [1], [2], [0, 0, 0, 1, 1, 2], [0], [0]>} : vector<4x8x8xbf16>, vector<4x8x8xbf16>, vector<4x8x8xf32> -> vector<4x8x8xf32>
    "tpu.trace_stop"() : () -> ()
    %cst_69 = arith.constant dense<0.000000e+00> : vector<4x8xf32>
    %221 = vector.multi_reduction <add>, %220, %cst_69 [2] : vector<4x8x8xf32> to vector<4x8xf32>
    %222 = vector.shape_cast %221 : vector<4x8xf32> to vector<4x8x1xf32>
    %cst_70 = arith.constant 8.000000e+00 : f32
    %223 = vector.broadcast %cst_70 : f32 to vector<4x8x1xf32>
    %224 = arith.divf %222, %223 : vector<4x8x1xf32>
    %225 = vector.broadcast %224 : vector<4x8x1xf32> to vector<4x8x8xf32>
    %226 = arith.subf %220, %225 : vector<4x8x8xf32>
    %227 = arith.mulf %226, %226 : vector<4x8x8xf32>
    %cst_71 = arith.constant dense<0.000000e+00> : vector<4x8xf32>
    %228 = vector.multi_reduction <add>, %227, %cst_71 [2] : vector<4x8x8xf32> to vector<4x8xf32>
    %229 = vector.shape_cast %228 : vector<4x8xf32> to vector<4x8x1xf32>
    %cst_72 = arith.constant 8.000000e+00 : f32
    %230 = vector.broadcast %cst_72 : f32 to vector<4x8x1xf32>
    %231 = arith.divf %229, %230 : vector<4x8x1xf32>
    %cst_73 = arith.constant 9.99999997E-7 : f32
    %232 = vector.broadcast %cst_73 : f32 to vector<4x8x1xf32>
    %233 = arith.addf %231, %232 : vector<4x8x1xf32>
    %234 = math.rsqrt %233 : vector<4x8x1xf32>
    %235 = vector.broadcast %234 : vector<4x8x1xf32> to vector<4x8x8xf32>
    %236 = arith.mulf %226, %235 : vector<4x8x8xf32>
    %237 = vector.extract_strided_slice %56 {offsets = [0, 0, 20], sizes = [4, 8, 4], strides = [1, 1, 1]} : vector<4x8x32xbf16> to vector<4x8x4xbf16>
    %238 = vector.extract_strided_slice %72 {offsets = [0, 0, 20], sizes = [4, 8, 4], strides = [1, 1, 1]} : vector<4x8x32xbf16> to vector<4x8x4xbf16>
    "tpu.trace_start"() <{level = 10 : i32, message = "btd,bsd->bts"}> : () -> ()
    %cst_74 = arith.constant dense<0.000000e+00> : vector<4x8x8xf32>
    %239 = tpu.matmul %237, %238, %cst_74 {dimension_numbers = #tpu.dot_dimension_numbers<[2], [2], [1], [1], [0, 0, 0, 1, 1, 1], [0], [0]>} : vector<4x8x4xbf16>, vector<4x8x4xbf16>, vector<4x8x8xf32> -> vector<4x8x8xf32>
    "tpu.trace_stop"() : () -> ()
    %240 = vector.extract_strided_slice %64 {offsets = [0, 0, 20], sizes = [4, 8, 4], strides = [1, 1, 1]} : vector<4x8x32xbf16> to vector<4x8x4xbf16>
    %241 = vector.extract_strided_slice %80 {offsets = [0, 0, 20], sizes = [4, 8, 4], strides = [1, 1, 1]} : vector<4x8x32xbf16> to vector<4x8x4xbf16>
    "tpu.trace_start"() <{level = 10 : i32, message = "btd,bsd->bts"}> : () -> ()
    %cst_75 = arith.constant dense<0.000000e+00> : vector<4x8x8xf32>
    %242 = tpu.matmul %240, %241, %cst_75 {dimension_numbers = #tpu.dot_dimension_numbers<[2], [2], [1], [1], [0, 0, 0, 1, 1, 1], [0], [0]>} : vector<4x8x4xbf16>, vector<4x8x4xbf16>, vector<4x8x8xf32> -> vector<4x8x8xf32>
    "tpu.trace_stop"() : () -> ()
    %243 = arith.addf %239, %242 : vector<4x8x8xf32>
    %c5 = arith.constant 5 : index
    %c0_76 = arith.constant 0 : index
    %c0_77 = arith.constant 0 : index
    %244 = vector.load %arg22[%c5, %c0_76, %c0_77] : memref<8x8x8xf32, #tpu.memory_space<vmem>>, vector<1x8x8xf32>
    %245 = vector.shape_cast %244 : vector<1x8x8xf32> to vector<8x8xf32>
    %246 = vector.shape_cast %245 : vector<8x8xf32> to vector<1x8x8xf32>
    %247 = vector.broadcast %246 : vector<1x8x8xf32> to vector<4x8x8xf32>
    %248 = arith.mulf %243, %247 : vector<4x8x8xf32>
    %249 = arith.truncf %248 : vector<4x8x8xf32> to vector<4x8x8xbf16>
    %250 = vector.extract_strided_slice %81 {offsets = [0, 0, 40], sizes = [4, 8, 8], strides = [1, 1, 1]} : vector<4x8x64xbf16> to vector<4x8x8xbf16>
    "tpu.trace_start"() <{level = 10 : i32, message = "bts,bsd->btd"}> : () -> ()
    %cst_78 = arith.constant dense<0.000000e+00> : vector<4x8x8xf32>
    %251 = tpu.matmul %249, %250, %cst_78 {dimension_numbers = #tpu.dot_dimension_numbers<[2], [1], [1], [2], [0, 0, 0, 1, 1, 2], [0], [0]>} : vector<4x8x8xbf16>, vector<4x8x8xbf16>, vector<4x8x8xf32> -> vector<4x8x8xf32>
    "tpu.trace_stop"() : () -> ()
    %cst_79 = arith.constant dense<0.000000e+00> : vector<4x8xf32>
    %252 = vector.multi_reduction <add>, %251, %cst_79 [2] : vector<4x8x8xf32> to vector<4x8xf32>
    %253 = vector.shape_cast %252 : vector<4x8xf32> to vector<4x8x1xf32>
    %cst_80 = arith.constant 8.000000e+00 : f32
    %254 = vector.broadcast %cst_80 : f32 to vector<4x8x1xf32>
    %255 = arith.divf %253, %254 : vector<4x8x1xf32>
    %256 = vector.broadcast %255 : vector<4x8x1xf32> to vector<4x8x8xf32>
    %257 = arith.subf %251, %256 : vector<4x8x8xf32>
    %258 = arith.mulf %257, %257 : vector<4x8x8xf32>
    %cst_81 = arith.constant dense<0.000000e+00> : vector<4x8xf32>
    %259 = vector.multi_reduction <add>, %258, %cst_81 [2] : vector<4x8x8xf32> to vector<4x8xf32>
    %260 = vector.shape_cast %259 : vector<4x8xf32> to vector<4x8x1xf32>
    %cst_82 = arith.constant 8.000000e+00 : f32
    %261 = vector.broadcast %cst_82 : f32 to vector<4x8x1xf32>
    %262 = arith.divf %260, %261 : vector<4x8x1xf32>
    %cst_83 = arith.constant 9.99999997E-7 : f32
    %263 = vector.broadcast %cst_83 : f32 to vector<4x8x1xf32>
    %264 = arith.addf %262, %263 : vector<4x8x1xf32>
    %265 = math.rsqrt %264 : vector<4x8x1xf32>
    %266 = vector.broadcast %265 : vector<4x8x1xf32> to vector<4x8x8xf32>
    %267 = arith.mulf %257, %266 : vector<4x8x8xf32>
    %268 = vector.extract_strided_slice %56 {offsets = [0, 0, 24], sizes = [4, 8, 4], strides = [1, 1, 1]} : vector<4x8x32xbf16> to vector<4x8x4xbf16>
    %269 = vector.extract_strided_slice %72 {offsets = [0, 0, 24], sizes = [4, 8, 4], strides = [1, 1, 1]} : vector<4x8x32xbf16> to vector<4x8x4xbf16>
    "tpu.trace_start"() <{level = 10 : i32, message = "btd,bsd->bts"}> : () -> ()
    %cst_84 = arith.constant dense<0.000000e+00> : vector<4x8x8xf32>
    %270 = tpu.matmul %268, %269, %cst_84 {dimension_numbers = #tpu.dot_dimension_numbers<[2], [2], [1], [1], [0, 0, 0, 1, 1, 1], [0], [0]>} : vector<4x8x4xbf16>, vector<4x8x4xbf16>, vector<4x8x8xf32> -> vector<4x8x8xf32>
    "tpu.trace_stop"() : () -> ()
    %271 = vector.extract_strided_slice %64 {offsets = [0, 0, 24], sizes = [4, 8, 4], strides = [1, 1, 1]} : vector<4x8x32xbf16> to vector<4x8x4xbf16>
    %272 = vector.extract_strided_slice %80 {offsets = [0, 0, 24], sizes = [4, 8, 4], strides = [1, 1, 1]} : vector<4x8x32xbf16> to vector<4x8x4xbf16>
    "tpu.trace_start"() <{level = 10 : i32, message = "btd,bsd->bts"}> : () -> ()
    %cst_85 = arith.constant dense<0.000000e+00> : vector<4x8x8xf32>
    %273 = tpu.matmul %271, %272, %cst_85 {dimension_numbers = #tpu.dot_dimension_numbers<[2], [2], [1], [1], [0, 0, 0, 1, 1, 1], [0], [0]>} : vector<4x8x4xbf16>, vector<4x8x4xbf16>, vector<4x8x8xf32> -> vector<4x8x8xf32>
    "tpu.trace_stop"() : () -> ()
    %274 = arith.addf %270, %273 : vector<4x8x8xf32>
    %c6 = arith.constant 6 : index
    %c0_86 = arith.constant 0 : index
    %c0_87 = arith.constant 0 : index
    %275 = vector.load %arg22[%c6, %c0_86, %c0_87] : memref<8x8x8xf32, #tpu.memory_space<vmem>>, vector<1x8x8xf32>
    %276 = vector.shape_cast %275 : vector<1x8x8xf32> to vector<8x8xf32>
    %277 = vector.shape_cast %276 : vector<8x8xf32> to vector<1x8x8xf32>
    %278 = vector.broadcast %277 : vector<1x8x8xf32> to vector<4x8x8xf32>
    %279 = arith.mulf %274, %278 : vector<4x8x8xf32>
    %280 = arith.truncf %279 : vector<4x8x8xf32> to vector<4x8x8xbf16>
    %281 = vector.extract_strided_slice %81 {offsets = [0, 0, 48], sizes = [4, 8, 8], strides = [1, 1, 1]} : vector<4x8x64xbf16> to vector<4x8x8xbf16>
    "tpu.trace_start"() <{level = 10 : i32, message = "bts,bsd->btd"}> : () -> ()
    %cst_88 = arith.constant dense<0.000000e+00> : vector<4x8x8xf32>
    %282 = tpu.matmul %280, %281, %cst_88 {dimension_numbers = #tpu.dot_dimension_numbers<[2], [1], [1], [2], [0, 0, 0, 1, 1, 2], [0], [0]>} : vector<4x8x8xbf16>, vector<4x8x8xbf16>, vector<4x8x8xf32> -> vector<4x8x8xf32>
    "tpu.trace_stop"() : () -> ()
    %cst_89 = arith.constant dense<0.000000e+00> : vector<4x8xf32>
    %283 = vector.multi_reduction <add>, %282, %cst_89 [2] : vector<4x8x8xf32> to vector<4x8xf32>
    %284 = vector.shape_cast %283 : vector<4x8xf32> to vector<4x8x1xf32>
    %cst_90 = arith.constant 8.000000e+00 : f32
    %285 = vector.broadcast %cst_90 : f32 to vector<4x8x1xf32>
    %286 = arith.divf %284, %285 : vector<4x8x1xf32>
    %287 = vector.broadcast %286 : vector<4x8x1xf32> to vector<4x8x8xf32>
    %288 = arith.subf %282, %287 : vector<4x8x8xf32>
    %289 = arith.mulf %288, %288 : vector<4x8x8xf32>
    %cst_91 = arith.constant dense<0.000000e+00> : vector<4x8xf32>
    %290 = vector.multi_reduction <add>, %289, %cst_91 [2] : vector<4x8x8xf32> to vector<4x8xf32>
    %291 = vector.shape_cast %290 : vector<4x8xf32> to vector<4x8x1xf32>
    %cst_92 = arith.constant 8.000000e+00 : f32
    %292 = vector.broadcast %cst_92 : f32 to vector<4x8x1xf32>
    %293 = arith.divf %291, %292 : vector<4x8x1xf32>
    %cst_93 = arith.constant 9.99999997E-7 : f32
    %294 = vector.broadcast %cst_93 : f32 to vector<4x8x1xf32>
    %295 = arith.addf %293, %294 : vector<4x8x1xf32>
    %296 = math.rsqrt %295 : vector<4x8x1xf32>
    %297 = vector.broadcast %296 : vector<4x8x1xf32> to vector<4x8x8xf32>
    %298 = arith.mulf %288, %297 : vector<4x8x8xf32>
    %299 = vector.extract_strided_slice %56 {offsets = [0, 0, 28], sizes = [4, 8, 4], strides = [1, 1, 1]} : vector<4x8x32xbf16> to vector<4x8x4xbf16>
    %300 = vector.extract_strided_slice %72 {offsets = [0, 0, 28], sizes = [4, 8, 4], strides = [1, 1, 1]} : vector<4x8x32xbf16> to vector<4x8x4xbf16>
    "tpu.trace_start"() <{level = 10 : i32, message = "btd,bsd->bts"}> : () -> ()
    %cst_94 = arith.constant dense<0.000000e+00> : vector<4x8x8xf32>
    %301 = tpu.matmul %299, %300, %cst_94 {dimension_numbers = #tpu.dot_dimension_numbers<[2], [2], [1], [1], [0, 0, 0, 1, 1, 1], [0], [0]>} : vector<4x8x4xbf16>, vector<4x8x4xbf16>, vector<4x8x8xf32> -> vector<4x8x8xf32>
    "tpu.trace_stop"() : () -> ()
    %302 = vector.extract_strided_slice %64 {offsets = [0, 0, 28], sizes = [4, 8, 4], strides = [1, 1, 1]} : vector<4x8x32xbf16> to vector<4x8x4xbf16>
    %303 = vector.extract_strided_slice %80 {offsets = [0, 0, 28], sizes = [4, 8, 4], strides = [1, 1, 1]} : vector<4x8x32xbf16> to vector<4x8x4xbf16>
    "tpu.trace_start"() <{level = 10 : i32, message = "btd,bsd->bts"}> : () -> ()
    %cst_95 = arith.constant dense<0.000000e+00> : vector<4x8x8xf32>
    %304 = tpu.matmul %302, %303, %cst_95 {dimension_numbers = #tpu.dot_dimension_numbers<[2], [2], [1], [1], [0, 0, 0, 1, 1, 1], [0], [0]>} : vector<4x8x4xbf16>, vector<4x8x4xbf16>, vector<4x8x8xf32> -> vector<4x8x8xf32>
    "tpu.trace_stop"() : () -> ()
    %305 = arith.addf %301, %304 : vector<4x8x8xf32>
    %c7 = arith.constant 7 : index
    %c0_96 = arith.constant 0 : index
    %c0_97 = arith.constant 0 : index
    %306 = vector.load %arg22[%c7, %c0_96, %c0_97] : memref<8x8x8xf32, #tpu.memory_space<vmem>>, vector<1x8x8xf32>
    %307 = vector.shape_cast %306 : vector<1x8x8xf32> to vector<8x8xf32>
    %308 = vector.shape_cast %307 : vector<8x8xf32> to vector<1x8x8xf32>
    %309 = vector.broadcast %308 : vector<1x8x8xf32> to vector<4x8x8xf32>
    %310 = arith.mulf %305, %309 : vector<4x8x8xf32>
    %311 = arith.truncf %310 : vector<4x8x8xf32> to vector<4x8x8xbf16>
    %312 = vector.extract_strided_slice %81 {offsets = [0, 0, 56], sizes = [4, 8, 8], strides = [1, 1, 1]} : vector<4x8x64xbf16> to vector<4x8x8xbf16>
    "tpu.trace_start"() <{level = 10 : i32, message = "bts,bsd->btd"}> : () -> ()
    %cst_98 = arith.constant dense<0.000000e+00> : vector<4x8x8xf32>
    %313 = tpu.matmul %311, %312, %cst_98 {dimension_numbers = #tpu.dot_dimension_numbers<[2], [1], [1], [2], [0, 0, 0, 1, 1, 2], [0], [0]>} : vector<4x8x8xbf16>, vector<4x8x8xbf16>, vector<4x8x8xf32> -> vector<4x8x8xf32>
    "tpu.trace_stop"() : () -> ()
    %cst_99 = arith.constant dense<0.000000e+00> : vector<4x8xf32>
    %314 = vector.multi_reduction <add>, %313, %cst_99 [2] : vector<4x8x8xf32> to vector<4x8xf32>
    %315 = vector.shape_cast %314 : vector<4x8xf32> to vector<4x8x1xf32>
    %cst_100 = arith.constant 8.000000e+00 : f32
    %316 = vector.broadcast %cst_100 : f32 to vector<4x8x1xf32>
    %317 = arith.divf %315, %316 : vector<4x8x1xf32>
    %318 = vector.broadcast %317 : vector<4x8x1xf32> to vector<4x8x8xf32>
    %319 = arith.subf %313, %318 : vector<4x8x8xf32>
    %320 = arith.mulf %319, %319 : vector<4x8x8xf32>
    %cst_101 = arith.constant dense<0.000000e+00> : vector<4x8xf32>
    %321 = vector.multi_reduction <add>, %320, %cst_101 [2] : vector<4x8x8xf32> to vector<4x8xf32>
    %322 = vector.shape_cast %321 : vector<4x8xf32> to vector<4x8x1xf32>
    %cst_102 = arith.constant 8.000000e+00 : f32
    %323 = vector.broadcast %cst_102 : f32 to vector<4x8x1xf32>
    %324 = arith.divf %322, %323 : vector<4x8x1xf32>
    %cst_103 = arith.constant 9.99999997E-7 : f32
    %325 = vector.broadcast %cst_103 : f32 to vector<4x8x1xf32>
    %326 = arith.addf %324, %325 : vector<4x8x1xf32>
    %327 = math.rsqrt %326 : vector<4x8x1xf32>
    %328 = vector.broadcast %327 : vector<4x8x1xf32> to vector<4x8x8xf32>
    %329 = arith.mulf %319, %328 : vector<4x8x8xf32>
    %330 = tpu.concatenate %112, %143, %174, %205, %236, %267, %298, %329 in 2 : vector<4x8x8xf32>, vector<4x8x8xf32>, vector<4x8x8xf32>, vector<4x8x8xf32>, vector<4x8x8xf32>, vector<4x8x8xf32>, vector<4x8x8xf32>, vector<4x8x8xf32> -> vector<4x8x64xf32>
    %331 = math.absf %42 : vector<32x64xf32>
    %cst_104 = arith.constant 0.000000e+00 : f32
    %332 = vector.broadcast %cst_104 : f32 to vector<32x64xf32>
    %333 = arith.subf %332, %331 : vector<32x64xf32>
    %334 = math.exp %333 : vector<32x64xf32>
    %cst_105 = arith.constant 1.000000e+00 : f32
    %335 = vector.broadcast %cst_105 : f32 to vector<32x64xf32>
    %336 = arith.addf %335, %334 : vector<32x64xf32>
    %337 = tpu.reciprocal %336 {approx = true} : vector<32x64xf32> -> vector<32x64xf32>
    %cst_106 = arith.constant 0.000000e+00 : f32
    %338 = vector.broadcast %cst_106 : f32 to vector<32x64xf32>
    %339 = arith.cmpf oge, %42, %338 : vector<32x64xf32>
    %340 = arith.mulf %334, %337 : vector<32x64xf32>
    %341 = arith.select %339, %337, %340 : vector<32x64xi1>, vector<32x64xf32>
    %342 = arith.mulf %42, %341 : vector<32x64xf32>
    %343 = vector.shape_cast %330 : vector<4x8x64xf32> to vector<32x64xf32>
    %344 = arith.mulf %343, %342 : vector<32x64xf32>
    %345 = arith.truncf %344 : vector<32x64xf32> to vector<32x64xbf16>
    %c0_107 = arith.constant 0 : index
    %c0_108 = arith.constant 0 : index
    %c0_109 = arith.constant 0 : index
    %346 = vector.load %arg12[%c0_107, %c0_108, %c0_109] : memref<1x64x64xbf16, #tpu.memory_space<vmem>>, vector<1x64x64xbf16>
    %347 = vector.shape_cast %346 : vector<1x64x64xbf16> to vector<64x64xbf16>
    %cst_110 = arith.constant dense<0.000000e+00> : vector<32x64xf32>
    %348 = tpu.matmul %345, %347, %cst_110 {dimension_numbers = #tpu.dot_dimension_numbers<[1], [0], [0], [1], [0, 0, 1, 1], [], []>} : vector<32x64xbf16>, vector<64x64xbf16>, vector<32x64xf32> -> vector<32x64xf32>
    %c0_111 = arith.constant 0 : index
    %c0_112 = arith.constant 0 : index
    %c0_113 = arith.constant 0 : index
    %349 = vector.load %arg13[%c0_111, %c0_112, %c0_113] : memref<1x1x64xf32, #tpu.memory_space<vmem>>, vector<1x1x64xf32>
    %350 = vector.shape_cast %349 : vector<1x1x64xf32> to vector<1x64xf32>
    %351 = vector.broadcast %350 : vector<1x64xf32> to vector<32x64xf32>
    %352 = arith.addf %348, %351 : vector<32x64xf32>
    %353 = arith.addf %3, %352 : vector<32x64xf32>
    %c0_114 = arith.constant 0 : index
    %c0_115 = arith.constant 0 : index
    %c0_116 = arith.constant 0 : index
    %354 = vector.load %arg8[%c0_114, %c0_115, %c0_116] : memref<1x1x64xf32, #tpu.memory_space<vmem>>, vector<1x1x64xf32>
    %355 = vector.shape_cast %354 : vector<1x1x64xf32> to vector<1x64xf32>
    %c0_117 = arith.constant 0 : index
    %c0_118 = arith.constant 0 : index
    %c0_119 = arith.constant 0 : index
    %356 = vector.load %arg9[%c0_117, %c0_118, %c0_119] : memref<1x1x64xf32, #tpu.memory_space<vmem>>, vector<1x1x64xf32>
    %357 = vector.shape_cast %356 : vector<1x1x64xf32> to vector<1x64xf32>
    %cst_120 = arith.constant dense<0.000000e+00> : vector<32xf32>
    %358 = vector.multi_reduction <add>, %353, %cst_120 [1] : vector<32x64xf32> to vector<32xf32>
    %359 = vector.shape_cast %358 : vector<32xf32> to vector<32x1xf32>
    %cst_121 = arith.constant 6.400000e+01 : f32
    %360 = vector.broadcast %cst_121 : f32 to vector<32x1xf32>
    %361 = arith.divf %359, %360 : vector<32x1xf32>
    %362 = vector.broadcast %361 : vector<32x1xf32> to vector<32x64xf32>
    %363 = arith.subf %353, %362 : vector<32x64xf32>
    %364 = arith.mulf %363, %363 : vector<32x64xf32>
    %cst_122 = arith.constant dense<0.000000e+00> : vector<32xf32>
    %365 = vector.multi_reduction <add>, %364, %cst_122 [1] : vector<32x64xf32> to vector<32xf32>
    %366 = vector.shape_cast %365 : vector<32xf32> to vector<32x1xf32>
    %cst_123 = arith.constant 6.400000e+01 : f32
    %367 = vector.broadcast %cst_123 : f32 to vector<32x1xf32>
    %368 = arith.divf %366, %367 : vector<32x1xf32>
    %cst_124 = arith.constant 9.99999997E-7 : f32
    %369 = vector.broadcast %cst_124 : f32 to vector<32x1xf32>
    %370 = arith.addf %368, %369 : vector<32x1xf32>
    %371 = math.rsqrt %370 : vector<32x1xf32>
    %372 = vector.broadcast %371 : vector<32x1xf32> to vector<32x64xf32>
    %373 = arith.mulf %363, %372 : vector<32x64xf32>
    %374 = vector.broadcast %355 : vector<1x64xf32> to vector<32x64xf32>
    %375 = arith.mulf %373, %374 : vector<32x64xf32>
    %376 = vector.broadcast %357 : vector<1x64xf32> to vector<32x64xf32>
    %377 = arith.addf %375, %376 : vector<32x64xf32>
    %378 = arith.truncf %377 : vector<32x64xf32> to vector<32x64xbf16>
    %c0_125 = arith.constant 0 : index
    %c0_126 = arith.constant 0 : index
    %c0_127 = arith.constant 0 : index
    %379 = vector.load %arg14[%c0_125, %c0_126, %c0_127] : memref<1x64x2048xbf16, #tpu.memory_space<vmem>>, vector<1x64x2048xbf16>
    %380 = vector.shape_cast %379 : vector<1x64x2048xbf16> to vector<64x2048xbf16>
    %cst_128 = arith.constant dense<0.000000e+00> : vector<32x2048xf32>
    %381 = tpu.matmul %378, %380, %cst_128 {dimension_numbers = #tpu.dot_dimension_numbers<[1], [0], [0], [1], [0, 0, 1, 1], [], []>} : vector<32x64xbf16>, vector<64x2048xbf16>, vector<32x2048xf32> -> vector<32x2048xf32>
    %c0_129 = arith.constant 0 : index
    %c0_130 = arith.constant 0 : index
    %c0_131 = arith.constant 0 : index
    %382 = vector.load %arg15[%c0_129, %c0_130, %c0_131] : memref<1x1x2048xf32, #tpu.memory_space<vmem>>, vector<1x1x2048xf32>
    %383 = vector.shape_cast %382 : vector<1x1x2048xf32> to vector<1x2048xf32>
    %384 = vector.broadcast %383 : vector<1x2048xf32> to vector<32x2048xf32>
    %385 = arith.addf %381, %384 : vector<32x2048xf32>
    %386 = math.absf %385 : vector<32x2048xf32>
    %cst_132 = arith.constant 0.000000e+00 : f32
    %387 = vector.broadcast %cst_132 : f32 to vector<32x2048xf32>
    %388 = arith.subf %387, %386 : vector<32x2048xf32>
    %389 = math.exp %388 : vector<32x2048xf32>
    %cst_133 = arith.constant 1.000000e+00 : f32
    %390 = vector.broadcast %cst_133 : f32 to vector<32x2048xf32>
    %391 = arith.addf %390, %389 : vector<32x2048xf32>
    %392 = tpu.reciprocal %391 {approx = true} : vector<32x2048xf32> -> vector<32x2048xf32>
    %cst_134 = arith.constant 0.000000e+00 : f32
    %393 = vector.broadcast %cst_134 : f32 to vector<32x2048xf32>
    %394 = arith.cmpf oge, %385, %393 : vector<32x2048xf32>
    %395 = arith.mulf %389, %392 : vector<32x2048xf32>
    %396 = arith.select %394, %392, %395 : vector<32x2048xi1>, vector<32x2048xf32>
    %397 = arith.mulf %385, %396 : vector<32x2048xf32>
    %398 = arith.truncf %397 : vector<32x2048xf32> to vector<32x2048xbf16>
    %c0_135 = arith.constant 0 : index
    %c0_136 = arith.constant 0 : index
    %c0_137 = arith.constant 0 : index
    %399 = vector.load %arg16[%c0_135, %c0_136, %c0_137] : memref<1x2048x64xbf16, #tpu.memory_space<vmem>>, vector<1x2048x64xbf16>
    %400 = vector.shape_cast %399 : vector<1x2048x64xbf16> to vector<2048x64xbf16>
    %cst_138 = arith.constant dense<0.000000e+00> : vector<32x64xf32>
    %401 = tpu.matmul %398, %400, %cst_138 {dimension_numbers = #tpu.dot_dimension_numbers<[1], [0], [0], [1], [0, 0, 1, 1], [], []>} : vector<32x2048xbf16>, vector<2048x64xbf16>, vector<32x64xf32> -> vector<32x64xf32>
    %c0_139 = arith.constant 0 : index
    %c0_140 = arith.constant 0 : index
    %c0_141 = arith.constant 0 : index
    %402 = vector.load %arg17[%c0_139, %c0_140, %c0_141] : memref<1x1x64xf32, #tpu.memory_space<vmem>>, vector<1x1x64xf32>
    %403 = vector.shape_cast %402 : vector<1x1x64xf32> to vector<1x64xf32>
    %404 = vector.broadcast %403 : vector<1x64xf32> to vector<32x64xf32>
    %405 = arith.addf %401, %404 : vector<32x64xf32>
    %406 = arith.addf %353, %405 : vector<32x64xf32>
    %c0_142 = arith.constant 0 : index
    %c0_143 = arith.constant 0 : index
    %407 = vector.load %arg21[%c0_142, %c0_143] : memref<32x64xf32, #tpu.memory_space<vmem>>, vector<32x64xf32>
    tpu.vector_store %arg21[%c0_142, %c0_143], %406 {strides = array<i32>} : memref<32x64xf32, #tpu.memory_space<vmem>>, vector<32x64xf32>,
    %c1_i32 = arith.constant 1 : i32
    %408 = arith.cmpi eq, %arg1, %c1_i32 : i32
    %409 = arith.extui %408 : i1 to i32
    %c0_i32_144 = arith.constant 0 : i32
    %410 = arith.cmpi ne, %409, %c0_i32_144 : i32
    scf.if %410 {
      %411 = vector.shape_cast %406 : vector<32x64xf32> to vector<1x32x64xf32>
      %c0_145 = arith.constant 0 : index
      %c0_146 = arith.constant 0 : index
      %412 = vector.load %arg18[%c0_145, %c0_146] : memref<1x64xf32, #tpu.memory_space<vmem>>, vector<1x64xf32>
      %413 = vector.shape_cast %412 : vector<1x64xf32> to vector<1x1x64xf32>
      %414 = vector.broadcast %413 : vector<1x1x64xf32> to vector<1x32x64xf32>
      %415 = arith.mulf %411, %414 : vector<1x32x64xf32>
      %cst_147 = arith.constant dense<0.000000e+00> : vector<1x32xf32>
      %416 = vector.multi_reduction <add>, %415, %cst_147 [2] : vector<1x32x64xf32> to vector<1x32xf32>
      %c0_148 = arith.constant 0 : index
      %c0_149 = arith.constant 0 : index
      %417 = vector.load %arg19[%c0_148, %c0_149] : memref<1x1xf32, #tpu.memory_space<vmem>>, vector<1x1xf32>
      %418 = vector.broadcast %417 : vector<1x1xf32> to vector<1x32xf32>
      %419 = arith.addf %416, %418 : vector<1x32xf32>
      %420 = math.absf %419 : vector<1x32xf32>
      %cst_150 = arith.constant 0.000000e+00 : f32
      %421 = vector.broadcast %cst_150 : f32 to vector<1x32xf32>
      %422 = arith.subf %421, %420 : vector<1x32xf32>
      %423 = math.exp %422 : vector<1x32xf32>
      %cst_151 = arith.constant 1.000000e+00 : f32
      %424 = vector.broadcast %cst_151 : f32 to vector<1x32xf32>
      %425 = arith.addf %424, %423 : vector<1x32xf32>
      %cst_152 = arith.constant 1.000000e+00 : f32
      %426 = vector.broadcast %cst_152 : f32 to vector<1x32xf32>
      %427 = arith.divf %426, %425 : vector<1x32xf32>
      %cst_153 = arith.constant 0.000000e+00 : f32
      %428 = vector.broadcast %cst_153 : f32 to vector<1x32xf32>
      %429 = arith.cmpf oge, %419, %428 : vector<1x32xf32>
      %430 = arith.mulf %423, %427 : vector<1x32xf32>
      %431 = arith.select %429, %427, %430 : vector<1x32xi1>, vector<1x32xf32>
      %c0_154 = arith.constant 0 : index
      %c0_155 = arith.constant 0 : index
      %c0_156 = arith.constant 0 : index
      %432 = vector.load %arg20[%c0_154, %c0_155, %c0_156] : memref<1x1x32xf32, #tpu.memory_space<vmem>>, vector<1x1x32xf32>
      %433 = vector.shape_cast %432 : vector<1x1x32xf32> to vector<1x32xf32>
      %434 = vector.shape_cast %431 : vector<1x32xf32> to vector<1x1x32xf32>
      tpu.vector_store %arg20[%c0_154, %c0_155, %c0_156], %434 {strides = array<i32>} : memref<1x1x32xf32, #tpu.memory_space<vmem>>, vector<1x1x32xf32>,
    } else {
    }
    return
  }
  func.func @transform_0(%arg0: i32, %arg1: i32) -> (i32, i32, i32) {
    %c0_i32 = arith.constant 0 : i32
    %c0_i32_0 = arith.constant 0 : i32
    %c0_i32_1 = arith.constant 0 : i32
    return %arg0, %c0_i32, %c0_i32_0 : i32, i32, i32
  }
  func.func @transform_1(%arg0: i32, %arg1: i32) -> (i32, i32) {
    %c0_i32 = arith.constant 0 : i32
    %c0_i32_0 = arith.constant 0 : i32
    %c0_i32_1 = arith.constant 0 : i32
    return %c0_i32, %c0_i32_0 : i32, i32
  }
  func.func @transform_2(%arg0: i32, %arg1: i32) -> (i32, i32) {
    %c0_i32 = arith.constant 0 : i32
    %c0_i32_0 = arith.constant 0 : i32
    %c0_i32_1 = arith.constant 0 : i32
    return %c0_i32, %c0_i32_0 : i32, i32
  }
  func.func @transform_3(%arg0: i32, %arg1: i32) -> (i32, i32) {
    %c0_i32 = arith.constant 0 : i32
    %c0_i32_0 = arith.constant 0 : i32
    %c0_i32_1 = arith.constant 0 : i32
    return %c0_i32, %c0_i32_0 : i32, i32
  }
  func.func @transform_4(%arg0: i32, %arg1: i32) -> (i32, i32, i32) {
    %c0_i32 = arith.constant 0 : i32
    %c0_i32_0 = arith.constant 0 : i32
    %c0_i32_1 = arith.constant 0 : i32
    return %arg1, %c0_i32, %c0_i32_0 : i32, i32, i32
  }
  func.func @transform_5(%arg0: i32, %arg1: i32) -> (i32, i32, i32) {
    %c0_i32 = arith.constant 0 : i32
    %c0_i32_0 = arith.constant 0 : i32
    %c0_i32_1 = arith.constant 0 : i32
    return %arg1, %c0_i32, %c0_i32_0 : i32, i32, i32
  }
  func.func @transform_6(%arg0: i32, %arg1: i32) -> (i32, i32, i32) {
    %c0_i32 = arith.constant 0 : i32
    %c0_i32_0 = arith.constant 0 : i32
    %c0_i32_1 = arith.constant 0 : i32
    return %arg1, %c0_i32, %c0_i32_0 : i32, i32, i32
  }
  func.func @transform_7(%arg0: i32, %arg1: i32) -> (i32, i32, i32) {
    %c0_i32 = arith.constant 0 : i32
    %c0_i32_0 = arith.constant 0 : i32
    %c0_i32_1 = arith.constant 0 : i32
    return %arg1, %c0_i32, %c0_i32_0 : i32, i32, i32
  }
  func.func @transform_8(%arg0: i32, %arg1: i32) -> (i32, i32, i32) {
    %c0_i32 = arith.constant 0 : i32
    %c0_i32_0 = arith.constant 0 : i32
    %c0_i32_1 = arith.constant 0 : i32
    return %arg1, %c0_i32, %c0_i32_0 : i32, i32, i32
  }
  func.func @transform_9(%arg0: i32, %arg1: i32) -> (i32, i32, i32) {
    %c0_i32 = arith.constant 0 : i32
    %c0_i32_0 = arith.constant 0 : i32
    %c0_i32_1 = arith.constant 0 : i32
    return %arg1, %c0_i32, %c0_i32_0 : i32, i32, i32
  }
  func.func @transform_10(%arg0: i32, %arg1: i32) -> (i32, i32, i32) {
    %c0_i32 = arith.constant 0 : i32
    %c0_i32_0 = arith.constant 0 : i32
    %c0_i32_1 = arith.constant 0 : i32
    return %arg1, %c0_i32, %c0_i32_0 : i32, i32, i32
  }
  func.func @transform_11(%arg0: i32, %arg1: i32) -> (i32, i32, i32) {
    %c0_i32 = arith.constant 0 : i32
    %c0_i32_0 = arith.constant 0 : i32
    %c0_i32_1 = arith.constant 0 : i32
    return %arg1, %c0_i32, %c0_i32_0 : i32, i32, i32
  }
  func.func @transform_12(%arg0: i32, %arg1: i32) -> (i32, i32, i32) {
    %c0_i32 = arith.constant 0 : i32
    %c0_i32_0 = arith.constant 0 : i32
    %c0_i32_1 = arith.constant 0 : i32
    return %arg1, %c0_i32, %c0_i32_0 : i32, i32, i32
  }
  func.func @transform_13(%arg0: i32, %arg1: i32) -> (i32, i32, i32) {
    %c0_i32 = arith.constant 0 : i32
    %c0_i32_0 = arith.constant 0 : i32
    %c0_i32_1 = arith.constant 0 : i32
    return %arg1, %c0_i32, %c0_i32_0 : i32, i32, i32
  }
  func.func @transform_14(%arg0: i32, %arg1: i32) -> (i32, i32, i32) {
    %c0_i32 = arith.constant 0 : i32
    %c0_i32_0 = arith.constant 0 : i32
    %c0_i32_1 = arith.constant 0 : i32
    return %arg1, %c0_i32, %c0_i32_0 : i32, i32, i32
  }
  func.func @transform_15(%arg0: i32, %arg1: i32) -> (i32, i32, i32) {
    %c0_i32 = arith.constant 0 : i32
    %c0_i32_0 = arith.constant 0 : i32
    %c0_i32_1 = arith.constant 0 : i32
    return %arg1, %c0_i32, %c0_i32_0 : i32, i32, i32
  }
  func.func @transform_16(%arg0: i32, %arg1: i32) -> (i32, i32) {
    %c0_i32 = arith.constant 0 : i32
    %c0_i32_0 = arith.constant 0 : i32
    %c0_i32_1 = arith.constant 0 : i32
    return %c0_i32, %c0_i32_0 : i32, i32
  }
  func.func @transform_17(%arg0: i32, %arg1: i32) -> (i32, i32) {
    %c0_i32 = arith.constant 0 : i32
    %c0_i32_0 = arith.constant 0 : i32
    %c0_i32_1 = arith.constant 0 : i32
    return %c0_i32, %c0_i32_0 : i32, i32
  }
  func.func @transform_18(%arg0: i32, %arg1: i32) -> (i32, i32, i32) {
    %c0_i32 = arith.constant 0 : i32
    %c0_i32_0 = arith.constant 0 : i32
    %c0_i32_1 = arith.constant 0 : i32
    return %arg0, %c0_i32, %c0_i32_0 : i32, i32, i32
  }
}

</mosaic_0001>

<bundles_post_ra>
// kernel: tpu_custom_call.1
= control target key start
LH: loop header
LB: loop body
LE: loop exit
PB: predicated region body
PF: predicated region fallthrough
CT: control target
= control target key end

     0   :  { %s13083_s0 = inlined_call_operand.vmem [shape: f32[8,8,64], index: 0, kind: input, shape index: {}]   ;;  %s13084_s1 = inlined_call_operand.vmem [shape: f32[8,64], index: 1, kind: input, shape index: {}]   ;;  %s13085_s2 = inlined_call_operand.vmem [shape: f32[8,32], index: 2, kind: input, shape index: {}]   ;;  %s13086_s3 = inlined_call_operand.vmem [shape: f32[8,32], index: 3, kind: input, shape index: {}]   ;;  %s13087_s4 = inlined_call_operand.vmem [shape: f32[2,1,64], index: 4, kind: input, shape index: {}]   ;;  %s13088_s5 = inlined_call_operand.vmem [shape: f32[2,1,64], index: 5, kind: input, shape index: {}]   ;;  %s13089_s6 = inlined_call_operand.vmem [shape: f32[2,1,64], index: 6, kind: input, shape index: {}]   ;;  %s13090_s7 = inlined_call_operand.vmem [shape: f32[2,1,64], index: 7, kind: input, shape index: {}]   ;;  %s13091_s8 = inlined_call_operand.vmem [shape: bf16[2,64,256], index: 8, kind: input, shape index: {}]   ;;  %s13092_s9 = inlined_call_operand.vmem [shape: f32[2,1,256], index: 9, kind: input, shape index: {}]   ;;  %s13093_s10 = inlined_call_operand.vmem [shape: bf16[2,64,64], index: 10, kind: input, shape index: {}]   ;;  %s13094_s11 = inlined_call_operand.vmem [shape: f32[2,1,64], index: 11, kind: input, shape index: {}]   ;;  %s13095_s12 = inlined_call_operand.vmem [shape: bf16[2,64,2048], index: 12, kind: input, shape index: {}]   ;;  %s13096_s13 = inlined_call_operand.vmem [shape: f32[2,1,2048], index: 13, kind: input, shape index: {}]   ;;  %s13097_s14 = inlined_call_operand.vmem [shape: bf16[2,2048,64], index: 14, kind: input, shape index: {}]   ;;  %s13098_s15 = inlined_call_operand.vmem [shape: f32[2,1,64], index: 15, kind: input, shape index: {}]   ;;  %s13099_s16 = inlined_call_operand.vmem [shape: f32[1,64], index: 16, kind: input, shape index: {}]   ;;  %s13100_s17 = inlined_call_operand.<no memory space> [shape: f32[1,1], index: 17, kind: input, shape index: {}]   ;;  %s13101_s18 = inlined_call_operand.hbm [shape: f32[2,1,32], index: 18, kind: output, shape index: {}]  }
   0x1   :  { %13136 = sst [smem:[#allocation66_spill]] %s13083_s0  ;;  %v23_v0 = vstv %s13100_s17 }
   0x2   :  { %13137 = sst [smem:[#allocation67_spill]] %s13084_s1  ;;  %24 = vst [vmem:[#allocation4] sm:$0x1] %v23_v0 }
   0x3   :  { %13138 = sst [smem:[#allocation68_spill]] %s13085_s2 }
   0x4   :  { %13139 = sst [smem:[#allocation69_spill]] %s13086_s3 }
   0x5   :  { %13140 = sst [smem:[#allocation70_spill]] %s13089_s6 }
   0x6   :  { %13141 = sst [smem:[#allocation71_spill]] %s13090_s7 }
   0x7   :  { %13142 = sst [smem:[#allocation72_spill]] %s13091_s8 }
   0x8   :  { %13143 = sst [smem:[#allocation73_spill]] %s13092_s9 }
   0x9   :  { %13144 = sst [smem:[#allocation74_spill]] %s13093_s10 }
   0xa   :  { %13145 = sst [smem:[#allocation75_spill]] %s13099_s16 }
   0xb   :  { %13146 = sst [smem:[#allocation76_spill]] %s13101_s18 }
   0xc   :  { %25 = vsyncpa [#allocation6], 0 }
   0xd   :  { %27 = vsyncpa [#allocation6 + $0x1], 0  ;;  %s9603_s29 = smov 0   ;;  %s9605_s30 = smov 0  }
   0xe   :  { %s9607_s0 = smov 0   ;;  %s9609_s19 = smov 0  }
   0xf   :  { %s9611_s1 = smov 0   ;;  %s9613_s20 = smov 0  }
  0x10   :  { %s9615_s21 = smov 0   ;;  %s9617_s22 = smov 0  }
  0x11 LB: > { %13147 = sst [smem:[#allocation8_spill]] %s9441_s29  ;;  %s7689_s17 = sadd.s32 4294967295, %s9469_s22   ;;  %s9469_s22 = sphi %s9617_s22, %s33_s22   ;;  %s9465_s21 = sphi %s9615_s21, %s13303_s21   ;;  %s9461_s20 = sphi %s9613_s20, %s13302_s20   ;;  %s9457_s1 = sphi %s9611_s1, %s13306_s1   ;;  %s9453_s19 = sphi %s9609_s19, %s13300_s19   ;;  %s9449_s0 = sphi %s9607_s0, %s13299_s0   ;;  %s9445_s30 = sphi %s9605_s30, %s13305_s30   ;;  %s9441_s29 = sphi %s9603_s29, %s13304_s29  }
  0x12   : > { %13148 = sst [smem:[#allocation9_spill]] %s9449_s0  ;;  %s7690_s2 = sadd.s32 4294967294, %s9469_s22  }
  0x13   : > { %13149 = sst [smem:[#allocation10_spill]] %s9457_s1  ;;  %s42_s23 = sadd.s32 1, %s9461_s20 }
  0x14   : > { %13150 = sst [smem:[#allocation11_spill]] %s9461_s20  ;;  %p43_p0 = scmp.ge.s32.totalorder %s42_s23, 2 }
  0x15   : > { %13151 = sst [smem:[#allocation12_spill]] %s9465_s21  ;;  %s45_s24 = sadd.s32 1, %s9465_s21 }
  0x16   : > { %13152 = sst [smem:[#allocation13_spill]] %s9469_s22  ;;  %p505_p1 = scmp.ne.s32.totalorder %s9449_s0, %s9445_s30 }
  0x17   : > { %p506_p2 = scmp.eq.s32.totalorder %s7689_s17, 3  ;;  %s13308_s23 = smov (%p43_p0, %s42_s23), 0 }
  0x18   : > { %13153 = sst [smem:[#allocation14_spill]] %s13308_s23  ;;  %s13310_s24 = smov (!%p43_p0, %s45_s24), %s9465_s21 }
  0x19   : > { %p9652_p3 = por %p506_p2, %p505_p1  ;;  %p511_p4 = scmp.ne.s32.totalorder %s9445_s30, %s9441_s29 }
  0x1a   : > { %p47_p5 = scmp.ge.s32.totalorder %s13310_s24, 2  ;;  %p512_p6 = scmp.eq.s32.totalorder %s7690_s2, 3 }
  0x1b   : > { %s13154_s25 = scalar_select %p9652_p3, 1, 0 }
  0x1c   : > { %p7693_p7 = scmp.ge.s32.totalorder %s9469_s22, 1  ;;  %p636_p8 = scmp.lt.s32.totalorder %s9469_s22, 5 }
  0x1d   : > { %13155 = sst [smem:[#allocation15_spill]] %s13154_s25  ;;  %s13312_s24 = smov (%p47_p5, %s13310_s24), 0 }
  0x1e   : > { %13156 = sst [smem:[#allocation16_spill]] %s13312_s24  ;;  %p9662_p9 = por %p512_p6, %p511_p4 }
  0x1f   : > { %p637_p10 = pnand %p7693_p7, %p636_p8  ;;  %s492_s27 = ssub.s32 %s9465_s21, %s13312_s24 }
  0x20   : > { %s13157_s26 = scalar_select %p9662_p9, 1, 0 }
  0x21   : > { %s495_s28 = sadd.s32 1, %s9449_s0  ;;  %p493_p11 = scmp.eq.s32.totalorder %s492_s27, 0 }
  0x22   : > { %13158 = sst [smem:[#allocation17_spill]] %s13157_s26  ;;  %640 = sbr.rel (%p637_p10) target bundleno = 3893 (0xf35), region = 92 }
  0x23   : > { %s9670_s17 = scalar_select %p493_p11, %s9449_s0, %s495_s28  }
  0x25   : > { %13159 = sst [smem:[#allocation18_spill]] %s9670_s17 }
  0x27   : > { %s7694_s23 = sshll.u32 %s9457_s1, 2  ;;  %p741_p13 = scmp.lt.s32.totalorder %s9453_s19, 1 }
  0x28   : > { %p736_p12 = scmp.lt.s32.totalorder %s7694_s23, 7  ;;  %s13160_s2 = sld [smem:[#allocation66_spill]] }
  0x29   : > { %s9676_s20 = scalar_select %p741_p13, %s9453_s19, 1 }
  0x2a   : > { %s13314_s23 = smov (!%p736_p12, %s7694_s23), 7  ;;  %s13163_s8 = sld [smem:[#allocation72_spill]] }
  0x2b   : > { %s7695_s27 = sshll.u32 %s13314_s23, 3  ;;  %s7698_s17 = sshll.u32 %s9676_s20, 1 }
  0x2c   : > { %s13164_s9 = sld [smem:[#allocation73_spill]]  ;;  %s8663_s25 = sshll.u32 %s9676_s20, 5 }
  0x2d   : > { %s13165_s10 = sld [smem:[#allocation74_spill]]  ;;  %s8664_s7 = sshll.u32 %s9676_s20, 9 }
  0x2e   : > { %s739_s21 = scalar_lea.vmem %s13160_s2, %s7695_s27  ;;  %s8662_s2 = sshll.u32 %s9676_s20, 6 }
  0x2f   : > { %s7703_s27 = sshll.u32 %s9676_s20, 4  ;;  %s13166_s24 = sand.u32 1, %s9445_s30  }
  0x30   : > { %s9701_s0 = scalar_lea.vmem %s13163_s8, %s8662_s2  ;;  %s9724_s8 = scalar_lea.vmem %s13095_s12, %s8664_s7 }
  0x31   : > { %s9729_s29 = scalar_lea.vmem %s13096_s13, %s7703_s27  ;;  %s9743_s6 = scalar_lea.vmem [#allocation5], %s13166_s24 }
  0x32   : > { %s9707_s22 = scalar_lea.vmem %s13164_s9, %s7698_s17  ;;  %s8665_s9 = sshll.u32 %s9676_s20, 10 }
  0x33   : > { %s9713_s16 = scalar_lea.vmem %s13165_s10, %s8663_s25  ;;  %s9739_s23 = scalar_lea.vmem %s13097_s14, %s8665_s9 }
  0x34   : > { %p7706_p0 = scmp.ne.s32.totalorder %s9453_s19, 0 }
  0x35   : > { %s13167_s2 = sld [smem:[#allocation67_spill]] (!%p7706_p0) }
  0x36   : > { %791 = sbr.rel (%p7706_p0) target bundleno = 89 (0x59), region = 96 }
  0x3b   : > { %v792_v1 = vld [vmem:[%s739_s21] sm:$0xff]  ;;  %vm801_vm0 = vcmask 523264   ;;  %v793_v3 = vld [vmem:[%s739_s21 + $0x8] sm:$0xff]  ;;  %v806_v4 = vlaneseq  ;;  %v794_v7 = vld [vmem:[%s739_s21 + $0x10] sm:$0xff]  ;;  %vm819_vm3 = vcmask 64512  }
  0x3c   : > { %v796_v2 = vld [vmem:[%s13167_s2] sm:$0xff]  ;;  %v795_v8 = vld [vmem:[%s739_s21 + $0x18] sm:$0xff] }
  0x3d   : > { %v797_v5 = vadd.f32 %v796_v2, %v792_v1  ;;  %v798_v6 = vadd.f32 %v796_v2, %v793_v3  ;;  %v799_v9 = vadd.f32 %v796_v2, %v794_v7  ;;  %v800_v10 = vadd.f32 %v796_v2, %v795_v8 }
  0x3e   : > { %v807_v11 = vshrl.u32 %v806_v4, 7  ;;  %v809_v12 = vand.u32 127, %v806_v4 }
  0x3f   : > { %802 = vst.msk [vmem:[#allocation2] sm:$0xff] %vm801_vm0, %v797_v5 }
  0x40   : > { %803 = vst.msk [vmem:[#allocation2 + $0x8] sm:$0xff] %vm801_vm0, %v798_v6  ;;  %v811_v13 = vsub.s32 %v807_v11, %v809_v12  ;;  %vm9749_vm2 = vcmp.ge.s32.totalorder %v807_v11, %v809_v12 }
  0x41   : > { %804 = vst.msk [vmem:[#allocation2 + $0x10] sm:$0xff] %vm801_vm0, %v799_v9 }
  0x42   : > { %805 = vst.msk [vmem:[#allocation2 + $0x18] sm:$0xff] %vm801_vm0, %v800_v10  ;;  %vm812_vm1 = vcmp.gt.s32.totalorder %v811_v13, 0  ;;  %v7707_v14 = vcvt.s32.f32 %v811_v13 }
  0x44   : > { %v7708_v15 = vsel %vm812_vm1, %v7707_v14, 0.0 }
  0x45   : > { %v815_v16 = vmul.f32 -0.031748697, %v7708_v15  ;;  %v821_v17 = vmul.f32 -0.021253964, %v7708_v15  ;;  %v827_v18 = vmul.f32 -0.014253026, %v7708_v15 }
  0x46   : > { %v833_v19 = vmul.f32 -0.009569183, %v7708_v15  ;;  %v839_v20 = vmul.f32 -0.006429495, %v7708_v15  ;;  %v845_v21 = vmul.f32 -0.004322177, %v7708_v15 }
  0x47   : > { %v816_v22 = vmul.f32 1.442695, %v815_v16  ;;  %v822_v23 = vmul.f32 1.442695, %v821_v17  ;;  %v828_v24 = vmul.f32 1.442695, %v827_v18 }
  0x48   : > { %v834_v25 = vmul.f32 1.442695, %v833_v19  ;;  %v840_v26 = vmul.f32 1.442695, %v839_v20  ;;  %v851_v27 = vmul.f32 -0.0029065525, %v7708_v15 }
  0x49   : > { %8975 = vpow2.f32 %v816_v22  ;;  %v857_v28 = vmul.f32 -0.001955035, %v7708_v15  ;;  %v846_v29 = vmul.f32 1.442695, %v845_v21 }
  0x4a   : > { %8977 = vpow2.f32 %v822_v23  ;;  %v852_v30 = vmul.f32 1.442695, %v851_v27 }
  0x4b   : > { %8979 = vpow2.f32 %v828_v24  ;;  %v858_v31 = vmul.f32 1.442695, %v857_v28 }
  0x4c   : > { %8981 = vpow2.f32 %v834_v25 }
  0x4d   : > { %8983 = vpow2.f32 %v840_v26 }
  0x4e   : > { %8985 = vpow2.f32 %v846_v29 }
  0x4f   : > { %v8976_v33 = vpop.eup %8975  ;;  %8987 = vpow2.f32 %v852_v30 }
  0x50   : > { %v8978_v34 = vpop.eup %8977  ;;  %v818_v35 = vsel %vm9749_vm2, %v8976_v33, 0.0  ;;  %8989 = vpow2.f32 %v858_v31 }
  0x51   : > { %v8980_v36 = vpop.eup %8979  ;;  %820 = vst.msk [vmem:[#allocation3] sm:$0xff] %vm819_vm3, %v818_v35  ;;  %v824_v37 = vsel %vm9749_vm2, %v8978_v34, 0.0 }
  0x52   : > { %v8982_v38 = vpop.eup %8981  ;;  %826 = vst.msk [vmem:[#allocation3 + $0x8] sm:$0xff] %vm819_vm3, %v824_v37  ;;  %v830_v39 = vsel %vm9749_vm2, %v8980_v36, 0.0 }
  0x53   : > { %v8984_v40 = vpop.eup %8983  ;;  %832 = vst.msk [vmem:[#allocation3 + $0x10] sm:$0xff] %vm819_vm3, %v830_v39  ;;  %v836_v41 = vsel %vm9749_vm2, %v8982_v38, 0.0 }
  0x54   : > { %v8986_v42 = vpop.eup %8985  ;;  %838 = vst.msk [vmem:[#allocation3 + $0x18] sm:$0xff] %vm819_vm3, %v836_v41  ;;  %v842_v43 = vsel %vm9749_vm2, %v8984_v40, 0.0 }
  0x55   : > { %v8988_v44 = vpop.eup %8987  ;;  %844 = vst.msk [vmem:[#allocation3 + $0x20] sm:$0xff] %vm819_vm3, %v842_v43  ;;  %v848_v45 = vsel %vm9749_vm2, %v8986_v42, 0.0 }
  0x56   : > { %v8990_v46 = vpop.eup %8989  ;;  %850 = vst.msk [vmem:[#allocation3 + $0x28] sm:$0xff] %vm819_vm3, %v848_v45  ;;  %v854_v47 = vsel %vm9749_vm2, %v8988_v44, 0.0 }
  0x57   : > { %856 = vst.msk [vmem:[#allocation3 + $0x30] sm:$0xff] %vm819_vm3, %v854_v47  ;;  %v860_v48 = vsel %vm9749_vm2, %v8990_v46, 0.0 }
  0x58   : > { %862 = vst.msk [vmem:[#allocation3 + $0x38] sm:$0xff] %vm819_vm3, %v860_v48 }
  0x59 PF: > { %v865_v49 = vld [vmem:[#allocation2 + $0x10] sm:$0xff]  ;;  %vm869_vm4 = vcmask 523264   ;;  %v863_v50 = vld [vmem:[#allocation2] sm:$0xff]  ;;  %v866_v53 = vld [vmem:[#allocation2 + $0x18] sm:$0xff]  ;;  %v9471_v57 = vmov 64.0   ;;  %s13171_s21 = sld [smem:[#allocation68_spill]]  ;;  %s13173_s7 = scalar_lea.vmem %s13087_s4, %s9676_s20 }
  0x5a   : > { %v876_v51 = vsel %vm869_vm4, %v865_v49, 0.0  ;;  %v870_v52 = vsel %vm869_vm4, %v863_v50, 0.0  ;;  %v864_v54 = vld [vmem:[#allocation2 + $0x8] sm:$0xff]  ;;  %v879_v55 = vsel %vm869_vm4, %v866_v53, 0.0  ;;  %8997 = vrcp.f32 %v9471_v57  ;;  %v7735_v20 = vld [vmem:[%s9701_s0 + $0x30] sm:$0xf]  ;;  %s13174_s9 = scalar_lea.vmem %s13088_s5, %s9676_s20 }
  0x5b   : > { %877 = vadd.xlane.f32.xlu1 %v876_v51  ;;  %871 = vadd.xlane.f32.xlu0 %v870_v52  ;;  %v873_v56 = vsel %vm869_vm4, %v864_v54, 0.0  ;;  %v8673_v21 = vld [vmem:[%s9701_s0 + $0x34] sm:$0xf0]  ;;  %v8672_v22 = vld [vmem:[%s9701_s0 + $0x34] sm:$0xf]  ;;  %s13172_s28 = sld [smem:[#allocation69_spill]] }
  0x5c   : > { %v7736_v23 = vor.u32 %v8673_v21, %v7735_v20  ;;  %v7737_v24 = vld [vmem:[%s9701_s0 + $0x38] sm:$0xf0]  ;;  %v7727_v26 = vld [vmem:[%s9701_s0 + $0x20] sm:$0xf]  ;;  %v8671_v27 = vld [vmem:[%s9701_s0 + $0x24] sm:$0xf0] }
  0x5d   : > { %v7740_v25 = vor.u32 %v8672_v22, %v7737_v24  ;;  %v8670_v28 = vld [vmem:[%s9701_s0 + $0x24] sm:$0xf]  ;;  %v7728_v29 = vor.u32 %v8671_v27, %v7727_v26  ;;  %v7729_v30 = vld [vmem:[%s9701_s0 + $0x28] sm:$0xf0]  ;;  %v7719_v32 = vld [vmem:[%s9701_s0 + $0x10] sm:$0xf] }
  0x5e   : > { %1045 = vmatpush.bf16.msra.mxu0 %v7736_v23  ;;  %v7732_v31 = vor.u32 %v8670_v28, %v7729_v30  ;;  %v8669_v33 = vld [vmem:[%s9701_s0 + $0x14] sm:$0xf0]  ;;  %v8668_v34 = vld [vmem:[%s9701_s0 + $0x14] sm:$0xf]  ;;  %v7721_v36 = vld [vmem:[%s9701_s0 + $0x18] sm:$0xf0] }
  0x5f   : > { %1064 = vmatpush.bf16.msra.mxu1 %v7740_v25  ;;  %v7720_v35 = vor.u32 %v8669_v33, %v7719_v32  ;;  %v7711_v37 = vld [vmem:[%s9701_s0] sm:$0xf]  ;;  %v8667_v38 = vld [vmem:[%s9701_s0 + $0x4] sm:$0xf0]  ;;  %v7724_v40 = vor.u32 %v8668_v34, %v7721_v36  ;;  %v8666_v41 = vld [vmem:[%s9701_s0 + $0x4] sm:$0xf] }
  0x60   : > { %v8998_v58 = vpop.eup %8997  ;;  %v7713_v42 = vld [vmem:[%s9701_s0 + $0x8] sm:$0xf0]  ;;  %v7712_v45 = vor.u32 %v8667_v38, %v7711_v37  ;;  %v9830_v52 = vld [vmem:[%s13171_s21] sm:$0xff]  ;;  %s9472_s26 = smov 96   ;;  %s13116_s17 = smov 64   ;;  %vm1243_vm2 = vcmask 31744  }
  0x61   : > { %v883_v59 = vmul.f32 64.0, %v8998_v58  ;;  %vm887_vm5 = vweird.f32 %v8998_v58  ;;  %v7716_v46 = vor.u32 %v8666_v41, %v7713_v42  ;;  %s13128_s18 = smov 32   ;;  %v8992_v26 = vld [vmem:[%s13174_s9] ss:$0 sm:$0xff]  ;;  %s9476_s10 = smov 60   ;;  %vm1459_vm3 = vcmask 1043456  }
  0x62   : > { %1046 = vmatpush.bf16.msra.mxu0 %v7728_v29  ;;  %v9869_v41 = vld [vmem:[%s9707_s22] sm:$0x3]  ;;  %s9475_s22 = smov 28   ;;  %s9477_s21 = smov 92  }
  0x63   : > { %880 = vadd.xlane.f32.xlu1 %v879_v55  ;;  %874 = vadd.xlane.f32.xlu0 %v873_v56  ;;  %v884_v60 = vsub.f32 1.0, %v883_v59  ;;  %v991_v42 = vperm.slane %v9869_v41, 0  ;;  %s9478_s24 = smov 124   ;;  %s9479_s0 = smov 120  }
  0x64   : > { %1065 = vmatpush.bf16.msra.mxu1 %v7732_v31  ;;  %s13114_s25 = smov 56   ;;  %s9482_s3 = smov 88  }
  0x65   : > { %v885_v61 = vmul.f32 %v8998_v58, %v884_v60  ;;  %s9484_s27 = smov 84   ;;  %s9485_s2 = smov 52  }
  0x66   : > { %1047 = vmatpush.bf16.msra.mxu0 %v7720_v35  ;;  %s9486_s9 = smov 20   ;;  %s9492_s1 = smov 12  }
  0x67   : > { %v886_v62 = vadd.f32 %v8998_v58, %v885_v61  ;;  %p8659_p1 = scmp.ne.s32.totalorder %s9453_s19, 1 }
  0x68   : > { %1066 = vmatpush.bf16.msra.mxu1 %v7724_v40 }
  0x69   : > { %v9781_v63 = vsel %vm887_vm5, %v8998_v58, %v886_v62  ;;  %vm1455_vm5 = vcmask 64512  }
  0x6a   : > { %13170 = vst [vmem:[#allocation19_spill] sm:$0xff] %v9781_v63  ;;  %1048 = vmatpush.bf16.msra.mxu0 %v7712_v45 }
  0x6c   : > { %1067 = vmatpush.bf16.msra.mxu1 %v7716_v46 }
  0xce   : > { %v878_v0 = vpop.xlane.xlu1 %877  ;;  %v872_v1 = vpop.xlane.xlu0 %871 }
  0xcf   : > { %v891_v2 = vmul.f32 %v9781_v63, %v878_v0  ;;  %v889_v3 = vmul.f32 %v9781_v63, %v872_v1 }
  0xd1   : > { %v9785_v4 = vsub.f32 %v865_v49, %v891_v2  ;;  %v9787_v5 = vsub.f32 %v863_v50, %v889_v3 }
  0xd3   : > { %v899_v6 = vmul.f32 %v9785_v4, %v9785_v4  ;;  %v897_v7 = vmul.f32 %v9787_v5, %v9787_v5 }
  0xd5   : > { %v907_v8 = vsel %vm869_vm4, %v899_v6, 0.0  ;;  %v901_v9 = vsel %vm869_vm4, %v897_v7, 0.0 }
  0xd6   : > { %v881_v10 = vpop.xlane.xlu1 %880  ;;  %908 = vadd.xlane.f32.xlu0 %v907_v8  ;;  %902 = vadd.xlane.f32.xlu2 %v901_v9  ;;  %v875_v11 = vpop.xlane.xlu0 %874 }
  0xd7   : > { %v892_v12 = vmul.f32 %v9781_v63, %v881_v10  ;;  %v890_v13 = vmul.f32 %v9781_v63, %v875_v11 }
  0xd9   : > { %v9797_v14 = vsub.f32 %v866_v53, %v892_v12  ;;  %v9799_v15 = vsub.f32 %v864_v54, %v890_v13  ;;  %v9835_v53 = vld [vmem:[%s13172_s28] sm:$0xff]  ;;  %s9480_s28 = smov 24  }
  0xdb   : > { %v900_v16 = vmul.f32 %v9797_v14, %v9797_v14  ;;  %v898_v17 = vmul.f32 %v9799_v15, %v9799_v15 }
  0xdd   : > { %v910_v18 = vsel %vm869_vm4, %v900_v16, 0.0  ;;  %v904_v19 = vsel %vm869_vm4, %v898_v17, 0.0 }
  0xde   : > { %911 = vadd.xlane.f32.xlu1 %v910_v18  ;;  %905 = vadd.xlane.f32.xlu2 %v904_v19  ;;  %v8991_v19 = vld [vmem:[%s13173_s7] ss:$0 sm:$0xff]  ;;  %s9483_s7 = smov 112  }
  0xea   : > { %1191 = vrot.lane.b32.xlu0 %v9830_v52, %s9472_s26 }
  0xf2   : > { %1160 = vrot.lane.b32.xlu0 %v9835_v53, %s9472_s26 }
  0xf6   : > { %1198 = vrot.lane.b32.xlu2 %v9835_v53, %s13116_s17 }
  0xfe   : > { %1118 = vrot.lane.b32.xlu2 %v9830_v52, %s13128_s18 }
 0x149   : > { %v903_v39 = vpop.xlane.xlu2 %902  ;;  %v909_v44 = vpop.xlane.xlu0 %908 }
 0x14a   : > { %v913_v43 = vmul.f32 %v903_v39, %v9781_v63  ;;  %v915_v48 = vmul.f32 %v909_v44, %v9781_v63 }
 0x14c   : > { %v917_v47 = vadd.f32 1e-06, %v913_v43  ;;  %v9825_v49 = vadd.f32 1e-06, %v915_v48 }
 0x14e   : > { %8999 = vrsqrt.f32 %v917_v47  ;;  %vm927_vm7 = vweird.f32 %v917_v47  ;;  %vm947_vm14 = vweird.f32 %v9825_v49 }
 0x14f   : > { %9001 = vrsqrt.f32 %v9825_v49 }
 0x151   : > { %v912_v50 = vpop.xlane.xlu1 %911  ;;  %v906_v51 = vpop.xlane.xlu2 %905 }
 0x152   : > { %v916_v54 = vmul.f32 %v912_v50, %v9781_v63  ;;  %v914_v55 = vmul.f32 %v906_v51, %v9781_v63 }
 0x154   : > { %v9000_v56 = vpop.eup %8999  ;;  %v920_v57 = vadd.f32 1e-06, %v916_v54  ;;  %v918_v58 = vadd.f32 1e-06, %v914_v55 }
 0x155   : > { %v922_v59 = vmul.f32 %v9000_v56, %v917_v47  ;;  %v9002_v62 = vpop.eup %9001  ;;  %vm928_vm6 = vweird.f32 %v9000_v56 }
 0x156   : > { %9003 = vrsqrt.f32 %v920_v57  ;;  %v942_v7 = vmul.f32 %v9002_v62, %v9825_v49  ;;  %vm929_vm8 = vmor %vm927_vm7, %vm928_vm6  ;;  %vm937_vm10 = vweird.f32 %v918_v58  ;;  %vm957_vm12 = vweird.f32 %v920_v57 }
 0x157   : > { %v923_v60 = vmul.f32 %v9000_v56, %v922_v59  ;;  %9005 = vrsqrt.f32 %v918_v58  ;;  %vm948_vm15 = vweird.f32 %v9002_v62 }
 0x158   : > { %v943_v12 = vmul.f32 %v9002_v62, %v942_v7  ;;  %vm949_vm1 = vmor %vm947_vm14, %vm948_vm15 }
 0x159   : > { %v924_v61 = vmul.f32 0.5, %v923_v60  ;;  %v1199_v45 = vpop.permute.xlu2 %1198 }
 0x15a   : > { %v944_v20 = vmul.f32 0.5, %v943_v12 }
 0x15b   : > { %v925_v0 = vsub.f32 1.5, %v924_v61 }
 0x15c   : > { %v9004_v1 = vpop.eup %9003 }
 0x15d   : > { %v9006_v2 = vpop.eup %9005  ;;  %v952_v3 = vmul.f32 %v9004_v1, %v920_v57  ;;  %v926_v6 = vmul.f32 %v9000_v56, %v925_v0  ;;  %vm958_vm13 = vweird.f32 %v9004_v1 }
 0x15e   : > { %v932_v8 = vmul.f32 %v9006_v2, %v918_v58  ;;  %vm938_vm9 = vweird.f32 %v9006_v2  ;;  %vm959_vm0 = vmor %vm957_vm12, %vm958_vm13 }
 0x15f   : > { %v953_v9 = vmul.f32 %v9004_v1, %v952_v3  ;;  %v930_v11 = vsel %vm929_vm8, %v9000_v56, %v926_v6  ;;  %vm939_vm11 = vmor %vm937_vm10, %vm938_vm9  ;;  %v9892_v56 = vpop.permute.xlu0 %1191 }
 0x160   : > { %v933_v10 = vmul.f32 %v9006_v2, %v932_v8  ;;  %v961_v18 = vmul.f32 %v930_v11, %v9787_v5  ;;  %v945_v5 = vsub.f32 1.5, %v944_v20 }
 0x161   : > { %v954_v16 = vmul.f32 0.5, %v953_v9 }
 0x162   : > { %v934_v13 = vmul.f32 0.5, %v933_v10  ;;  %v968_v25 = vmul.f32 %v8991_v19, %v961_v18  ;;  %v946_v31 = vmul.f32 %v9002_v62, %v945_v5 }
 0x163   : > { %v955_v22 = vsub.f32 1.5, %v954_v16 }
 0x164   : > { %v935_v17 = vsub.f32 1.5, %v934_v13  ;;  %v975_v29 = vadd.f32 %v8992_v26, %v968_v25  ;;  %v950_v33 = vsel %vm949_vm1, %v9002_v62, %v946_v31 }
 0x165   : > { %v956_v28 = vmul.f32 %v9004_v1, %v955_v22  ;;  %v963_v35 = vmul.f32 %v950_v33, %v9785_v4 }
 0x166   : > { %v936_v21 = vmul.f32 %v9006_v2, %v935_v17 }
 0x167   : > { %v960_v32 = vsel %vm959_vm0, %v9004_v1, %v956_v28  ;;  %v970_v37 = vmul.f32 %v8991_v19, %v963_v35  ;;  %v9902_v61 = vpop.permute.xlu0 %1160  ;;  %v1119_v1 = vpop.permute.xlu2 %1118 }
 0x168   : > { %v940_v23 = vsel %vm939_vm11, %v9006_v2, %v936_v21  ;;  %v964_v34 = vmul.f32 %v960_v32, %v9797_v14 }
 0x169   : > { %v962_v24 = vmul.f32 %v940_v23, %v9799_v15  ;;  %v977_v39 = vadd.f32 %v8992_v26, %v970_v37 }
 0x16a   : > { %v971_v36 = vmul.f32 %v8991_v19, %v964_v34 }
 0x16b   : > { %v969_v27 = vmul.f32 %v8991_v19, %v962_v24 }
 0x16c   : > { %v978_v38 = vadd.f32 %v8992_v26, %v971_v36 }
 0x16d   : > { %v976_v30 = vadd.f32 %v8992_v26, %v969_v27 }
 0x16e   : > { %v980_v40 = vpack.c.bf16 %v978_v38, %v977_v39 }
 0x16f   : > { %v979_v15 = vpack.c.bf16 %v976_v30, %v975_v29 }
 0x171   : > { %7741 = vmatmul.msk.bf16.vlgmr.msra.gmra.mxu0 %vm869_vm4, %v979_v15  ;;  %7743 = vmatmul.msk.bf16.vlgmr.msra.gmra.mxu1 %vm869_vm4, %v979_v15 }
 0x181   : > { %7742 = vmatmul.msk.bf16.gmra.mxu0 %vm869_vm4, %v980_v40  ;;  %7744 = vmatmul.msk.bf16.gmra.mxu1 %vm869_vm4, %v980_v40 }
 0x1ee   : > { %v1050_v43 = vpop.f32.mrf.mxu0 }
 0x1ef   : > { %v9872_v44 = vadd.f32 %v1050_v43, %v991_v42 }
 0x1f1   : > { %v1125_v4 = vmul.f32 %v9835_v53, %v9872_v44  ;;  %v1201_v14 = vmul.f32 %v1199_v45, %v9872_v44  ;;  %v1163_v62 = vmul.f32 %v9902_v61, %v9872_v44  ;;  %v1194_v11 = vmul.f32 %v9892_v56, %v9872_v44 }
 0x1f3   : > { %1133 = vrot.lane.b32.xlu2 %v1125_v4, %s13128_s18  ;;  %1209 = vrot.lane.b32.xlu1 %v1201_v14, %s13128_s18 }
 0x1f6   : > { %v1052_v46 = vpop.f32.mrf.mxu0 }
 0x1f7   : > { %v9879_v47 = vadd.f32 %v1052_v46, %v991_v42 }
 0x1f9   : > { %v1126_v48 = vmul.f32 %v9835_v53, %v9879_v47  ;;  %v1202_v49 = vmul.f32 %v1199_v45, %v9879_v47  ;;  %v1164_v0 = vmul.f32 %v9902_v61, %v9879_v47  ;;  %v1195_v5 = vmul.f32 %v9892_v56, %v9879_v47 }
 0x1fa   : > { %v1122_v30 = vmul.f32 %v1119_v1, %v9879_v47 }
 0x1fb   : > { %1135 = vrot.lane.b32.xlu0 %v1126_v48, %s13128_s18  ;;  %1211 = vrot.lane.b32.xlu1 %v1202_v49, %s13128_s18 }
 0x1fe   : > { %v1055_v50 = vpop.f32.mrf.mxu0 }
 0x1ff   : > { %v9886_v51 = vadd.f32 %v1055_v50, %v991_v42 }
 0x201   : > { %v1203_v54 = vmul.f32 %v1199_v45, %v9886_v51  ;;  %v1127_v55 = vmul.f32 %v9835_v53, %v9886_v51  ;;  %v1196_v3 = vmul.f32 %v9892_v56, %v9886_v51  ;;  %v1123_v39 = vmul.f32 %v1119_v1, %v9886_v51 }
 0x203   : > { %1213 = vrot.lane.b32.xlu2 %v1203_v54, %s13128_s18  ;;  %1137 = vrot.lane.b32.xlu0 %v1127_v55, %s13128_s18 }
 0x206   : > { %v1057_v57 = vpop.f32.mrf.mxu0 }
 0x207   : > { %v9895_v58 = vadd.f32 %v1057_v57, %v991_v42 }
 0x209   : > { %v1204_v59 = vmul.f32 %v1199_v45, %v9895_v58  ;;  %v1128_v60 = vmul.f32 %v9835_v53, %v9895_v58  ;;  %v1124_v12 = vmul.f32 %v1119_v1, %v9895_v58  ;;  %v1197_v46 = vmul.f32 %v9892_v56, %v9895_v58 }
 0x20a   : > { %v1166_v50 = vmul.f32 %v9902_v61, %v9895_v58 }
 0x20b   : > { %1215 = vrot.lane.b32.xlu1 %v1204_v59, %s13128_s18  ;;  %1139 = vrot.lane.b32.xlu2 %v1128_v60, %s13128_s18 }
 0x213   : > { %1153 = vrot.lane.b32.xlu1 %v9830_v52, %s13116_s17  ;;  %1171 = vrot.lane.b32.xlu2 %v1163_v62, %s9472_s26 }
 0x21b   : > { %1173 = vrot.lane.b32.xlu1 %v1164_v0, %s9472_s26  ;;  %1086 = vrot.lane.b32.xlu2 %v9835_v53, %s13128_s18  ;;  %v1121_v53 = vmul.f32 %v1119_v1, %v9872_v44 }
 0x24d   : > { %v1134_v2 = vpop.permute.xlu2 %1133 }
 0x24e   : > { %v1145_v19 = vadd.f32 %v1134_v2, %v1121_v53  ;;  %v1165_v53 = vmul.f32 %v9902_v61, %v9886_v51 }
 0x250   : > { %v1149_v24 = vpack.c.bf16 %v1145_v19, %v1145_v19 }
 0x252   : > { %v1234_v15 = vunpack.c.l.b16 %v1149_v24 }
 0x254   : > { %v9935_v35 = vpack.c.b16 %v1234_v15, %v1234_v15  ;;  %v1081_v15 = vmul.f32 %v9830_v52, %v9872_v44 }
 0x25d   : > { %v1214_v6 = vpop.permute.xlu2 %1213 }
 0x25e   : > { %v1223_v7 = vadd.f32 %v1214_v6, %v1196_v3 }
 0x260   : > { %v1227_v8 = vpack.c.bf16 %v1223_v7, %v1223_v7 }
 0x262   : > { %v1298_v9 = vunpack.c.l.b16 %v1227_v8 }
 0x264   : > { %v9916_v10 = vpack.c.b16 %v1298_v9, %v1298_v9 }
 0x265   : > { %v1210_v13 = vpop.permute.xlu1 %1209  ;;  %v1140_v16 = vpop.permute.xlu2 %1139 }
 0x266   : > { %v1221_v17 = vadd.f32 %v1210_v13, %v1194_v11  ;;  %v1148_v18 = vadd.f32 %v1140_v16, %v1124_v12  ;;  %1300 = vrot.lane.b32.xlu2 %v9916_v10, %s13128_s18 }
 0x268   : > { %v1225_v20 = vpack.c.bf16 %v1221_v17, %v1221_v17  ;;  %v1152_v21 = vpack.c.bf16 %v1148_v18, %v1148_v18 }
 0x26a   : > { %v1239_v22 = vunpack.c.l.b16 %v1225_v20  ;;  %v1322_v23 = vunpack.c.l.b16 %v1152_v21 }
 0x26c   : > { %v9924_v25 = vpack.c.b16 %v1239_v22, %v1239_v22  ;;  %v9926_v26 = vpack.c.b16 %v1322_v23, %v1322_v23 }
 0x26d   : > { %v1212_v27 = vpop.permute.xlu1 %1211  ;;  %v1172_v28 = vpop.permute.xlu2 %1171 }
 0x26e   : > { %v1222_v29 = vadd.f32 %v1212_v27, %v1195_v5  ;;  %v1136_v31 = vpop.permute.xlu0 %1135  ;;  %1241 = vrot.lane.b32.xlu0 %v9924_v25, %s13128_s18  ;;  %1324 = vrot.lane.b32.xlu2 %v9926_v26, %s9472_s26 }
 0x26f   : > { %v1146_v33 = vadd.f32 %v1136_v31, %v1122_v30 }
 0x270   : > { %v1226_v32 = vpack.c.bf16 %v1222_v29, %v1222_v29 }
 0x271   : > { %v1150_v37 = vpack.c.bf16 %v1146_v33, %v1146_v33 }
 0x272   : > { %v1269_v34 = vunpack.c.l.b16 %v1226_v32 }
 0x273   : > { %v1264_v43 = vunpack.c.l.b16 %v1150_v37  ;;  %v1069_v37 = vpop.f32.mrf.mxu1 }
 0x274   : > { %v9937_v36 = vpack.c.b16 %v1269_v34, %v1269_v34 }
 0x275   : > { %v9939_v38 = vpop.permute.xlu2 %1086  ;;  %v9949_v4 = vpack.c.b16 %v1264_v43, %v1264_v43 }
 0x276   : > { %v1138_v40 = vpop.permute.xlu0 %1137  ;;  %1236 = vrot.lane.b32.xlu0 %v9935_v35, %s9472_s26  ;;  %1271 = vrot.lane.b32.xlu1 %v9937_v36, %s13128_s18  ;;  %v1089_v42 = vmul.f32 %v9939_v38, %v9872_v44  ;;  %v1091_v0 = vmul.f32 %v9939_v38, %v9886_v51  ;;  %v1090_v16 = vmul.f32 %v9939_v38, %v9879_v47 }
 0x277   : > { %v1147_v45 = vadd.f32 %v1138_v40, %v1123_v39  ;;  %v10010_v40 = vperm.slane %v9869_v41, 1 }
 0x278   : > { %1097 = vrot.lane.b32.xlu2 %v1089_v42, %s9472_s26 }
 0x279   : > { %v1151_v14 = vpack.c.bf16 %v1147_v45, %v1147_v45 }
 0x27b   : > { %v1293_v54 = vunpack.c.l.b16 %v1151_v14  ;;  %v10020_v14 = vadd.f32 %v1069_v37, %v10010_v40  ;;  %v1071_v41 = vpop.f32.mrf.mxu1 }
 0x27d   : > { %v1216_v48 = vpop.permute.xlu1 %1215  ;;  %v9958_v59 = vpack.c.b16 %v1293_v54, %v1293_v54  ;;  %13175 = vst [vmem:[#allocation20_spill] sm:$0xff] %v10020_v14 }
 0x27e   : > { %v1224_v49 = vadd.f32 %v1216_v48, %v1197_v46  ;;  %1266 = vrot.lane.b32.xlu0 %v9949_v4, %s9472_s26  ;;  %v1229_v46 = vpack.c.bf16 %v10020_v14, %v10020_v14  ;;  %v10025_v48 = vadd.f32 %v1071_v41, %v10010_v40 }
 0x280   : > { %v1228_v55 = vpack.c.bf16 %v1224_v49, %v1224_v49  ;;  %1177 = vrot.lane.b32.xlu2 %v1166_v50, %s9472_s26  ;;  %13176 = vst [vmem:[#allocation21_spill] sm:$0xff] %v10025_v48  ;;  %v1461_v54 = vsel %vm1459_vm3, %v1229_v46, 0 }
 0x282   : > { %v1327_v57 = vunpack.c.l.b16 %v1228_v55  ;;  %v1230_v55 = vpack.c.bf16 %v10025_v48, %v10025_v48 }
 0x284   : > { %v9960_v60 = vpack.c.b16 %v1327_v57, %v1327_v57 }
 0x285   : > { %v9962_v62 = vpop.permute.xlu1 %1153 }
 0x286   : > { %v1156_v56 = vmul.f32 %v9962_v62, %v9872_v44  ;;  %1329 = vrot.lane.b32.xlu1 %v9960_v60, %s13128_s18  ;;  %1295 = vrot.lane.b32.xlu0 %v9958_v59, %s9472_s26  ;;  %v1157_v6 = vmul.f32 %v9962_v62, %v9879_v47  ;;  %v1159_v21 = vmul.f32 %v9962_v62, %v9895_v58  ;;  %s9502_s18 = smov 100  }
 0x288   : > { %v1183_v1 = vsub.f32 %v1156_v56, %v1172_v28  ;;  %1101 = vrot.lane.b32.xlu2 %v1091_v0, %s9472_s26  ;;  %v1082_v0 = vmul.f32 %v9830_v52, %v9879_v47 }
 0x28a   : > { %v1187_v2 = vpack.c.bf16 %v1183_v1, %v1183_v1 }
 0x28c   : > { %v1351_v3 = vunpack.c.l.b16 %v1187_v2  ;;  %v1480_v2 = vsel %vm1459_vm3, %v1230_v55, 0 }
 0x28d   : > { %v1174_v7 = vpop.permute.xlu1 %1173 }
 0x28e   : > { %v9975_v8 = vpack.c.b16 %v1351_v3, %v1351_v3  ;;  %v1184_v9 = vsub.f32 %v1157_v6, %v1174_v7 }
 0x290   : > { %v1188_v11 = vpack.c.bf16 %v1184_v9, %v1184_v9  ;;  %1353 = vrot.lane.b32.xlu1 %v9975_v8, %s13116_s17  ;;  %1653 = vrot.lane.b32.xlu2 %v9937_v36, %s9475_s22 }
 0x292   : > { %v1375_v12 = vunpack.c.l.b16 %v1188_v11  ;;  %v1158_v11 = vmul.f32 %v9962_v62, %v9886_v51  ;;  %v1092_v62 = vmul.f32 %v9939_v38, %v9895_v58  ;;  %v1083_v38 = vmul.f32 %v9830_v52, %v9886_v51 }
 0x294   : > { %v9981_v13 = vpack.c.b16 %v1375_v12, %v1375_v12 }
 0x296   : > { %1377 = vrot.lane.b32.xlu0 %v9981_v13, %s13116_s17 }
 0x298   : > { %1099 = vrot.lane.b32.xlu1 %v1090_v16, %s9472_s26  ;;  %1725 = vrot.lane.b32.xlu2 %v9975_v8, %s9476_s10 }
 0x29e   : > { %1175 = vrot.lane.b32.xlu0 %v1165_v53, %s9472_s26 }
 0x2c0   : > { %v1301_v17 = vpop.permute.xlu2 %1300 }
 0x2c1   : > { %v1306_v18 = vsel %vm1243_vm2, %v1301_v17, 0 }
 0x2c2   : > { %1315 = vmatpush.bf16.xpose.msra.mxu2 %v1306_v18 }
 0x2c8   : > { %v1325_v19 = vpop.permute.xlu2 %1324 }
 0x2d2   : > { %v1098_v20 = vpop.permute.xlu2 %1097 }
 0x2d3   : > { %v1109_v32 = vsub.f32 %v1081_v15, %v1098_v20 }
 0x2d5   : > { %v1113_v34 = vpack.c.bf16 %v1109_v32, %v1109_v32 }
 0x2d7   : > { %v1721_v39 = vunpack.c.l.b16 %v1113_v34 }
 0x2d9   : > { %v10012_v45 = vpack.c.b16 %v1721_v39, %v1721_v39 }
 0x2da   : > { %v1178_v22 = vpop.permute.xlu2 %1177 }
 0x2db   : > { %v1186_v23 = vsub.f32 %v1159_v21, %v1178_v22  ;;  %v1835_v21 = vunpack.c.l.b16 %v1229_v46 }
 0x2dd   : > { %v1190_v24 = vpack.c.bf16 %v1186_v23, %v1186_v23  ;;  %v10060_v22 = vpack.c.b16 %v1835_v21, %v1835_v21  ;;  %v1084_v21 = vmul.f32 %v9830_v52, %v9895_v58 }
 0x2df   : > { %v1423_v5 = vunpack.c.l.b16 %v1190_v24 }
 0x2e0   : > { %v1242_v27 = vpop.permute.xlu0 %1241 }
 0x2e1   : > { %v9996_v28 = vpack.c.b16 %v1423_v5, %v1423_v5  ;;  %v1248_v61 = vsel %vm1243_vm2, %v1242_v27, 0  ;;  %v1074_v5 = vpop.f32.mrf.mxu1 }
 0x2e2   : > { %1257 = vmatpush.bf16.xpose.msra.mxu3 %v1248_v61  ;;  %v1102_v6 = vpop.permute.xlu2 %1101  ;;  %v10110_v37 = vadd.f32 %v1074_v5, %v10010_v40 }
 0x2e3   : > { %1425 = vrot.lane.b32.xlu0 %v9996_v28, %s13116_s17  ;;  %v1111_v23 = vsub.f32 %v1083_v38, %v1102_v6 }
 0x2e4   : > { %13178 = vst [vmem:[#allocation23_spill] sm:$0xff] %v10110_v37 }
 0x2e5   : > { %v10076_v24 = vpack.c.bf16 %v1111_v23, %v1111_v23 }
 0x2e7   : > { %v1773_v27 = vunpack.c.l.b16 %v10076_v24 }
 0x2e8   : > { %v1272_v29 = vpop.permute.xlu1 %1271  ;;  %v1237_v30 = vpop.permute.xlu0 %1236 }
 0x2e9   : > { %7745 = vmatmul.msk.bf16.vlgmr.msra.gmra.mxu3 %vm1243_vm2, %v1237_v30  ;;  %v1277_v31 = vsel %vm1243_vm2, %v1272_v29, 0  ;;  %v10083_v51 = vpack.c.b16 %v1773_v27, %v1773_v27  ;;  %v1076_v61 = vpop.f32.mrf.mxu1  ;;  %v1859_v29 = vunpack.c.l.b16 %v1230_v55 }
 0x2ea   : > { %1286 = vmatpush.bf16.xpose.msrb.mxu3 %v1277_v31  ;;  %v1654_v18 = vpop.permute.xlu2 %1653  ;;  %v10090_v30 = vadd.f32 %v1076_v61, %v10010_v40 }
 0x2eb   : > { %1630 = vrot.lane.b32.xlu0 %v9924_v25, %s9475_s22  ;;  %v1659_v20 = vsel %vm1243_vm2, %v1654_v18, 0  ;;  %v10092_v31 = vpack.c.b16 %v1859_v29, %v1859_v29 }
 0x2ec   : > { %13177 = vst [vmem:[#allocation22_spill] sm:$0xff] %v10090_v30  ;;  %v10100_v15 = vpack.c.bf16 %v10090_v30, %v10090_v30 }
 0x2f0   : > { %v1267_v33 = vpop.permute.xlu0 %1266 }
 0x2f2   : > { %v1726_v41 = vpop.permute.xlu2 %1725 }
 0x2f3   : > { %1651 = vrot.lane.b32.xlu0 %v9949_v4, %s9477_s21  ;;  %v1731_v5 = vsel %vm1243_vm2, %v1726_v41, 0 }
 0x2f8   : > { %v1330_v42 = vpop.permute.xlu1 %1329  ;;  %v1296_v43 = vpop.permute.xlu0 %1295 }
 0x2f9   : > { %v1335_v44 = vsel %vm1243_vm2, %v1330_v42, 0  ;;  %7746 = vmatmul.msk.bf16.vlgmr.msrb.gmra.mxu3 %vm1243_vm2, %v1267_v33  ;;  %7747 = vmatmul.msk.bf16.vlgmr.msra.gmra.mxu2 %vm1243_vm2, %v1296_v43  ;;  %v1231_v43 = vpack.c.bf16 %v10110_v37, %v10110_v37 }
 0x2fa   : > { %1344 = vmatpush.bf16.xpose.msra.mxu3 %v1335_v44 }
 0x2fb   : > { %1723 = vrot.lane.b32.xlu0 %v10012_v45, %s9478_s24  ;;  %v1883_v44 = vunpack.c.l.b16 %v1231_v43 }
 0x2fd   : > { %v10119_v46 = vpack.c.b16 %v1883_v44, %v1883_v44 }
 0x302   : > { %v1354_v49 = vpop.permute.xlu1 %1353 }
 0x303   : > { %1699 = vrot.lane.b32.xlu0 %v9960_v60, %s9475_s22  ;;  %v1359_v50 = vsel %vm1243_vm2, %v1354_v49, 0 }
 0x304   : > { %1368 = vmatpush.bf16.xpose.msrb.mxu2 %v1359_v50 }
 0x308   : > { %v1378_v57 = vpop.permute.xlu0 %1377 }
 0x309   : > { %v1383_v56 = vsel %vm1243_vm2, %v1378_v57, 0  ;;  %7748 = vmatmul.msk.bf16.vlgmr.msra.gmra.mxu3 %vm1243_vm2, %v1325_v19 }
 0x30a   : > { %v1100_v1 = vpop.permute.xlu1 %1099  ;;  %1392 = vmatpush.bf16.xpose.msrb.mxu3 %v1383_v56 }
 0x30b   : > { %v1110_v3 = vsub.f32 %v1082_v0, %v1100_v1  ;;  %7749 = vmatmul.msk.bf16.vlgmr.msrb.gmra.mxu2 %vm1243_vm2, %v1113_v34  ;;  %v1518_v34 = vsel %vm1459_vm3, %v10100_v15, 0 }
 0x30c   : > { %1470 = vmatpush.bf16.msra.mxu2 %v1461_v54 }
 0x30d   : > { %v1114_v7 = vpack.c.bf16 %v1110_v3, %v1110_v3 }
 0x30f   : > { %v1747_v9 = vunpack.c.l.b16 %v1114_v7 }
 0x310   : > { %v1176_v12 = vpop.permute.xlu0 %1175 }
 0x311   : > { %v10041_v16 = vpack.c.b16 %v1747_v9, %v1747_v9  ;;  %v1185_v53 = vsub.f32 %v1158_v11, %v1176_v12 }
 0x312   : > { %1489 = vmatpush.bf16.msra.mxu3 %v1480_v2 }
 0x313   : > { %v1189_v17 = vpack.c.bf16 %v1185_v53, %v1185_v53  ;;  %1749 = vrot.lane.b32.xlu2 %v10041_v16, %s9478_s24 }
 0x315   : > { %v1399_v47 = vunpack.c.l.b16 %v1189_v17  ;;  %v10154_v17 = vld [vmem:[#allocation3] sm:$0xff] }
 0x317   : > { %v10045_v19 = vpack.c.b16 %v1399_v47, %v1399_v47  ;;  %v1499_v47 = vsel %vm1459_vm3, %v1231_v43, 0 }
 0x319   : > { %7750 = vmatmul.msk.bf16.vlgmr.msrb.gmra.mxu3 %vm1243_vm2, %v1114_v7  ;;  %1777 = vrot.lane.b32.xlu0 %v10045_v19, %s9476_s10 }
 0x31a   : > { %1668 = vmatpush.bf16.xpose.msrb.mxu3 %v1659_v20  ;;  %1401 = vrot.lane.b32.xlu1 %v10045_v19, %s13116_s17  ;;  %s9494_s17 = smov 108  }
 0x31b   : > { %1674 = vrot.lane.b32.xlu2 %v9958_v59, %s9477_s21 }
 0x322   : > { %1103 = vrot.lane.b32.xlu1 %v1092_v62, %s9472_s26 }
 0x323   : > { %1803 = vrot.lane.b32.xlu2 %v9996_v28, %s9476_s10 }
 0x32a   : > { %1628 = vrot.lane.b32.xlu1 %v9935_v35, %s9477_s21 }
 0x32b   : > { %1837 = vrot.lane.b32.xlu2 %v10060_v22, %s9479_s0 }
 0x332   : > { %1751 = vrot.lane.b32.xlu1 %v9981_v13, %s9476_s10  ;;  %s9488_s10 = smov 16  }
 0x333   : > { %2043 = vrot.lane.b32.xlu2 %v9937_v36, %s9480_s28 }
 0x33a   : > { %1676 = vrot.lane.b32.xlu1 %v9916_v10, %s9475_s22  ;;  %s9487_s22 = smov 116  }
 0x33b   : > { %2112 = vrot.lane.b32.xlu2 %v9975_v8, %s13114_s25 }
 0x342   : > { %1697 = vrot.lane.b32.xlu1 %v9926_v26, %s9477_s21  ;;  %s9489_s21 = smov 80  }
 0x343   : > { %2133 = vrot.lane.b32.xlu2 %v10041_v16, %s9479_s0 }
 0x34a   : > { %1775 = vrot.lane.b32.xlu1 %v10083_v51, %s9478_s24 }
 0x34b   : > { %2066 = vrot.lane.b32.xlu2 %v9916_v10, %s9480_s28 }
 0x352   : > { %1861 = vrot.lane.b32.xlu1 %v10092_v31, %s9479_s0 }
 0x353   : > { %2087 = vrot.lane.b32.xlu2 %v9926_v26, %s9482_s3 }
 0x355   : > { %v1426_v32 = vpop.permute.xlu0 %1425 }
 0x356   : > { %v1431_v33 = vsel %vm1243_vm2, %v1426_v32, 0 }
 0x357   : > { %1440 = vmatpush.bf16.xpose.msrb.mxu1 %v1431_v33 }
 0x35a   : > { %2018 = vrot.lane.b32.xlu1 %v9935_v35, %s9482_s3 }
 0x35b   : > { %2156 = vrot.lane.b32.xlu2 %v10083_v51, %s9479_s0 }
 0x35d   : > { %v1631_v39 = vpop.permute.xlu0 %1630 }
 0x35e   : > { %v1636_v42 = vsel %vm1243_vm2, %v1631_v39, 0 }
 0x35f   : > { %1527 = vmatpush.bf16.msra.mxu1 %v1518_v34  ;;  %1645 = vmatpush.bf16.xpose.msrb.mxu2 %v1636_v42 }
 0x362   : > { %2135 = vrot.lane.b32.xlu1 %v9981_v13, %s13114_s25 }
 0x363   : > { %2233 = vrot.lane.b32.xlu2 %v10092_v31, %s9483_s7 }
 0x365   : > { %v10141_v0 = vpop.permute.xlu0 %1651 }
 0x36a   : > { %1885 = vrot.lane.b32.xlu1 %v10119_v46, %s9479_s0 }
 0x36b   : > { %2384 = vrot.lane.b32.xlu2 %v9935_v35, %s9484_s27 }
 0x36c   : > { %v1259_v40 = vpop.f32.mrf.mxu3 }
 0x36d   : > { %v10125_v49 = vpop.permute.xlu2 %1749  ;;  %v10145_v6 = vpop.permute.xlu0 %1723 }
 0x372   : > { %2089 = vrot.lane.b32.xlu1 %v9960_v60, %s9480_s28 }
 0x373   : > { %2501 = vrot.lane.b32.xlu2 %v9981_v13, %s9485_s2 }
 0x374   : > { %v1261_v50 = vpop.f32.mrf.mxu3 }
 0x375   : > { %v10131_v54 = vpop.permute.xlu2 %1674  ;;  %v1700_v29 = vpop.permute.xlu0 %1699 }
 0x376   : > { %v1705_v34 = vsel %vm1243_vm2, %v1700_v29, 0 }
 0x37a   : > { %2158 = vrot.lane.b32.xlu1 %v10045_v19, %s13114_s25 }
 0x37b   : > { %2254 = vrot.lane.b32.xlu2 %v10119_v46, %s9483_s7 }
 0x37c   : > { %v1288_v55 = vpop.f32.mrf.mxu3  ;;  %v10137_v57 = vpop.f32.mrf.mxu2 }
 0x37d   : > { %v10139_v56 = vpop.permute.xlu2 %1803 }
 0x383   : > { %2455 = vrot.lane.b32.xlu2 %v9960_v60, %s9486_s9 }
 0x384   : > { %v1290_v1 = vpop.f32.mrf.mxu3  ;;  %v1319_v2 = vpop.f32.mrf.mxu2 }
 0x385   : > { %v1838_v3 = vpop.permute.xlu2 %1837 }
 0x386   : > { %v1843_v2 = vsel %vm1459_vm3, %v1838_v3, 0 }
 0x38b   : > { %2524 = vrot.lane.b32.xlu2 %v10045_v19, %s9485_s2 }
 0x38c   : > { %v1402_v7 = vpop.permute.xlu1 %1401  ;;  %v10149_v9 = vpop.f32.mrf.mxu3 }
 0x38d   : > { %v10151_v11 = vpop.permute.xlu2 %2043  ;;  %v1407_v12 = vsel %vm1243_vm2, %v1402_v7, 0 }
 0x38e   : > { %1416 = vmatpush.bf16.xpose.msrb.mxu0 %v1407_v12  ;;  %v1370_v53 = vpop.f32.mrf.mxu2 }
 0x38f   : > { %v1371_v18 = vadd.f32 %v1370_v53, %v1259_v40 }
 0x391   : > { %v1447_v20 = vmul.f32 %v10154_v17, %v1371_v18  ;;  %v1907_v18 = vunpack.c.l.b16 %v10100_v15 }
 0x393   : > { %v1451_v62 = vpack.c.bf16 %v1447_v20, %v1447_v20  ;;  %v10215_v20 = vpack.c.b16 %v1907_v18, %v1907_v18 }
 0x394   : > { %v1104_v38 = vpop.permute.xlu1 %1103  ;;  %v1348_v23 = vpop.f32.mrf.mxu3 }
 0x395   : > { %v1112_v27 = vsub.f32 %v1084_v21, %v1104_v38  ;;  %7751 = vmatmul.msk.bf16.vlgmr.msrb.gmra.mxu0 %vm1243_vm2, %v10076_v24  ;;  %v10163_v61 = vpop.permute.xlu2 %2112  ;;  %7753 = vmatmul.msk.bf16.vlgmr.msra.gmra.mxu2 %vm1455_vm5, %v1451_v62  ;;  %v2049_v21 = vsel %vm1243_vm2, %v10151_v11, 0 }
 0x396   : > { %1508 = vmatpush.bf16.msra.mxu0 %v1499_v47  ;;  %1740 = vmatpush.bf16.xpose.msra.mxu2 %v1731_v5  ;;  %v1372_v32 = vpop.f32.mrf.mxu2 }
 0x397   : > { %v1116_v33 = vpack.c.bf16 %v1112_v27, %v1112_v27 }
 0x399   : > { %v1799_v39 = vunpack.c.l.b16 %v1116_v33  ;;  %7752 = vmatmul.msk.bf16.vlgmr.msrb.gmra.mxu1 %vm1243_vm2, %v1116_v33 }
 0x39a   : > { %1714 = vmatpush.bf16.xpose.msrb.mxu1 %v1705_v34 }
 0x39b   : > { %v10168_v52 = vpack.c.b16 %v1799_v39, %v1799_v39 }
 0x39c   : > { %v1629_v58 = vpop.permute.xlu1 %1628  ;;  %v1394_v42 = vpop.f32.mrf.mxu3 }
 0x39d   : > { %v1395_v43 = vadd.f32 %v1394_v42, %v1288_v55  ;;  %2545 = vrot.lane.b32.xlu2 %v10168_v52, %s9487_s22  ;;  %2179 = vrot.lane.b32.xlu1 %v10168_v52, %s9479_s0  ;;  %v10174_v24 = vpop.permute.xlu2 %2133  ;;  %v1778_v42 = vpop.permute.xlu0 %1777 }
 0x39e   : > { %1801 = vrot.lane.b32.xlu0 %v10168_v52, %s9478_s24  ;;  %s9490_s24 = smov 104  }
 0x39f   : > { %v1448_v44 = vmul.f32 %v10154_v17, %v1395_v43 }
 0x3a1   : > { %v1452_v41 = vpack.c.bf16 %v1448_v44, %v1448_v44 }
 0x3a3   : > { %7754 = vmatmul.msk.bf16.vlgmr.msra.gmra.mxu3 %vm1455_vm5, %v1452_v41 }
 0x3a4   : > { %v1752_v40 = vpop.permute.xlu1 %1751  ;;  %v1396_v50 = vpop.f32.mrf.mxu3 }
 0x3a5   : > { %v1757_v55 = vsel %vm1243_vm2, %v1752_v40, 0  ;;  %2752 = vrot.lane.b32.xlu2 %v9924_v25, %s9488_s10  ;;  %2386 = vrot.lane.b32.xlu1 %v9924_v25, %s9486_s9  ;;  %v10185_v1 = vpop.permute.xlu2 %2066 }
 0x3a6   : > { %2020 = vrot.lane.b32.xlu0 %v9924_v25, %s9480_s28  ;;  %7757 = vmatmul.msk.bf16.vlgmr.msrb.gmra.mxu2 %vm1243_vm2, %v1629_v58 }
 0x3a7   : > { %1766 = vmatpush.bf16.xpose.msra.mxu3 %v1757_v55  ;;  %1852 = vmatpush.bf16.msrb.mxu2 %v1843_v2 }
 0x3ac   : > { %v1677_v7 = vpop.permute.xlu1 %1676 }
 0x3ad   : > { %v1682_v12 = vsel %vm1243_vm2, %v1677_v7, 0  ;;  %2773 = vrot.lane.b32.xlu2 %v9949_v4, %s9489_s21  ;;  %2407 = vrot.lane.b32.xlu1 %v9949_v4, %s9484_s27  ;;  %v10196_v53 = vpop.permute.xlu2 %2087 }
 0x3ae   : > { %2041 = vrot.lane.b32.xlu0 %v9949_v4, %s9482_s3  ;;  %1691 = vmatpush.bf16.xpose.msrb.mxu0 %v1682_v12 }
 0x3b3   : > { %7758 = vmatmul.msk.bf16.vlgmr.msrb.gmra.mxu3 %vm1243_vm2, %v10141_v0 }
 0x3b4   : > { %v10202_v3 = vpop.permute.xlu1 %1697 }
 0x3b5   : > { %2842 = vrot.lane.b32.xlu2 %v10012_v45, %s9483_s7  ;;  %2476 = vrot.lane.b32.xlu1 %v10012_v45, %s9487_s22  ;;  %v10208_v47 = vpop.permute.xlu2 %2156 }
 0x3b6   : > { %2110 = vrot.lane.b32.xlu0 %v10012_v45, %s9479_s0  ;;  %7761 = vmatmul.msk.bf16.vlgmr.msra.gmra.mxu2 %vm1243_vm2, %v10145_v6 }
 0x3bc   : > { %v10217_v0 = vpop.permute.xlu1 %1775 }
 0x3bd   : > { %2641 = vrot.lane.b32.xlu2 %v10215_v20, %s9490_s24  ;;  %2275 = vrot.lane.b32.xlu1 %v10215_v20, %s9483_s7  ;;  %v10225_v62 = vpop.permute.xlu2 %2233 }
 0x3be   : > { %1909 = vrot.lane.b32.xlu0 %v10215_v20, %s9479_s0  ;;  %s13126_s0 = smov 48  }
 0x3c3   : > { %7762 = vmatmul.msk.bf16.vlgmr.msra.gmra.mxu3 %vm1243_vm2, %v10125_v49 }
 0x3c4   : > { %v1862_v15 = vpop.permute.xlu1 %1861 }
 0x3c5   : > { %v1867_v6 = vsel %vm1459_vm3, %v1862_v15, 0  ;;  %2796 = vrot.lane.b32.xlu2 %v9958_v59, %s9489_s21  ;;  %2430 = vrot.lane.b32.xlu1 %v9958_v59, %s9484_s27  ;;  %v10238_v38 = vpop.permute.xlu2 %2384 }
 0x3c6   : > { %2064 = vrot.lane.b32.xlu0 %v9958_v59, %s9482_s3  ;;  %1876 = vmatpush.bf16.msrb.mxu3 %v1867_v6 }
 0x3ca   : > { %2058 = vmatpush.bf16.xpose.msra.mxu3 %v2049_v21  ;;  %v1783_v21 = vsel %vm1243_vm2, %v1778_v42, 0 }
 0x3cc   : > { %v10262_v23 = vpop.permute.xlu1 %2018 }
 0x3cd   : > { %2913 = vrot.lane.b32.xlu2 %v9996_v28, %s13126_s0  ;;  %2547 = vrot.lane.b32.xlu1 %v9996_v28, %s9485_s2  ;;  %v10246_v49 = vpop.permute.xlu2 %2501 }
 0x3ce   : > { %2181 = vrot.lane.b32.xlu0 %v9996_v28, %s13114_s25  ;;  %s9493_s25 = smov 44  }
 0x3d4   : > { %v10272_v27 = vpop.permute.xlu1 %2135 }
 0x3d5   : > { %2944 = vrot.lane.b32.xlu2 %v10060_v22, %s9472_s26  ;;  %2578 = vrot.lane.b32.xlu1 %v10060_v22, %s9490_s24  ;;  %v10254_v11 = vpop.permute.xlu2 %2254 }
 0x3d6   : > { %2212 = vrot.lane.b32.xlu0 %v10060_v22, %s9483_s7 }
 0x3dc   : > { %v1886_v32 = vpop.permute.xlu1 %1885 }
 0x3dd   : > { %3141 = vrot.lane.b32.xlu2 %v9937_v36, %s9492_s1  ;;  %2775 = vrot.lane.b32.xlu1 %v9937_v36, %s9488_s10  ;;  %v10270_v5 = vpop.permute.xlu2 %2455 }
 0x3de   : > { %2409 = vrot.lane.b32.xlu0 %v9937_v36, %s9486_s9 }
 0x3e4   : > { %v10290_v34 = vpop.permute.xlu1 %2089 }
 0x3e5   : > { %3210 = vrot.lane.b32.xlu2 %v9975_v8, %s9493_s25  ;;  %2844 = vrot.lane.b32.xlu1 %v9975_v8, %s13126_s0  ;;  %v10280_v29 = vpop.permute.xlu2 %2524  ;;  %v2095_v14 = vsel %vm1243_vm2, %v10290_v34, 0 }
 0x3e6   : > { %2478 = vrot.lane.b32.xlu0 %v9975_v8, %s9485_s2  ;;  %s9495_s2 = smov 76  }
 0x3ec   : > { %v10306_v58 = vpop.permute.xlu1 %2158 }
 0x3ed   : > { %3231 = vrot.lane.b32.xlu2 %v10041_v16, %s9494_s17  ;;  %2865 = vrot.lane.b32.xlu1 %v10041_v16, %s9483_s7 }
 0x3ee   : > { %2499 = vrot.lane.b32.xlu0 %v10041_v16, %s9487_s22 }
 0x3f5   : > { %3164 = vrot.lane.b32.xlu2 %v9916_v10, %s9492_s1  ;;  %2798 = vrot.lane.b32.xlu1 %v9916_v10, %s9488_s10 }
 0x3f6   : > { %2432 = vrot.lane.b32.xlu0 %v9916_v10, %s9486_s9  ;;  %s9497_s9 = smov 40  }
 0x3f7   : > { %v10288_v33 = vpop.permute.xlu2 %2545 }
 0x3fd   : > { %3185 = vrot.lane.b32.xlu2 %v9926_v26, %s9495_s2  ;;  %2819 = vrot.lane.b32.xlu1 %v9926_v26, %s9489_s21 }
 0x3fe   : > { %2453 = vrot.lane.b32.xlu0 %v9926_v26, %s9484_s27  ;;  %s9496_s27 = smov 72  }
 0x3ff   : > { %v10298_v39 = vpop.permute.xlu2 %2752 }
 0x405   : > { %3254 = vrot.lane.b32.xlu2 %v10083_v51, %s9494_s17  ;;  %2888 = vrot.lane.b32.xlu1 %v10083_v51, %s9483_s7 }
 0x406   : > { %2522 = vrot.lane.b32.xlu0 %v10083_v51, %s9487_s22  ;;  %s9498_s22 = smov 8  }
 0x407   : > { %v10308_v43 = vpop.permute.xlu2 %2773 }
 0x40d   : > { %3331 = vrot.lane.b32.xlu2 %v10092_v31, %s9482_s3  ;;  %2965 = vrot.lane.b32.xlu1 %v10092_v31, %s9472_s26 }
 0x40e   : > { %2599 = vrot.lane.b32.xlu0 %v10092_v31, %s9490_s24 }
 0x40f   : > { %v10316_v44 = vpop.permute.xlu1 %2179  ;;  %v10328_v7 = vpop.permute.xlu2 %2842 }
 0x410   : > { %v10318_v41 = vpop.permute.xlu0 %1801 }
 0x412   : > { %v1418_v40 = vpop.f32.mrf.mxu0 }
 0x413   : > { %v1419_v50 = vadd.f32 %v1418_v40, %v10137_v57 }
 0x415   : > { %v1449_v55 = vmul.f32 %v10154_v17, %v1419_v50  ;;  %3482 = vrot.lane.b32.xlu2 %v9935_v35, %s9496_s27  ;;  %3116 = vrot.lane.b32.xlu1 %v9935_v35, %s9495_s2 }
 0x416   : > { %2750 = vrot.lane.b32.xlu0 %v9935_v35, %s9489_s21  ;;  %v1442_v2 = vpop.f32.mrf.mxu1 }
 0x417   : > { %v1453_v12 = vpack.c.bf16 %v1449_v55, %v1449_v55  ;;  %v1443_v18 = vadd.f32 %v1442_v2, %v10149_v9  ;;  %v10331_v15 = vpop.permute.xlu1 %2386  ;;  %v1809_v9 = vsel %vm1243_vm2, %v10139_v56, 0  ;;  %v10352_v2 = vpop.permute.xlu2 %2641 }
 0x418   : > { %v2021_v57 = vpop.permute.xlu0 %2020  ;;  %v10333_v6 = vpop.f32.mrf.mxu2 }
 0x419   : > { %v1450_v40 = vmul.f32 %v10154_v17, %v1443_v18  ;;  %v2026_v50 = vsel %vm1243_vm2, %v2021_v57, 0  ;;  %7755 = vmatmul.msk.bf16.vlgmr.msra.gmra.mxu0 %vm1455_vm5, %v1453_v12  ;;  %v1891_v18 = vsel %vm1459_vm3, %v1886_v32, 0 }
 0x41a   : > { %1792 = vmatpush.bf16.xpose.msra.mxu0 %v1783_v21  ;;  %2035 = vmatpush.bf16.xpose.msra.mxu2 %v2026_v50  ;;  %v1420_v63 = vpop.f32.mrf.mxu0 }
 0x41b   : > { %v1454_v30 = vpack.c.bf16 %v1450_v40, %v1450_v40 }
 0x41d   : > { %3599 = vrot.lane.b32.xlu2 %v9981_v13, %s9497_s9  ;;  %3233 = vrot.lane.b32.xlu1 %v9981_v13, %s9493_s25 }
 0x41e   : > { %2867 = vrot.lane.b32.xlu0 %v9981_v13, %s13126_s0  ;;  %7756 = vmatmul.msk.bf16.vlgmr.msra.gmra.mxu1 %vm1455_vm5, %v1454_v30  ;;  %v1444_v17 = vpop.f32.mrf.mxu1 }
 0x41f   : > { %1818 = vmatpush.bf16.xpose.msra.mxu1 %v1809_v9  ;;  %v10348_v42 = vpop.permute.xlu1 %2407  ;;  %v10369_v21 = vpop.permute.xlu2 %2796 }
 0x420   : > { %v10350_v63 = vpop.permute.xlu0 %2041  ;;  %v1474_v55 = vpop.f32.mrf.mxu2  ;;  %13179 = vst [vmem:[#allocation24_spill] sm:$0xff] %v10369_v21 }
 0x425   : > { %3574 = vrot.lane.b32.xlu2 %v10012_v45, %s9490_s24  ;;  %2986 = vrot.lane.b32.xlu1 %v10119_v46, %s9472_s26 }
 0x426   : > { %2620 = vrot.lane.b32.xlu0 %v10119_v46, %s9490_s24  ;;  %v10360_v56 = vpop.f32.mrf.mxu3 }
 0x427   : > { %v10362_v30 = vpop.permute.xlu1 %2476  ;;  %v10382_v17 = vpop.permute.xlu2 %2913 }
 0x428   : > { %v10364_v12 = vpop.permute.xlu0 %2110  ;;  %13180 = vst [vmem:[#allocation25_spill] sm:$0xff] %v10382_v17 }
 0x429   : > { %v1647_v57 = vpop.f32.mrf.mxu2  ;;  %7759 = vmatmul.msk.bf16.vlgmr.msrb.gmra.mxu0 %vm1243_vm2, %v10131_v54 }
 0x42a   : > { %1900 = vmatpush.bf16.msrb.mxu0 %v1891_v18 }
 0x42d   : > { %3553 = vrot.lane.b32.xlu2 %v9960_v60, %s9498_s22  ;;  %3187 = vrot.lane.b32.xlu1 %v9960_v60, %s9492_s1 }
 0x42e   : > { %2821 = vrot.lane.b32.xlu0 %v9960_v60, %s9488_s10  ;;  %7760 = vmatmul.msk.bf16.vlgmr.msrb.gmra.mxu1 %vm1243_vm2, %v10202_v3  ;;  %v1493_v32 = vpop.f32.mrf.mxu3 }
 0x42f   : > { %v10379_v40 = vpop.permute.xlu1 %2275  ;;  %v2072_v32 = vsel %vm1243_vm2, %v10185_v1, 0 }
 0x430   : > { %v1910_v54 = vpop.permute.xlu0 %1909 }
 0x431   : > { %v1915_v50 = vsel %vm1459_vm3, %v1910_v54, 0  ;;  %v1649_v9 = vpop.f32.mrf.mxu2 }
 0x432   : > { %1924 = vmatpush.bf16.msrb.mxu1 %v1915_v50  ;;  %v10396_v50 = vld [vmem:[#allocation3 + $0x8] sm:$0xff] }
 0x435   : > { %3622 = vrot.lane.b32.xlu2 %v10045_v19, %s9497_s9  ;;  %3256 = vrot.lane.b32.xlu1 %v10045_v19, %s9493_s25 }
 0x436   : > { %2890 = vrot.lane.b32.xlu0 %v10045_v19, %s13126_s0  ;;  %v1670_v3 = vpop.f32.mrf.mxu3  ;;  %s9499_s0 = smov 4  }
 0x437   : > { %v10390_v55 = vpop.permute.xlu1 %2430 }
 0x438   : > { %v10392_v18 = vpop.permute.xlu0 %2064 }
 0x439   : > { %v1742_v54 = vpop.f32.mrf.mxu2  ;;  %7763 = vmatmul.msk.bf16.vlgmr.msra.gmra.mxu0 %vm1243_vm2, %v10217_v0 }
 0x43a   : > { %v1743_v9 = vadd.f32 %v1742_v54, %v1647_v57  ;;  %2081 = vmatpush.bf16.xpose.msra.mxu0 %v2072_v32  ;;  %v10411_v57 = vpop.permute.xlu2 %2944  ;;  %v2118_v54 = vsel %vm1243_vm2, %v10163_v61, 0 }
 0x43c   : > { %v1826_v37 = vmul.f32 %v10396_v50, %v1743_v9 }
 0x43d   : > { %3643 = vrot.lane.b32.xlu2 %v10168_v52, %s9490_s24  ;;  %3277 = vrot.lane.b32.xlu1 %v10168_v52, %s9494_s17 }
 0x43e   : > { %v1830_v1 = vpack.c.bf16 %v1826_v37, %v1826_v37  ;;  %2911 = vrot.lane.b32.xlu0 %v10168_v52, %s9483_s7  ;;  %7764 = vmatmul.msk.bf16.vlgmr.msra.gmra.mxu1 %vm1243_vm2, %v10318_v41  ;;  %v1672_v0 = vpop.f32.mrf.mxu3  ;;  %s9500_s7 = smov 68  }
 0x43f   : > { %2104 = vmatpush.bf16.xpose.msra.mxu1 %v2095_v14  ;;  %v10413_v32 = vpop.permute.xlu1 %2547 }
 0x440   : > { %v10417_v9 = vpop.permute.xlu0 %2181  ;;  %7765 = vmatmul.msk.bf16.vlgmr.msrb.gmra.mxu2 %vm1455_vm5, %v1830_v1 }
 0x441   : > { %2127 = vmatpush.bf16.xpose.msrb.mxu2 %v2118_v54  ;;  %v1744_v37 = vpop.f32.mrf.mxu2 }
 0x442   : > { %v10428_v0 = vpop.permute.xlu2 %3141 }
 0x445   : > { %3850 = vrot.lane.b32.xlu2 %v9924_v25, %s9499_s0  ;;  %3484 = vrot.lane.b32.xlu1 %v9924_v25, %s9498_s22 }
 0x446   : > { %3118 = vrot.lane.b32.xlu0 %v9924_v25, %s9492_s1  ;;  %v1768_v14 = vpop.f32.mrf.mxu3  ;;  %v2141_v25 = vsel %vm1243_vm2, %v10272_v27, 0  ;;  %s9501_s1 = smov 36  }
 0x447   : > { %v10426_v34 = vpop.permute.xlu1 %2578  ;;  %v1769_v61 = vadd.f32 %v1768_v14, %v1670_v3 }
 0x448   : > { %v2213_v41 = vpop.permute.xlu0 %2212 }
 0x449   : > { %v1827_v1 = vmul.f32 %v10396_v50, %v1769_v61  ;;  %v2218_v14 = vsel %vm1459_vm3, %v2213_v41, 0 }
 0x44b   : > { %v1831_v54 = vpack.c.bf16 %v1827_v1, %v1827_v1  ;;  %v10445_v1 = vpop.permute.xlu2 %3210 }
 0x44c   : > { %13181 = vst [vmem:[#allocation26_spill] sm:$0xff] %v10445_v1 }
 0x44d   : > { %3871 = vrot.lane.b32.xlu2 %v9949_v4, %s9500_s7  ;;  %3505 = vrot.lane.b32.xlu1 %v9949_v4, %s9496_s27 }
 0x44e   : > { %3139 = vrot.lane.b32.xlu0 %v9949_v4, %s9495_s2  ;;  %7766 = vmatmul.msk.bf16.vlgmr.msrb.gmra.mxu3 %vm1455_vm5, %v1831_v54  ;;  %v1770_v3 = vpop.f32.mrf.mxu3 }
 0x44f   : > { %2150 = vmatpush.bf16.xpose.msrb.mxu3 %v2141_v25  ;;  %v10440_v37 = vpop.permute.xlu1 %2775  ;;  %v2392_v25 = vsel %vm1243_vm2, %v10331_v15, 0 }
 0x450   : > { %v2410_v61 = vpop.permute.xlu0 %2409  ;;  %7769 = vmatmul.msk.bf16.vlgmr.msra.gmra.mxu2 %vm1243_vm2, %v10262_v23  ;;  %v2239_v23 = vsel %vm1459_vm3, %v10225_v62, 0 }
 0x451   : > { %2227 = vmatpush.bf16.msra.mxu2 %v2218_v14 }
 0x453   : > { %v10457_v41 = vpop.permute.xlu2 %3231 }
 0x454   : > { %13182 = vst [vmem:[#allocation27_spill] sm:$0xff] %v10457_v41 }
 0x455   : > { %3942 = vrot.lane.b32.xlu2 %v9975_v8, %s9501_s1  ;;  %3352 = vrot.lane.b32.xlu1 %v10119_v46, %s9482_s3 }
 0x456   : > { %3208 = vrot.lane.b32.xlu0 %v10012_v45, %s9494_s17  ;;  %s13264_s17 = smov 64  }
 0x457   : > { %v10453_v4 = vpop.permute.xlu1 %2844 }
 0x458   : > { %v10455_v27 = vpop.permute.xlu0 %2478 }
 0x45d   : > { %3963 = vrot.lane.b32.xlu2 %v10041_v16, %s9502_s18  ;;  %3597 = vrot.lane.b32.xlu1 %v10041_v16, %s9490_s24  ;;  %v10483_v16 = vpop.permute.xlu2 %3164 }
 0x45e   : > { %3007 = vrot.lane.b32.xlu0 %v10215_v20, %s9472_s26  ;;  %7770 = vmatmul.msk.bf16.vlgmr.msra.gmra.mxu3 %vm1243_vm2, %v10350_v63  ;;  %13184 = vst [vmem:[#allocation29_spill] sm:$0xff] %v10483_v16  ;;  %v2415_v63 = vsel %vm1243_vm2, %v2410_v61, 0  ;;  %s13262_s26 = smov 32  }
 0x45f   : > { %2248 = vmatpush.bf16.msra.mxu3 %v2239_v23  ;;  %v10469_v54 = vpop.permute.xlu1 %2865 }
 0x460   : > { %13183 = vst [vmem:[#allocation28_spill] sm:$0xff] %v10469_v54  ;;  %v10473_v3 = vpop.permute.xlu0 %2499  ;;  %7773 = vmatmul.msk.bf16.vlgmr.msrb.gmra.mxu2 %vm1243_vm2, %v10364_v12 }
 0x461   : > { %2401 = vmatpush.bf16.xpose.msrb.mxu2 %v2392_v25 }
 0x465   : > { %3894 = vrot.lane.b32.xlu2 %v9958_v59, %s9500_s7  ;;  %3528 = vrot.lane.b32.xlu1 %v9958_v59, %s9496_s27  ;;  %v10502_v14 = vpop.permute.xlu2 %3185 }
 0x466   : > { %3162 = vrot.lane.b32.xlu0 %v9958_v59, %s9495_s2  ;;  %13186 = vst [vmem:[#allocation31_spill] sm:$0xff] %v10502_v14 }
 0x467   : > { %v10485_v62 = vpop.permute.xlu1 %2798 }
 0x468   : > { %v10487_v15 = vpop.permute.xlu0 %2432 }
 0x46d   : > { %4042 = vrot.lane.b32.xlu2 %v10060_v22, %s9496_s27  ;;  %3645 = vrot.lane.b32.xlu1 %v9996_v28, %s9497_s9 }
 0x46e   : > { %3279 = vrot.lane.b32.xlu0 %v9996_v28, %s9493_s25  ;;  %7774 = vmatmul.msk.bf16.vlgmr.msrb.gmra.mxu3 %vm1243_vm2, %v10174_v24  ;;  %v10514_v24 = vpop.permute.xlu2 %3254 }
 0x46f   : > { %2424 = vmatpush.bf16.xpose.msrb.mxu3 %v2415_v63  ;;  %v10498_v59 = vpop.permute.xlu1 %2819  ;;  %13188 = vst [vmem:[#allocation33_spill] sm:$0xff] %v10514_v24 }
 0x470   : > { %13185 = vst [vmem:[#allocation30_spill] sm:$0xff] %v10498_v59  ;;  %v10500_v12 = vpop.permute.xlu0 %2453 }
 0x475   : > { %4105 = vrot.lane.b32.xlu2 %v10215_v20, %s9496_s27  ;;  %3676 = vrot.lane.b32.xlu1 %v10060_v22, %s9489_s21 }
 0x476   : > { %3310 = vrot.lane.b32.xlu0 %v10060_v22, %s9482_s3  ;;  %v10526_v22 = vpop.permute.xlu2 %3331 }
 0x477   : > { %v10510_v61 = vpop.permute.xlu1 %2888  ;;  %13189 = vst [vmem:[#allocation34_spill] sm:$0xff] %v10526_v22 }
 0x478   : > { %13187 = vst [vmem:[#allocation32_spill] sm:$0xff] %v10510_v61  ;;  %v10512_v23 = vpop.permute.xlu0 %2522 }
 0x47d   : > { %4011 = vrot.lane.b32.xlu2 %v9996_v28, %s9501_s1  ;;  %3873 = vrot.lane.b32.xlu1 %v9937_v36, %s9499_s0 }
 0x47e   : > { %3507 = vrot.lane.b32.xlu0 %v9937_v36, %s9498_s22  ;;  %v10540_v36 = vpop.permute.xlu2 %3482 }
 0x47f   : > { %v10522_v25 = vpop.permute.xlu1 %2965  ;;  %13191 = vst [vmem:[#allocation36_spill] sm:$0xff] %v10540_v36 }
 0x480   : > { %v10524_v63 = vpop.permute.xlu0 %2599 }
 0x485   : > { %3718 = vrot.lane.b32.xlu1 %v10119_v46, %s9489_s21 }
 0x486   : > { %3576 = vrot.lane.b32.xlu0 %v9975_v8, %s9497_s9  ;;  %v10556_v22 = vpop.permute.xlu2 %3599 }
 0x487   : > { %v10532_v48 = vpop.permute.xlu1 %3116  ;;  %13194 = vst [vmem:[#allocation39_spill] sm:$0xff] %v10556_v22 }
 0x488   : > { %13190 = vst [vmem:[#allocation35_spill] sm:$0xff] %v10532_v48  ;;  %v10534_v28 = vpop.permute.xlu0 %2750 }
 0x48d   : > { %3965 = vrot.lane.b32.xlu1 %v9981_v13, %s9501_s1 }
 0x48e   : > { %3373 = vrot.lane.b32.xlu0 %v10215_v20, %s9482_s3  ;;  %v10568_v1 = vpop.permute.xlu2 %3574  ;;  %s13271_s3 = scalar_lea.vmem %s13094_s11, %s9676_s20 }
 0x48f   : > { %v10542_v24 = vpop.permute.xlu1 %3233  ;;  %13196 = vst [vmem:[#allocation41_spill] sm:$0xff] %v10568_v1 }
 0x490   : > { %13192 = vst [vmem:[#allocation37_spill] sm:$0xff] %v10542_v24  ;;  %v10544_v14 = vpop.permute.xlu0 %2867 }
 0x495   : > { %3896 = vrot.lane.b32.xlu1 %v9916_v10, %s9499_s0 }
 0x496   : > { %3530 = vrot.lane.b32.xlu0 %v9916_v10, %s9498_s22  ;;  %v10550_v8 = vpop.f32.mrf.mxu0 }
 0x497   : > { %v10552_v41 = vpop.permute.xlu1 %2986  ;;  %v1539_v22 = vsel %vm1455_vm5, %v10550_v8, 0.0 }
 0x498   : > { %13193 = vst [vmem:[#allocation38_spill] sm:$0xff] %v10552_v41  ;;  %v10554_v13 = vpop.permute.xlu0 %2620 }
 0x49b   : > { %v10558_v48 = vpop.f32.mrf.mxu1 }
 0x49d   : > { %3986 = vrot.lane.b32.xlu1 %v10083_v51, %s9502_s18 }
 0x49e   : > { %3551 = vrot.lane.b32.xlu0 %v9926_v26, %s9496_s27  ;;  %v1512_v36 = vpop.f32.mrf.mxu0 }
 0x49f   : > { %v10566_v10 = vpop.permute.xlu1 %3187 }
 0x4a0   : > { %v10564_v24 = vpop.permute.xlu0 %2821  ;;  %13195 = vst [vmem:[#allocation40_spill] sm:$0xff] %v10566_v10  ;;  %v10580_v10 = vpop.permute.xlu2 %3553 }
 0x4a1   : > { %13199 = vst [vmem:[#allocation44_spill] sm:$0xff] %v10580_v10 }
 0x4a3   : > { %v1531_v61 = vpop.f32.mrf.mxu1 }
 0x4a4   : > { %v1536_v61 = vsel %vm1455_vm5, %v10360_v56, 0.0 }
 0x4a5   : > { %4063 = vrot.lane.b32.xlu1 %v10092_v31, %s9496_s27 }
 0x4a6   : > { %3620 = vrot.lane.b32.xlu0 %v10083_v51, %s9490_s24  ;;  %1540 = vadd.xlane.f32.xlu2 %v1539_v22  ;;  %v1693_v16 = vpop.f32.mrf.mxu0  ;;  %s13275_s24 = sld [smem:[#allocation70_spill]] }
 0x4a7   : > { %v10578_v21 = vpop.permute.xlu1 %3256 }
 0x4a8   : > { %v10576_v59 = vpop.permute.xlu0 %2890  ;;  %13198 = vst [vmem:[#allocation43_spill] sm:$0xff] %v10578_v21  ;;  %v10594_v21 = vpop.permute.xlu2 %3622 }
 0x4a9   : > { %13197 = vst [vmem:[#allocation42_spill] sm:$0xff] %v10576_v59 }
 0x4aa   : > { %13200 = vst [vmem:[#allocation45_spill] sm:$0xff] %v10594_v21 }
 0x4ab   : > { %v1716_v36 = vpop.f32.mrf.mxu1 }
 0x4ad   : > { %3917 = vrot.lane.b32.xlu1 %v9926_v26, %s9500_s7 }
 0x4ae   : > { %3697 = vrot.lane.b32.xlu0 %v10092_v31, %s9489_s21  ;;  %1537 = vadd.xlane.f32.xlu2 %v1536_v61  ;;  %v1695_v51 = vpop.f32.mrf.mxu0 }
 0x4af   : > { %v10590_v41 = vpop.permute.xlu1 %3277  ;;  %v2164_v51 = vsel %vm1243_vm2, %v10306_v58, 0 }
 0x4b0   : > { %v10588_v22 = vpop.permute.xlu0 %2911 }
 0x4b3   : > { %v1718_v1 = vpop.f32.mrf.mxu1 }
 0x4b6   : > { %3848 = vrot.lane.b32.xlu0 %v9935_v35, %s9500_s7  ;;  %v1794_v10 = vpop.f32.mrf.mxu0 }
 0x4b7   : > { %v1795_v26 = vadd.f32 %v1794_v10, %v1693_v16  ;;  %v10605_v16 = vpop.permute.xlu1 %3484 }
 0x4b8   : > { %v10596_v17 = vpop.permute.xlu0 %3118 }
 0x4b9   : > { %v1828_v59 = vmul.f32 %v10396_v50, %v1795_v26 }
 0x4bb   : > { %v1832_v54 = vpack.c.bf16 %v1828_v59, %v1828_v59  ;;  %v1820_v31 = vpop.f32.mrf.mxu1  ;;  %v10609_v59 = vpop.permute.xlu2 %3643 }
 0x4bc   : > { %v1821_v61 = vadd.f32 %v1820_v31, %v1716_v36  ;;  %13201 = vst [vmem:[#allocation46_spill] sm:$0xff] %v10609_v59  ;;  %v2187_v36 = vsel %vm1243_vm2, %v10417_v9, 0 }
 0x4bd   : > { %7767 = vmatmul.msk.bf16.vlgmr.msrb.gmra.mxu0 %vm1455_vm5, %v1832_v54 }
 0x4be   : > { %v1829_v1 = vmul.f32 %v10396_v50, %v1821_v61  ;;  %3739 = vrot.lane.b32.xlu0 %v10215_v20, %s9489_s21  ;;  %2173 = vmatpush.bf16.xpose.msrb.mxu0 %v2164_v51  ;;  %v1796_v35 = vpop.f32.mrf.mxu0  ;;  %v2260_v61 = vsel %vm1459_vm3, %v10254_v11, 0  ;;  %v2281_v51 = vsel %vm1459_vm3, %v10379_v40, 0 }
 0x4bf   : > { %v10620_v54 = vpop.permute.xlu1 %3505 }
 0x4c0   : > { %v1833_v10 = vpack.c.bf16 %v1829_v1, %v1829_v1  ;;  %v10607_v21 = vpop.permute.xlu0 %3139 }
 0x4c2   : > { %7768 = vmatmul.msk.bf16.vlgmr.msrb.gmra.mxu1 %vm1455_vm5, %v1833_v10 }
 0x4c3   : > { %2196 = vmatpush.bf16.xpose.msrb.mxu1 %v2187_v36  ;;  %v1822_v58 = vpop.f32.mrf.mxu1  ;;  %v10614_v50 = vpop.f32.mrf.mxu2 }
 0x4c4   : > { %v10622_v26 = vpop.permute.xlu2 %3850 }
 0x4c6   : > { %3940 = vrot.lane.b32.xlu0 %v10012_v45, %s9502_s18 }
 0x4c7   : > { %v10638_v11 = vpop.permute.xlu1 %3352 }
 0x4c8   : > { %v10618_v20 = vpop.permute.xlu0 %3208 }
 0x4cb   : > { %v1856_v31 = vpop.f32.mrf.mxu2 }
 0x4cc   : > { %v10640_v35 = vpop.permute.xlu2 %3871  ;;  %v2461_v31 = vsel %vm1243_vm2, %v10270_v5, 0 }
 0x4cd   : > { %7771 = vmatmul.msk.bf16.vlgmr.msra.gmra.mxu0 %vm1243_vm2, %v10392_v18  ;;  %13202 = vst [vmem:[#allocation47_spill] sm:$0xff] %v10640_v35 }
 0x4ce   : > { %3988 = vrot.lane.b32.xlu0 %v10045_v19, %s9501_s1  ;;  %2269 = vmatpush.bf16.msra.mxu0 %v2260_v61  ;;  %v1542_v19 = vsel %vm1455_vm5, %v10558_v48, 0.0  ;;  %v10662_v61 = vld [vmem:[#allocation3 + $0x10] sm:$0xff]  ;;  %s13282_s1 = sld [smem:[#allocation75_spill]] (!%p8659_p1) }
 0x4cf   : > { %v10652_v36 = vpop.permute.xlu1 %3597 }
 0x4d0   : > { %v10630_v9 = vpop.permute.xlu0 %3007 }
 0x4d1   : > { %v10632_v45 = vpop.f32.mrf.mxu3 }
 0x4d2   : > { %7772 = vmatmul.msk.bf16.vlgmr.msra.gmra.mxu1 %vm1243_vm2, %v10196_v53  ;;  %v2438_v53 = vsel %vm1243_vm2, %v10487_v15, 0 }
 0x4d3   : > { %2290 = vmatpush.bf16.msra.mxu1 %v2281_v51  ;;  %v2037_v1 = vpop.f32.mrf.mxu2 }
 0x4d6   : > { %4084 = vrot.lane.b32.xlu0 %v10119_v46, %s9496_s27  ;;  %v10656_v46 = vpop.permute.xlu2 %3942 }
 0x4d7   : > { %1543 = vadd.xlane.f32.xlu1 %v1542_v19  ;;  %13203 = vst [vmem:[#allocation48_spill] sm:$0xff] %v10656_v46 }
 0x4d8   : > { %v10646_v10 = vpop.permute.xlu0 %3162 }
 0x4d9   : > { %v1880_v18 = vpop.f32.mrf.mxu3 }
 0x4db   : > { %v2039_v40 = vpop.f32.mrf.mxu2 }
 0x4dd   : > { %7775 = vmatmul.msk.bf16.vlgmr.msrb.gmra.mxu0 %vm1243_vm2, %v10208_v47 }
 0x4de   : > { %3919 = vrot.lane.b32.xlu0 %v9960_v60, %s9499_s0  ;;  %2447 = vmatpush.bf16.xpose.msrb.mxu0 %v2438_v53  ;;  %v10669_v60 = vpop.permute.xlu1 %3528  ;;  %v10671_v40 = vpop.permute.xlu2 %3963  ;;  %s13276_s0 = scalar_lea.vmem %s13275_s24, %s9676_s20 }
 0x4df   : > { %13204 = vst [vmem:[#allocation49_spill] sm:$0xff] %v10669_v60  ;;  %v2530_v60 = vsel %vm1243_vm2, %v10280_v29, 0  ;;  %v2626_v29 = vsel %vm1459_vm3, %v10554_v13, 0  ;;  %v2804_v13 = vsel %vm1243_vm2, %v10485_v62, 0 }
 0x4e0   : > { %v10664_v51 = vpop.permute.xlu0 %3279  ;;  %13205 = vst [vmem:[#allocation50_spill] sm:$0xff] %v10671_v40 }
 0x4e1   : > { %v2060_v58 = vpop.f32.mrf.mxu3 }
 0x4e2   : > { %7776 = vmatmul.msk.bf16.vlgmr.msrb.gmra.mxu1 %vm1243_vm2, %v10316_v44  ;;  %v2484_v44 = vsel %vm1243_vm2, %v10455_v27, 0 }
 0x4e3   : > { %2470 = vmatpush.bf16.xpose.msrb.mxu1 %v2461_v31  ;;  %v2129_v15 = vpop.f32.mrf.mxu2 }
 0x4e4   : > { %v2130_v47 = vadd.f32 %v2129_v15, %v2037_v1 }
 0x4e6   : > { %v2204_v19 = vmul.f32 %v10662_v61, %v2130_v47  ;;  %4009 = vrot.lane.b32.xlu0 %v10168_v52, %s9502_s18  ;;  %v10678_v15 = vpop.permute.xlu1 %3645  ;;  %v10680_v52 = vpop.permute.xlu2 %3894  ;;  %s13265_s18 = smov 48  }
 0x4e7   : > { %13206 = vst [vmem:[#allocation51_spill] sm:$0xff] %v10680_v52 }
 0x4e8   : > { %v2208_v18 = vpack.c.bf16 %v2204_v19, %v2204_v19  ;;  %v10676_v53 = vpop.permute.xlu0 %3310 }
 0x4e9   : > { %v2062_v5 = vpop.f32.mrf.mxu3 }
 0x4ea   : > { %7777 = vmatmul.msk.bf16.vlgmr.msra.gmra.mxu2 %vm1455_vm5, %v2208_v18  ;;  %v2507_v5 = vsel %vm1243_vm2, %v10246_v49, 0 }
 0x4eb   : > { %2493 = vmatpush.bf16.xpose.msra.mxu2 %v2484_v44  ;;  %v2131_v1 = vpop.f32.mrf.mxu2  ;;  %v2584_v44 = vsel %vm1459_vm3, %v10426_v34, 0  ;;  %v2605_v34 = vsel %vm1459_vm3, %v10524_v63, 0 }
 0x4ee   : > { %v10694_v1 = vpop.permute.xlu2 %4042 }
 0x4ef   : > { %13207 = vst [vmem:[#allocation52_spill] sm:$0xff] %v10694_v1 }
 0x4f0   : > { %v10686_v27 = vpop.permute.xlu0 %3507 }
 0x4f1   : > { %v2152_v31 = vpop.f32.mrf.mxu3 }
 0x4f2   : > { %v2153_v47 = vadd.f32 %v2152_v31, %v2060_v58  ;;  %v10692_v58 = vpop.permute.xlu1 %3676  ;;  %v9503_v31 = vmov 8.0  }
 0x4f3   : > { %9007 = vrcp.f32 %v9503_v31  ;;  %v1533_v31 = vsel %vm1455_vm5, %v10333_v6, 0.0 }
 0x4f4   : > { %v2205_v19 = vmul.f32 %v10662_v61, %v2153_v47 }
 0x4f6   : > { %v2209_v35 = vpack.c.bf16 %v2205_v19, %v2205_v19  ;;  %v10700_v19 = vpop.permute.xlu2 %4105 }
 0x4f7   : > { %13208 = vst [vmem:[#allocation53_spill] sm:$0xff] %v10700_v19 }
 0x4f8   : > { %7778 = vmatmul.msk.bf16.vlgmr.msra.gmra.mxu3 %vm1455_vm5, %v2209_v35  ;;  %v10696_v49 = vpop.permute.xlu0 %3576 }
 0x4f9   : > { %2516 = vmatpush.bf16.xpose.msra.mxu3 %v2507_v5  ;;  %v2154_v18 = vpop.f32.mrf.mxu3  ;;  %v9008_v35 = vpop.eup %9007 }
 0x4fa   : > { %7781 = vmatmul.msk.bf16.vlgmr.msrb.gmra.mxu2 %vm1243_vm2, %v10238_v38  ;;  %v10698_v47 = vpop.permute.xlu1 %3873  ;;  %v1546_v5 = vmul.f32 8.0, %v9008_v35  ;;  %v2758_v38 = vsel %vm1243_vm2, %v10298_v39, 0  ;;  %vm1550_vm6 = vweird.f32 %v9008_v35 }
 0x4fb   : > { %2593 = vmatpush.bf16.msrb.mxu2 %v2584_v44 }
 0x4fc   : > { %v1547_v18 = vsub.f32 1.0, %v1546_v5 }
 0x4fe   : > { %v1548_v19 = vmul.f32 %v9008_v35, %v1547_v18  ;;  %v10716_v63 = vpop.permute.xlu2 %4011 }
 0x4ff   : > { %13209 = vst [vmem:[#allocation54_spill] sm:$0xff] %v10716_v63 }
 0x500   : > { %v10710_v44 = vpop.permute.xlu0 %3373 }
 0x502   : > { %v10714_v52 = vpop.permute.xlu1 %3718 }
 0x508   : > { %7782 = vmatmul.msk.bf16.vlgmr.msrb.gmra.mxu3 %vm1243_vm2, %v10348_v42  ;;  %v1549_v42 = vadd.f32 %v9008_v35, %v1548_v19 }
 0x509   : > { %2614 = vmatpush.bf16.msrb.mxu3 %v2605_v34  ;;  %v10718_v34 = vpop.permute.xlu0 %3530 }
 0x50a   : > { %7785 = vmatmul.msk.bf16.vlgmr.msra.gmra.mxu2 %vm1243_vm2, %v10362_v30  ;;  %v10720_v39 = vsel %vm1550_vm6, %v9008_v35, %v1549_v42  ;;  %v2781_v30 = vsel %vm1243_vm2, %v10440_v37, 0 }
 0x50b   : > { %2767 = vmatpush.bf16.xpose.msra.mxu2 %v2758_v38  ;;  %v10726_v38 = vpop.permute.xlu1 %3965 }
 0x50c   : > { %13210 = vst [vmem:[#allocation55_spill] sm:$0xff] %v10726_v38 }
 0x510   : > { %1534 = vadd.xlane.f32.xlu0 %v1533_v31 }
 0x511   : > { %v10735_v42 = vpop.permute.xlu0 %3551 }
 0x512   : > { %13212 = vst [vmem:[#allocation57_spill] sm:$0xff] %v10735_v42 }
 0x518   : > { %7786 = vmatmul.msk.bf16.vlgmr.msra.gmra.mxu3 %vm1243_vm2, %v10473_v3 }
 0x519   : > { %2790 = vmatpush.bf16.xpose.msra.mxu3 %v2781_v30  ;;  %v1541_v5 = vpop.xlane.xlu2 %1540  ;;  %v10738_v30 = vpop.permute.xlu1 %3896 }
 0x51a   : > { %v1554_v18 = vmul.f32 %v10720_v39, %v1541_v5  ;;  %13213 = vst [vmem:[#allocation58_spill] sm:$0xff] %v10738_v30 }
 0x51c   : > { %v10730_v31 = vsub.f32 %v10550_v8, %v1554_v18  ;;  %v10746_v18 = vpop.permute.xlu0 %3620 }
 0x51d   : > { %13215 = vst [vmem:[#allocation60_spill] sm:$0xff] %v10746_v18 }
 0x51e   : > { %13211 = vst [vmem:[#allocation56_spill] sm:$0xff] %v10730_v31  ;;  %v1562_v19 = vmul.f32 %v10730_v31, %v10730_v31 }
 0x520   : > { %v1570_v35 = vsel %vm1455_vm5, %v1562_v19, 0.0 }
 0x521   : > { %1571 = vadd.xlane.f32.xlu2 %v1570_v35  ;;  %v1538_v37 = vpop.xlane.xlu2 %1537  ;;  %v10748_v19 = vpop.permute.xlu1 %3986  ;;  %v1933_v35 = vsel %vm1455_vm5, %v10632_v45, 0.0 }
 0x522   : > { %v1553_v3 = vmul.f32 %v10720_v39, %v1538_v37  ;;  %13216 = vst [vmem:[#allocation61_spill] sm:$0xff] %v10748_v19 }
 0x524   : > { %v10741_v63 = vsub.f32 %v10360_v56, %v1553_v3  ;;  %v10752_v37 = vpop.permute.xlu0 %3697 }
 0x526   : > { %13214 = vst [vmem:[#allocation59_spill] sm:$0xff] %v10741_v63  ;;  %v1561_v8 = vmul.f32 %v10741_v63, %v10741_v63 }
 0x528   : > { %v1567_v5 = vsel %vm1455_vm5, %v1561_v8, 0.0 }
 0x529   : > { %1568 = vadd.xlane.f32.xlu0 %v1567_v5  ;;  %v10754_v31 = vpop.permute.xlu1 %4063 }
 0x52a   : > { %13217 = vst [vmem:[#allocation62_spill] sm:$0xff] %v10754_v31 }
 0x52c   : > { %v10760_v8 = vpop.permute.xlu0 %3848 }
 0x52d   : > { %13218 = vst [vmem:[#allocation63_spill] sm:$0xff] %v10760_v8 }
 0x531   : > { %1934 = vadd.xlane.f32.xlu0 %v1933_v35  ;;  %v10764_v40 = vpop.permute.xlu1 %3917 }
 0x532   : > { %13219 = vst [vmem:[#allocation64_spill] sm:$0xff] %v10764_v40 }
 0x534   : > { %v10766_v38 = vpop.permute.xlu0 %3739 }
 0x535   : > { %13220 = vst [vmem:[#allocation65_spill] sm:$0xff] %v10766_v38 }
 0x53a   : > { %v10756_v56 = vpop.f32.mrf.mxu0 }
 0x53b   : > { %v1936_v3 = vsel %vm1455_vm5, %v10756_v56, 0.0 }
 0x53c   : > { %1937 = vadd.xlane.f32.xlu2 %v1936_v3  ;;  %v10775_v40 = vpop.permute.xlu0 %3940 }
 0x53f   : > { %v10762_v5 = vpop.f32.mrf.mxu1 }
 0x542   : > { %v1904_v19 = vpop.f32.mrf.mxu0 }
 0x544   : > { %v10777_v42 = vpop.permute.xlu0 %3988 }
 0x547   : > { %v1928_v1 = vpop.f32.mrf.mxu1 }
 0x54a   : > { %v1544_v35 = vpop.xlane.xlu1 %1543  ;;  %v2083_v63 = vpop.f32.mrf.mxu0 }
 0x54b   : > { %v1555_v31 = vmul.f32 %v10720_v39, %v1544_v35 }
 0x54d   : > { %v10770_v46 = vsub.f32 %v10558_v48, %v1555_v31 }
 0x54f   : > { %v2106_v59 = vpop.f32.mrf.mxu1  ;;  %v1563_v3 = vmul.f32 %v10770_v46, %v10770_v46 }
 0x551   : > { %v1573_v8 = vsel %vm1455_vm5, %v1563_v3, 0.0 }
 0x552   : > { %1574 = vadd.xlane.f32.xlu1 %v1573_v8  ;;  %v2085_v18 = vpop.f32.mrf.mxu0 }
 0x557   : > { %v2108_v1 = vpop.f32.mrf.mxu1 }
 0x558   : > { %v10787_v1 = vpop.permute.xlu0 %4084 }
 0x55a   : > { %v2175_v19 = vpop.f32.mrf.mxu0 }
 0x55b   : > { %v2176_v30 = vadd.f32 %v2175_v19, %v2083_v63  ;;  %v2553_v63 = vsel %vm1243_vm2, %v10413_v32, 0  ;;  %v2647_v32 = vsel %vm1459_vm3, %v10352_v2, 0 }
 0x55d   : > { %v2206_v35 = vmul.f32 %v10662_v61, %v2176_v30 }
 0x55f   : > { %v2210_v38 = vpack.c.bf16 %v2206_v35, %v2206_v35  ;;  %v2198_v48 = vpop.f32.mrf.mxu1 }
 0x560   : > { %v2199_v31 = vadd.f32 %v2198_v48, %v2106_v59 }
 0x561   : > { %7779 = vmatmul.msk.bf16.vlgmr.msra.gmra.mxu0 %vm1455_vm5, %v2210_v38  ;;  %v10793_v38 = vpop.permute.xlu0 %3919 }
 0x562   : > { %v2207_v8 = vmul.f32 %v10662_v61, %v2199_v31  ;;  %2539 = vmatpush.bf16.xpose.msra.mxu0 %v2530_v60  ;;  %v2177_v18 = vpop.f32.mrf.mxu0 }
 0x564   : > { %v2211_v3 = vpack.c.bf16 %v2207_v8, %v2207_v8 }
 0x566   : > { %7780 = vmatmul.msk.bf16.vlgmr.msra.gmra.mxu1 %vm1455_vm5, %v2211_v3 }
 0x567   : > { %2562 = vmatpush.bf16.xpose.msra.mxu1 %v2553_v63  ;;  %v2200_v30 = vpop.f32.mrf.mxu1  ;;  %v10820_v63 = vld [vmem:[#allocation3 + $0x18] sm:$0xff] }
 0x569   : > { %v10801_v60 = vpop.permute.xlu0 %4009 }
 0x56d   : > { %v10789_v59 = vpop.f32.mrf.mxu2 }
 0x571   : > { %7783 = vmatmul.msk.bf16.vlgmr.msrb.gmra.mxu0 %vm1243_vm2, %v10390_v55 }
 0x572   : > { %2635 = vmatpush.bf16.msrb.mxu0 %v2626_v29 }
 0x575   : > { %v2231_v61 = vpop.f32.mrf.mxu2 }
 0x576   : > { %7784 = vmatmul.msk.bf16.vlgmr.msrb.gmra.mxu1 %vm1243_vm2, %v10500_v12  ;;  %v2827_v12 = vsel %vm1243_vm2, %v10564_v24, 0  ;;  %v2850_v61 = vsel %vm1243_vm2, %v10453_v4, 0 }
 0x577   : > { %2656 = vmatpush.bf16.msrb.mxu1 %v2647_v32 }
 0x57b   : > { %v10803_v19 = vpop.f32.mrf.mxu3 }
 0x57d   : > { %v2403_v35 = vpop.f32.mrf.mxu2 }
 0x581   : > { %7787 = vmatmul.msk.bf16.vlgmr.msra.gmra.mxu0 %vm1243_vm2, %v10512_v23 }
 0x582   : > { %2813 = vmatpush.bf16.xpose.msra.mxu0 %v2804_v13  ;;  %v1930_v13 = vsel %vm1455_vm5, %v10614_v50, 0.0 }
 0x583   : > { %v1535_v55 = vpop.xlane.xlu0 %1534  ;;  %v2252_v48 = vpop.f32.mrf.mxu3 }
 0x584   : > { %v1552_v2 = vmul.f32 %v10720_v39, %v1535_v55 }
 0x585   : > { %v2405_v31 = vpop.f32.mrf.mxu2 }
 0x586   : > { %v10813_v8 = vsub.f32 %v10333_v6, %v1552_v2  ;;  %7788 = vmatmul.msk.bf16.vlgmr.msra.gmra.mxu1 %vm1243_vm2, %v10288_v33  ;;  %v1939_v6 = vsel %vm1455_vm5, %v10762_v5, 0.0  ;;  %v2873_v31 = vsel %vm1243_vm2, %v10544_v14, 0 }
 0x587   : > { %2836 = vmatpush.bf16.xpose.msra.mxu1 %v2827_v12  ;;  %v2950_v12 = vsel %vm1459_vm3, %v10411_v57, 0  ;;  %v3124_v57 = vsel %vm1243_vm2, %v10596_v17, 0 }
 0x588   : > { %v1560_v62 = vmul.f32 %v10813_v8, %v10813_v8 }
 0x58a   : > { %v1564_v23 = vsel %vm1455_vm5, %v1560_v62, 0.0 }
 0x58b   : > { %1565 = vadd.xlane.f32.xlu1 %v1564_v23  ;;  %v2426_v18 = vpop.f32.mrf.mxu3 }
 0x58d   : > { %v2495_v3 = vpop.f32.mrf.mxu2 }
 0x58e   : > { %v2496_v30 = vadd.f32 %v2495_v3, %v2403_v35  ;;  %v2971_v3 = vsel %vm1459_vm3, %v10522_v25, 0  ;;  %v3147_v25 = vsel %vm1243_vm2, %v10428_v0, 0 }
 0x590   : > { %v2570_v24 = vmul.f32 %v10820_v63, %v2496_v30 }
 0x592   : > { %v2574_v29 = vpack.c.bf16 %v2570_v24, %v2570_v24 }
 0x593   : > { %1940 = vadd.xlane.f32.xlu1 %v1939_v6  ;;  %v2428_v33 = vpop.f32.mrf.mxu3 }
 0x594   : > { %7789 = vmatmul.msk.bf16.vlgmr.msrb.gmra.mxu2 %vm1455_vm5, %v2574_v29  ;;  %v10838_v62 = vpop.xlane.xlu2 %1571 }
 0x595   : > { %2859 = vmatpush.bf16.xpose.msrb.mxu2 %v2850_v61  ;;  %v2497_v32 = vpop.f32.mrf.mxu2 }
 0x59b   : > { %1931 = vadd.xlane.f32.xlu1 %v1930_v13  ;;  %v2518_v35 = vpop.f32.mrf.mxu3 }
 0x59c   : > { %v2519_v55 = vadd.f32 %v2518_v35, %v2426_v18 }
 0x59e   : > { %v2571_v48 = vmul.f32 %v10820_v63, %v2519_v55 }
 0x5a0   : > { %v2575_v2 = vpack.c.bf16 %v2571_v48, %v2571_v48 }
 0x5a2   : > { %7790 = vmatmul.msk.bf16.vlgmr.msrb.gmra.mxu3 %vm1455_vm5, %v2575_v2 }
 0x5a3   : > { %2882 = vmatpush.bf16.xpose.msrb.mxu3 %v2873_v31  ;;  %v2520_v4 = vpop.f32.mrf.mxu3 }
 0x5a4   : > { %7793 = vmatmul.msk.bf16.vlgmr.msra.gmra.mxu2 %vm1243_vm2, %v10534_v28 }
 0x5a5   : > { %2959 = vmatpush.bf16.msra.mxu2 %v2950_v12 }
 0x5af   : > { %v1938_v23 = vpop.xlane.xlu2 %1937 }
 0x5b0   : > { %v1944_v18 = vmul.f32 %v1938_v23, %v10720_v39 }
 0x5b2   : > { %v10844_v14 = vsub.f32 %v10756_v56, %v1944_v18  ;;  %7794 = vmatmul.msk.bf16.vlgmr.msra.gmra.mxu3 %vm1243_vm2, %v10308_v43  ;;  %v13221_v56 = vld [vmem:[#allocation28_spill] sm:$0xff]  ;;  %v10859_v43 = vpop.xlane.xlu0 %1568 }
 0x5b3   : > { %2980 = vmatpush.bf16.msra.mxu3 %v2971_v3 }
 0x5b4   : > { %7797 = vmatmul.msk.bf16.vlgmr.msrb.gmra.mxu2 %vm1243_vm2, %v10328_v7  ;;  %v1952_v28 = vmul.f32 %v10844_v14, %v10844_v14 }
 0x5b5   : > { %3133 = vmatpush.bf16.xpose.msrb.mxu2 %v3124_v57 }
 0x5b6   : > { %v1960_v30 = vsel %vm1455_vm5, %v1952_v28, 0.0  ;;  %v13222_v28 = vld [vmem:[#allocation42_spill] sm:$0xff] }
 0x5b7   : > { %1961 = vadd.xlane.f32.xlu0 %v1960_v30  ;;  %v2896_v30 = vsel %vm1243_vm2, %v13222_v28, 0  ;;  %v13226_v28 = vld [vmem:[#allocation30_spill] sm:$0xff] }
 0x5ba   : > { %v1935_v17 = vpop.xlane.xlu0 %1934 }
 0x5bb   : > { %v1943_v24 = vmul.f32 %v1935_v17, %v10720_v39 }
 0x5bd   : > { %v10865_v29 = vsub.f32 %v10632_v45, %v1943_v24 }
 0x5bf   : > { %v1951_v0 = vmul.f32 %v10865_v29, %v10865_v29 }
 0x5c1   : > { %v1957_v32 = vsel %vm1455_vm5, %v1951_v0, 0.0 }
 0x5c2   : > { %7798 = vmatmul.msk.bf16.vlgmr.msrb.gmra.mxu3 %vm1243_vm2, %v13221_v56 }
 0x5c3   : > { %3156 = vmatpush.bf16.xpose.msrb.mxu3 %v3147_v25 }
 0x5c5   : > { %v10874_v48 = vpop.xlane.xlu1 %1574 }
 0x5de   : > { %v10862_v7 = vpop.f32.mrf.mxu0 }
 0x5df   : > { %v2302_v6 = vsel %vm1455_vm5, %v10862_v7, 0.0 }
 0x5e0   : > { %2303 = vadd.xlane.f32.xlu0 %v2302_v6 }
 0x5e3   : > { %v10869_v33 = vpop.f32.mrf.mxu1 }
 0x5e6   : > { %v2273_v61 = vpop.f32.mrf.mxu0 }
 0x5e7   : > { %v13223_v61 = vld [vmem:[#allocation25_spill] sm:$0xff] }
 0x5e8   : > { %1958 = vadd.xlane.f32.xlu0 %v1957_v32  ;;  %v2919_v32 = vsel %vm1243_vm2, %v13223_v61, 0  ;;  %v13228_v61 = vld [vmem:[#allocation32_spill] sm:$0xff] }
 0x5eb   : > { %v2294_v13 = vpop.f32.mrf.mxu1 }
 0x5ee   : > { %v2449_v35 = vpop.f32.mrf.mxu0 }
 0x5f3   : > { %v2472_v55 = vpop.f32.mrf.mxu1 }
 0x5f6   : > { %v2451_v45 = vpop.f32.mrf.mxu0 }
 0x5fb   : > { %v2474_v2 = vpop.f32.mrf.mxu1 }
 0x5fe   : > { %v10876_v31 = vpop.xlane.xlu1 %1565  ;;  %v2541_v4 = vpop.f32.mrf.mxu0 }
 0x5ff   : > { %v2542_v12 = vadd.f32 %v2541_v4, %v2449_v35  ;;  %v13224_v4 = vld [vmem:[#allocation38_spill] sm:$0xff] }
 0x601   : > { %v2572_v23 = vmul.f32 %v10820_v63, %v2542_v12  ;;  %v2992_v12 = vsel %vm1459_vm3, %v13224_v4, 0 }
 0x603   : > { %v2576_v18 = vpack.c.bf16 %v2572_v23, %v2572_v23  ;;  %v2564_v3 = vpop.f32.mrf.mxu1  ;;  %v13225_v23 = vld [vmem:[#allocation24_spill] sm:$0xff] }
 0x604   : > { %v2565_v57 = vadd.f32 %v2564_v3, %v2472_v55 }
 0x605   : > { %7791 = vmatmul.msk.bf16.vlgmr.msrb.gmra.mxu0 %vm1455_vm5, %v2576_v18  ;;  %v2305_v18 = vsel %vm1455_vm5, %v10869_v33, 0.0 }
 0x606   : > { %v2573_v25 = vmul.f32 %v10820_v63, %v2565_v57  ;;  %2905 = vmatpush.bf16.xpose.msrb.mxu0 %v2896_v30  ;;  %v1941_v56 = vpop.xlane.xlu1 %1940  ;;  %v2543_v17 = vpop.f32.mrf.mxu0  ;;  %v2296_v30 = vsel %vm1455_vm5, %v10789_v59, 0.0 }
 0x607   : > { %v1945_v24 = vmul.f32 %v1941_v56, %v10720_v39  ;;  %v13227_v17 = vld [vmem:[#allocation29_spill] sm:$0xff] }
 0x608   : > { %v2577_v6 = vpack.c.bf16 %v2573_v25, %v2573_v25  ;;  %v2299_v25 = vsel %vm1455_vm5, %v10803_v19, 0.0 }
 0x609   : > { %v10885_v0 = vsub.f32 %v10762_v5, %v1945_v24  ;;  %v3170_v24 = vsel %vm1243_vm2, %v13227_v17, 0 }
 0x60a   : > { %7792 = vmatmul.msk.bf16.vlgmr.msrb.gmra.mxu1 %vm1455_vm5, %v2577_v6 }
 0x60b   : > { %2928 = vmatpush.bf16.xpose.msrb.mxu1 %v2919_v32  ;;  %v2566_v13 = vpop.f32.mrf.mxu1  ;;  %v1953_v35 = vmul.f32 %v10885_v0, %v10885_v0  ;;  %v13229_v32 = vld [vmem:[#allocation40_spill] sm:$0xff] }
 0x60c   : > { %v3193_v13 = vsel %vm1243_vm2, %v13229_v32, 0  ;;  %v3316_v32 = vsel %vm1459_vm3, %v10676_v53, 0 }
 0x60d   : > { %v1963_v63 = vsel %vm1455_vm5, %v1953_v35, 0.0 }
 0x60e   : > { %1964 = vadd.xlane.f32.xlu2 %v1963_v63  ;;  %v1932_v55 = vpop.xlane.xlu1 %1931 }
 0x60f   : > { %v1942_v45 = vmul.f32 %v1932_v55, %v10720_v39 }
 0x611   : > { %v10895_v2 = vsub.f32 %v10614_v50, %v1942_v45  ;;  %v3013_v50 = vsel %vm1459_vm3, %v10630_v9, 0 }
 0x613   : > { %v1950_v5 = vmul.f32 %v10895_v2, %v10895_v2 }
 0x615   : > { %7795 = vmatmul.msk.bf16.vlgmr.msra.gmra.mxu0 %vm1243_vm2, %v13225_v23  ;;  %v1954_v3 = vsel %vm1455_vm5, %v1950_v5, 0.0  ;;  %v10926_v5 = vld [vmem:[#allocation3 + $0x20] sm:$0xff] }
 0x616   : > { %3001 = vmatpush.bf16.msra.mxu0 %v2992_v12  ;;  %2306 = vadd.xlane.f32.xlu2 %v2305_v18 }
 0x617   : > { %1955 = vadd.xlane.f32.xlu1 %v1954_v3  ;;  %v10906_v57 = vpop.f32.mrf.mxu2  ;;  %v13230_v3 = vld [vmem:[#allocation26_spill] sm:$0xff] }
 0x61a   : > { %7796 = vmatmul.msk.bf16.vlgmr.msra.gmra.mxu1 %vm1243_vm2, %v13226_v28 }
 0x61b   : > { %3022 = vmatpush.bf16.msra.mxu1 %v3013_v50  ;;  %v3216_v50 = vsel %vm1243_vm2, %v13230_v3, 0 }
 0x61e   : > { %2297 = vadd.xlane.f32.xlu2 %v2296_v30 }
 0x61f   : > { %2300 = vadd.xlane.f32.xlu1 %v2299_v25  ;;  %v2597_v56 = vpop.f32.mrf.mxu2 }
 0x625   : > { %v10918_v6 = vpop.f32.mrf.mxu3  ;;  %7799 = vmatmul.msk.bf16.vlgmr.msrb.gmra.mxu0 %vm1243_vm2, %v13228_v61 }
 0x626   : > { %3179 = vmatpush.bf16.xpose.msrb.mxu0 %v3170_v24  ;;  %v13231_v24 = vld [vmem:[#allocation37_spill] sm:$0xff] }
 0x627   : > { %v2769_v9 = vpop.f32.mrf.mxu2  ;;  %v3239_v61 = vsel %vm1243_vm2, %v13231_v24, 0 }
 0x62a   : > { %7800 = vmatmul.msk.bf16.vlgmr.msrb.gmra.mxu1 %vm1243_vm2, %v10588_v22  ;;  %v10933_v17 = vpop.xlane.xlu0 %1961 }
 0x62b   : > { %3202 = vmatpush.bf16.xpose.msrb.mxu1 %v3193_v13  ;;  %v13232_v13 = vld [vmem:[#allocation35_spill] sm:$0xff] }
 0x62d   : > { %v2618_v35 = vpop.f32.mrf.mxu3 }
 0x62f   : > { %v2771_v63 = vpop.f32.mrf.mxu2 }
 0x635   : > { %v2792_v55 = vpop.f32.mrf.mxu3 }
 0x637   : > { %v2861_v45 = vpop.f32.mrf.mxu2 }
 0x638   : > { %v2862_v4 = vadd.f32 %v2861_v45, %v2769_v9 }
 0x63a   : > { %v2936_v12 = vmul.f32 %v10926_v5, %v2862_v4 }
 0x63c   : > { %v2940_v23 = vpack.c.bf16 %v2936_v12, %v2936_v12 }
 0x63d   : > { %v2794_v18 = vpop.f32.mrf.mxu3 }
 0x63e   : > { %7801 = vmatmul.msk.bf16.vlgmr.msra.gmra.mxu2 %vm1455_vm5, %v2940_v23  ;;  %v13233_v23 = vld [vmem:[#allocation34_spill] sm:$0xff] }
 0x63f   : > { %3225 = vmatpush.bf16.xpose.msra.mxu2 %v3216_v50  ;;  %v2863_v28 = vpop.f32.mrf.mxu2  ;;  %v3337_v53 = vsel %vm1459_vm3, %v13233_v23, 0 }
 0x645   : > { %v2884_v22 = vpop.f32.mrf.mxu3 }
 0x646   : > { %v2885_v30 = vadd.f32 %v2884_v22, %v2792_v55 }
 0x648   : > { %v2937_v25 = vmul.f32 %v10926_v5, %v2885_v30 }
 0x64a   : > { %v2941_v56 = vpack.c.bf16 %v2937_v25, %v2937_v25  ;;  %v3513_v25 = vsel %vm1243_vm2, %v10686_v27, 0 }
 0x64c   : > { %7802 = vmatmul.msk.bf16.vlgmr.msra.gmra.mxu3 %vm1455_vm5, %v2941_v56  ;;  %v13234_v56 = vld [vmem:[#allocation27_spill] sm:$0xff] }
 0x64d   : > { %3248 = vmatpush.bf16.xpose.msra.mxu3 %v3239_v61  ;;  %v2886_v9 = vpop.f32.mrf.mxu3 }
 0x64e   : > { %7805 = vmatmul.msk.bf16.vlgmr.msrb.gmra.mxu2 %vm1243_vm2, %v13232_v13 }
 0x64f   : > { %3325 = vmatpush.bf16.msrb.mxu2 %v3316_v32 }
 0x653   : > { %v2304_v35 = vpop.xlane.xlu0 %2303 }
 0x654   : > { %v2310_v63 = vmul.f32 %v2304_v35, %v10720_v39 }
 0x656   : > { %v10944_v55 = vsub.f32 %v10862_v7, %v2310_v63  ;;  %v3490_v7 = vsel %vm1243_vm2, %v10605_v16, 0 }
 0x658   : > { %v2318_v45 = vmul.f32 %v10944_v55, %v10944_v55 }
 0x65a   : > { %v2326_v4 = vsel %vm1455_vm5, %v2318_v45, 0.0 }
 0x65b   : > { %2327 = vadd.xlane.f32.xlu1 %v2326_v4  ;;  %v1959_v12 = vpop.xlane.xlu0 %1958 }
 0x65c   : > { %v1967_v18 = vmul.f32 %v1959_v12, %v10720_v39  ;;  %7806 = vmatmul.msk.bf16.vlgmr.msrb.gmra.mxu3 %vm1243_vm2, %v10607_v21 }
 0x65d   : > { %3346 = vmatpush.bf16.msrb.mxu3 %v3337_v53 }
 0x65e   : > { %v1971_v3 = vadd.f32 1e-06, %v1967_v18  ;;  %7809 = vmatmul.msk.bf16.vlgmr.msra.gmra.mxu2 %vm1243_vm2, %v10618_v20 }
 0x65f   : > { %3499 = vmatpush.bf16.xpose.msra.mxu2 %v3490_v7 }
 0x660   : > { %9009 = vrsqrt.f32 %v1971_v3  ;;  %vm1990_vm8 = vweird.f32 %v1971_v3 }
 0x666   : > { %v9010_v50 = vpop.eup %9009 }
 0x667   : > { %v1985_v28 = vmul.f32 %v9010_v50, %v1971_v3  ;;  %vm1991_vm7 = vweird.f32 %v9010_v50 }
 0x668   : > { %vm1992_vm9 = vmor %vm1990_vm8, %vm1991_vm7 }
 0x669   : > { %v1986_v22 = vmul.f32 %v9010_v50, %v1985_v28 }
 0x66b   : > { %v1987_v30 = vmul.f32 0.5, %v1986_v22 }
 0x66c   : > { %7810 = vmatmul.msk.bf16.vlgmr.msra.gmra.mxu3 %vm1243_vm2, %v13234_v56 }
 0x66d   : > { %v1988_v21 = vsub.f32 1.5, %v1987_v30  ;;  %3522 = vmatpush.bf16.xpose.msra.mxu3 %v3513_v25 }
 0x66f   : > { %v1989_v16 = vmul.f32 %v9010_v50, %v1988_v21 }
 0x671   : > { %v1993_v24 = vsel %vm1992_vm9, %v9010_v50, %v1989_v16 }
 0x672   : > { %v2015_v20 = vmul.f32 %v1993_v24, %v10865_v29 }
 0x674   : > { %4220 = vrot.lane.b32.xlu2 %v2015_v20, %s9498_s22 }
 0x681   : > { %v10964_v61 = vpop.xlane.xlu2 %1964 }
 0x682   : > { %v10966_v9 = vpop.f32.mrf.mxu0 }
 0x683   : > { %v2668_v27 = vsel %vm1455_vm5, %v10966_v9, 0.0 }
 0x684   : > { %2669 = vadd.xlane.f32.xlu1 %v2668_v27 }
 0x687   : > { %v10970_v32 = vpop.f32.mrf.mxu1 }
 0x689   : > { %v2307_v13 = vpop.xlane.xlu2 %2306 }
 0x68a   : > { %v1956_v35 = vpop.xlane.xlu1 %1955  ;;  %v2639_v63 = vpop.f32.mrf.mxu0 }
 0x68b   : > { %v1966_v45 = vmul.f32 %v1956_v35, %v10720_v39 }
 0x68d   : > { %v1970_v4 = vadd.f32 1e-06, %v1966_v45 }
 0x68f   : > { %9011 = vrsqrt.f32 %v1970_v4  ;;  %v2660_v29 = vpop.f32.mrf.mxu1  ;;  %vm1980_vm11 = vweird.f32 %v1970_v4 }
 0x691   : > { %v2298_v12 = vpop.xlane.xlu2 %2297 }
 0x692   : > { %v2308_v23 = vmul.f32 %v2298_v12, %v10720_v39  ;;  %v2301_v53 = vpop.xlane.xlu1 %2300  ;;  %v2815_v18 = vpop.f32.mrf.mxu0 }
 0x693   : > { %v2309_v7 = vmul.f32 %v2301_v53, %v10720_v39 }
 0x694   : > { %v10976_v3 = vsub.f32 %v10789_v59, %v2308_v23  ;;  %v2665_v23 = vsel %vm1455_vm5, %v10918_v6, 0.0 }
 0x695   : > { %v9012_v50 = vpop.eup %9011  ;;  %v10979_v28 = vsub.f32 %v10803_v19, %v2309_v7 }
 0x696   : > { %v1975_v22 = vmul.f32 %v9012_v50, %v1970_v4  ;;  %v2316_v21 = vmul.f32 %v10976_v3, %v10976_v3  ;;  %vm1981_vm10 = vweird.f32 %v9012_v50 }
 0x697   : > { %v2838_v30 = vpop.f32.mrf.mxu1  ;;  %v2317_v25 = vmul.f32 %v10979_v28, %v10979_v28  ;;  %vm1982_vm12 = vmor %vm1980_vm11, %vm1981_vm10 }
 0x698   : > { %v1976_v56 = vmul.f32 %v9012_v50, %v1975_v22  ;;  %v2320_v27 = vsel %vm1455_vm5, %v2316_v21, 0.0 }
 0x699   : > { %v2323_v16 = vsel %vm1455_vm5, %v2317_v25, 0.0 }
 0x69a   : > { %v1977_v24 = vmul.f32 0.5, %v1976_v56  ;;  %2324 = vadd.xlane.f32.xlu1 %v2323_v16  ;;  %v2817_v20 = vpop.f32.mrf.mxu0  ;;  %v13235_v56 = vld [vmem:[#allocation43_spill] sm:$0xff] }
 0x69b   : > { %v3262_v4 = vsel %vm1243_vm2, %v13235_v56, 0 }
 0x69c   : > { %v1978_v59 = vsub.f32 1.5, %v1977_v24  ;;  %v13236_v24 = vld [vmem:[#allocation31_spill] sm:$0xff] }
 0x69d   : > { %2321 = vadd.xlane.f32.xlu2 %v2320_v27 }
 0x69e   : > { %v1979_v19 = vmul.f32 %v9012_v50, %v1978_v59 }
 0x69f   : > { %v2840_v35 = vpop.f32.mrf.mxu1 }
 0x6a0   : > { %v1983_v63 = vsel %vm1982_vm12, %v9012_v50, %v1979_v19  ;;  %v13237_v19 = vld [vmem:[#allocation33_spill] sm:$0xff] }
 0x6a1   : > { %v2014_v45 = vmul.f32 %v1983_v63, %v10895_v2 }
 0x6a2   : > { %v2907_v29 = vpop.f32.mrf.mxu0 }
 0x6a3   : > { %4218 = vrot.lane.b32.xlu0 %v2014_v45, %s9498_s22  ;;  %v2908_v12 = vadd.f32 %v2907_v29, %v2815_v18  ;;  %v3285_v18 = vsel %vm1243_vm2, %v10664_v51, 0  ;;  %v2311_v51 = vmul.f32 %v2307_v13, %v10720_v39  ;;  %v13238_v13 = vld [vmem:[#allocation44_spill] sm:$0xff] }
 0x6a4   : > { %v3559_v35 = vsel %vm1243_vm2, %v13238_v13, 0 }
 0x6a5   : > { %v2938_v53 = vmul.f32 %v10926_v5, %v2908_v12  ;;  %2666 = vadd.xlane.f32.xlu2 %v2665_v23  ;;  %v11011_v59 = vsub.f32 %v10869_v33, %v2311_v51  ;;  %v2662_v12 = vsel %vm1455_vm5, %v10906_v57, 0.0  ;;  %v13239_v51 = vld [vmem:[#allocation39_spill] sm:$0xff] }
 0x6a7   : > { %v2942_v7 = vpack.c.bf16 %v2938_v53, %v2938_v53  ;;  %v2930_v22 = vpop.f32.mrf.mxu1 }
 0x6a8   : > { %v2931_v25 = vadd.f32 %v2930_v22, %v2838_v30  ;;  %v3358_v30 = vsel %vm1459_vm3, %v10638_v11, 0  ;;  %v2319_v11 = vmul.f32 %v11011_v59, %v11011_v59 }
 0x6a9   : > { %7803 = vmatmul.msk.bf16.vlgmr.msra.gmra.mxu0 %vm1455_vm5, %v2942_v7  ;;  %v11030_v7 = vld [vmem:[#allocation3 + $0x28] sm:$0xff] }
 0x6aa   : > { %v2939_v2 = vmul.f32 %v10926_v5, %v2931_v25  ;;  %3271 = vmatpush.bf16.xpose.msra.mxu0 %v3262_v4  ;;  %v2909_v50 = vpop.f32.mrf.mxu0  ;;  %v3379_v5 = vsel %vm1459_vm3, %v10710_v44, 0  ;;  %v2329_v44 = vsel %vm1455_vm5, %v2319_v11, 0.0  ;;  %v3582_v4 = vsel %vm1243_vm2, %v10696_v49, 0 }
 0x6ab   : > { %v1576_v50 = vmul.f32 %v10876_v31, %v10720_v39  ;;  %v3605_v11 = vsel %vm1243_vm2, %v13239_v51, 0  ;;  %v3682_v31 = vsel %vm1459_vm3, %v10692_v58, 0  ;;  %v3703_v58 = vsel %vm1459_vm3, %v10752_v37, 0 }
 0x6ac   : > { %v2943_v21 = vpack.c.bf16 %v2939_v2, %v2939_v2 }
 0x6ae   : > { %7804 = vmatmul.msk.bf16.vlgmr.msra.gmra.mxu1 %vm1455_vm5, %v2943_v21 }
 0x6af   : > { %3294 = vmatpush.bf16.xpose.msra.mxu1 %v3285_v18  ;;  %v2932_v16 = vpop.f32.mrf.mxu1 }
 0x6b0   : > { %v1580_v16 = vadd.f32 1e-06, %v1576_v50 }
 0x6b2   : > { %9013 = vrsqrt.f32 %v1580_v16  ;;  %vm1590_vm14 = vweird.f32 %v1580_v16 }
 0x6b9   : > { %7807 = vmatmul.msk.bf16.vlgmr.msrb.gmra.mxu0 %vm1243_vm2, %v10646_v10  ;;  %v3536_v10 = vsel %vm1243_vm2, %v10718_v34, 0  ;;  %v2671_v34 = vsel %vm1455_vm5, %v10970_v32, 0.0 }
 0x6ba   : > { %3367 = vmatpush.bf16.msrb.mxu0 %v3358_v30 }
 0x6be   : > { %7808 = vmatmul.msk.bf16.vlgmr.msrb.gmra.mxu1 %vm1243_vm2, %v13236_v24 }
 0x6bf   : > { %3388 = vmatpush.bf16.msrb.mxu1 %v3379_v5 }
 0x6c1   : > { %v11008_v20 = vpop.f32.mrf.mxu2 }
 0x6c9   : > { %v2963_v27 = vpop.f32.mrf.mxu2  ;;  %7811 = vmatmul.msk.bf16.vlgmr.msra.gmra.mxu0 %vm1243_vm2, %v13237_v19  ;;  %v13240_v19 = vld [vmem:[#allocation36_spill] sm:$0xff] }
 0x6ca   : > { %3545 = vmatpush.bf16.xpose.msra.mxu0 %v3536_v10 }
 0x6cd   : > { %2330 = vadd.xlane.f32.xlu0 %v2329_v44  ;;  %v9014_v44 = vpop.eup %9013 }
 0x6ce   : > { %7812 = vmatmul.msk.bf16.vlgmr.msra.gmra.mxu1 %vm1243_vm2, %v10590_v41  ;;  %v11038_v21 = vpop.xlane.xlu1 %2327  ;;  %vm1591_vm13 = vweird.f32 %v9014_v44 }
 0x6cf   : > { %3568 = vmatpush.bf16.xpose.msra.mxu1 %v3559_v35  ;;  %v11024_v33 = vpop.f32.mrf.mxu3  ;;  %vm1592_vm15 = vmor %vm1590_vm14, %vm1591_vm13  ;;  %vm4330_vm13 = vcmask 130048  }
 0x6d1   : > { %v3135_v63 = vpop.f32.mrf.mxu2 }
 0x6d5   : > { %2672 = vadd.xlane.f32.xlu0 %v2671_v34 }
 0x6d7   : > { %v2984_v45 = vpop.f32.mrf.mxu3 }
 0x6d9   : > { %v3137_v29 = vpop.f32.mrf.mxu2 }
 0x6dd   : > { %2663 = vadd.xlane.f32.xlu0 %v2662_v12  ;;  %v11061_v12 = vpop.permute.xlu2 %4220 }
 0x6df   : > { %v3158_v23 = vpop.f32.mrf.mxu3 }
 0x6e1   : > { %v3227_v53 = vpop.f32.mrf.mxu2 }
 0x6e2   : > { %v3228_v22 = vadd.f32 %v3227_v53, %v3135_v63  ;;  %v1585_v63 = vmul.f32 %v9014_v44, %v1580_v16 }
 0x6e4   : > { %v3302_v41 = vmul.f32 %v11030_v7, %v3228_v22  ;;  %v1586_v45 = vmul.f32 %v9014_v44, %v1585_v63 }
 0x6e6   : > { %v3306_v25 = vpack.c.bf16 %v3302_v41, %v3302_v41  ;;  %v1587_v29 = vmul.f32 0.5, %v1586_v45 }
 0x6e7   : > { %v3160_v56 = vpop.f32.mrf.mxu3 }
 0x6e8   : > { %7813 = vmatmul.msk.bf16.vlgmr.msrb.gmra.mxu2 %vm1455_vm5, %v3306_v25  ;;  %v1588_v53 = vsub.f32 1.5, %v1587_v29 }
 0x6e9   : > { %3591 = vmatpush.bf16.xpose.msrb.mxu2 %v3582_v4  ;;  %v3229_v2 = vpop.f32.mrf.mxu2 }
 0x6ea   : > { %v1589_v22 = vmul.f32 %v9014_v44, %v1588_v53 }
 0x6ec   : > { %v1593_v4 = vsel %vm1592_vm15, %v9014_v44, %v1589_v22 }
 0x6ed   : > { %v1624_v2 = vmul.f32 %v1593_v4, %v10813_v8 }
 0x6ef   : > { %v3250_v18 = vpop.f32.mrf.mxu3 }
 0x6f0   : > { %v3251_v30 = vadd.f32 %v3250_v18, %v3158_v23  ;;  %v13241_v23 = vld [vmem:[#allocation41_spill] sm:$0xff]  ;;  %v3879_v18 = vsel %vm1243_vm2, %v10698_v47, 0 }
 0x6f2   : > { %v3303_v5 = vmul.f32 %v11030_v7, %v3251_v30 }
 0x6f4   : > { %v3307_v24 = vpack.c.bf16 %v3303_v5, %v3303_v5 }
 0x6f6   : > { %7814 = vmatmul.msk.bf16.vlgmr.msrb.gmra.mxu3 %vm1455_vm5, %v3307_v24 }
 0x6f7   : > { %3614 = vmatpush.bf16.xpose.msrb.mxu3 %v3605_v11  ;;  %v3252_v49 = vpop.f32.mrf.mxu3  ;;  %v2670_v10 = vpop.xlane.xlu1 %2669 }
 0x6f8   : > { %v2676_v27 = vmul.f32 %v2670_v10, %v10720_v39  ;;  %7817 = vmatmul.msk.bf16.vlgmr.msra.gmra.mxu2 %vm1243_vm2, %v13240_v19 }
 0x6f9   : > { %3691 = vmatpush.bf16.msra.mxu2 %v3682_v31 }
 0x6fa   : > { %v11050_v13 = vsub.f32 %v10966_v9, %v2676_v27  ;;  %v3856_v9 = vsel %vm1243_vm2, %v10622_v26, 0 }
 0x6fc   : > { %v2684_v35 = vmul.f32 %v11050_v13, %v11050_v13 }
 0x6fe   : > { %v2692_v34 = vsel %vm1455_vm5, %v2684_v35, 0.0 }
 0x6ff   : > { %2693 = vadd.xlane.f32.xlu2 %v2692_v34 }
 0x706   : > { %7818 = vmatmul.msk.bf16.vlgmr.msra.gmra.mxu3 %vm1243_vm2, %v10620_v54 }
 0x707   : > { %3712 = vmatpush.bf16.msra.mxu3 %v3703_v58 }
 0x708   : > { %7821 = vmatmul.msk.bf16.vlgmr.msrb.gmra.mxu2 %vm1243_vm2, %v13241_v23 }
 0x709   : > { %3865 = vmatpush.bf16.xpose.msrb.mxu2 %v3856_v9 }
 0x70d   : > { %v2325_v41 = vpop.xlane.xlu1 %2324 }
 0x70e   : > { %v2333_v25 = vmul.f32 %v2325_v41, %v10720_v39 }
 0x710   : > { %v2337_v37 = vadd.f32 1e-06, %v2333_v25  ;;  %v2322_v54 = vpop.xlane.xlu2 %2321 }
 0x711   : > { %v2332_v56 = vmul.f32 %v2322_v54, %v10720_v39 }
 0x712   : > { %9015 = vrsqrt.f32 %v2337_v37  ;;  %vm2356_vm1 = vweird.f32 %v2337_v37 }
 0x713   : > { %v2336_v26 = vadd.f32 1e-06, %v2332_v56 }
 0x715   : > { %9017 = vrsqrt.f32 %v2336_v26  ;;  %v4219_v50 = vpop.permute.xlu0 %4218  ;;  %vm2346_vm8 = vweird.f32 %v2336_v26 }
 0x716   : > { %v11071_v30 = vsel %vm1455_vm5, %v1624_v2, %v4219_v50  ;;  %7822 = vmatmul.msk.bf16.vlgmr.msrb.gmra.mxu3 %vm1243_vm2, %v10652_v36 }
 0x717   : > { %3888 = vmatpush.bf16.xpose.msrb.mxu3 %v3879_v18 }
 0x718   : > { %v9016_v16 = vpop.eup %9015  ;;  %v2667_v27 = vpop.xlane.xlu2 %2666 }
 0x719   : > { %v2351_v5 = vmul.f32 %v9016_v16, %v2337_v37  ;;  %vm2357_vm0 = vweird.f32 %v9016_v16  ;;  %v2675_v44 = vmul.f32 %v2667_v27, %v10720_v39 }
 0x71a   : > { %vm2358_vm6 = vmor %vm2356_vm1, %vm2357_vm0 }
 0x71b   : > { %v9018_v24 = vpop.eup %9017  ;;  %v2352_v51 = vmul.f32 %v9016_v16, %v2351_v5  ;;  %v11081_v29 = vsub.f32 %v10918_v6, %v2675_v44 }
 0x71c   : > { %v2341_v11 = vmul.f32 %v9018_v24, %v2336_v26  ;;  %vm2347_vm7 = vweird.f32 %v9018_v24 }
 0x71d   : > { %v2353_v49 = vmul.f32 0.5, %v2352_v51  ;;  %vm2348_vm9 = vmor %vm2346_vm8, %vm2347_vm7  ;;  %v13242_v51 = vld [vmem:[#allocation45_spill] sm:$0xff] }
 0x71e   : > { %v2342_v10 = vmul.f32 %v9018_v24, %v2341_v11  ;;  %v3628_v11 = vsel %vm1243_vm2, %v13242_v51, 0 }
 0x71f   : > { %v2354_v8 = vsub.f32 1.5, %v2353_v49 }
 0x720   : > { %v2343_v31 = vmul.f32 0.5, %v2342_v10 }
 0x721   : > { %v2355_v19 = vmul.f32 %v9016_v16, %v2354_v8 }
 0x722   : > { %v2344_v47 = vsub.f32 1.5, %v2343_v31 }
 0x723   : > { %v2359_v36 = vsel %vm2358_vm6, %v9016_v16, %v2355_v19 }
 0x724   : > { %v2345_v35 = vmul.f32 %v9018_v24, %v2344_v47  ;;  %v2381_v63 = vmul.f32 %v2359_v36, %v10979_v28  ;;  %v2683_v28 = vmul.f32 %v11081_v29, %v11081_v29 }
 0x726   : > { %4236 = vrot.lane.b32.xlu0 %v2381_v63, %s9488_s10  ;;  %v11078_v34 = vpop.f32.mrf.mxu0  ;;  %v2349_v45 = vsel %vm2348_vm9, %v9018_v24, %v2345_v35  ;;  %v2689_v22 = vsel %vm1455_vm5, %v2683_v28, 0.0  ;;  %v13245_v28 = vld [vmem:[#allocation57_spill] sm:$0xff] }
 0x727   : > { %v3034_v58 = vsel %vm1455_vm5, %v11078_v34, 0.0  ;;  %v2380_v9 = vmul.f32 %v2349_v45, %v10976_v3  ;;  %v13243_v45 = vld [vmem:[#allocation49_spill] sm:$0xff] }
 0x728   : > { %3035 = vadd.xlane.f32.xlu2 %v3034_v58  ;;  %v13244_v58 = vld [vmem:[#allocation65_spill] sm:$0xff] }
 0x729   : > { %4234 = vrot.lane.b32.xlu1 %v2380_v9, %s9488_s10  ;;  %v3745_v9 = vsel %vm1459_vm3, %v13244_v58, 0 }
 0x72b   : > { %v11087_v23 = vpop.f32.mrf.mxu1 }
 0x72c   : > { %v3037_v63 = vsel %vm1455_vm5, %v11087_v23, 0.0 }
 0x72e   : > { %v3005_v53 = vpop.f32.mrf.mxu0 }
 0x72f   : > { %v3028_v53 = vsel %vm1455_vm5, %v11008_v20, 0.0 }
 0x730   : > { %2690 = vadd.xlane.f32.xlu2 %v2689_v22  ;;  %v13246_v22 = vld [vmem:[#allocation58_spill] sm:$0xff] }
 0x733   : > { %v3026_v41 = vpop.f32.mrf.mxu1 }
 0x734   : > { %v3902_v41 = vsel %vm1243_vm2, %v13246_v22, 0 }
 0x736   : > { %v3181_v6 = vpop.f32.mrf.mxu0 }
 0x73b   : > { %v3204_v25 = vpop.f32.mrf.mxu1 }
 0x73e   : > { %v3183_v37 = vpop.f32.mrf.mxu0 }
 0x73f   : > { %v3925_v37 = vsel %vm1243_vm2, %v10793_v38, 0  ;;  %v11144_v38 = vld [vmem:[#allocation3 + $0x30] sm:$0xff] }
 0x740   : > { %v11092_v54 = vpop.xlane.xlu0 %2330 }
 0x743   : > { %v3206_v56 = vpop.f32.mrf.mxu1 }
 0x746   : > { %v3273_v3 = vpop.f32.mrf.mxu0 }
 0x747   : > { %v3274_v4 = vadd.f32 %v3273_v3, %v3181_v6  ;;  %v13247_v6 = vld [vmem:[#allocation60_spill] sm:$0xff]  ;;  %v13248_v3 = vld [vmem:[#allocation46_spill] sm:$0xff] }
 0x748   : > { %v2673_v26 = vpop.xlane.xlu0 %2672 }
 0x749   : > { %v3304_v2 = vmul.f32 %v11030_v7, %v3274_v4  ;;  %v2677_v50 = vmul.f32 %v2673_v26, %v10720_v39 }
 0x74b   : > { %v3308_v18 = vpack.c.bf16 %v3304_v2, %v3304_v2  ;;  %v11097_v16 = vsub.f32 %v10970_v32, %v2677_v50  ;;  %v3296_v5 = vpop.f32.mrf.mxu1  ;;  %v3651_v32 = vsel %vm1243_vm2, %v10678_v15, 0  ;;  %v3724_v15 = vsel %vm1459_vm3, %v10714_v52, 0 }
 0x74c   : > { %v3297_v24 = vadd.f32 %v3296_v5, %v3204_v25  ;;  %v1577_v25 = vmul.f32 %v10859_v43, %v10720_v39 }
 0x74d   : > { %7815 = vmatmul.msk.bf16.vlgmr.msrb.gmra.mxu0 %vm1455_vm5, %v3308_v18  ;;  %v2685_v8 = vmul.f32 %v11097_v16, %v11097_v16 }
 0x74e   : > { %v3305_v49 = vmul.f32 %v11030_v7, %v3297_v24  ;;  %3637 = vmatpush.bf16.xpose.msrb.mxu0 %v3628_v11  ;;  %v3275_v10 = vpop.f32.mrf.mxu0  ;;  %v1581_v56 = vadd.f32 1e-06, %v1577_v25 }
 0x74f   : > { %v2695_v47 = vsel %vm1455_vm5, %v2685_v8, 0.0 }
 0x750   : > { %v3309_v31 = vpack.c.bf16 %v3305_v49, %v3305_v49  ;;  %v2664_v27 = vpop.xlane.xlu0 %2663  ;;  %9019 = vrsqrt.f32 %v1581_v56  ;;  %vm1600_vm11 = vweird.f32 %v1581_v56 }
 0x751   : > { %v2674_v19 = vmul.f32 %v2664_v27, %v10720_v39 }
 0x752   : > { %7816 = vmatmul.msk.bf16.vlgmr.msrb.gmra.mxu1 %vm1455_vm5, %v3309_v31 }
 0x753   : > { %v11111_v44 = vsub.f32 %v10906_v57, %v2674_v19  ;;  %3660 = vmatpush.bf16.xpose.msrb.mxu1 %v3651_v32  ;;  %v3298_v7 = vpop.f32.mrf.mxu1  ;;  %2696 = vadd.xlane.f32.xlu1 %v2695_v47  ;;  %v3031_v57 = vsel %vm1455_vm5, %v11024_v33, 0.0  ;;  %v13249_v47 = vld [vmem:[#allocation48_spill] sm:$0xff] }
 0x754   : > { %v3948_v7 = vsel %vm1243_vm2, %v13249_v47, 0 }
 0x755   : > { %v2682_v36 = vmul.f32 %v11111_v44, %v11111_v44 }
 0x756   : > { %v9020_v50 = vpop.eup %9019 }
 0x757   : > { %v2686_v35 = vsel %vm1455_vm5, %v2682_v36, 0.0  ;;  %v1595_v18 = vmul.f32 %v9020_v50, %v1581_v56  ;;  %vm1601_vm10 = vweird.f32 %v9020_v50 }
 0x758   : > { %2687 = vadd.xlane.f32.xlu0 %v2686_v35  ;;  %vm1602_vm12 = vmor %vm1600_vm11, %vm1601_vm10 }
 0x759   : > { %v1596_v24 = vmul.f32 %v9020_v50, %v1595_v18  ;;  %v13252_v18 = vld [vmem:[#allocation52_spill] sm:$0xff] }
 0x75b   : > { %3038 = vadd.xlane.f32.xlu1 %v3037_v63  ;;  %v1597_v43 = vmul.f32 0.5, %v1596_v24 }
 0x75d   : > { %7819 = vmatmul.msk.bf16.vlgmr.msra.gmra.mxu0 %vm1243_vm2, %v13243_v45  ;;  %v1598_v49 = vsub.f32 1.5, %v1597_v43 }
 0x75e   : > { %3733 = vmatpush.bf16.msra.mxu0 %v3724_v15  ;;  %v13250_v15 = vld [vmem:[#allocation59_spill] sm:$0xff] }
 0x75f   : > { %v1599_v27 = vmul.f32 %v9020_v50, %v1598_v49 }
 0x760   : > { %3032 = vadd.xlane.f32.xlu0 %v3031_v57 }
 0x761   : > { %v1603_v36 = vsel %vm1602_vm12, %v9020_v50, %v1599_v27 }
 0x762   : > { %7820 = vmatmul.msk.bf16.vlgmr.msra.gmra.mxu1 %vm1243_vm2, %v13245_v28  ;;  %v1625_v45 = vmul.f32 %v1603_v36, %v13250_v15 }
 0x763   : > { %3754 = vmatpush.bf16.msra.mxu1 %v3745_v9  ;;  %3029 = vadd.xlane.f32.xlu1 %v3028_v53 }
 0x764   : > { %v4327_v57 = vsel %vm1455_vm5, %v1625_v45, %v11061_v12  ;;  %v13251_v12 = vld [vmem:[#allocation55_spill] sm:$0xff] }
 0x76b   : > { %v11130_v52 = vpop.f32.mrf.mxu2 }
 0x76d   : > { %7823 = vmatmul.msk.bf16.vlgmr.msrb.gmra.mxu0 %vm1243_vm2, %v13247_v6 }
 0x76e   : > { %3911 = vmatpush.bf16.xpose.msrb.mxu0 %v3902_v41 }
 0x772   : > { %7824 = vmatmul.msk.bf16.vlgmr.msrb.gmra.mxu1 %vm1243_vm2, %v13248_v3  ;;  %v11150_v35 = vpop.xlane.xlu2 %2693 }
 0x773   : > { %3934 = vmatpush.bf16.xpose.msrb.mxu1 %v3925_v37  ;;  %v3329_v4 = vpop.f32.mrf.mxu2 }
 0x774   : > { %v3971_v4 = vsel %vm1243_vm2, %v13251_v12, 0 }
 0x779   : > { %v11142_v26 = vpop.f32.mrf.mxu3 }
 0x77b   : > { %v3501_v2 = vpop.f32.mrf.mxu2 }
 0x781   : > { %v3350_v5 = vpop.f32.mrf.mxu3 }
 0x782   : > { %v13253_v5 = vld [vmem:[#allocation63_spill] sm:$0xff] }
 0x783   : > { %v3503_v51 = vpop.f32.mrf.mxu2 }
 0x789   : > { %v3524_v11 = vpop.f32.mrf.mxu3 }
 0x78b   : > { %v3593_v10 = vpop.f32.mrf.mxu2 }
 0x78c   : > { %v3594_v8 = vadd.f32 %v3593_v10, %v3501_v2  ;;  %v13254_v10 = vld [vmem:[#allocation62_spill] sm:$0xff] }
 0x78e   : > { %v3668_v31 = vmul.f32 %v11144_v38, %v3594_v8  ;;  %v4069_v8 = vsel %vm1459_vm3, %v13254_v10, 0 }
 0x790   : > { %v3672_v19 = vpack.c.bf16 %v3668_v31, %v3668_v31  ;;  %v13255_v31 = vld [vmem:[#allocation47_spill] sm:$0xff] }
 0x791   : > { %v3526_v32 = vpop.f32.mrf.mxu3 }
 0x792   : > { %7825 = vmatmul.msk.bf16.vlgmr.msra.gmra.mxu2 %vm1455_vm5, %v3672_v19 }
 0x793   : > { %3957 = vmatpush.bf16.xpose.msra.mxu2 %v3948_v7  ;;  %v3595_v63 = vpop.f32.mrf.mxu2 }
 0x794   : > { %v13256_v63 = vld [vmem:[#allocation50_spill] sm:$0xff] }
 0x798   : > { %v4237_v58 = vpop.permute.xlu0 %4236 }
 0x799   : > { %v11156_v9 = vsel %vm4330_vm13, %v4327_v57, %v4237_v58  ;;  %v3616_v28 = vpop.f32.mrf.mxu3 }
 0x79a   : > { %v3617_v53 = vadd.f32 %v3616_v28, %v3524_v11 }
 0x79b   : > { %v4235_v22 = vpop.permute.xlu1 %4234  ;;  %v3036_v41 = vpop.xlane.xlu2 %3035 }
 0x79c   : > { %v3669_v6 = vmul.f32 %v11144_v38, %v3617_v53  ;;  %v11161_v25 = vsel %vm4330_vm13, %v11071_v30, %v4235_v22  ;;  %v3042_v37 = vmul.f32 %v3036_v41, %v10720_v39  ;;  %v4048_v30 = vsel %vm1459_vm3, %v13252_v18, 0 }
 0x79e   : > { %v3673_v56 = vpack.c.bf16 %v3669_v6, %v3669_v6  ;;  %v11165_v3 = vsub.f32 %v11078_v34, %v3042_v37 }
 0x7a0   : > { %7826 = vmatmul.msk.bf16.vlgmr.msra.gmra.mxu3 %vm1455_vm5, %v3673_v56  ;;  %v3050_v2 = vmul.f32 %v11165_v3, %v11165_v3 }
 0x7a1   : > { %3980 = vmatpush.bf16.xpose.msra.mxu3 %v3971_v4  ;;  %v3618_v50 = vpop.f32.mrf.mxu3 }
 0x7a2   : > { %7829 = vmatmul.msk.bf16.vlgmr.msrb.gmra.mxu2 %vm1243_vm2, %v13253_v5  ;;  %v3058_v24 = vsel %vm1455_vm5, %v3050_v2, 0.0 }
 0x7a3   : > { %4057 = vmatpush.bf16.msrb.mxu2 %v4048_v30  ;;  %v2691_v34 = vpop.xlane.xlu2 %2690  ;;  %3059 = vadd.xlane.f32.xlu0 %v3058_v24 }
 0x7a4   : > { %v2699_v51 = vmul.f32 %v2691_v34, %v10720_v39 }
 0x7a6   : > { %v2703_v43 = vadd.f32 1e-06, %v2699_v51 }
 0x7a8   : > { %9021 = vrsqrt.f32 %v2703_v43  ;;  %vm2722_vm15 = vweird.f32 %v2703_v43 }
 0x7ae   : > { %v9022_v11 = vpop.eup %9021 }
 0x7af   : > { %v2717_v49 = vmul.f32 %v9022_v11, %v2703_v43  ;;  %vm2723_vm14 = vweird.f32 %v9022_v11 }
 0x7b0   : > { %7830 = vmatmul.msk.bf16.vlgmr.msrb.gmra.mxu3 %vm1243_vm2, %v13255_v31  ;;  %vm2724_vm0 = vmor %vm2722_vm15, %vm2723_vm14  ;;  %vm4340_vm14 = vcmask 261120  }
 0x7b1   : > { %v2718_v27 = vmul.f32 %v9022_v11, %v2717_v49  ;;  %4078 = vmatpush.bf16.msrb.mxu3 %v4069_v8  ;;  %v3397_v8 = vsel %vm1455_vm5, %v11142_v26, 0.0 }
 0x7b2   : > { %7833 = vmatmul.msk.bf16.vlgmr.msra.gmra.mxu2 %vm1243_vm2, %v10775_v40 }
 0x7b3   : > { %v2719_v19 = vmul.f32 0.5, %v2718_v27 }
 0x7b5   : > { %v2720_v32 = vsub.f32 1.5, %v2719_v19 }
 0x7b7   : > { %v2721_v47 = vmul.f32 %v9022_v11, %v2720_v32 }
 0x7b9   : > { %v2725_v7 = vsel %vm2724_vm0, %v9022_v11, %v2721_v47 }
 0x7ba   : > { %v2747_v36 = vmul.f32 %v2725_v7, %v11081_v29 }
 0x7bc   : > { %4252 = vrot.lane.b32.xlu0 %v2747_v36, %s9480_s28 }
 0x7c0   : > { %7834 = vmatmul.msk.bf16.vlgmr.msra.gmra.mxu3 %vm1243_vm2, %v13256_v63 }
 0x7c6   : > { %v11188_v15 = vpop.xlane.xlu1 %2696 }
 0x7ca   : > { %v11190_v45 = vpop.f32.mrf.mxu0 }
 0x7cb   : > { %v2688_v57 = vpop.xlane.xlu0 %2687  ;;  %v3400_v27 = vsel %vm1455_vm5, %v11190_v45, 0.0 }
 0x7cc   : > { %v2698_v40 = vmul.f32 %v2688_v57, %v10720_v39 }
 0x7ce   : > { %v2702_v58 = vadd.f32 1e-06, %v2698_v40  ;;  %v3039_v28 = vpop.xlane.xlu1 %3038 }
 0x7cf   : > { %v11193_v53 = vpop.f32.mrf.mxu1  ;;  %v3043_v22 = vmul.f32 %v3039_v28, %v10720_v39 }
 0x7d0   : > { %9023 = vrsqrt.f32 %v2702_v58  ;;  %vm2712_vm6 = vweird.f32 %v2702_v58 }
 0x7d1   : > { %v11197_v29 = vsub.f32 %v11087_v23, %v3043_v22  ;;  %v3994_v22 = vsel %vm1243_vm2, %v10777_v42, 0  ;;  %v13259_v42 = vld [vmem:[#allocation53_spill] sm:$0xff] }
 0x7d2   : > { %v3371_v41 = vpop.f32.mrf.mxu0 }
 0x7d3   : > { %v3051_v6 = vmul.f32 %v11197_v29, %v11197_v29  ;;  %v3033_v51 = vpop.xlane.xlu0 %3032 }
 0x7d4   : > { %v3041_v49 = vmul.f32 %v3033_v51, %v10720_v39 }
 0x7d5   : > { %v3061_v37 = vsel %vm1455_vm5, %v3051_v6, 0.0 }
 0x7d6   : > { %v9024_v56 = vpop.eup %9023  ;;  %3062 = vadd.xlane.f32.xlu2 %v3061_v37  ;;  %v3030_v12 = vpop.xlane.xlu1 %3029  ;;  %v13257_v37 = vld [vmem:[#allocation54_spill] sm:$0xff] }
 0x7d7   : > { %v2707_v4 = vmul.f32 %v9024_v56, %v2702_v58  ;;  %v3392_v2 = vpop.f32.mrf.mxu1  ;;  %v3040_v50 = vmul.f32 %v3030_v12, %v10720_v39  ;;  %vm2713_vm1 = vweird.f32 %v9024_v56 }
 0x7d8   : > { %vm2714_vm7 = vmor %vm2712_vm6, %vm2713_vm1  ;;  %v13258_v2 = vld [vmem:[#allocation51_spill] sm:$0xff] }
 0x7d9   : > { %v2708_v18 = vmul.f32 %v9024_v56, %v2707_v4  ;;  %v11204_v30 = vsub.f32 %v11008_v20, %v3040_v50  ;;  %v11213_v20 = vsub.f32 %v11024_v33, %v3041_v49  ;;  %v4090_v4 = vsel %vm1459_vm3, %v10787_v1, 0  ;;  %v13260_v50 = vld [vmem:[#allocation64_spill] sm:$0xff] }
 0x7da   : > { %v3547_v5 = vpop.f32.mrf.mxu0  ;;  %v3403_v1 = vsel %vm1455_vm5, %v11193_v53, 0.0 }
 0x7db   : > { %v3048_v23 = vmul.f32 %v11204_v30, %v11204_v30  ;;  %v2709_v24 = vmul.f32 0.5, %v2708_v18  ;;  %v3049_v47 = vmul.f32 %v11213_v20, %v11213_v20  ;;  %v13261_v18 = vld [vmem:[#allocation61_spill] sm:$0xff] }
 0x7dd   : > { %v3052_v34 = vsel %vm1455_vm5, %v3048_v23, 0.0  ;;  %v2710_v11 = vsub.f32 1.5, %v2709_v24  ;;  %v3055_v33 = vsel %vm1455_vm5, %v3049_v47, 0.0  ;;  %v3394_v24 = vsel %vm1455_vm5, %v11130_v52, 0.0 }
 0x7de   : > { %3053 = vadd.xlane.f32.xlu1 %v3052_v34 }
 0x7df   : > { %v3570_v43 = vpop.f32.mrf.mxu1  ;;  %v2711_v31 = vmul.f32 %v9024_v56, %v2710_v11 }
 0x7e1   : > { %v2715_v32 = vsel %vm2714_vm7, %v9024_v56, %v2711_v31  ;;  %v4017_v56 = vsel %vm1243_vm2, %v13257_v37, 0 }
 0x7e2   : > { %v3549_v10 = vpop.f32.mrf.mxu0  ;;  %v2746_v63 = vmul.f32 %v2715_v32, %v11111_v44 }
 0x7e6   : > { %3398 = vadd.xlane.f32.xlu1 %v3397_v8  ;;  %3401 = vadd.xlane.f32.xlu0 %v3400_v27  ;;  %v11256_v27 = vld [vmem:[#allocation3 + $0x38] sm:$0xff] }
 0x7e7   : > { %v3572_v19 = vpop.f32.mrf.mxu1 }
 0x7ea   : > { %v3639_v7 = vpop.f32.mrf.mxu0 }
 0x7eb   : > { %v3640_v36 = vadd.f32 %v3639_v7, %v3547_v5 }
 0x7ed   : > { %v3670_v57 = vmul.f32 %v11144_v38, %v3640_v36 }
 0x7ee   : > { %4250 = vrot.lane.b32.xlu2 %v2746_v63, %s9480_s28  ;;  %3056 = vadd.xlane.f32.xlu0 %v3055_v33 }
 0x7ef   : > { %v3674_v40 = vpack.c.bf16 %v3670_v57, %v3670_v57  ;;  %v3662_v28 = vpop.f32.mrf.mxu1 }
 0x7f0   : > { %v3663_v58 = vadd.f32 %v3662_v28, %v3570_v43 }
 0x7f1   : > { %7827 = vmatmul.msk.bf16.vlgmr.msra.gmra.mxu0 %vm1455_vm5, %v3674_v40 }
 0x7f2   : > { %v3671_v41 = vmul.f32 %v11144_v38, %v3663_v58  ;;  %4003 = vmatpush.bf16.xpose.msra.mxu0 %v3994_v22  ;;  %v3641_v6 = vpop.f32.mrf.mxu0  ;;  %v4111_v38 = vsel %vm1459_vm3, %v13259_v42, 0  ;;  %vm4335_vm3 = vcmask 195584  }
 0x7f4   : > { %v3675_v44 = vpack.c.bf16 %v3671_v41, %v3671_v41 }
 0x7f6   : > { %7828 = vmatmul.msk.bf16.vlgmr.msra.gmra.mxu1 %vm1455_vm5, %v3675_v44 }
 0x7f7   : > { %4026 = vmatpush.bf16.xpose.msra.mxu1 %v4017_v56  ;;  %v3664_v12 = vpop.f32.mrf.mxu1 }
 0x801   : > { %7831 = vmatmul.msk.bf16.vlgmr.msrb.gmra.mxu0 %vm1243_vm2, %v13258_v2 }
 0x802   : > { %4099 = vmatpush.bf16.msrb.mxu0 %v4090_v4 }
 0x806   : > { %7832 = vmatmul.msk.bf16.vlgmr.msrb.gmra.mxu1 %vm1243_vm2, %v13260_v50 }
 0x807   : > { %4120 = vmatpush.bf16.msrb.mxu1 %v4111_v38 }
 0x811   : > { %7835 = vmatmul.msk.bf16.vlgmr.msra.gmra.mxu0 %vm1243_vm2, %v13261_v18 }
 0x815   : > { %v11240_v5 = vpop.f32.mrf.mxu2 }
 0x816   : > { %7836 = vmatmul.msk.bf16.vlgmr.msra.gmra.mxu1 %vm1243_vm2, %v10801_v60  ;;  %v11250_v43 = vpop.xlane.xlu0 %3059 }
 0x817   : > { %3404 = vadd.xlane.f32.xlu2 %v3403_v1 }
 0x81d   : > { %v3695_v23 = vpop.f32.mrf.mxu2 }
 0x81f   : > { %3395 = vadd.xlane.f32.xlu2 %v3394_v24 }
 0x823   : > { %v11248_v34 = vpop.f32.mrf.mxu3 }
 0x825   : > { %v3867_v51 = vpop.f32.mrf.mxu2 }
 0x82b   : > { %v3716_v11 = vpop.f32.mrf.mxu3 }
 0x82d   : > { %v3869_v49 = vpop.f32.mrf.mxu2 }
 0x82e   : > { %v4253_v10 = vpop.permute.xlu0 %4252 }
 0x82f   : > { %v11254_v60 = vsel %vm4335_vm3, %v11156_v9, %v4253_v10 }
 0x833   : > { %v3890_v8 = vpop.f32.mrf.mxu3 }
 0x835   : > { %v3959_v31 = vpop.f32.mrf.mxu2 }
 0x836   : > { %v3960_v19 = vadd.f32 %v3959_v31, %v3867_v51 }
 0x838   : > { %v4034_v32 = vmul.f32 %v11256_v27, %v3960_v19 }
 0x83a   : > { %v4038_v47 = vpack.c.bf16 %v4034_v32, %v4034_v32 }
 0x83b   : > { %v3892_v7 = vpop.f32.mrf.mxu3 }
 0x83c   : > { %7837 = vmatmul.msk.bf16.vlgmr.msrb.gmra.mxu2 %vm1455_vm5, %v4038_v47 }
 0x83d   : > { %v3961_v36 = vpop.f32.mrf.mxu2 }
 0x843   : > { %v3982_v63 = vpop.f32.mrf.mxu3 }
 0x844   : > { %v3983_v57 = vadd.f32 %v3982_v63, %v3890_v8 }
 0x846   : > { %v4035_v33 = vmul.f32 %v11256_v27, %v3983_v57 }
 0x848   : > { %v4039_v40 = vpack.c.bf16 %v4035_v33, %v4035_v33 }
 0x849   : > { %v11261_v28 = vpop.xlane.xlu2 %3062 }
 0x84a   : > { %7838 = vmatmul.msk.bf16.vlgmr.msrb.gmra.mxu3 %vm1455_vm5, %v4039_v40 }
 0x84b   : > { %v3984_v9 = vpop.f32.mrf.mxu3 }
 0x851   : > { %v3054_v58 = vpop.xlane.xlu1 %3053  ;;  %v4251_v22 = vpop.permute.xlu2 %4250 }
 0x852   : > { %v3064_v41 = vmul.f32 %v3054_v58, %v10720_v39  ;;  %v11267_v6 = vsel %vm4335_vm3, %v11161_v25, %v4251_v22 }
 0x854   : > { %v3068_v44 = vadd.f32 1e-06, %v3064_v41 }
 0x856   : > { %9025 = vrsqrt.f32 %v3068_v44  ;;  %vm3078_vm8 = vweird.f32 %v3068_v44 }
 0x859   : > { %v3402_v37 = vpop.xlane.xlu0 %3401 }
 0x85a   : > { %v3408_v56 = vmul.f32 %v3402_v37, %v10720_v39 }
 0x85c   : > { %v11271_v12 = vsub.f32 %v11190_v45, %v3408_v56  ;;  %v9026_v4 = vpop.eup %9025 }
 0x85d   : > { %v3073_v38 = vmul.f32 %v9026_v4, %v3068_v44  ;;  %vm3079_vm2 = vweird.f32 %v9026_v4 }
 0x85e   : > { %v3416_v2 = vmul.f32 %v11271_v12, %v11271_v12  ;;  %vm3080_vm10 = vmor %vm3078_vm8, %vm3079_vm2  ;;  %vm4345_vm8 = vcmask 326656  }
 0x85f   : > { %v3074_v1 = vmul.f32 %v9026_v4, %v3073_v38 }
 0x860   : > { %v3424_v42 = vsel %vm1455_vm5, %v3416_v2, 0.0 }
 0x861   : > { %3425 = vadd.xlane.f32.xlu1 %v3424_v42  ;;  %v3057_v50 = vpop.xlane.xlu0 %3056  ;;  %v3075_v23 = vmul.f32 0.5, %v3074_v1 }
 0x862   : > { %v3065_v25 = vmul.f32 %v3057_v50, %v10720_v39 }
 0x863   : > { %v3076_v51 = vsub.f32 1.5, %v3075_v23 }
 0x864   : > { %v3069_v18 = vadd.f32 1e-06, %v3065_v25 }
 0x865   : > { %v3077_v10 = vmul.f32 %v9026_v4, %v3076_v51 }
 0x866   : > { %9027 = vrsqrt.f32 %v3069_v18  ;;  %vm3088_vm11 = vweird.f32 %v3069_v18 }
 0x867   : > { %v3081_v47 = vsel %vm3080_vm10, %v9026_v4, %v3077_v10 }
 0x868   : > { %v3112_v63 = vmul.f32 %v3081_v47, %v11204_v30 }
 0x86c   : > { %v9028_v24 = vpop.eup %9027 }
 0x86d   : > { %v3083_v11 = vmul.f32 %v9028_v24, %v3069_v18  ;;  %vm3089_vm9 = vweird.f32 %v9028_v24 }
 0x86e   : > { %v11277_v45 = vpop.f32.mrf.mxu0  ;;  %vm3090_vm12 = vmor %vm3088_vm11, %vm3089_vm9 }
 0x86f   : > { %v3084_v49 = vmul.f32 %v9028_v24, %v3083_v11 }
 0x871   : > { %v3085_v8 = vmul.f32 0.5, %v3084_v49  ;;  %v3399_v49 = vpop.xlane.xlu1 %3398 }
 0x873   : > { %v3086_v31 = vsub.f32 1.5, %v3085_v8  ;;  %v11279_v19 = vpop.f32.mrf.mxu1  ;;  %v3760_v8 = vsel %vm1455_vm5, %v11240_v5, 0.0 }
 0x875   : > { %v3087_v32 = vmul.f32 %v9028_v24, %v3086_v31 }
 0x876   : > { %v3737_v7 = vpop.f32.mrf.mxu0 }
 0x877   : > { %v3091_v36 = vsel %vm3090_vm12, %v9028_v24, %v3087_v32  ;;  %v3769_v24 = vsel %vm1455_vm5, %v11279_v19, 0.0  ;;  %v3763_v7 = vsel %vm1455_vm5, %v11248_v34, 0.0 }
 0x878   : > { %v3113_v57 = vmul.f32 %v3091_v36, %v11213_v20 }
 0x87a   : > { %4266 = vrot.lane.b32.xlu1 %v3112_v63, %s13262_s26  ;;  %4268 = vrot.lane.b32.xlu2 %v3113_v57, %s13262_s26 }
 0x87b   : > { %v3758_v33 = vpop.f32.mrf.mxu1 }
 0x87e   : > { %v3913_v40 = vpop.f32.mrf.mxu0 }
 0x883   : > { %v3936_v9 = vpop.f32.mrf.mxu1 }
 0x886   : > { %v3915_v58 = vpop.f32.mrf.mxu0 }
 0x88a   : > { %v3405_v22 = vpop.xlane.xlu2 %3404 }
 0x88b   : > { %v3938_v41 = vpop.f32.mrf.mxu1  ;;  %v3409_v44 = vmul.f32 %v3405_v22, %v10720_v39 }
 0x88d   : > { %v11287_v37 = vsub.f32 %v11193_v53, %v3409_v44 }
 0x88e   : > { %v4005_v56 = vpop.f32.mrf.mxu0 }
 0x88f   : > { %v4006_v4 = vadd.f32 %v4005_v56, %v3913_v40  ;;  %v3417_v30 = vmul.f32 %v11287_v37, %v11287_v37 }
 0x891   : > { %v4036_v20 = vmul.f32 %v11256_v27, %v4006_v4  ;;  %v3427_v2 = vsel %vm1455_vm5, %v3417_v30, 0.0 }
 0x892   : > { %3428 = vadd.xlane.f32.xlu0 %v3427_v2  ;;  %v3396_v50 = vpop.xlane.xlu2 %3395 }
 0x893   : > { %v4040_v42 = vpack.c.bf16 %v4036_v20, %v4036_v20  ;;  %v4028_v38 = vpop.f32.mrf.mxu1  ;;  %v3406_v53 = vmul.f32 %v3396_v50, %v10720_v39 }
 0x894   : > { %v4029_v25 = vadd.f32 %v4028_v38, %v3936_v9 }
 0x895   : > { %7839 = vmatmul.msk.bf16.vlgmr.msrb.gmra.mxu0 %vm1455_vm5, %v4040_v42  ;;  %v11299_v51 = vsub.f32 %v11130_v52, %v3406_v53  ;;  %v3766_v52 = vsel %vm1455_vm5, %v11277_v45, 0.0 }
 0x896   : > { %v4037_v18 = vmul.f32 %v11256_v27, %v4029_v25  ;;  %v4007_v1 = vpop.f32.mrf.mxu0  ;;  %v3407_v27 = vmul.f32 %v3399_v49, %v10720_v39 }
 0x897   : > { %v3414_v10 = vmul.f32 %v11299_v51, %v11299_v51 }
 0x898   : > { %v4041_v23 = vpack.c.bf16 %v4037_v18, %v4037_v18  ;;  %v11309_v32 = vsub.f32 %v11142_v26, %v3407_v27 }
 0x899   : > { %v3418_v31 = vsel %vm1455_vm5, %v3414_v10, 0.0 }
 0x89a   : > { %7840 = vmatmul.msk.bf16.vlgmr.msrb.gmra.mxu1 %vm1455_vm5, %v4041_v23  ;;  %3770 = vadd.xlane.f32.xlu0 %v3769_v24  ;;  %v3415_v47 = vmul.f32 %v11309_v32, %v11309_v32 }
 0x89b   : > { %v4030_v11 = vpop.f32.mrf.mxu1 }
 0x89c   : > { %v3421_v36 = vsel %vm1455_vm5, %v3415_v47, 0.0 }
 0x8a2   : > { %3761 = vadd.xlane.f32.xlu0 %v3760_v8 }
 0x8a3   : > { %3419 = vadd.xlane.f32.xlu2 %v3418_v31 }
 0x8a4   : > { %3767 = vadd.xlane.f32.xlu1 %v3766_v52 }
 0x8ab   : > { %3764 = vadd.xlane.f32.xlu2 %v3763_v7 }
 0x8ac   : > { %3422 = vadd.xlane.f32.xlu1 %v3421_v36 }
 0x8bf   : > { %v11318_v63 = vpop.f32.mrf.mxu2 }
 0x8c0   : > { %v4126_v7 = vsel %vm1455_vm5, %v11318_v63, 0.0 }
 0x8c7   : > { %v4061_v57 = vpop.f32.mrf.mxu2 }
 0x8cd   : > { %v11320_v26 = vpop.f32.mrf.mxu3 }
 0x8d4   : > { %v11322_v40 = vpop.xlane.xlu1 %3425  ;;  %v11330_v44 = vpop.permute.xlu2 %4268 }
 0x8d5   : > { %v4082_v33 = vpop.f32.mrf.mxu3 }
 0x8ec   : > { %v4267_v9 = vpop.permute.xlu1 %4266 }
 0x8ed   : > { %v11326_v58 = vsel %vm4340_vm14, %v11267_v6, %v4267_v9 }
 0x905   : > { %v11328_v22 = vpop.xlane.xlu0 %3428 }
 0x90d   : > { %v3771_v41 = vpop.xlane.xlu0 %3770 }
 0x90e   : > { %v3775_v56 = vmul.f32 %v3771_v41, %v10720_v39 }
 0x910   : > { %v11334_v4 = vsub.f32 %v11279_v19, %v3775_v56 }
 0x912   : > { %v11336_v30 = vpop.f32.mrf.mxu0  ;;  %v3783_v20 = vmul.f32 %v11334_v4, %v11334_v4 }
 0x913   : > { %v4132_v33 = vsel %vm1455_vm5, %v11336_v30, 0.0 }
 0x914   : > { %v3793_v2 = vsel %vm1455_vm5, %v3783_v20, 0.0 }
 0x915   : > { %3794 = vadd.xlane.f32.xlu1 %v3793_v2 }
 0x916   : > { %v3420_v6 = vpop.xlane.xlu2 %3419 }
 0x917   : > { %v11341_v42 = vpop.f32.mrf.mxu1  ;;  %v3430_v38 = vmul.f32 %v3420_v6, %v10720_v39  ;;  %v3768_v50 = vpop.xlane.xlu1 %3767 }
 0x918   : > { %v3774_v25 = vmul.f32 %v3768_v50, %v10720_v39  ;;  %v4135_v1 = vsel %vm1455_vm5, %v11341_v42, 0.0 }
 0x919   : > { %v3434_v18 = vadd.f32 1e-06, %v3430_v38 }
 0x91a   : > { %v11346_v19 = vsub.f32 %v11277_v45, %v3774_v25  ;;  %v4103_v53 = vpop.f32.mrf.mxu0 }
 0x91b   : > { %9029 = vrsqrt.f32 %v3434_v18  ;;  %vm3444_vm0 = vweird.f32 %v3434_v18 }
 0x91c   : > { %v3782_v23 = vmul.f32 %v11346_v19, %v11346_v19 }
 0x91d   : > { %4136 = vadd.xlane.f32.xlu1 %v4135_v1 }
 0x91e   : > { %v3765_v24 = vpop.xlane.xlu2 %3764  ;;  %v3790_v11 = vsel %vm1455_vm5, %v3782_v23, 0.0 }
 0x91f   : > { %v4124_v49 = vpop.f32.mrf.mxu1  ;;  %v3423_v10 = vpop.xlane.xlu1 %3422  ;;  %3791 = vadd.xlane.f32.xlu2 %v3790_v11  ;;  %v3773_v31 = vmul.f32 %v3765_v24, %v10720_v39 }
 0x920   : > { %v3431_v27 = vmul.f32 %v3423_v10, %v10720_v39  ;;  %v3762_v24 = vpop.xlane.xlu0 %3761 }
 0x921   : > { %v9030_v8 = vpop.eup %9029  ;;  %v11358_v57 = vsub.f32 %v11248_v34, %v3773_v31  ;;  %v3772_v11 = vmul.f32 %v3762_v24, %v10720_v39 }
 0x922   : > { %v3439_v45 = vmul.f32 %v9030_v8, %v3434_v18  ;;  %v3435_v52 = vadd.f32 1e-06, %v3431_v27  ;;  %vm3445_vm15 = vweird.f32 %v9030_v8  ;;  %v4129_v27 = vsel %vm1455_vm5, %v11320_v26, 0.0 }
 0x923   : > { %v3781_v20 = vmul.f32 %v11358_v57, %v11358_v57  ;;  %vm3446_vm1 = vmor %vm3444_vm0, %vm3445_vm15 }
 0x924   : > { %v3440_v47 = vmul.f32 %v9030_v8, %v3439_v45  ;;  %9031 = vrsqrt.f32 %v3435_v52  ;;  %vm3454_vm7 = vweird.f32 %v3435_v52 }
 0x925   : > { %4127 = vadd.xlane.f32.xlu1 %v4126_v7  ;;  %v3787_v34 = vsel %vm1455_vm5, %v3781_v20, 0.0 }
 0x926   : > { %v3441_v36 = vmul.f32 0.5, %v3440_v47 }
 0x927   : > { %4133 = vadd.xlane.f32.xlu2 %v4132_v33 }
 0x928   : > { %v3442_v9 = vsub.f32 1.5, %v3441_v36 }
 0x92a   : > { %v9032_v41 = vpop.eup %9031  ;;  %v3443_v56 = vmul.f32 %v9030_v8, %v3442_v9  ;;  %v2334_v9 = vmul.f32 %v11038_v21, %v10720_v39 }
 0x92b   : > { %v3449_v2 = vmul.f32 %v9032_v41, %v3435_v52  ;;  %vm3455_vm6 = vweird.f32 %v9032_v41 }
 0x92c   : > { %v3447_v6 = vsel %vm3446_vm1, %v9030_v8, %v3443_v56  ;;  %vm3456_vm2 = vmor %vm3454_vm7, %vm3455_vm6 }
 0x92d   : > { %v3450_v38 = vmul.f32 %v9032_v41, %v3449_v2  ;;  %v3478_v50 = vmul.f32 %v3447_v6, %v11299_v51  ;;  %v11371_v51 = vsub.f32 %v11240_v5, %v3772_v11  ;;  %v2338_v6 = vadd.f32 1e-06, %v2334_v9 }
 0x92f   : > { %v3451_v25 = vmul.f32 0.5, %v3450_v38  ;;  %4282 = vrot.lane.b32.xlu0 %v3478_v50, %s9497_s9  ;;  %3788 = vadd.xlane.f32.xlu2 %v3787_v34  ;;  %v3780_v49 = vmul.f32 %v11371_v51, %v11371_v51  ;;  %vm2366_vm0 = vweird.f32 %v2338_v6 }
 0x931   : > { %v3452_v53 = vsub.f32 1.5, %v3451_v25  ;;  %v3784_v10 = vsel %vm1455_vm5, %v3780_v49, 0.0  ;;  %v2701_v25 = vmul.f32 %v11188_v15, %v10720_v39 }
 0x933   : > { %v3453_v1 = vmul.f32 %v9032_v41, %v3452_v53 }
 0x935   : > { %v3457_v18 = vsel %vm3456_vm2, %v9032_v41, %v3453_v1 }
 0x936   : > { %v3479_v23 = vmul.f32 %v3457_v18, %v11309_v32  ;;  %v13263_v32 = vld [vmem:[#allocation21_spill] sm:$0xff] }
 0x937   : > { %v4361_v45 = vand.u32 2147483647, %v13263_v32  ;;  %vm4385_vm9 = vcmp.ge.f32.partialorder %v13263_v32, 0.0 }
 0x939   : > { %v4365_v31 = vsub.f32 0.0, %v4361_v45 }
 0x93b   : > { %v4370_v36 = vmul.f32 1.442695, %v4365_v31 }
 0x93d   : > { %9033 = vpow2.f32 %v4370_v36 }
 0x93e   : > { %4284 = vrot.lane.b32.xlu1 %v3479_v23, %s9497_s9  ;;  %9035 = vrsqrt.f32 %v2338_v6  ;;  %v2705_v23 = vadd.f32 1e-06, %v2701_v25 }
 0x940   : > { %vm2742_vm7 = vweird.f32 %v2705_v23 }
 0x943   : > { %v9034_v34 = vpop.eup %9033 }
 0x944   : > { %v4377_v1 = vadd.f32 1.0, %v9034_v34  ;;  %v9036_v49 = vpop.eup %9035 }
 0x945   : > { %vm2367_vm15 = vweird.f32 %v9036_v49 }
 0x946   : > { %9037 = vrcp.f32 %v4377_v1  ;;  %vm2368_vm1 = vmor %vm2366_vm0, %vm2367_vm15 }
 0x947   : > { %9039 = vrsqrt.f32 %v2705_v23 }
 0x94c   : > { %v9038_v45 = vpop.eup %9037 }
 0x94d   : > { %v9040_v31 = vpop.eup %9039 }
 0x94e   : > { %vm2743_vm6 = vweird.f32 %v9040_v31 }
 0x94f   : > { %vm2744_vm2 = vmor %vm2742_vm7, %vm2743_vm6 }
 0x959   : > { %3785 = vadd.xlane.f32.xlu0 %v3784_v10 }
 0x961   : > { %4130 = vadd.xlane.f32.xlu0 %v4129_v27  ;;  %v2361_v27 = vmul.f32 %v9036_v49, %v2338_v6  ;;  %v2335_v6 = vmul.f32 %v11092_v54, %v10720_v39 }
 0x988   : > { %v11378_v8 = vpop.xlane.xlu1 %3794 }
 0x990   : > { %v4137_v52 = vpop.xlane.xlu1 %4136 }
 0x991   : > { %v4141_v47 = vmul.f32 %v4137_v52, %v10720_v39  ;;  %v2362_v52 = vmul.f32 %v9036_v49, %v2361_v27 }
 0x992   : > { %v11382_v5 = vpop.xlane.xlu2 %3791 }
 0x993   : > { %v11385_v7 = vsub.f32 %v11341_v42, %v4141_v47  ;;  %v2363_v9 = vmul.f32 0.5, %v2362_v52 }
 0x995   : > { %v4149_v33 = vmul.f32 %v11385_v7, %v11385_v7 }
 0x997   : > { %v4159_v41 = vsel %vm1455_vm5, %v4149_v33, 0.0  ;;  %v4389_v33 = vmul.f32 %v9038_v45, %v9034_v34 }
 0x998   : > { %4160 = vadd.xlane.f32.xlu2 %v4159_v41  ;;  %v4128_v56 = vpop.xlane.xlu1 %4127  ;;  %v2737_v41 = vmul.f32 %v9040_v31, %v2705_v23 }
 0x999   : > { %v4138_v20 = vmul.f32 %v4128_v56, %v10720_v39 }
 0x99a   : > { %v4134_v2 = vpop.xlane.xlu2 %4133 }
 0x99b   : > { %v11394_v38 = vsub.f32 %v11318_v63, %v4138_v20  ;;  %v4140_v42 = vmul.f32 %v4134_v2, %v10720_v39  ;;  %v4393_v20 = vsel %vm4385_vm9, %v9038_v45, %v4389_v33  ;;  %v2364_v2 = vsub.f32 1.5, %v2363_v9 }
 0x99d   : > { %v11398_v50 = vsub.f32 %v11336_v30, %v4140_v42  ;;  %v4146_v21 = vmul.f32 %v11394_v38, %v11394_v38  ;;  %v2738_v42 = vmul.f32 %v9040_v31, %v2737_v41 }
 0x99f   : > { %v4150_v53 = vsel %vm1455_vm5, %v4146_v21, 0.0  ;;  %v4148_v63 = vmul.f32 %v11398_v50, %v11398_v50  ;;  %v2739_v1 = vmul.f32 0.5, %v2738_v42 }
 0x9a0   : > { %4151 = vadd.xlane.f32.xlu1 %v4150_v53  ;;  %v4397_v53 = vmul.f32 %v4393_v20, %v13263_v32  ;;  %v1968_v32 = vmul.f32 %v10933_v17, %v10720_v39 }
 0x9a1   : > { %v4283_v18 = vpop.permute.xlu0 %4282  ;;  %v4156_v30 = vsel %vm1455_vm5, %v4148_v63, 0.0  ;;  %v2365_v63 = vmul.f32 %v9036_v49, %v2364_v2 }
 0x9a2   : > { %v11410_v24 = vsel %vm4345_vm8, %v11326_v58, %v4283_v18  ;;  %v3789_v11 = vpop.xlane.xlu2 %3788  ;;  %4157 = vadd.xlane.f32.xlu0 %v4156_v30  ;;  %v2740_v30 = vsub.f32 1.5, %v2739_v1  ;;  %v1972_v45 = vadd.f32 1e-06, %v1968_v32 }
 0x9a3   : > { %v3797_v15 = vmul.f32 %v3789_v11, %v10720_v39  ;;  %v2369_v11 = vsel %vm2368_vm1, %v9036_v49, %v2365_v63  ;;  %v13266_v49 = vld [vmem:[#allocation20_spill] sm:$0xff] }
 0x9a4   : > { %v4360_v52 = vand.u32 2147483647, %v13266_v49  ;;  %vm2000_vm15 = vweird.f32 %v1972_v45 }
 0x9a5   : > { %v3801_v10 = vadd.f32 1e-06, %v3797_v15  ;;  %v2382_v15 = vmul.f32 %v2369_v11, %v10944_v55  ;;  %v2700_v11 = vmul.f32 %v11150_v35, %v10720_v39 }
 0x9a6   : > { %v4364_v33 = vsub.f32 0.0, %v4360_v52 }
 0x9a7   : > { %9041 = vrsqrt.f32 %v3801_v10  ;;  %vm3820_vm11 = vweird.f32 %v3801_v10 }
 0x9a8   : > { %9043 = vrsqrt.f32 %v1972_v45  ;;  %v4368_v9 = vmul.f32 1.442695, %v4364_v33 }
 0x9ad   : > { %v9042_v47 = vpop.eup %9041 }
 0x9ae   : > { %v3815_v36 = vmul.f32 %v9042_v47, %v3801_v10  ;;  %vm3821_vm10 = vweird.f32 %v9042_v47  ;;  %v2741_v10 = vmul.f32 %v9040_v31, %v2740_v30  ;;  %v9044_v23 = vpop.eup %9043 }
 0x9af   : > { %vm3822_vm12 = vmor %vm3820_vm11, %vm3821_vm10 }
 0x9b0   : > { %v3816_v58 = vmul.f32 %v9042_v47, %v3815_v36  ;;  %v2745_v27 = vsel %vm2744_vm2, %v9040_v31, %v2741_v10  ;;  %v11428_v36 = vadd.f32 1e-06, %v2335_v6  ;;  %v1995_v31 = vmul.f32 %v9044_v23, %v1972_v45 }
 0x9b1   : > { %v11456_v6 = vadd.f32 1e-06, %v2700_v11  ;;  %vm4384_vm2 = vcmp.ge.f32.partialorder %v13266_v49, 0.0 }
 0x9b2   : > { %v3817_v56 = vmul.f32 0.5, %v3816_v58  ;;  %v1996_v58 = vmul.f32 %v9044_v23, %v1995_v31  ;;  %v3067_v31 = vmul.f32 %v11261_v28, %v10720_v39  ;;  %vm2376_vm6 = vweird.f32 %v11428_v36 }
 0x9b3   : > { %v3798_v28 = vmul.f32 %v11382_v5, %v10720_v39 }
 0x9b4   : > { %v3818_v21 = vsub.f32 1.5, %v3817_v56  ;;  %v1969_v56 = vmul.f32 %v10964_v61, %v10720_v39 }
 0x9b6   : > { %v3819_v25 = vmul.f32 %v9042_v47, %v3818_v21  ;;  %v11440_v63 = vadd.f32 1e-06, %v1969_v56 }
 0x9b8   : > { %v3823_v34 = vsel %vm3822_vm12, %v9042_v47, %v3819_v25  ;;  %vm2001_vm12 = vweird.f32 %v9044_v23 }
 0x9b9   : > { %4406 = vrot.lane.b32.xlu1 %v4397_v53, %s13264_s17  ;;  %v3845_v18 = vmul.f32 %v3823_v34, %v11358_v57  ;;  %v2749_v57 = vmul.f32 %v2745_v27, %v11097_v16  ;;  %v3066_v16 = vmul.f32 %v11250_v43, %v10720_v39  ;;  %v1997_v53 = vmul.f32 0.5, %v1996_v58  ;;  %vm2002_vm0 = vmor %vm2000_vm15, %vm2001_vm12 }
 0x9ba   : > { %vm2010_vm15 = vweird.f32 %v11440_v63 }
 0x9bb   : > { %4300 = vrot.lane.b32.xlu0 %v3845_v18, %s13265_s18  ;;  %v11435_v20 = vadd.f32 1e-06, %v3066_v16  ;;  %v1998_v30 = vsub.f32 1.5, %v1997_v53 }
 0x9bd   : > { %v1999_v52 = vmul.f32 %v9044_v23, %v1998_v30 }
 0x9c1   : > { %4238 = vrot.lane.b32.xlu1 %v2382_v15, %s9488_s10 }
 0x9c9   : > { %4256 = vrot.lane.b32.xlu1 %v2749_v57, %s9480_s28 }
 0x9cc   : > { %v3786_v55 = vpop.xlane.xlu0 %3785 }
 0x9cd   : > { %v3796_v47 = vmul.f32 %v3786_v55, %v10720_v39 }
 0x9cf   : > { %v3800_v17 = vadd.f32 1e-06, %v3796_v47 }
 0x9d1   : > { %9045 = vrsqrt.f32 %v3800_v17  ;;  %vm3810_vm10 = vweird.f32 %v3800_v17 }
 0x9d2   : > { %9047 = vrsqrt.f32 %v11428_v36 }
 0x9d3   : > { %9049 = vpow2.f32 %v4368_v9 }
 0x9d4   : > { %v4131_v41 = vpop.xlane.xlu0 %4130  ;;  %9051 = vrsqrt.f32 %v11435_v20 }
 0x9d5   : > { %v4139_v42 = vmul.f32 %v4131_v41, %v10720_v39  ;;  %9053 = vrsqrt.f32 %v11440_v63  ;;  %v2003_v41 = vsel %vm2002_vm0, %v9044_v23, %v1999_v52 }
 0x9d6   : > { %v2016_v58 = vmul.f32 %v2003_v41, %v10844_v14 }
 0x9d7   : > { %v9046_v54 = vpop.eup %9045  ;;  %v11446_v61 = vsub.f32 %v11320_v26, %v4139_v42 }
 0x9d8   : > { %v3805_v2 = vmul.f32 %v9046_v54, %v3800_v17  ;;  %v11438_v21 = vpop.eup %9047  ;;  %vm3811_vm9 = vweird.f32 %v9046_v54 }
 0x9d9   : > { %v2371_v43 = vmul.f32 %v11438_v21, %v11428_v36  ;;  %v9050_v18 = vpop.eup %9049  ;;  %v4147_v32 = vmul.f32 %v11446_v61, %v11446_v61  ;;  %vm3812_vm11 = vmor %vm3810_vm10, %vm3811_vm9  ;;  %vm2377_vm1 = vweird.f32 %v11438_v21  ;;  %vm3098_vm10 = vweird.f32 %v11435_v20 }
 0x9da   : > { %v3806_v25 = vmul.f32 %v9046_v54, %v3805_v2  ;;  %v11454_v27 = vpop.eup %9051  ;;  %v4376_v26 = vadd.f32 1.0, %v9050_v18  ;;  %vm2378_vm7 = vmor %vm2376_vm6, %vm2377_vm1  ;;  %vm2732_vm6 = vweird.f32 %v11456_v6 }
 0x9db   : > { %v2372_v15 = vmul.f32 %v11438_v21, %v2371_v43  ;;  %v3093_v35 = vmul.f32 %v11454_v27, %v11435_v20  ;;  %v4153_v17 = vsel %vm1455_vm5, %v4147_v32, 0.0  ;;  %v9054_v33 = vpop.eup %9053  ;;  %vm3099_vm9 = vweird.f32 %v11454_v27 }
 0x9dc   : > { %v3807_v1 = vmul.f32 0.5, %v3806_v25  ;;  %9055 = vrcp.f32 %v4376_v26  ;;  %vm3100_vm12 = vmor %vm3098_vm10, %vm3099_vm9 }
 0x9dd   : > { %v2373_v47 = vmul.f32 0.5, %v2372_v15  ;;  %9057 = vrsqrt.f32 %v11456_v6  ;;  %v3094_v9 = vmul.f32 %v11454_v27, %v3093_v35 }
 0x9de   : > { %v3808_v34 = vsub.f32 1.5, %v3807_v1 }
 0x9df   : > { %v2374_v16 = vsub.f32 1.5, %v2373_v47  ;;  %v3095_v42 = vmul.f32 0.5, %v3094_v9  ;;  %v11501_v9 = vpop.permute.xlu1 %4284 }
 0x9e0   : > { %v3809_v10 = vmul.f32 %v9046_v54, %v3808_v34  ;;  %v3802_v34 = vadd.f32 1e-06, %v3798_v28 }
 0x9e1   : > { %v2375_v45 = vmul.f32 %v11438_v21, %v2374_v16  ;;  %v3096_v43 = vsub.f32 1.5, %v3095_v42 }
 0x9e2   : > { %v3813_v57 = vsel %vm3812_vm11, %v9046_v54, %v3809_v10  ;;  %v11468_v54 = vadd.f32 1e-06, %v3067_v31  ;;  %v9056_v56 = vpop.eup %9055  ;;  %vm2011_vm11 = vweird.f32 %v9054_v33 }
 0x9e3   : > { %v3844_v55 = vmul.f32 %v3813_v57, %v11371_v51  ;;  %v2005_v51 = vmul.f32 %v9054_v33, %v11440_v63  ;;  %v9058_v25 = vpop.eup %9057  ;;  %v4388_v23 = vmul.f32 %v9056_v56, %v9050_v18  ;;  %v2379_v1 = vsel %vm2378_vm7, %v11438_v21, %v2375_v45  ;;  %vm2012_vm0 = vmor %vm2010_vm15, %vm2011_vm11 }
 0x9e4   : > { %9059 = vrsqrt.f32 %v11468_v54  ;;  %v2727_v53 = vmul.f32 %v9058_v25, %v11456_v6  ;;  %v2383_v30 = vmul.f32 %v2379_v1, %v11011_v59  ;;  %v3097_v10 = vmul.f32 %v11454_v27, %v3096_v43 }
 0x9e5   : > { %4298 = vrot.lane.b32.xlu2 %v3844_v55, %s13265_s18  ;;  %4154 = vadd.xlane.f32.xlu0 %v4153_v17  ;;  %v2006_v2 = vmul.f32 %v9054_v33, %v2005_v51  ;;  %v4392_v11 = vsel %vm4384_vm2, %v9056_v56, %v4388_v23  ;;  %9061 = vrsqrt.f32 %v3802_v34  ;;  %vm2733_vm1 = vweird.f32 %v9058_v25 }
 0x9e6   : > { %v2728_v15 = vmul.f32 %v9058_v25, %v2727_v53  ;;  %v4396_v21 = vmul.f32 %v4392_v11, %v13266_v49  ;;  %v3101_v26 = vsel %vm3100_vm12, %v11454_v27, %v3097_v10  ;;  %vm2734_vm7 = vmor %vm2732_vm6, %vm2733_vm1  ;;  %vm3108_vm9 = vweird.f32 %v11468_v54 }
 0x9e7   : > { %v2007_v14 = vmul.f32 0.5, %v2006_v2  ;;  %v3114_v57 = vmul.f32 %v3101_v26, %v11165_v3  ;;  %vm3830_vm12 = vweird.f32 %v3802_v34 }
 0x9e8   : > { %v2729_v32 = vmul.f32 0.5, %v2728_v15 }
 0x9e9   : > { %v2008_v36 = vsub.f32 1.5, %v2007_v14 }
 0x9ea   : > { %v9060_v5 = vpop.eup %9059  ;;  %v2730_v55 = vsub.f32 1.5, %v2729_v32 }
 0x9eb   : > { %v2009_v18 = vmul.f32 %v9054_v33, %v2008_v36  ;;  %v3103_v59 = vmul.f32 %v9060_v5, %v11468_v54  ;;  %v9062_v47 = vpop.eup %9061  ;;  %vm3109_vm2 = vweird.f32 %v9060_v5 }
 0x9ec   : > { %v2731_v35 = vmul.f32 %v9058_v25, %v2730_v55  ;;  %v3825_v31 = vmul.f32 %v9062_v47, %v3802_v34  ;;  %vm3110_vm10 = vmor %vm3108_vm9, %vm3109_vm2  ;;  %vm3831_vm11 = vweird.f32 %v9062_v47 }
 0x9ed   : > { %4222 = vrot.lane.b32.xlu2 %v2016_v58, %s9498_s22  ;;  %v3104_v20 = vmul.f32 %v9060_v5, %v3103_v59  ;;  %v2013_v52 = vsel %vm2012_vm0, %v9054_v33, %v2009_v18  ;;  %vm3832_vm15 = vmor %vm3830_vm12, %vm3831_vm11  ;;  %vm4350_vm11 = vcmask 392192  }
 0x9ee   : > { %v2017_v49 = vmul.f32 %v2013_v52, %v10885_v0  ;;  %v3826_v27 = vmul.f32 %v9062_v47, %v3825_v31  ;;  %v2735_v3 = vsel %vm2734_vm7, %v9058_v25, %v2731_v35  ;;  %v3432_v0 = vmul.f32 %v11322_v40, %v10720_v39 }
 0x9ef   : > { %v3105_v17 = vmul.f32 0.5, %v3104_v20  ;;  %v2748_v51 = vmul.f32 %v2735_v3, %v11050_v13  ;;  %v3799_v40 = vmul.f32 %v11378_v8, %v10720_v39 }
 0x9f0   : > { %v3827_v16 = vmul.f32 0.5, %v3826_v27  ;;  %v11504_v2 = vadd.f32 1e-06, %v3432_v0 }
 0x9f1   : > { %v3106_v63 = vsub.f32 1.5, %v3105_v17  ;;  %v3803_v14 = vadd.f32 1e-06, %v3799_v40 }
 0x9f2   : > { %v3828_v41 = vsub.f32 1.5, %v3827_v16  ;;  %v4342_v16 = vsel %vm4340_vm14, %v11254_v60, %v11330_v44  ;;  %vm3464_vm12 = vweird.f32 %v11504_v2 }
 0x9f3   : > { %v3107_v33 = vmul.f32 %v9060_v5, %v3106_v63  ;;  %v4347_v0 = vsel %vm4345_vm8, %v4342_v16, %v11501_v9  ;;  %v8675_v16 = vld [vmem:[%s9713_s16 + $0x8] sm:$0xff] }
 0x9f4   : > { %v3829_v42 = vmul.f32 %v9062_v47, %v3828_v41 }
 0x9f5   : > { %4240 = vrot.lane.b32.xlu2 %v2383_v30, %s9488_s10  ;;  %v3111_v56 = vsel %vm3110_vm10, %v9060_v5, %v3107_v33  ;;  %v13267_v30 = vld [vmem:[#allocation23_spill] sm:$0xff] }
 0x9f6   : > { %v3115_v45 = vmul.f32 %v3111_v56, %v11197_v29  ;;  %v3833_v28 = vsel %vm3832_vm15, %v9062_v47, %v3829_v42  ;;  %v4362_v11 = vand.u32 2147483647, %v13267_v30 }
 0x9f7   : > { %v3846_v43 = vmul.f32 %v3833_v28, %v11346_v19 }
 0x9f8   : > { %v4366_v15 = vsub.f32 0.0, %v4362_v11 }
 0x9f9   : > { %4404 = vrot.lane.b32.xlu0 %v4396_v21, %s13264_s17 }
 0x9fa   : > { %v4372_v59 = vmul.f32 1.442695, %v4366_v15 }
 0x9fd   : > { %4270 = vrot.lane.b32.xlu2 %v3114_v57, %s13262_s26 }
 0xa01   : > { %4224 = vrot.lane.b32.xlu0 %v2017_v49, %s9498_s22 }
 0xa09   : > { %4254 = vrot.lane.b32.xlu0 %v2748_v51, %s9480_s28  ;;  %s13268_s28 = smov 56  }
 0xa0b   : > { %v4161_v6 = vpop.xlane.xlu2 %4160 }
 0xa0c   : > { %v4165_v58 = vmul.f32 %v4161_v6, %v10720_v39 }
 0xa0e   : > { %v4169_v13 = vadd.f32 1e-06, %v4165_v58 }
 0xa10   : > { %9063 = vrsqrt.f32 %v4169_v13  ;;  %vm4206_vm1 = vweird.f32 %v4169_v13 }
 0xa11   : > { %4272 = vrot.lane.b32.xlu0 %v3115_v45, %s13262_s26  ;;  %9065 = vrsqrt.f32 %v11504_v2 }
 0xa13   : > { %v4152_v54 = vpop.xlane.xlu1 %4151 }
 0xa14   : > { %v4162_v25 = vmul.f32 %v4152_v54, %v10720_v39 }
 0xa15   : > { %v4158_v35 = vpop.xlane.xlu0 %4157 }
 0xa16   : > { %v9064_v23 = vpop.eup %9063  ;;  %v4166_v53 = vadd.f32 1e-06, %v4162_v25  ;;  %v4164_v25 = vmul.f32 %v4158_v35, %v10720_v39 }
 0xa17   : > { %v4201_v29 = vmul.f32 %v9064_v23, %v4169_v13  ;;  %v9066_v1 = vpop.eup %9065  ;;  %vm4207_vm0 = vweird.f32 %v9064_v23 }
 0xa18   : > { %9067 = vrsqrt.f32 %v4166_v53  ;;  %v3459_v8 = vmul.f32 %v9066_v1, %v11504_v2  ;;  %vm4208_vm6 = vmor %vm4206_vm1, %vm4207_vm0  ;;  %vm4176_vm2 = vweird.f32 %v4166_v53  ;;  %vm3465_vm10 = vweird.f32 %v9066_v1 }
 0xa19   : > { %v4202_v36 = vmul.f32 %v9064_v23, %v4201_v29  ;;  %4302 = vrot.lane.b32.xlu0 %v3846_v43, %s13265_s18  ;;  %9069 = vrsqrt.f32 %v3803_v14  ;;  %vm3466_vm15 = vmor %vm3464_vm12, %vm3465_vm10  ;;  %vm3840_vm1 = vweird.f32 %v3803_v14  ;;  %v13269_v29 = vld [vmem:[#allocation22_spill] sm:$0xff] }
 0xa1a   : > { %v3460_v21 = vmul.f32 %v9066_v1, %v3459_v8  ;;  %9071 = vpow2.f32 %v4372_v59  ;;  %v4363_v43 = vand.u32 2147483647, %v13269_v29 }
 0xa1b   : > { %v4203_v34 = vmul.f32 0.5, %v4202_v36 }
 0xa1c   : > { %v3461_v20 = vmul.f32 0.5, %v3460_v21 }
 0xa1d   : > { %v4204_v10 = vsub.f32 1.5, %v4203_v34 }
 0xa1e   : > { %v9068_v5 = vpop.eup %9067  ;;  %v3462_v17 = vsub.f32 1.5, %v3461_v20 }
 0xa1f   : > { %v4205_v18 = vmul.f32 %v9064_v23, %v4204_v10  ;;  %v4171_v32 = vmul.f32 %v9068_v5, %v4166_v53  ;;  %v9070_v19 = vpop.eup %9069  ;;  %vm4177_vm7 = vweird.f32 %v9068_v5 }
 0xa20   : > { %v3835_v52 = vmul.f32 %v9070_v19, %v3803_v14  ;;  %vm4178_vm9 = vmor %vm4176_vm2, %vm4177_vm7  ;;  %v9072_v51 = vpop.eup %9071  ;;  %v3463_v33 = vmul.f32 %v9066_v1, %v3462_v17  ;;  %vm3841_vm0 = vweird.f32 %v9070_v19  ;;  %vm4386_vm7 = vcmp.ge.f32.partialorder %v13267_v30, 0.0 }
 0xa21   : > { %v4172_v26 = vmul.f32 %v9068_v5, %v4171_v32  ;;  %v4209_v57 = vsel %vm4208_vm6, %v9064_v23, %v4205_v18  ;;  %v4378_v41 = vadd.f32 1.0, %v9072_v51  ;;  %vm3842_vm6 = vmor %vm3840_vm1, %vm3841_vm0  ;;  %v4168_v23 = vadd.f32 1e-06, %v4164_v25 }
 0xa22   : > { %v4213_v55 = vmul.f32 %v4209_v57, %v11385_v7  ;;  %v3836_v31 = vmul.f32 %v9070_v19, %v3835_v52  ;;  %v3467_v56 = vsel %vm3466_vm15, %v9066_v1, %v3463_v33  ;;  %v8677_v33 = vld [vmem:[%s9713_s16 + $0x18] sm:$0xff] }
 0xa23   : > { %v4173_v47 = vmul.f32 0.5, %v4172_v26  ;;  %9073 = vrcp.f32 %v4378_v41  ;;  %v3480_v13 = vmul.f32 %v3467_v56, %v11271_v12  ;;  %v3433_v12 = vmul.f32 %v11328_v22, %v10720_v39  ;;  %4468 = vmatpush.bf16.msra.mxu2 %v8677_v33  ;;  %v8674_v56 = vld [vmem:[%s9713_s16] sm:$0xff] }
 0xa24   : > { %4320 = vrot.lane.b32.xlu0 %v4213_v55, %s13268_s28  ;;  %v3837_v7 = vmul.f32 0.5, %v3836_v31  ;;  %v1579_v41 = vmul.f32 %v10874_v48, %v10720_v39 }
 0xa25   : > { %v4174_v49 = vsub.f32 1.5, %v4173_v47  ;;  %v3437_v54 = vadd.f32 1e-06, %v3433_v12 }
 0xa26   : > { %v3838_v58 = vsub.f32 1.5, %v3837_v7  ;;  %v8676_v7 = vld [vmem:[%s9713_s16 + $0x10] sm:$0xff] }
 0xa27   : > { %v4175_v63 = vmul.f32 %v9068_v5, %v4174_v49  ;;  %9075 = vrsqrt.f32 %v3437_v54  ;;  %vm3474_vm15 = vweird.f32 %v3437_v54  ;;  %4469 = vmatpush.bf16.msra.mxu2 %v8676_v7 }
 0xa28   : > { %v3839_v45 = vmul.f32 %v9070_v19, %v3838_v58 }
 0xa29   : > { %v4179_v27 = vsel %vm4178_vm9, %v9068_v5, %v4175_v63  ;;  %v9074_v44 = vpop.eup %9073 }
 0xa2a   : > { %v4210_v3 = vmul.f32 %v4179_v27, %v11394_v38  ;;  %v3843_v60 = vsel %vm3842_vm6, %v9070_v19, %v3839_v45  ;;  %v4390_v2 = vmul.f32 %v9074_v44, %v9072_v51  ;;  %vm4196_vm6 = vweird.f32 %v4168_v23 }
 0xa2b   : > { %v3847_v9 = vmul.f32 %v3843_v60, %v11334_v4  ;;  %4470 = vmatpush.bf16.msra.mxu2 %v8675_v16 }
 0xa2c   : > { %4314 = vrot.lane.b32.xlu1 %v4210_v3, %s13268_s28  ;;  %v4394_v42 = vsel %vm4386_vm7, %v9074_v44, %v4390_v2 }
 0xa2d   : > { %v4301_v6 = vpop.permute.xlu0 %4300  ;;  %v4398_v40 = vmul.f32 %v4394_v42, %v13267_v30  ;;  %v9076_v53 = vpop.eup %9075  ;;  %v4367_v30 = vsub.f32 0.0, %v4363_v43 }
 0xa2e   : > { %v11527_v38 = vsel %vm4350_vm11, %v4347_v0, %v4301_v6  ;;  %v3469_v1 = vmul.f32 %v9076_v53, %v3437_v54  ;;  %vm3475_vm12 = vweird.f32 %v9076_v53  ;;  %v4407_v6 = vpop.permute.xlu1 %4406 }
 0xa2f   : > { %v4374_v34 = vmul.f32 1.442695, %v4367_v30  ;;  %vm3476_vm0 = vmor %vm3474_vm15, %vm3475_vm12  ;;  %4471 = vmatpush.bf16.msra.mxu2 %v8674_v56  ;;  %v9353_v56 = vld [vmem:[#allocation2] sm:$0xff] }
 0xa30   : > { %v3470_v36 = vmul.f32 %v9076_v53, %v3469_v1 }
 0xa32   : > { %v3471_v10 = vmul.f32 0.5, %v3470_v36 }
 0xa34   : > { %4286 = vrot.lane.b32.xlu1 %v3480_v13, %s9497_s9  ;;  %v3472_v32 = vsub.f32 1.5, %v3471_v10  ;;  %v1583_v13 = vadd.f32 1e-06, %v1579_v41 }
 0xa36   : > { %v3473_v20 = vmul.f32 %v9076_v53, %v3472_v32  ;;  %v4239_v44 = vpop.permute.xlu1 %4238 }
 0xa38   : > { %v3477_v35 = vsel %vm3476_vm0, %v9076_v53, %v3473_v20 }
 0xa39   : > { %v3481_v17 = vmul.f32 %v3477_v35, %v11287_v37 }
 0xa3c   : > { %4304 = vrot.lane.b32.xlu1 %v3847_v9, %s13265_s18 }
 0xa3e   : > { %v4257_v25 = vpop.permute.xlu1 %4256 }
 0xa3f   : > { %v4299_v0 = vpop.permute.xlu2 %4298 }
 0xa40   : > { %v4351_v43 = vsel %vm4350_vm11, %v11410_v24, %v4299_v0 }
 0xa44   : > { %4408 = vrot.lane.b32.xlu1 %v4398_v40, %s13264_s17 }
 0xa47   : > { %v4223_v45 = vpop.permute.xlu2 %4222 }
 0xa4f   : > { %v4241_v42 = vpop.permute.xlu2 %4240 }
 0xa58   : > { %v4155_v28 = vpop.xlane.xlu0 %4154 }
 0xa59   : > { %v4163_v4 = vmul.f32 %v4155_v28, %v10720_v39 }
 0xa5b   : > { %v4167_v14 = vadd.f32 1e-06, %v4163_v4  ;;  %v4271_v4 = vpop.permute.xlu2 %4270 }
 0xa5d   : > { %9077 = vrsqrt.f32 %v4167_v14  ;;  %vm4186_vm9 = vweird.f32 %v4167_v14 }
 0xa5e   : > { %9079 = vrsqrt.f32 %v4168_v23 }
 0xa5f   : > { %9081 = vpow2.f32 %v4374_v34 }
 0xa63   : > { %v9078_v11 = vpop.eup %9077 }
 0xa64   : > { %v4181_v8 = vmul.f32 %v9078_v11, %v4167_v14  ;;  %v9080_v22 = vpop.eup %9079  ;;  %vm4187_vm2 = vweird.f32 %v9078_v11 }
 0xa65   : > { %v4191_v5 = vmul.f32 %v9080_v22, %v4168_v23  ;;  %vm4188_vm10 = vmor %vm4186_vm9, %vm4187_vm2  ;;  %v9082_v55 = vpop.eup %9081  ;;  %vm4197_vm1 = vweird.f32 %v9080_v22  ;;  %vm4387_vm2 = vcmp.ge.f32.partialorder %v13269_v29, 0.0  ;;  %vm4355_vm9 = vcmask 457728  }
 0xa66   : > { %v4182_v15 = vmul.f32 %v9078_v11, %v4181_v8  ;;  %v4379_v47 = vadd.f32 1.0, %v9082_v55  ;;  %vm4198_vm7 = vmor %vm4196_vm6, %vm4197_vm1  ;;  %vm1620_vm1 = vweird.f32 %v1583_v13 }
 0xa67   : > { %v4192_v19 = vmul.f32 %v9080_v22, %v4191_v5 }
 0xa68   : > { %v4183_v21 = vmul.f32 0.5, %v4182_v15  ;;  %9083 = vrcp.f32 %v4379_v47 }
 0xa69   : > { %v4193_v52 = vmul.f32 0.5, %v4192_v19 }
 0xa6a   : > { %v4184_v18 = vsub.f32 1.5, %v4183_v21 }
 0xa6b   : > { %v4194_v49 = vsub.f32 1.5, %v4193_v52  ;;  %v4405_v60 = vpop.permute.xlu0 %4404 }
 0xa6c   : > { %v4185_v59 = vmul.f32 %v9078_v11, %v4184_v18  ;;  %v13270_v18 = vld [vmem:[#allocation56_spill] sm:$0xff] }
 0xa6d   : > { %v4195_v31 = vmul.f32 %v9080_v22, %v4194_v49 }
 0xa6e   : > { %v4189_v26 = vsel %vm4188_vm10, %v9078_v11, %v4185_v59  ;;  %v9084_v63 = vpop.eup %9083 }
 0xa6f   : > { %v4211_v57 = vmul.f32 %v4189_v26, %v11446_v61  ;;  %v4199_v61 = vsel %vm4198_vm7, %v9080_v22, %v4195_v31  ;;  %v4391_v3 = vmul.f32 %v9084_v63, %v9082_v55 }
 0xa70   : > { %v4212_v27 = vmul.f32 %v4199_v61, %v11398_v50  ;;  %v1578_v50 = vmul.f32 %v10838_v62, %v10720_v39 }
 0xa71   : > { %4316 = vrot.lane.b32.xlu2 %v4211_v57, %s13268_s28  ;;  %v4395_v51 = vsel %vm4387_vm2, %v9084_v63, %v4391_v3 }
 0xa72   : > { %v4399_v37 = vmul.f32 %v4395_v51, %v13269_v29  ;;  %v1582_v58 = vadd.f32 1e-06, %v1578_v50  ;;  %v8993_v50 = vld [vmem:[%s13271_s3] ss:$0 sm:$0xff] }
 0xa73   : > { %v4225_v54 = vpop.permute.xlu0 %4224 }
 0xa74   : > { %9085 = vrsqrt.f32 %v1582_v58  ;;  %vm1610_vm15 = vweird.f32 %v1582_v58 }
 0xa75   : > { %9087 = vrsqrt.f32 %v1583_v13 }
 0xa79   : > { %4288 = vrot.lane.b32.xlu2 %v3481_v17, %s9497_s9  ;;  %s13277_s9 = sld [smem:[#allocation71_spill]] }
 0xa7a   : > { %v9086_v9 = vpop.eup %9085 }
 0xa7b   : > { %v9088_v2 = vpop.eup %9087  ;;  %v1605_v40 = vmul.f32 %v9086_v9, %v1582_v58  ;;  %v4255_v14 = vpop.permute.xlu0 %4254  ;;  %vm1611_vm10 = vweird.f32 %v9086_v9 }
 0xa7c   : > { %v1615_v12 = vmul.f32 %v9088_v2, %v1583_v13  ;;  %vm1621_vm12 = vweird.f32 %v9088_v2  ;;  %vm1612_vm0 = vmor %vm1610_vm15, %vm1611_vm10 }
 0xa7d   : > { %v1606_v62 = vmul.f32 %v9086_v9, %v1605_v40  ;;  %vm1622_vm6 = vmor %vm1620_vm1, %vm1621_vm12 }
 0xa7e   : > { %v1616_v28 = vmul.f32 %v9088_v2, %v1615_v12 }
 0xa7f   : > { %v1607_v39 = vmul.f32 0.5, %v1606_v62  ;;  %s13278_s22 = scalar_lea.vmem %s13277_s9, %s9676_s20 }
 0xa80   : > { %v1617_v48 = vmul.f32 0.5, %v1616_v28 }
 0xa81   : > { %4318 = vrot.lane.b32.xlu2 %v4212_v27, %s13268_s28  ;;  %v1608_v53 = vsub.f32 1.5, %v1607_v39  ;;  %v9356_v39 = vld [vmem:[#allocation2 + $0x18] sm:$0xff] }
 0xa82   : > { %v1618_v29 = vsub.f32 1.5, %v1617_v48 }
 0xa83   : > { %v1609_v11 = vmul.f32 %v9086_v9, %v1608_v53  ;;  %v4273_v21 = vpop.permute.xlu0 %4272  ;;  %v13274_v53 = vld [vmem:[#allocation19_spill] sm:$0xff] }
 0xa84   : > { %v1619_v36 = vmul.f32 %v9088_v2, %v1618_v29 }
 0xa85   : > { %v1613_v5 = vsel %vm1612_vm0, %v9086_v9, %v1609_v11  ;;  %v9354_v9 = vld [vmem:[#allocation2 + $0x8] sm:$0xff] }
 0xa86   : > { %v1623_v24 = vsel %vm1622_vm6, %v9088_v2, %v1619_v36  ;;  %v1626_v32 = vmul.f32 %v1613_v5, %v13270_v18 }
 0xa87   : > { %v1627_v19 = vmul.f32 %v1623_v24, %v10770_v46 }
 0xa89   : > { %4410 = vrot.lane.b32.xlu2 %v4399_v37, %s13264_s17  ;;  %v4329_v26 = vsel %vm1455_vm5, %v1627_v19, %v4225_v54  ;;  %v9355_v54 = vld [vmem:[#allocation2 + $0x10] sm:$0xff] }
 0xa8a   : > { %v4334_v57 = vsel %vm4330_vm13, %v4329_v26, %v4241_v42  ;;  %v8053_v26 = vld [vmem:[%s9724_s8 + $0x180] sm:$0xf] }
 0xa8b   : > { %v4303_v47 = vpop.permute.xlu0 %4302  ;;  %v4339_v49 = vsel %vm4335_vm3, %v4334_v57, %v4257_v25  ;;  %v8734_v57 = vld [vmem:[%s9724_s8 + $0x1bc] sm:$0xf0] }
 0xa8c   : > { %v4344_v17 = vsel %vm4340_vm14, %v4339_v49, %v4273_v21  ;;  %v8735_v49 = vld [vmem:[%s9724_s8 + $0x1c4] sm:$0xf0] }
 0xa96   : > { %v4321_v51 = vpop.permute.xlu0 %4320 }
 0xa9e   : > { %v4315_v23 = vpop.permute.xlu1 %4314 }
 0xa9f   : > { %v4356_v1 = vsel %vm4355_vm9, %v4351_v43, %v4315_v23 }
 0xaa0   : > { %v4416_v22 = vmul.f32 %v4405_v60, %v4356_v1 }
 0xaa6   : > { %v4287_v15 = vpop.permute.xlu1 %4286 }
 0xaae   : > { %v4305_v52 = vpop.permute.xlu1 %4304 }
 0xab6   : > { %v4409_v37 = vpop.permute.xlu1 %4408 }
 0xacb   : > { %v4317_v30 = vpop.permute.xlu2 %4316 }
 0xacc   : > { %v4357_v8 = vsel %vm4355_vm9, %v11527_v38, %v4317_v30  ;;  %v4328_v38 = vsel %vm1455_vm5, %v1626_v32, %v4223_v45 }
 0xacd   : > { %v4417_v34 = vmul.f32 %v4407_v6, %v4357_v8  ;;  %v4333_v55 = vsel %vm4330_vm13, %v4328_v38, %v4239_v44 }
 0xace   : > { %v4338_v20 = vsel %vm4335_vm3, %v4333_v55, %v4255_v14  ;;  %v8726_v55 = vld [vmem:[%s9724_s8 + $0x184] sm:$0xf] }
 0xacf   : > { %v4420_v10 = vpack.c.bf16 %v4417_v34, %v4416_v22  ;;  %v4343_v46 = vsel %vm4340_vm14, %v4338_v20, %v4271_v4  ;;  %v8054_v20 = vor.u32 %v8734_v57, %v8053_v26 }
 0xad0   : > { %v4348_v31 = vsel %vm4345_vm8, %v4343_v46, %v4287_v15  ;;  %v8727_v46 = vld [vmem:[%s9724_s8 + $0x18c] sm:$0xf] }
 0xad1   : > { %7857 = vmatmul.msk.bf16.vlgmr.msra.gmra.mxu2 %vm869_vm4, %v4420_v10  ;;  %v4353_v63 = vsel %vm4350_vm11, %v4348_v31, %v4303_v47  ;;  %v8061_v47 = vld [vmem:[%s9724_s8 + $0x188] sm:$0xf]  ;;  %v8063_v31 = vld [vmem:[%s9724_s8 + $0x1c8] sm:$0xf0]  ;;  %5023 = vmatpush.bf16.msra.mxu3 %v8054_v20 }
 0xad3   : > { %v4289_v59 = vpop.permute.xlu2 %4288 }
 0xad4   : > { %v4349_v61 = vsel %vm4345_vm8, %v4344_v17, %v4289_v59  ;;  %v8062_v17 = vor.u32 %v8735_v49, %v8061_v47 }
 0xad5   : > { %v4354_v27 = vsel %vm4350_vm11, %v4349_v61, %v4305_v52  ;;  %v8055_v52 = vld [vmem:[%s9724_s8 + $0x1c0] sm:$0xf0]  ;;  %v8066_v61 = vor.u32 %v8727_v46, %v8063_v31 }
 0xad6   : > { %v4359_v7 = vsel %vm4355_vm9, %v4354_v27, %v4321_v51  ;;  %5061 = vmatpush.bf16.msra.mxu1 %v8062_v17  ;;  %v8718_v27 = vld [vmem:[%s9724_s8 + $0x13c] sm:$0xf0] }
 0xad7   : > { %5080 = vmatpush.bf16.msrb.mxu2 %v8066_v61 }
 0xadb   : > { %v4319_v35 = vpop.permute.xlu2 %4318 }
 0xadc   : > { %v4358_v3 = vsel %vm4355_vm9, %v4353_v63, %v4319_v35  ;;  %v8058_v35 = vor.u32 %v8726_v55, %v8055_v52  ;;  %v7989_v63 = vld [vmem:[%s9724_s8 + $0x100] sm:$0xf] }
 0xadd   : > { %v4418_v16 = vmul.f32 %v4409_v37, %v4358_v3  ;;  %v8710_v3 = vld [vmem:[%s9724_s8 + $0x104] sm:$0xf]  ;;  %v7990_v51 = vor.u32 %v8718_v27, %v7989_v63 }
 0xade   : > { %5042 = vmatpush.bf16.msra.mxu0 %v8058_v35  ;;  %v7991_v37 = vld [vmem:[%s9724_s8 + $0x140] sm:$0xf0] }
 0xadf   : > { %5024 = vmatpush.bf16.msra.mxu3 %v7990_v51 }
 0xae3   : > { %v4411_v33 = vpop.permute.xlu2 %4410 }
 0xae4   : > { %v4419_v0 = vmul.f32 %v4411_v33, %v4359_v7  ;;  %v7997_v33 = vld [vmem:[%s9724_s8 + $0x108] sm:$0xf] }
 0xae5   : > { %v8719_v7 = vld [vmem:[%s9724_s8 + $0x144] sm:$0xf0] }
 0xae6   : > { %v4421_v6 = vpack.c.bf16 %v4419_v0, %v4418_v16  ;;  %v7994_v16 = vor.u32 %v8710_v3, %v7991_v37  ;;  %v7998_v0 = vor.u32 %v8719_v7, %v7997_v33  ;;  %v11672_v3 = vld [vmem:[%s13276_s0] ss:$0 sm:$0xff] }
 0xae7   : > { %v11681_v33 = vld [vmem:[%s13278_s22] ss:$0 sm:$0xff] }
 0xae8   : > { %7858 = vmatmul.msk.bf16.gmra.mxu2 %vm869_vm4, %v4421_v6  ;;  %v8711_v6 = vld [vmem:[%s9724_s8 + $0x10c] sm:$0xf]  ;;  %5043 = vmatpush.bf16.msra.mxu0 %v7994_v16  ;;  %v8069_v16 = vld [vmem:[%s9724_s8 + $0x190] sm:$0xf] }
 0xae9   : > { %5062 = vmatpush.bf16.msra.mxu1 %v7998_v0  ;;  %v8736_v0 = vld [vmem:[%s9724_s8 + $0x1cc] sm:$0xf0] }
 0xb54   : > { %v4473_v41 = vpop.f32.mrf.mxu2 }
 0xb55   : > { %v4474_v58 = vadd.f32 %v8993_v50, %v4473_v41 }
 0xb57   : > { %v11586_v13 = vadd.f32 %v9353_v56, %v4474_v58  ;;  %v7925_v58 = vld [vmem:[%s9724_s8 + $0x80] sm:$0xf] }
 0xb58   : > { %v8702_v56 = vld [vmem:[%s9724_s8 + $0xbc] sm:$0xf0] }
 0xb59   : > { %v4489_v45 = vsel %vm869_vm4, %v11586_v13, 0.0 }
 0xb5a   : > { %4490 = vadd.xlane.f32.xlu0 %v4489_v45  ;;  %v8694_v45 = vld [vmem:[%s9724_s8 + $0x84] sm:$0xf] }
 0xb5c   : > { %v4475_v60 = vpop.f32.mrf.mxu2 }
 0xb5d   : > { %v4476_v44 = vadd.f32 %v8993_v50, %v4475_v60 }
 0xb5f   : > { %v11590_v2 = vadd.f32 %v9354_v9, %v4476_v44  ;;  %v7926_v44 = vor.u32 %v8702_v56, %v7925_v58  ;;  %v7927_v9 = vld [vmem:[%s9724_s8 + $0xc0] sm:$0xf0]  ;;  %v8070_v58 = vor.u32 %v8736_v0, %v8069_v16  ;;  %v8071_v56 = vld [vmem:[%s9724_s8 + $0x1d0] sm:$0xf0] }
 0xb61   : > { %v4492_v42 = vsel %vm869_vm4, %v11590_v2, 0.0  ;;  %5025 = vmatpush.bf16.msra.mxu3 %v7926_v44 }
 0xb62   : > { %4493 = vadd.xlane.f32.xlu1 %v4492_v42  ;;  %v7933_v42 = vld [vmem:[%s9724_s8 + $0x88] sm:$0xf] }
 0xb6b   : > { %v4478_v40 = vpop.f32.mrf.mxu2 }
 0xb6c   : > { %v4479_v12 = vadd.f32 %v8993_v50, %v4478_v40  ;;  %v8703_v40 = vld [vmem:[%s9724_s8 + $0xc4] sm:$0xf0] }
 0xb6e   : > { %v11594_v25 = vadd.f32 %v9355_v54, %v4479_v12  ;;  %v7930_v54 = vor.u32 %v8694_v45, %v7927_v9  ;;  %v8077_v45 = vld [vmem:[%s9724_s8 + $0x198] sm:$0xf] }
 0xb70   : > { %13272 = vst [vmem:[#allocation28_spill] sm:$0xff] %v11594_v25  ;;  %v4495_v62 = vsel %vm869_vm4, %v11594_v25, 0.0  ;;  %5044 = vmatpush.bf16.msra.mxu0 %v7930_v54  ;;  %v8005_v54 = vld [vmem:[%s9724_s8 + $0x110] sm:$0xf] }
 0xb71   : > { %4496 = vadd.xlane.f32.xlu2 %v4495_v62  ;;  %v7934_v62 = vor.u32 %v8703_v40, %v7933_v42  ;;  %v8729_v40 = vld [vmem:[%s9724_s8 + $0x19c] sm:$0xf] }
 0xb73   : > { %v4480_v28 = vpop.f32.mrf.mxu2  ;;  %5063 = vmatpush.bf16.msra.mxu1 %v7934_v62 }
 0xb74   : > { %v4481_v4 = vadd.f32 %v8993_v50, %v4480_v28  ;;  %v7999_v50 = vld [vmem:[%s9724_s8 + $0x148] sm:$0xf0] }
 0xb75   : > { %v8002_v41 = vor.u32 %v8711_v6, %v7999_v50  ;;  %v8695_v28 = vld [vmem:[%s9724_s8 + $0x8c] sm:$0xf]  ;;  %v8728_v6 = vld [vmem:[%s9724_s8 + $0x194] sm:$0xf] }
 0xb76   : > { %v11598_v48 = vadd.f32 %v9356_v39, %v4481_v4  ;;  %v7935_v4 = vld [vmem:[%s9724_s8 + $0xc8] sm:$0xf0]  ;;  %v8074_v9 = vor.u32 %v8728_v6, %v8071_v56 }
 0xb77   : > { %5081 = vmatpush.bf16.msrb.mxu2 %v8002_v41  ;;  %v7938_v39 = vor.u32 %v8695_v28, %v7935_v4  ;;  %v8720_v28 = vld [vmem:[%s9724_s8 + $0x14c] sm:$0xf0]  ;;  %v8712_v4 = vld [vmem:[%s9724_s8 + $0x114] sm:$0xf] }
 0xb78   : > { %13273 = vst [vmem:[#allocation42_spill] sm:$0xff] %v11598_v48  ;;  %v4498_v23 = vsel %vm869_vm4, %v11598_v48, 0.0 }
 0xb79   : > { %4499 = vadd.xlane.f32.xlu0 %v4498_v23 }
 0xb7b   : > { %5082 = vmatpush.bf16.msrb.mxu2 %v7938_v39  ;;  %v8007_v39 = vld [vmem:[%s9724_s8 + $0x150] sm:$0xf0] }
 0xbcd   : > { %v4491_v14 = vpop.xlane.xlu0 %4490 }
 0xbce   : > { %v4501_v29 = vmul.f32 %v4491_v14, %v13274_v53  ;;  %v7861_v14 = vld [vmem:[%s9724_s8] sm:$0xf] }
 0xbd0   : > { %v11604_v43 = vsub.f32 %v11586_v13, %v4501_v29  ;;  %v8686_v29 = vld [vmem:[%s9724_s8 + $0x3c] sm:$0xf0] }
 0xbd2   : > { %v4509_v1 = vmul.f32 %v11604_v43, %v11604_v43 }
 0xbd4   : > { %v4513_v30 = vsel %vm869_vm4, %v4509_v1, 0.0  ;;  %v7862_v1 = vor.u32 %v8686_v29, %v7861_v14  ;;  %v8006_v14 = vor.u32 %v8720_v28, %v8005_v54  ;;  %v8010_v29 = vor.u32 %v8712_v4, %v8007_v39 }
 0xbd5   : > { %v4494_v11 = vpop.xlane.xlu1 %4493  ;;  %4514 = vadd.xlane.f32.xlu1 %v4513_v30  ;;  %v8678_v30 = vld [vmem:[%s9724_s8 + $0x4] sm:$0xf] }
 0xbd6   : > { %v4502_v36 = vmul.f32 %v4494_v11, %v13274_v53  ;;  %v7863_v11 = vld [vmem:[%s9724_s8 + $0x40] sm:$0xf0]  ;;  %5026 = vmatpush.bf16.msra.mxu3 %v7862_v1  ;;  %v8013_v1 = vld [vmem:[%s9724_s8 + $0x118] sm:$0xf] }
 0xbd8   : > { %v11611_v8 = vsub.f32 %v11590_v2, %v4502_v36  ;;  %v7869_v36 = vld [vmem:[%s9724_s8 + $0x8] sm:$0xf] }
 0xbda   : > { %v4510_v22 = vmul.f32 %v11611_v8, %v11611_v8  ;;  %5099 = vmatpush.bf16.msrb.mxu3 %v8070_v58  ;;  %v7887_v58 = vld [vmem:[%s9724_s8 + $0x58] sm:$0xf0] }
 0xbdc   : > { %v4516_v34 = vsel %vm869_vm4, %v4510_v22, 0.0  ;;  %v7866_v22 = vor.u32 %v8678_v30, %v7863_v11  ;;  %v8721_v30 = vld [vmem:[%s9724_s8 + $0x154] sm:$0xf0] }
 0xbdd   : > { %4517 = vadd.xlane.f32.xlu2 %v4516_v34  ;;  %v8687_v34 = vld [vmem:[%s9724_s8 + $0x44] sm:$0xf0] }
 0xbde   : > { %5045 = vmatpush.bf16.msra.mxu0 %v7866_v22  ;;  %5100 = vmatpush.bf16.msrb.mxu3 %v8006_v14  ;;  %v8093_v14 = vld [vmem:[%s9724_s8 + $0x1a8] sm:$0xf] }
 0xbe2   : > { %5118 = vmatpush.bf16.msrb.mxu0 %v8074_v9 }
 0xbe4   : > { %v4497_v15 = vpop.xlane.xlu2 %4496 }
 0xbe5   : > { %v4503_v10 = vmul.f32 %v4497_v15, %v13274_v53  ;;  %v8679_v15 = vld [vmem:[%s9724_s8 + $0xc] sm:$0xf] }
 0xbe6   : > { %5119 = vmatpush.bf16.msrb.mxu0 %v8010_v29  ;;  %v8739_v29 = vld [vmem:[%s9724_s8 + $0x1e4] sm:$0xf0] }
 0xbe7   : > { %v11618_v5 = vsub.f32 %v11594_v25, %v4503_v10  ;;  %v7871_v10 = vld [vmem:[%s9724_s8 + $0x48] sm:$0xf0] }
 0xbe9   : > { %v4511_v24 = vmul.f32 %v11618_v5, %v11618_v5 }
 0xbeb   : > { %v4519_v21 = vsel %vm869_vm4, %v4511_v24, 0.0  ;;  %v7870_v24 = vor.u32 %v8687_v34, %v7869_v36  ;;  %v8014_v34 = vor.u32 %v8721_v30, %v8013_v1  ;;  %v8094_v30 = vor.u32 %v8739_v29, %v8093_v14  ;;  %v8039_v14 = vld [vmem:[%s9724_s8 + $0x170] sm:$0xf0] }
 0xbec   : > { %4520 = vadd.xlane.f32.xlu0 %v4519_v21  ;;  %v4500_v18 = vpop.xlane.xlu0 %4499  ;;  %v7874_v21 = vor.u32 %v8679_v15, %v7871_v10  ;;  %v8713_v15 = vld [vmem:[%s9724_s8 + $0x11c] sm:$0xf] }
 0xbed   : > { %v4504_v32 = vmul.f32 %v4500_v18, %v13274_v53  ;;  %5064 = vmatpush.bf16.msra.mxu1 %v7870_v24  ;;  %v8015_v10 = vld [vmem:[%s9724_s8 + $0x158] sm:$0xf0]  ;;  %v7941_v24 = vld [vmem:[%s9724_s8 + $0x90] sm:$0xf] }
 0xbee   : > { %5083 = vmatpush.bf16.msrb.mxu2 %v7874_v21  ;;  %v8704_v21 = vld [vmem:[%s9724_s8 + $0xcc] sm:$0xf0] }
 0xbef   : > { %v11625_v19 = vsub.f32 %v11598_v48, %v4504_v32 }
 0xbf1   : > { %v4512_v59 = vmul.f32 %v11625_v19, %v11625_v19 }
 0xbf3   : > { %v4522_v38 = vsel %vm869_vm4, %v4512_v59, 0.0 }
 0xbf4   : > { %4523 = vadd.xlane.f32.xlu1 %v4522_v38 }
 0xc48   : > { %v4515_v60 = vpop.xlane.xlu1 %4514 }
 0xc49   : > { %v4525_v12 = vmul.f32 %v4515_v60, %v13274_v53  ;;  %v8737_v60 = vld [vmem:[%s9724_s8 + $0x1d4] sm:$0xf0] }
 0xc4a   : > { %v8078_v42 = vor.u32 %v8737_v60, %v8077_v45 }
 0xc4b   : > { %v4529_v23 = vadd.f32 1e-06, %v4525_v12  ;;  %v8079_v12 = vld [vmem:[%s9724_s8 + $0x1d8] sm:$0xf0] }
 0xc4c   : > { %5137 = vmatpush.bf16.msrb.mxu1 %v8078_v42 }
 0xc4d   : > { %9089 = vrsqrt.f32 %v4529_v23  ;;  %vm4539_vm13 = vweird.f32 %v4529_v23 }
 0xc50   : > { %v4518_v18 = vpop.xlane.xlu2 %4517  ;;  %5138 = vmatpush.bf16.msrb.mxu1 %v8014_v34 }
 0xc51   : > { %v4526_v32 = vmul.f32 %v4518_v18, %v13274_v53  ;;  %v8696_v18 = vld [vmem:[%s9724_s8 + $0x94] sm:$0xf] }
 0xc53   : > { %v9090_v59 = vpop.eup %9089  ;;  %v4530_v38 = vadd.f32 1e-06, %v4526_v32 }
 0xc54   : > { %v4534_v26 = vmul.f32 %v9090_v59, %v4529_v23  ;;  %vm4540_vm5 = vweird.f32 %v9090_v59 }
 0xc55   : > { %9091 = vrsqrt.f32 %v4530_v38  ;;  %vm4541_vm3 = vmor %vm4539_vm13, %vm4540_vm5  ;;  %vm4549_vm8 = vweird.f32 %v4530_v38 }
 0xc56   : > { %v4535_v57 = vmul.f32 %v9090_v59, %v4534_v26  ;;  %v7942_v26 = vor.u32 %v8704_v21, %v7941_v24  ;;  %v8023_v24 = vld [vmem:[%s9724_s8 + $0x160] sm:$0xf0] }
 0xc58   : > { %v4536_v55 = vmul.f32 0.5, %v4535_v57  ;;  %v7943_v57 = vld [vmem:[%s9724_s8 + $0xd0] sm:$0xf0]  ;;  %5101 = vmatpush.bf16.msrb.mxu3 %v7942_v26  ;;  %v8715_v26 = vld [vmem:[%s9724_s8 + $0x12c] sm:$0xf] }
 0xc5a   : > { %v4537_v20 = vsub.f32 1.5, %v4536_v55  ;;  %v7949_v55 = vld [vmem:[%s9724_s8 + $0x98] sm:$0xf] }
 0xc5b   : > { %v9092_v52 = vpop.eup %9091 }
 0xc5c   : > { %v4538_v47 = vmul.f32 %v9090_v59, %v4537_v20  ;;  %v4544_v49 = vmul.f32 %v9092_v52, %v4530_v38  ;;  %vm4550_vm14 = vweird.f32 %v9092_v52  ;;  %v8018_v38 = vor.u32 %v8713_v15, %v8015_v10  ;;  %v8705_v20 = vld [vmem:[%s9724_s8 + $0xd4] sm:$0xf0]  ;;  %v8722_v15 = vld [vmem:[%s9724_s8 + $0x15c] sm:$0xf0]  ;;  %v8714_v10 = vld [vmem:[%s9724_s8 + $0x124] sm:$0xf] }
 0xc5d   : > { %vm4551_vm11 = vmor %vm4549_vm8, %vm4550_vm14 }
 0xc5e   : > { %v4545_v35 = vmul.f32 %v9092_v52, %v4544_v49  ;;  %v4542_v46 = vsel %vm4541_vm3, %v9090_v59, %v4538_v47  ;;  %v7950_v47 = vor.u32 %v8705_v20, %v7949_v55  ;;  %v8697_v49 = vld [vmem:[%s9724_s8 + $0x9c] sm:$0xf]  ;;  %v8031_v55 = vld [vmem:[%s9724_s8 + $0x168] sm:$0xf0]  ;;  %v7957_v20 = vld [vmem:[%s9724_s8 + $0xa0] sm:$0xf] }
 0xc5f   : > { %v4521_v17 = vpop.xlane.xlu0 %4520  ;;  %v4573_v51 = vmul.f32 %v4542_v46, %v11604_v43 }
 0xc60   : > { %v4546_v31 = vmul.f32 0.5, %v4545_v35  ;;  %v4527_v61 = vmul.f32 %v4521_v17, %v13274_v53  ;;  %v7951_v35 = vld [vmem:[%s9724_s8 + $0xd8] sm:$0xf0]  ;;  %v7877_v17 = vld [vmem:[%s9724_s8 + $0x10] sm:$0xf]  ;;  %5139 = vmatpush.bf16.msrb.mxu1 %v7950_v47  ;;  %v8034_v47 = vor.u32 %v8715_v26, %v8031_v55 }
 0xc61   : > { %v4580_v43 = vmul.f32 %v11672_v3, %v4573_v51  ;;  %v7885_v51 = vld [vmem:[%s9724_s8 + $0x18] sm:$0xf]  ;;  %v7954_v16 = vor.u32 %v8697_v49, %v7951_v35  ;;  %v8698_v49 = vld [vmem:[%s9724_s8 + $0xa4] sm:$0xf]  ;;  %v7983_v55 = vld [vmem:[%s9724_s8 + $0xf8] sm:$0xf0] }
 0xc62   : > { %v4547_v63 = vsub.f32 1.5, %v4546_v31  ;;  %v11665_v27 = vadd.f32 1e-06, %v4527_v61  ;;  %v8688_v31 = vld [vmem:[%s9724_s8 + $0x4c] sm:$0xf0] }
 0xc63   : > { %v4587_v11 = vadd.f32 %v11681_v33, %v4580_v43  ;;  %v8680_v61 = vld [vmem:[%s9724_s8 + $0x14] sm:$0xf]  ;;  %v7878_v0 = vor.u32 %v8688_v31, %v7877_v17  ;;  %v7959_v35 = vld [vmem:[%s9724_s8 + $0xe0] sm:$0xf0]  ;;  %v7965_v17 = vld [vmem:[%s9724_s8 + $0xa8] sm:$0xf] }
 0xc64   : > { %v4548_v37 = vmul.f32 %v9092_v52, %v4547_v63  ;;  %9093 = vrsqrt.f32 %v11665_v27  ;;  %v7879_v63 = vld [vmem:[%s9724_s8 + $0x50] sm:$0xf0]  ;;  %vm4559_vm2 = vweird.f32 %v11665_v27  ;;  %v8707_v31 = vld [vmem:[%s9724_s8 + $0xe4] sm:$0xf0]  ;;  %v8709_v26 = vld [vmem:[%s9724_s8 + $0xf4] sm:$0xf0] }
 0xc65   : > { %v7882_v43 = vor.u32 %v8680_v61, %v7879_v63  ;;  %5102 = vmatpush.bf16.msrb.mxu3 %v7878_v0  ;;  %v8699_v61 = vld [vmem:[%s9724_s8 + $0xac] sm:$0xf] }
 0xc66   : > { %v4552_v7 = vsel %vm4551_vm11, %v9092_v52, %v4548_v37  ;;  %v7946_v52 = vor.u32 %v8696_v18, %v7943_v57  ;;  %v8689_v37 = vld [vmem:[%s9724_s8 + $0x54] sm:$0xf0]  ;;  %v8026_v18 = vor.u32 %v8714_v10, %v8023_v24  ;;  %v7967_v63 = vld [vmem:[%s9724_s8 + $0xe8] sm:$0xf0]  ;;  %v8708_v10 = vld [vmem:[%s9724_s8 + $0xec] sm:$0xf0] }
 0xc67   : > { %v4574_v50 = vmul.f32 %v4552_v7, %v11611_v8  ;;  %v4524_v41 = vpop.xlane.xlu1 %4523  ;;  %v8082_v8 = vor.u32 %v8729_v40, %v8079_v12  ;;  %v7970_v0 = vor.u32 %v8699_v61, %v7967_v63  ;;  %v7917_v61 = vld [vmem:[%s9724_s8 + $0x38] sm:$0xf] }
 0xc68   : > { %v4528_v44 = vmul.f32 %v4524_v41, %v13274_v53  ;;  %5120 = vmatpush.bf16.msrb.mxu0 %v7946_v52  ;;  %v8681_v41 = vld [vmem:[%s9724_s8 + $0x1c] sm:$0xf]  ;;  %v8706_v52 = vld [vmem:[%s9724_s8 + $0xdc] sm:$0xf0]  ;;  %v8693_v63 = vld [vmem:[%s9724_s8 + $0x74] sm:$0xf0] }
 0xc69   : > { %v4581_v62 = vmul.f32 %v11672_v3, %v4574_v50  ;;  %5156 = vmatpush.bf16.msra.mxu2 %v8082_v8  ;;  %v7886_v50 = vor.u32 %v8689_v37, %v7885_v51  ;;  %v7962_v51 = vor.u32 %v8698_v49, %v7959_v35  ;;  %v7966_v37 = vor.u32 %v8707_v31, %v7965_v17  ;;  %v8692_v49 = vld [vmem:[%s9724_s8 + $0x6c] sm:$0xf0]  ;;  %v8684_v17 = vld [vmem:[%s9724_s8 + $0x34] sm:$0xf] }
 0xc6a   : > { %v11699_v23 = vpop.eup %9093  ;;  %v11701_v53 = vadd.f32 1e-06, %v4528_v44  ;;  %v7890_v44 = vor.u32 %v8681_v41, %v7887_v58  ;;  %v7901_v41 = vld [vmem:[%s9724_s8 + $0x28] sm:$0xf]  ;;  %v7911_v31 = vld [vmem:[%s9724_s8 + $0x70] sm:$0xf0] }
 0xc6b   : > { %v4588_v36 = vadd.f32 %v11681_v33, %v4581_v62  ;;  %v4554_v22 = vmul.f32 %v11699_v23, %v11665_v27  ;;  %vm4560_vm7 = vweird.f32 %v11699_v23  ;;  %5140 = vmatpush.bf16.msrb.mxu1 %v7886_v50  ;;  %v7895_v50 = vld [vmem:[%s9724_s8 + $0x60] sm:$0xf0]  ;;  %v8691_v58 = vld [vmem:[%s9724_s8 + $0x64] sm:$0xf0] }
 0xc6c   : > { %9095 = vrsqrt.f32 %v11701_v53  ;;  %vm4561_vm9 = vmor %vm4559_vm2, %vm4560_vm7  ;;  %5121 = vmatpush.bf16.msrb.mxu0 %v7882_v43  ;;  %vm4569_vm12 = vweird.f32 %v11701_v53 }
 0xc6d   : > { %v11715_v32 = vpack.c.bf16 %v4588_v36, %v4587_v11  ;;  %v4555_v59 = vmul.f32 %v11699_v23, %v4554_v22  ;;  %5157 = vmatpush.bf16.msra.mxu2 %v8018_v38  ;;  %v8731_v11 = vld [vmem:[%s9724_s8 + $0x1ac] sm:$0xf]  ;;  %v8021_v22 = vld [vmem:[%s9724_s8 + $0x120] sm:$0xf]  ;;  %v8723_v38 = vld [vmem:[%s9724_s8 + $0x164] sm:$0xf0] }
 0xc6e   : > { %v8095_v36 = vld [vmem:[%s9724_s8 + $0x1e8] sm:$0xf0]  ;;  %v8022_v21 = vor.u32 %v8722_v15, %v8021_v22  ;;  %v7973_v15 = vld [vmem:[%s9724_s8 + $0xb0] sm:$0xf] }
 0xc6f   : > { %v4556_v46 = vmul.f32 0.5, %v4555_v59  ;;  %8115 = vmatmul.msk.bf16.vlgmr.msra.gmra.mxu3 %vm869_vm4, %v11715_v32  ;;  %8117 = vmatmul.msk.bf16.vlgmr.msra.gmra.mxu0 %vm869_vm4, %v11715_v32  ;;  %v8098_v34 = vor.u32 %v8731_v11, %v8095_v36  ;;  %v8029_v59 = vld [vmem:[%s9724_s8 + $0x128] sm:$0xf]  ;;  %v8725_v11 = vld [vmem:[%s9724_s8 + $0x174] sm:$0xf0] }
 0xc70   : > { %8119 = vmatmul.msk.bf16.vlgmr.msra.gmra.mxu1 %vm869_vm4, %v11715_v32  ;;  %8121 = vmatmul.msk.bf16.vlgmr.msrb.gmra.mxu2 %vm869_vm4, %v11715_v32  ;;  %v8030_v57 = vor.u32 %v8723_v38, %v8029_v59  ;;  %v8717_v36 = vld [vmem:[%s9724_s8 + $0x13c] sm:$0xf]  ;;  %v7981_v59 = vld [vmem:[%s9724_s8 + $0xb8] sm:$0xf]  ;;  %v7974_v38 = vor.u32 %v8708_v10, %v7973_v15 }
 0xc71   : > { %v4557_v7 = vsub.f32 1.5, %v4556_v46  ;;  %5158 = vmatpush.bf16.msra.mxu2 %v7954_v16  ;;  %5213 = vmatpush.bf16.msra.mxu1 %v8094_v30  ;;  %v7958_v46 = vor.u32 %v8706_v52, %v7957_v20  ;;  %v8690_v16 = vld [vmem:[%s9724_s8 + $0x5c] sm:$0xf0]  ;;  %v8045_v30 = vld [vmem:[%s9724_s8 + $0x138] sm:$0xf]  ;;  %v7982_v52 = vor.u32 %v8709_v26, %v7981_v59  ;;  %v8759_v59 = vld [vmem:[%s9739_s23 + $0x88] sm:$0xff] }
 0xc72   : > { %v9096_v6 = vpop.eup %9095  ;;  %v8046_v22 = vor.u32 %v8725_v11, %v8045_v30 }
 0xc73   : > { %v4558_v56 = vmul.f32 %v11699_v23, %v4557_v7  ;;  %v4564_v45 = vmul.f32 %v9096_v6, %v11701_v53  ;;  %vm4570_vm10 = vweird.f32 %v9096_v6  ;;  %v8087_v53 = vld [vmem:[%s9724_s8 + $0x1e0] sm:$0xf0]  ;;  %v7893_v7 = vld [vmem:[%s9724_s8 + $0x20] sm:$0xf] }
 0xc74   : > { %vm4571_vm15 = vmor %vm4569_vm12, %vm4570_vm10  ;;  %v7894_v43 = vor.u32 %v8690_v16, %v7893_v7  ;;  %v7914_v7 = vor.u32 %v8684_v17, %v7911_v31  ;;  %v7918_v16 = vor.u32 %v8693_v63, %v7917_v61  ;;  %v8750_v61 = vld [vmem:[%s9739_s23 + $0x40] sm:$0xff] }
 0xc75   : > { %v4565_v60 = vmul.f32 %v9096_v6, %v4564_v45  ;;  %v4562_v9 = vsel %vm4561_vm9, %v11699_v23, %v4558_v56  ;;  %5159 = vmatpush.bf16.msra.mxu2 %v7890_v44  ;;  %v8085_v23 = vld [vmem:[%s9724_s8 + $0x1a0] sm:$0xf]  ;;  %5214 = vmatpush.bf16.msra.mxu1 %v8030_v57  ;;  %v8683_v56 = vld [vmem:[%s9724_s8 + $0x2c] sm:$0xf]  ;;  %v7902_v44 = vor.u32 %v8691_v58, %v7901_v41  ;;  %v8701_v57 = vld [vmem:[%s9724_s8 + $0xbc] sm:$0xf] }
 0xc76   : > { %v4575_v12 = vmul.f32 %v4562_v9, %v11618_v5  ;;  %v7903_v45 = vld [vmem:[%s9724_s8 + $0x68] sm:$0xf0]  ;;  %v7986_v35 = vor.u32 %v8701_v57, %v7983_v55  ;;  %v8764_v41 = vld [vmem:[%s9739_s23 + $0xb0] sm:$0xff]  ;;  %v8749_v58 = vld [vmem:[%s9739_s23 + $0x38] sm:$0xff] }
 0xc77   : > { %v4566_v42 = vmul.f32 0.5, %v4565_v60  ;;  %v7906_v9 = vor.u32 %v8683_v56, %v7903_v45  ;;  %v8773_v56 = vld [vmem:[%s9739_s23 + $0xf8] sm:$0xff]  ;;  %v8755_v45 = vld [vmem:[%s9739_s23 + $0x68] sm:$0xff]  ;;  %v8758_v63 = vld [vmem:[%s9739_s23 + $0x80] sm:$0xff] }
 0xc78   : > { %v4582_v62 = vmul.f32 %v11672_v3, %v4575_v12  ;;  %v8732_v12 = vld [vmem:[%s9724_s8 + $0x1b4] sm:$0xf] }
 0xc79   : > { %v4567_v40 = vsub.f32 1.5, %v4566_v42  ;;  %5232 = vmatpush.bf16.msrb.mxu2 %v8098_v34  ;;  %5215 = vmatpush.bf16.msra.mxu1 %v7966_v37  ;;  %v8101_v42 = vld [vmem:[%s9724_s8 + $0x1b0] sm:$0xf]  ;;  %v8047_v34 = vld [vmem:[%s9724_s8 + $0x178] sm:$0xf0] }
 0xc7a   : > { %v4589_v4 = vadd.f32 %v11681_v33, %v4582_v62  ;;  %v8109_v62 = vld [vmem:[%s9724_s8 + $0x1b8] sm:$0xf]  ;;  %v8050_v24 = vor.u32 %v8717_v36, %v8047_v34  ;;  %v7919_v37 = vld [vmem:[%s9724_s8 + $0x78] sm:$0xf0] }
 0xc7b   : > { %v4568_v54 = vmul.f32 %v9096_v6, %v4567_v40  ;;  %v8740_v40 = vld [vmem:[%s9724_s8 + $0x1ec] sm:$0xf0]  ;;  %v8745_v36 = vld [vmem:[%s9739_s23 + $0x18] sm:$0xff] }
 0xc7d   : > { %v4572_v27 = vsel %vm4571_vm15, %v9096_v6, %v4568_v54  ;;  %5233 = vmatpush.bf16.msrb.mxu2 %v8034_v47  ;;  %v8682_v6 = vld [vmem:[%s9724_s8 + $0x24] sm:$0xf]  ;;  %5216 = vmatpush.bf16.msra.mxu1 %v7902_v44  ;;  %v8102_v54 = vor.u32 %v8740_v40, %v8101_v42  ;;  %v7909_v47 = vld [vmem:[%s9724_s8 + $0x30] sm:$0xf]  ;;  %v8747_v40 = vld [vmem:[%s9739_s23 + $0x28] sm:$0xff] }
 0xc7e   : > { %v4576_v8 = vmul.f32 %v4572_v27, %v11625_v19  ;;  %v8738_v19 = vld [vmem:[%s9724_s8 + $0x1dc] sm:$0xf0]  ;;  %v7898_v60 = vor.u32 %v8682_v6, %v7895_v50  ;;  %v8103_v27 = vld [vmem:[%s9724_s8 + $0x1f0] sm:$0xf0]  ;;  %v8757_v6 = vld [vmem:[%s9739_s23 + $0x78] sm:$0xff] }
 0xc7f   : > { %v8756_v50 = vld [vmem:[%s9739_s23 + $0x70] sm:$0xff]  ;;  %v8762_v42 = vld [vmem:[%s9739_s23 + $0xa0] sm:$0xff] }
 0xc80   : > { %v4583_v28 = vmul.f32 %v11672_v3, %v4576_v8  ;;  %v8730_v3 = vld [vmem:[%s9724_s8 + $0x1a4] sm:$0xf]  ;;  %v8741_v8 = vld [vmem:[%s9724_s8 + $0x1f4] sm:$0xf0]  ;;  %v8772_v44 = vld [vmem:[%s9739_s23 + $0xf0] sm:$0xff] }
 0xc81   : > { %v8090_v1 = vor.u32 %v8730_v3, %v8087_v53  ;;  %5234 = vmatpush.bf16.msrb.mxu2 %v7970_v0  ;;  %v8716_v53 = vld [vmem:[%s9724_s8 + $0x134] sm:$0xf] }
 0xc82   : > { %v4590_v39 = vadd.f32 %v11681_v33, %v4583_v28  ;;  %v8086_v33 = vor.u32 %v8738_v19, %v8085_v23  ;;  %v8106_v28 = vor.u32 %v8732_v12, %v8103_v27  ;;  %v8111_v23 = vld [vmem:[%s9724_s8 + $0x1f8] sm:$0xf0]  ;;  %v8037_v19 = vld [vmem:[%s9724_s8 + $0x130] sm:$0xf]  ;;  %v8771_v12 = vld [vmem:[%s9739_s23 + $0xe8] sm:$0xff] }
 0xc83   : > { %5194 = vmatpush.bf16.msra.mxu0 %v8090_v1  ;;  %v8042_v1 = vor.u32 %v8716_v53, %v8039_v14  ;;  %v8753_v27 = vld [vmem:[%s9739_s23 + $0x58] sm:$0xff] }
 0xc84   : > { %v11751_v5 = vpack.c.bf16 %v4590_v39, %v4589_v4  ;;  %5175 = vmatpush.bf16.msra.mxu3 %v8086_v33  ;;  %v8110_v4 = vor.u32 %v8741_v8, %v8109_v62  ;;  %v8733_v39 = vld [vmem:[%s9724_s8 + $0x1bc] sm:$0xf]  ;;  %v8724_v33 = vld [vmem:[%s9724_s8 + $0x16c] sm:$0xf0] }
 0xc85   : > { %5235 = vmatpush.bf16.msrb.mxu2 %v7906_v9  ;;  %v8114_v3 = vor.u32 %v8733_v39, %v8111_v23  ;;  %v8038_v29 = vor.u32 %v8724_v33, %v8037_v19  ;;  %v8754_v9 = vld [vmem:[%s9739_s23 + $0x60] sm:$0xff]  ;;  %v8761_v62 = vld [vmem:[%s9739_s23 + $0x98] sm:$0xff]  ;;  %v8752_v23 = vld [vmem:[%s9739_s23 + $0x50] sm:$0xff] }
 0xc86   : > { %8116 = vmatmul.msk.bf16.gmra.mxu3 %vm869_vm4, %v11751_v5  ;;  %8118 = vmatmul.msk.bf16.gmra.mxu0 %vm869_vm4, %v11751_v5  ;;  %v8760_v19 = vld [vmem:[%s9739_s23 + $0x90] sm:$0xff] }
 0xc87   : > { %8120 = vmatmul.msk.bf16.gmra.mxu1 %vm869_vm4, %v11751_v5  ;;  %8122 = vmatmul.msk.bf16.gmra.mxu2 %vm869_vm4, %v11751_v5 }
 0xc88   : > { %5176 = vmatpush.bf16.msra.mxu3 %v8022_v21  ;;  %5195 = vmatpush.bf16.msra.mxu0 %v8026_v18  ;;  %v8700_v21 = vld [vmem:[%s9724_s8 + $0xb4] sm:$0xf] }
 0xc89   : > { %v7975_v18 = vld [vmem:[%s9724_s8 + $0xf0] sm:$0xf0] }
 0xc8a   : > { %v7978_v20 = vor.u32 %v8700_v21, %v7975_v18  ;;  %v8751_v18 = vld [vmem:[%s9739_s23 + $0x48] sm:$0xff] }
 0xc8c   : > { %5177 = vmatpush.bf16.msra.mxu3 %v7958_v46  ;;  %5196 = vmatpush.bf16.msra.mxu0 %v7962_v51  ;;  %v7910_v46 = vor.u32 %v8692_v49, %v7909_v47  ;;  %v8685_v51 = vld [vmem:[%s9724_s8 + $0x3c] sm:$0xf]  ;;  %v8744_v47 = vld [vmem:[%s9739_s23 + $0x10] sm:$0xff] }
 0xc8d   : > { %v7922_v0 = vor.u32 %v8685_v51, %v7919_v37  ;;  %v8768_v49 = vld [vmem:[%s9739_s23 + $0xd0] sm:$0xff] }
 0xc90   : > { %5178 = vmatpush.bf16.msra.mxu3 %v7894_v43  ;;  %5197 = vmatpush.bf16.msra.mxu0 %v7898_v60  ;;  %v8765_v43 = vld [vmem:[%s9739_s23 + $0xb8] sm:$0xff]  ;;  %v8763_v60 = vld [vmem:[%s9739_s23 + $0xa8] sm:$0xff] }
 0xc96   : > { %8123 = vmatmul.msk.bf16.vlgmr.msrb.gmra.mxu3 %vm869_vm4, %v11715_v32  ;;  %8125 = vmatmul.msk.bf16.vlgmr.msrb.gmra.mxu0 %vm869_vm4, %v11715_v32 }
 0xc97   : > { %8127 = vmatmul.msk.bf16.vlgmr.msrb.gmra.mxu1 %vm869_vm4, %v11715_v32  ;;  %8129 = vmatmul.msk.bf16.vlgmr.msra.gmra.mxu2 %vm869_vm4, %v11715_v32 }
 0xc98   : > { %5251 = vmatpush.bf16.msrb.mxu3 %v8102_v54  ;;  %5270 = vmatpush.bf16.msrb.mxu0 %v8106_v28  ;;  %v11884_v54 = vld [vmem:[%s9729_s29] sm:$0xff] }
 0xc99   : > { %5289 = vmatpush.bf16.msrb.mxu1 %v8110_v4  ;;  %5308 = vmatpush.bf16.msra.mxu2 %v8114_v3  ;;  %v11893_v8 = vperm.slane %v11884_v54, 1  ;;  %v8746_v28 = vld [vmem:[%s9739_s23 + $0x20] sm:$0xff]  ;;  %v11898_v39 = vperm.slane %v11884_v54, 2  ;;  %v11914_v30 = vperm.slane %v11884_v54, 3 }
 0xc9a   : > { %v8770_v4 = vld [vmem:[%s9739_s23 + $0xe0] sm:$0xff] }
 0xc9c   : > { %5252 = vmatpush.bf16.msrb.mxu3 %v8038_v29  ;;  %5271 = vmatpush.bf16.msrb.mxu0 %v8042_v1  ;;  %v11910_v29 = vperm.slane %v11884_v54, 0 }
 0xc9d   : > { %5290 = vmatpush.bf16.msrb.mxu1 %v8046_v22  ;;  %5309 = vmatpush.bf16.msra.mxu2 %v8050_v24  ;;  %v8769_v22 = vld [vmem:[%s9739_s23 + $0xd8] sm:$0xff] }
 0xca0   : > { %5253 = vmatpush.bf16.msrb.mxu3 %v7974_v38  ;;  %5272 = vmatpush.bf16.msrb.mxu0 %v7978_v20 }
 0xca1   : > { %5291 = vmatpush.bf16.msrb.mxu1 %v7982_v52  ;;  %5310 = vmatpush.bf16.msra.mxu2 %v7986_v35 }
 0xca4   : > { %5254 = vmatpush.bf16.msrb.mxu3 %v7910_v46  ;;  %5273 = vmatpush.bf16.msrb.mxu0 %v7914_v7 }
 0xca5   : > { %5292 = vmatpush.bf16.msrb.mxu1 %v7918_v16  ;;  %5311 = vmatpush.bf16.msra.mxu2 %v7922_v0 }
 0xca6   : > { %8124 = vmatmul.msk.bf16.gmra.mxu3 %vm869_vm4, %v11751_v5  ;;  %8126 = vmatmul.msk.bf16.gmra.mxu0 %vm869_vm4, %v11751_v5 }
 0xca7   : > { %8128 = vmatmul.msk.bf16.gmra.mxu1 %vm869_vm4, %v11751_v5  ;;  %8130 = vmatmul.msk.bf16.gmra.mxu2 %vm869_vm4, %v11751_v5 }
 0xcb6   : > { %8131 = vmatmul.msk.bf16.vlgmr.msra.gmra.mxu3 %vm869_vm4, %v11715_v32  ;;  %8133 = vmatmul.msk.bf16.vlgmr.msra.gmra.mxu0 %vm869_vm4, %v11715_v32 }
 0xcb7   : > { %8135 = vmatmul.msk.bf16.vlgmr.msra.gmra.mxu1 %vm869_vm4, %v11715_v32  ;;  %8137 = vmatmul.msk.bf16.vlgmr.msrb.gmra.mxu2 %vm869_vm4, %v11715_v32 }
 0xcb8   : > { %7042 = vmatpush.bf16.msra.mxu0 %v8757_v6  ;;  %7061 = vmatpush.bf16.msra.mxu1 %v8765_v43 }
 0xcb9   : > { %7023 = vmatpush.bf16.msra.mxu3 %v8749_v58  ;;  %7080 = vmatpush.bf16.msrb.mxu2 %v8773_v56 }
 0xcbc   : > { %7043 = vmatpush.bf16.msra.mxu0 %v8756_v50  ;;  %7062 = vmatpush.bf16.msra.mxu1 %v8764_v41  ;;  %v8743_v50 = vld [vmem:[%s9739_s23 + $0x8] sm:$0xff] }
 0xcbd   : > { %7081 = vmatpush.bf16.msrb.mxu2 %v8772_v44 }
 0xcc0   : > { %7044 = vmatpush.bf16.msra.mxu0 %v8755_v45  ;;  %7063 = vmatpush.bf16.msra.mxu1 %v8763_v60  ;;  %v8767_v60 = vld [vmem:[%s9739_s23 + $0xc8] sm:$0xff] }
 0xcc1   : > { %7082 = vmatpush.bf16.msrb.mxu2 %v8771_v12 }
 0xcc4   : > { %7045 = vmatpush.bf16.msra.mxu0 %v8754_v9  ;;  %7064 = vmatpush.bf16.msra.mxu1 %v8762_v42 }
 0xcc5   : > { %7083 = vmatpush.bf16.msrb.mxu2 %v8770_v4 }
 0xcc6   : > { %8132 = vmatmul.msk.bf16.gmra.mxu3 %vm869_vm4, %v11751_v5  ;;  %8134 = vmatmul.msk.bf16.gmra.mxu0 %vm869_vm4, %v11751_v5 }
 0xcc7   : > { %8136 = vmatmul.msk.bf16.gmra.mxu1 %vm869_vm4, %v11751_v5  ;;  %8138 = vmatmul.msk.bf16.gmra.mxu2 %vm869_vm4, %v11751_v5 }
 0xcc8   : > { %7046 = vmatpush.bf16.msra.mxu0 %v8753_v27  ;;  %7065 = vmatpush.bf16.msra.mxu1 %v8761_v62  ;;  %v8742_v62 = vld [vmem:[%s9739_s23] sm:$0xff] }
 0xcc9   : > { %7084 = vmatpush.bf16.msrb.mxu2 %v8769_v22 }
 0xccc   : > { %7047 = vmatpush.bf16.msra.mxu0 %v8752_v23  ;;  %7066 = vmatpush.bf16.msra.mxu1 %v8760_v19 }
 0xccd   : > { %7085 = vmatpush.bf16.msrb.mxu2 %v8768_v49 }
 0xcd0   : > { %7048 = vmatpush.bf16.msra.mxu0 %v8751_v18  ;;  %7067 = vmatpush.bf16.msra.mxu1 %v8759_v59 }
 0xcd1   : > { %7086 = vmatpush.bf16.msrb.mxu2 %v8767_v60 }
 0xcd4   : > { %7049 = vmatpush.bf16.msra.mxu0 %v8750_v61  ;;  %7068 = vmatpush.bf16.msra.mxu1 %v8758_v63 }
 0xcd6   : > { %8139 = vmatmul.msk.bf16.vlgmr.msrb.gmra.mxu3 %vm869_vm4, %v11715_v32  ;;  %8141 = vmatmul.msk.bf16.vlgmr.msrb.gmra.mxu0 %vm869_vm4, %v11715_v32 }
 0xcd7   : > { %8143 = vmatmul.msk.bf16.vlgmr.msrb.gmra.mxu1 %vm869_vm4, %v11715_v32  ;;  %8145 = vmatmul.msk.bf16.vlgmr.msra.gmra.mxu2 %vm869_vm4, %v11715_v32  ;;  %v8748_v32 = vld [vmem:[%s9739_s23 + $0x30] sm:$0xff] }
 0xcd8   : > { %7024 = vmatpush.bf16.msra.mxu3 %v8748_v32 }
 0xcdc   : > { %7025 = vmatpush.bf16.msra.mxu3 %v8747_v40 }
 0xce0   : > { %7026 = vmatpush.bf16.msra.mxu3 %v8746_v28  ;;  %v8766_v28 = vld [vmem:[%s9739_s23 + $0xc0] sm:$0xff] }
 0xce1   : > { %7087 = vmatpush.bf16.msrb.mxu2 %v8766_v28 }
 0xce4   : > { %7027 = vmatpush.bf16.msra.mxu3 %v8745_v36 }
 0xce6   : > { %8140 = vmatmul.msk.bf16.gmra.mxu3 %vm869_vm4, %v11751_v5  ;;  %8142 = vmatmul.msk.bf16.gmra.mxu0 %vm869_vm4, %v11751_v5 }
 0xce7   : > { %8144 = vmatmul.msk.bf16.gmra.mxu1 %vm869_vm4, %v11751_v5  ;;  %8146 = vmatmul.msk.bf16.gmra.mxu2 %vm869_vm4, %v11751_v5 }
 0xce8   : > { %7028 = vmatpush.bf16.msra.mxu3 %v8744_v47 }
 0xcec   : > { %v5047_v3 = vpop.f32.mrf.mxu0  ;;  %7029 = vmatpush.bf16.msra.mxu3 %v8743_v50 }
 0xced   : > { %v11903_v5 = vadd.f32 %v5047_v3, %v11893_v8  ;;  %v5066_v33 = vpop.f32.mrf.mxu1 }
 0xcee   : > { %v11906_v53 = vadd.f32 %v5066_v33, %v11898_v39 }
 0xcef   : > { %v5324_v14 = vand.u32 2147483647, %v11903_v5  ;;  %vm5708_vm0 = vcmp.ge.f32.partialorder %v11903_v5, 0.0 }
 0xcf0   : > { %v5325_v1 = vand.u32 2147483647, %v11906_v53  ;;  %7030 = vmatpush.bf16.msra.mxu3 %v8742_v62  ;;  %vm5709_vm1 = vcmp.ge.f32.partialorder %v11906_v53, 0.0 }
 0xcf1   : > { %v5388_v11 = vsub.f32 0.0, %v5324_v14 }
 0xcf2   : > { %v5389_v34 = vsub.f32 0.0, %v5325_v1  ;;  %v5028_v15 = vpop.f32.mrf.mxu3 }
 0xcf3   : > { %v5453_v10 = vmul.f32 1.442695, %v5388_v11  ;;  %v11919_v24 = vadd.f32 %v5028_v15, %v11910_v29  ;;  %v5085_v21 = vpop.f32.mrf.mxu2 }
 0xcf4   : > { %v5455_v38 = vmul.f32 1.442695, %v5389_v34  ;;  %v11924_v26 = vadd.f32 %v5085_v21, %v11914_v30  ;;  %v5049_v57 = vpop.f32.mrf.mxu0 }
 0xcf5   : > { %9097 = vpow2.f32 %v5453_v10  ;;  %v5323_v55 = vand.u32 2147483647, %v11919_v24  ;;  %v11928_v20 = vadd.f32 %v5049_v57, %v11893_v8  ;;  %v5068_v52 = vpop.f32.mrf.mxu1  ;;  %vm5707_vm6 = vcmp.ge.f32.partialorder %v11919_v24, 0.0 }
 0xcf6   : > { %9099 = vpow2.f32 %v5455_v38  ;;  %v5326_v35 = vand.u32 2147483647, %v11924_v26  ;;  %v11934_v17 = vadd.f32 %v5068_v52, %v11898_v39  ;;  %v8797_v52 = vld [vmem:[%s9739_s23 + $0x1b8] sm:$0xff]  ;;  %vm5710_vm13 = vcmp.ge.f32.partialorder %v11924_v26, 0.0 }
 0xcf7   : > { %v5387_v46 = vsub.f32 0.0, %v5323_v55  ;;  %v5340_v31 = vand.u32 2147483647, %v11928_v20  ;;  %v8789_v55 = vld [vmem:[%s9739_s23 + $0x178] sm:$0xff]  ;;  %7137 = vmatpush.bf16.msrb.mxu1 %v8797_v52  ;;  %vm5724_vm5 = vcmp.ge.f32.partialorder %v11928_v20, 0.0 }
 0xcf8   : > { %v5390_v51 = vsub.f32 0.0, %v5326_v35  ;;  %v5341_v37 = vand.u32 2147483647, %v11934_v17  ;;  %7118 = vmatpush.bf16.msrb.mxu0 %v8789_v55  ;;  %vm5725_vm3 = vcmp.ge.f32.partialorder %v11934_v17, 0.0 }
 0xcf9   : > { %v5451_v7 = vmul.f32 1.442695, %v5387_v46  ;;  %v5404_v16 = vsub.f32 0.0, %v5340_v31 }
 0xcfa   : > { %v5457_v0 = vmul.f32 1.442695, %v5390_v51  ;;  %v5405_v6 = vsub.f32 0.0, %v5341_v37  ;;  %v5030_v43 = vpop.f32.mrf.mxu3 }
 0xcfb   : > { %v9098_v41 = vpop.eup %9097  ;;  %9101 = vpow2.f32 %v5451_v7  ;;  %v5485_v58 = vmul.f32 1.442695, %v5404_v16  ;;  %v11942_v56 = vadd.f32 %v5030_v43, %v11910_v29  ;;  %v5087_v45 = vpop.f32.mrf.mxu2 }
 0xcfc   : > { %v9100_v32 = vpop.eup %9099  ;;  %v5580_v44 = vadd.f32 1.0, %v9098_v41  ;;  %9103 = vpow2.f32 %v5457_v0  ;;  %v5487_v9 = vmul.f32 1.442695, %v5405_v6  ;;  %v11946_v42 = vadd.f32 %v5087_v45, %v11914_v30  ;;  %v8788_v0 = vld [vmem:[%s9739_s23 + $0x170] sm:$0xff] }
 0xcfd   : > { %9105 = vpow2.f32 %v5485_v58  ;;  %v5339_v40 = vand.u32 2147483647, %v11942_v56  ;;  %v5581_v12 = vadd.f32 1.0, %v9100_v32  ;;  %v8796_v6 = vld [vmem:[%s9739_s23 + $0x1b0] sm:$0xff]  ;;  %7119 = vmatpush.bf16.msrb.mxu0 %v8788_v0  ;;  %vm5723_vm14 = vcmp.ge.f32.partialorder %v11942_v56, 0.0 }
 0xcfe   : > { %v5342_v27 = vand.u32 2147483647, %v11946_v42  ;;  %9107 = vrcp.f32 %v5580_v44  ;;  %7138 = vmatpush.bf16.msrb.mxu1 %v8796_v6  ;;  %v8805_v44 = vld [vmem:[%s9739_s23 + $0x1f8] sm:$0xff]  ;;  %v12018_v0 = vperm.slane %v11884_v54, 6  ;;  %v8779_v6 = vld [vmem:[%s9739_s23 + $0x128] sm:$0xff]  ;;  %vm5726_vm8 = vcmp.ge.f32.partialorder %v11946_v42, 0.0 }
 0xcff   : > { %v5403_v4 = vsub.f32 0.0, %v5339_v40  ;;  %9109 = vpow2.f32 %v5487_v9  ;;  %7156 = vmatpush.bf16.msra.mxu2 %v8805_v44 }
 0xd00   : > { %v5406_v23 = vsub.f32 0.0, %v5342_v27  ;;  %9111 = vrcp.f32 %v5581_v12 }
 0xd01   : > { %v9102_v19 = vpop.eup %9101  ;;  %v5483_v3 = vmul.f32 1.442695, %v5403_v4 }
 0xd02   : > { %v11952_v33 = vpop.eup %9103  ;;  %v5579_v14 = vadd.f32 1.0, %v9102_v19  ;;  %v5489_v11 = vmul.f32 1.442695, %v5406_v23 }
 0xd03   : > { %v9106_v1 = vpop.eup %9105  ;;  %9113 = vpow2.f32 %v5483_v3  ;;  %v5052_v36 = vpop.f32.mrf.mxu0  ;;  %v5582_v21 = vadd.f32 1.0, %v11952_v33 }
 0xd04   : > { %v5596_v22 = vadd.f32 1.0, %v9106_v1  ;;  %v5071_v34 = vpop.f32.mrf.mxu1  ;;  %v9108_v15 = vpop.eup %9107  ;;  %9115 = vrcp.f32 %v5579_v14  ;;  %v11956_v18 = vadd.f32 %v5052_v36, %v11893_v8  ;;  %v8787_v14 = vld [vmem:[%s9739_s23 + $0x168] sm:$0xff] }
 0xd05   : > { %v9110_v10 = vpop.eup %9109  ;;  %v5772_v57 = vmul.f32 %v9108_v15, %v9098_v41  ;;  %v11963_v49 = vadd.f32 %v5071_v34, %v11898_v39  ;;  %7120 = vmatpush.bf16.msrb.mxu0 %v8787_v14 }
 0xd06   : > { %9117 = vrcp.f32 %v5596_v22  ;;  %v5597_v59 = vadd.f32 1.0, %v9110_v10  ;;  %v9112_v38 = vpop.eup %9111  ;;  %v5356_v31 = vand.u32 2147483647, %v11956_v18  ;;  %vm5740_vm11 = vcmp.ge.f32.partialorder %v11956_v18, 0.0 }
 0xd07   : > { %9119 = vpow2.f32 %v5489_v11  ;;  %v5773_v51 = vmul.f32 %v9112_v38, %v9100_v32  ;;  %v5836_v16 = vsel %vm5708_vm0, %v9108_v15, %v5772_v57  ;;  %v5357_v41 = vand.u32 2147483647, %v11963_v49  ;;  %v8781_v32 = vld [vmem:[%s9739_s23 + $0x138] sm:$0xff] }
 0xd08   : > { %9121 = vrcp.f32 %v5597_v59  ;;  %v5420_v60 = vsub.f32 0.0, %v5356_v31  ;;  %v5900_v40 = vmul.f32 %v5836_v16, %v11903_v5  ;;  %7099 = vmatpush.bf16.msrb.mxu3 %v8781_v32  ;;  %v8804_v59 = vld [vmem:[%s9739_s23 + $0x1f0] sm:$0xff]  ;;  %v8786_v31 = vld [vmem:[%s9739_s23 + $0x160] sm:$0xff]  ;;  %vm5741_vm7 = vcmp.ge.f32.partialorder %v11963_v49, 0.0 }
 0xd09   : > { %v11960_v47 = vpop.eup %9113  ;;  %v5033_v35 = vpop.f32.mrf.mxu3  ;;  %9123 = vrcp.f32 %v5582_v21  ;;  %v5837_v12 = vsel %vm5709_vm1, %v9112_v38, %v5773_v51  ;;  %v5421_v5 = vsub.f32 0.0, %v5357_v41  ;;  %v8780_v21 = vld [vmem:[%s9739_s23 + $0x130] sm:$0xff]  ;;  %7157 = vmatpush.bf16.msra.mxu2 %v8804_v59  ;;  %7121 = vmatpush.bf16.msrb.mxu0 %v8786_v31 }
 0xd0a   : > { %v5595_v46 = vadd.f32 1.0, %v11960_v47  ;;  %v5090_v61 = vpop.f32.mrf.mxu2  ;;  %v9116_v63 = vpop.eup %9115  ;;  %v11982_v3 = vadd.f32 %v5033_v35, %v11910_v29  ;;  %v5901_v36 = vmul.f32 %v5837_v12, %v11906_v53  ;;  %v5517_v15 = vmul.f32 1.442695, %v5420_v60 }
 0xd0b   : > { %v5054_v37 = vpop.f32.mrf.mxu0  ;;  %v5771_v27 = vmul.f32 %v9116_v63, %v9102_v19  ;;  %v11989_v19 = vadd.f32 %v5090_v61, %v11914_v30 }
 0xd0c   : > { %v9118_v7 = vpop.eup %9117  ;;  %9125 = vrcp.f32 %v5595_v46  ;;  %v5073_v58 = vpop.f32.mrf.mxu1  ;;  %v5355_v52 = vand.u32 2147483647, %v11982_v3  ;;  %v12004_v35 = vadd.f32 %v5054_v37, %v11893_v8  ;;  %v12007_v46 = vperm.slane %v11884_v54, 5  ;;  %7100 = vmatpush.bf16.msrb.mxu3 %v8780_v21 }
 0xd0d   : > { %v11970_v43 = vpop.eup %9119  ;;  %v5788_v50 = vmul.f32 %v9118_v7, %v9106_v1  ;;  %v8795_v1 = vld [vmem:[%s9739_s23 + $0x1a8] sm:$0xff]  ;;  %v5835_v38 = vsel %vm5707_vm6, %v9116_v63, %v5771_v27  ;;  %v5519_v63 = vmul.f32 1.442695, %v5421_v5  ;;  %v12015_v16 = vadd.f32 %v5073_v58, %v11898_v39 }
 0xd0e   : > { %v5598_v45 = vadd.f32 1.0, %v11970_v43  ;;  %v9122_v9 = vpop.eup %9121  ;;  %7139 = vmatpush.bf16.msrb.mxu1 %v8795_v1  ;;  %v5899_v8 = vmul.f32 %v5835_v38, %v11919_v24  ;;  %v5419_v39 = vsub.f32 0.0, %v5355_v52  ;;  %v5372_v58 = vand.u32 2147483647, %v12004_v35 }
 0xd0f   : > { %v5852_v62 = vsel %vm5724_vm5, %v9118_v7, %v5788_v50  ;;  %v9124_v28 = vpop.eup %9123  ;;  %v5789_v23 = vmul.f32 %v9122_v9, %v9110_v10  ;;  %v8803_v50 = vld [vmem:[%s9739_s23 + $0x1e8] sm:$0xff]  ;;  %v5373_v27 = vand.u32 2147483647, %v12015_v16  ;;  %vm5739_vm2 = vcmp.ge.f32.partialorder %v11982_v3, 0.0 }
 0xd10   : > { %v5916_v4 = vmul.f32 %v5852_v62, %v11928_v20  ;;  %9127 = vrcp.f32 %v5598_v45  ;;  %v5774_v57 = vmul.f32 %v9124_v28, %v11952_v33  ;;  %v8794_v33 = vld [vmem:[%s9739_s23 + $0x1a0] sm:$0xff]  ;;  %7101 = vmatpush.bf16.msrb.mxu3 %v8779_v6  ;;  %7158 = vmatpush.bf16.msra.mxu2 %v8803_v50  ;;  %vm5756_vm9 = vcmp.ge.f32.partialorder %v12004_v35, 0.0 }
 0xd11   : > { %v5035_v20 = vpop.f32.mrf.mxu3  ;;  %v5853_v34 = vsel %vm5725_vm3, %v9122_v9, %v5789_v23  ;;  %9129 = vpow2.f32 %v5517_v15  ;;  %v12031_v9 = vperm.slane %v11884_v54, 4  ;;  %v5436_v23 = vsub.f32 0.0, %v5372_v58 }
 0xd12   : > { %v9126_v11 = vpop.eup %9125  ;;  %v5964_v22 = vpack.c.bf16 %v5916_v4, %v5900_v40  ;;  %v11992_v10 = vpop.f32.mrf.mxu2  ;;  %v5917_v55 = vmul.f32 %v5853_v34, %v11934_v17  ;;  %7140 = vmatpush.bf16.msrb.mxu1 %v8794_v33  ;;  %v5838_v41 = vsel %vm5710_vm13, %v9124_v28, %v5774_v57  ;;  %v12028_v60 = vadd.f32 %v5035_v20, %v11910_v29 }
 0xd13   : > { %v5787_v53 = vmul.f32 %v9126_v11, %v11960_v47  ;;  %v5358_v47 = vand.u32 2147483647, %v11989_v19  ;;  %v5123_v51 = vpop.f32.mrf.mxu0  ;;  %9131 = vpow2.f32 %v5519_v63  ;;  %v5515_v4 = vmul.f32 1.442695, %v5419_v39 }
 0xd14   : > { %7050 = vmatmul.bf16.vlgmr.msra.gmra.mxu0 %v5964_v22  ;;  %v5965_v61 = vpack.c.bf16 %v5917_v55, %v5901_v36  ;;  %v5142_v24 = vpop.f32.mrf.mxu1  ;;  %v12037_v62 = vadd.f32 %v5123_v51, %v12007_v46  ;;  %v5371_v14 = vand.u32 2147483647, %v12028_v60  ;;  %v12053_v34 = vperm.slane %v11884_v54, 7  ;;  %v8793_v51 = vld [vmem:[%s9739_s23 + $0x198] sm:$0xff] }
 0xd15   : > { %v5851_v17 = vsel %vm5723_vm14, %v9126_v11, %v5787_v53  ;;  %v5422_v44 = vsub.f32 0.0, %v5358_v47  ;;  %v12043_v20 = vadd.f32 %v5142_v24, %v12018_v0  ;;  %9133 = vpow2.f32 %v5515_v4  ;;  %v8785_v47 = vld [vmem:[%s9739_s23 + $0x158] sm:$0xff] }
 0xd16   : > { %v9128_v7 = vpop.eup %9127  ;;  %v5915_v37 = vmul.f32 %v5851_v17, %v11942_v56  ;;  %7069 = vmatmul.bf16.vlgmr.msra.gmra.mxu1 %v5965_v61  ;;  %v5549_v21 = vmul.f32 1.442695, %v5436_v23  ;;  %v5435_v59 = vsub.f32 0.0, %v5371_v14  ;;  %v12057_v38 = vadd.f32 %v11992_v10, %v11914_v30  ;;  %7122 = vmatpush.bf16.msrb.mxu0 %v8785_v47 }
 0xd17   : > { %v5790_v45 = vmul.f32 %v9128_v7, %v11970_v43  ;;  %v5902_v43 = vmul.f32 %v5838_v41, %v11924_v26  ;;  %v12040_v1 = vpop.eup %9129  ;;  %v5521_v5 = vmul.f32 1.442695, %v5422_v44  ;;  %v5437_v26 = vsub.f32 0.0, %v5373_v27  ;;  %7141 = vmatpush.bf16.msrb.mxu1 %v8793_v51  ;;  %v8778_v41 = vld [vmem:[%s9739_s23 + $0x120] sm:$0xff]  ;;  %v8784_v44 = vld [vmem:[%s9739_s23 + $0x150] sm:$0xff] }
 0xd18   : > { %v5963_v56 = vpack.c.bf16 %v5915_v37, %v5899_v8  ;;  %v5329_v22 = vand.u32 2147483647, %v12043_v20  ;;  %v5612_v57 = vadd.f32 1.0, %v12040_v1  ;;  %v5547_v30 = vmul.f32 1.442695, %v5435_v59  ;;  %7102 = vmatpush.bf16.msrb.mxu3 %v8778_v41 }
 0xd19   : > { %v5854_v32 = vsel %vm5726_vm8, %v9128_v7, %v5790_v45  ;;  %v5104_v40 = vpop.f32.mrf.mxu3  ;;  %v12049_v36 = vpop.eup %9131  ;;  %9135 = vpow2.f32 %v5521_v5  ;;  %v5551_v53 = vmul.f32 1.442695, %v5437_v26  ;;  %v5374_v10 = vand.u32 2147483647, %v12057_v38  ;;  %v8802_v45 = vld [vmem:[%s9739_s23 + $0x1e0] sm:$0xff] }
 0xd1a   : > { %v5918_v12 = vmul.f32 %v5854_v32, %v11946_v42  ;;  %7031 = vmatmul.bf16.vlgmr.msra.gmra.mxu3 %v5963_v56  ;;  %v5161_v29 = vpop.f32.mrf.mxu2  ;;  %v5328_v42 = vand.u32 2147483647, %v12037_v62  ;;  %v12047_v11 = vadd.f32 %v5104_v40, %v12031_v9  ;;  %v5613_v54 = vadd.f32 1.0, %v12049_v36  ;;  %7159 = vmatpush.bf16.msra.mxu2 %v8802_v45  ;;  %v8792_v40 = vld [vmem:[%s9739_s23 + $0x190] sm:$0xff] }
 0xd1b   : > { %v5125_v15 = vpop.f32.mrf.mxu0  ;;  %v5393_v33 = vsub.f32 0.0, %v5329_v22  ;;  %9137 = vpow2.f32 %v5549_v21  ;;  %v12067_v63 = vadd.f32 %v5161_v29, %v12053_v34  ;;  %v12072_v6 = vpop.eup %9133  ;;  %v5438_v58 = vsub.f32 0.0, %v5374_v10  ;;  %7123 = vmatpush.bf16.msrb.mxu0 %v8784_v44  ;;  %7142 = vmatpush.bf16.msrb.mxu1 %v8792_v40 }
 0xd1c   : > { %v5966_v28 = vpack.c.bf16 %v5918_v12, %v5902_v43  ;;  %v5144_v55 = vpop.f32.mrf.mxu1  ;;  %v5392_v52 = vsub.f32 0.0, %v5328_v42  ;;  %v5327_v31 = vand.u32 2147483647, %v12047_v11  ;;  %v12063_v61 = vadd.f32 %v5125_v15, %v12007_v46 }
 0xd1d   : > { %9139 = vrcp.f32 %v5612_v57  ;;  %v5463_v56 = vmul.f32 1.442695, %v5393_v33  ;;  %v5330_v32 = vand.u32 2147483647, %v12067_v63  ;;  %v12082_v27 = vadd.f32 %v5144_v55, %v12018_v0 }
 0xd1e   : > { %7088 = vmatmul.bf16.vlgmr.msrb.gmra.mxu2 %v5966_v28  ;;  %v5391_v7 = vsub.f32 0.0, %v5327_v31  ;;  %v5344_v8 = vand.u32 2147483647, %v12063_v61  ;;  %9141 = vpow2.f32 %v5551_v53  ;;  %v5461_v50 = vmul.f32 1.442695, %v5392_v52 }
 0xd1f   : > { %v12076_v24 = vpop.eup %9135  ;;  %9143 = vrcp.f32 %v5613_v54  ;;  %v5611_v23 = vadd.f32 1.0, %v12072_v6  ;;  %v5345_v26 = vand.u32 2147483647, %v12082_v27  ;;  %v5553_v59 = vmul.f32 1.442695, %v5438_v58 }
 0xd20   : > { %v5408_v39 = vsub.f32 0.0, %v5344_v8  ;;  %9145 = vpow2.f32 %v5547_v30  ;;  %v5459_v43 = vmul.f32 1.442695, %v5391_v7  ;;  %v5614_v14 = vadd.f32 1.0, %v12076_v24 }
 0xd21   : > { %v5106_v17 = vpop.f32.mrf.mxu3  ;;  %v12087_v4 = vpop.eup %9137  ;;  %9147 = vpow2.f32 %v5461_v50  ;;  %v5394_v57 = vsub.f32 0.0, %v5330_v32  ;;  %v5409_v31 = vsub.f32 0.0, %v5345_v26  ;;  %vm5757_vm10 = vcmp.ge.f32.partialorder %v12015_v16, 0.0 }
 0xd22   : > { %v5163_v37 = vpop.f32.mrf.mxu2  ;;  %v5493_v12 = vmul.f32 1.442695, %v5408_v39  ;;  %v12085_v29 = vadd.f32 %v5106_v17, %v12031_v9  ;;  %9149 = vpow2.f32 %v5463_v56  ;;  %v5628_v52 = vadd.f32 1.0, %v12087_v4 }
 0xd23   : > { %v5128_v28 = vpop.f32.mrf.mxu0  ;;  %v12091_v5 = vpop.eup %9139  ;;  %v12096_v22 = vadd.f32 %v5163_v37, %v12053_v34  ;;  %v5495_v47 = vmul.f32 1.442695, %v5409_v31  ;;  %v5465_v37 = vmul.f32 1.442695, %v5394_v57  ;;  %vm5742_vm12 = vcmp.ge.f32.partialorder %v11989_v19, 0.0 }
 0xd24   : > { %v5343_v42 = vand.u32 2147483647, %v12085_v29  ;;  %v5147_v15 = vpop.f32.mrf.mxu1  ;;  %v12098_v21 = vpop.eup %9141  ;;  %9151 = vpow2.f32 %v5493_v12  ;;  %v12101_v55 = vadd.f32 %v5128_v28, %v12007_v46  ;;  %vm5712_vm15 = vcmp.ge.f32.partialorder %v12037_v62, 0.0 }
 0xd25   : > { %v12103_v53 = vpop.eup %9143  ;;  %9153 = vpow2.f32 %v5459_v43  ;;  %v12109_v30 = vadd.f32 %v5147_v15, %v12018_v0  ;;  %v5629_v10 = vadd.f32 1.0, %v12098_v21  ;;  %v5346_v51 = vand.u32 2147483647, %v12096_v22 }
 0xd26   : > { %v12106_v33 = vpop.eup %9145  ;;  %9155 = vrcp.f32 %v5611_v23  ;;  %v5407_v17 = vsub.f32 0.0, %v5343_v42  ;;  %v5360_v50 = vand.u32 2147483647, %v12101_v55  ;;  %v8777_v23 = vld [vmem:[%s9739_s23 + $0x118] sm:$0xff]  ;;  %v5804_v42 = vmul.f32 %v12091_v5, %v12040_v1  ;;  %v8783_v1 = vld [vmem:[%s9739_s23 + $0x148] sm:$0xff] }
 0xd27   : > { %9157 = vrcp.f32 %v5614_v14  ;;  %v12113_v8 = vpop.eup %9147  ;;  %v5627_v56 = vadd.f32 1.0, %v12106_v33  ;;  %v5361_v32 = vand.u32 2147483647, %v12109_v30  ;;  %v5410_v12 = vsub.f32 0.0, %v5346_v51  ;;  %v8801_v14 = vld [vmem:[%s9739_s23 + $0x1d8] sm:$0xff]  ;;  %7103 = vmatpush.bf16.msrb.mxu3 %v8777_v23  ;;  %7124 = vmatpush.bf16.msrb.mxu0 %v8783_v1  ;;  %v8800_v23 = vld [vmem:[%s9739_s23 + $0x1d0] sm:$0xff] }
 0xd28   : > { %9159 = vpow2.f32 %v5553_v59  ;;  %v12119_v45 = vpop.eup %9149  ;;  %v5491_v58 = vmul.f32 1.442695, %v5407_v17  ;;  %v5584_v15 = vadd.f32 1.0, %v12113_v8  ;;  %v5424_v59 = vsub.f32 0.0, %v5360_v50  ;;  %7160 = vmatpush.bf16.msra.mxu2 %v8801_v14  ;;  %v8791_v17 = vld [vmem:[%s9739_s23 + $0x188] sm:$0xff]  ;;  %v8782_v1 = vld [vmem:[%s9739_s23 + $0x140] sm:$0xff] }
 0xd29   : > { %v5109_v54 = vpop.f32.mrf.mxu3  ;;  %9161 = vrcp.f32 %v5628_v52  ;;  %v5805_v52 = vmul.f32 %v12103_v53, %v12049_v36  ;;  %v5585_v31 = vadd.f32 1.0, %v12119_v45  ;;  %v5425_v51 = vsub.f32 0.0, %v5361_v32  ;;  %7143 = vmatpush.bf16.msrb.mxu1 %v8791_v17  ;;  %v8790_v17 = vld [vmem:[%s9739_s23 + $0x180] sm:$0xff] }
 0xd2a   : > { %v5166_v7 = vpop.f32.mrf.mxu2  ;;  %v12117_v41 = vadd.f32 %v5109_v54, %v12031_v9  ;;  %v12122_v39 = vpop.eup %9151  ;;  %9163 = vpow2.f32 %v5495_v47  ;;  %v5497_v36 = vmul.f32 1.442695, %v5410_v12  ;;  %v5525_v32 = vmul.f32 1.442695, %v5424_v59 }
 0xd2b   : > { %v12126_v44 = vadd.f32 %v5166_v7, %v12053_v34  ;;  %v12128_v40 = vpop.eup %9153  ;;  %9165 = vrcp.f32 %v5629_v10  ;;  %v5600_v43 = vadd.f32 1.0, %v12122_v39  ;;  %v5130_v54 = vpop.f32.mrf.mxu0  ;;  %v5869_v12 = vsel %vm5741_vm7, %v12103_v53, %v5805_v52  ;;  %7125 = vmatpush.bf16.msrb.mxu0 %v8782_v1  ;;  %v8775_v52 = vld [vmem:[%s9739_s23 + $0x108] sm:$0xff] }
 0xd2c   : > { %v5359_v28 = vand.u32 2147483647, %v12117_v41  ;;  %v12134_v26 = vpop.eup %9155  ;;  %9167 = vpow2.f32 %v5465_v37  ;;  %v5583_v47 = vadd.f32 1.0, %v12128_v40  ;;  %v12162_v48 = vadd.f32 %v5130_v54, %v12007_v46  ;;  %7161 = vmatpush.bf16.msra.mxu2 %v8800_v23  ;;  %v8821_v23 = vld [vmem:[%s9739_s23 + $0x278] sm:$0xff] }
 0xd2d   : > { %v12139_v57 = vpop.eup %9157  ;;  %9169 = vrcp.f32 %v5627_v56  ;;  %v5362_v7 = vand.u32 2147483647, %v12126_v44  ;;  %v8776_v56 = vld [vmem:[%s9739_s23 + $0x110] sm:$0xff]  ;;  %v5527_v46 = vmul.f32 1.442695, %v5425_v51  ;;  %7144 = vmatpush.bf16.msrb.mxu1 %v8790_v17  ;;  %v5149_v51 = vpop.f32.mrf.mxu1  ;;  %vm5728_vm0 = vcmp.ge.f32.partialorder %v12063_v61, 0.0 }
 0xd2e   : > { %v12147_v10 = vpop.eup %9159  ;;  %9171 = vpow2.f32 %v5491_v58  ;;  %v5423_v50 = vsub.f32 0.0, %v5359_v28  ;;  %v5868_v58 = vsel %vm5740_vm11, %v12091_v5, %v5804_v42  ;;  %7104 = vmatpush.bf16.msrb.mxu3 %v8776_v56  ;;  %vm5713_vm1 = vcmp.ge.f32.partialorder %v12043_v20, 0.0 }
 0xd2f   : > { %v12151_v37 = vpop.eup %9161  ;;  %9173 = vrcp.f32 %v5600_v43  ;;  %v5426_v42 = vsub.f32 0.0, %v5362_v7  ;;  %v12175_v53 = vmul.f32 %v5868_v58, %v11956_v18  ;;  %v5376_v18 = vand.u32 2147483647, %v12162_v48  ;;  %v8829_v58 = vld [vmem:[%s9739_s23 + $0x2b8] sm:$0xff]  ;;  %7194 = vmatpush.bf16.msra.mxu0 %v8821_v23 }
 0xd30   : > { %v12156_v14 = vpop.eup %9163  ;;  %9175 = vrcp.f32 %v5584_v15  ;;  %v5523_v59 = vmul.f32 1.442695, %v5423_v50  ;;  %v5820_v7 = vmul.f32 %v12151_v37, %v12087_v4  ;;  %v5803_v50 = vmul.f32 %v12134_v26, %v12072_v6 }
 0xd31   : > { %v9166_v43 = vpop.eup %9165  ;;  %9177 = vrcp.f32 %v5585_v31  ;;  %v5601_v28 = vadd.f32 1.0, %v12156_v14  ;;  %v8799_v31 = vld [vmem:[%s9739_s23 + $0x1c8] sm:$0xff]  ;;  %v5806_v4 = vmul.f32 %v12139_v57, %v12076_v24  ;;  %v5630_v6 = vadd.f32 1.0, %v12147_v10  ;;  %7213 = vmatpush.bf16.msra.mxu1 %v8829_v58  ;;  %v8798_v24 = vld [vmem:[%s9739_s23 + $0x1c0] sm:$0xff] }
 0xd32   : > { %v12169_v5 = vpop.eup %9167  ;;  %9179 = vrcp.f32 %v5583_v47  ;;  %v12183_v47 = vmul.f32 %v5869_v12, %v11963_v49  ;;  %v5821_v49 = vmul.f32 %v9166_v43, %v12098_v21  ;;  %7105 = vmatpush.bf16.msrb.mxu3 %v8775_v52  ;;  %7162 = vmatpush.bf16.msra.mxu2 %v8799_v31  ;;  %v5529_v12 = vmul.f32 1.442695, %v5426_v42  ;;  %v8774_v52 = vld [vmem:[%s9739_s23 + $0x100] sm:$0xff]  ;;  %v5168_v58 = vpop.f32.mrf.mxu2 }
 0xd33   : > { %v12172_v15 = vpop.eup %9169  ;;  %9181 = vpow2.f32 %v5497_v36  ;;  %v5586_v56 = vadd.f32 1.0, %v12169_v5  ;;  %v12203_v21 = vadd.f32 %v5149_v51, %v12018_v0  ;;  %v5884_v17 = vsel %vm5756_vm9, %v12151_v37, %v5820_v7 }
 0xd34   : > { %v12180_v54 = vpop.eup %9171  ;;  %9183 = vpow2.f32 %v5525_v32  ;;  %v5440_v42 = vsub.f32 0.0, %v5376_v18  ;;  %v5948_v25 = vmul.f32 %v5884_v17, %v12004_v35  ;;  %v5885_v0 = vsel %vm5757_vm10, %v9166_v43, %v5821_v49  ;;  %v8820_v35 = vld [vmem:[%s9739_s23 + $0x270] sm:$0xff]  ;;  %v8813_v17 = vld [vmem:[%s9739_s23 + $0x238] sm:$0xff] }
 0xd35   : > { %v9174_v36 = vpop.eup %9173  ;;  %9185 = vrcp.f32 %v5601_v28  ;;  %v5599_v28 = vadd.f32 1.0, %v12180_v54  ;;  %v5867_v37 = vsel %vm5739_vm2, %v12134_v26, %v5803_v50  ;;  %v5949_v7 = vmul.f32 %v5885_v0, %v12015_v16  ;;  %7195 = vmatpush.bf16.msra.mxu0 %v8820_v35 }
 0xd36   : > { %v12196_v32 = vpop.eup %9175  ;;  %9187 = vpow2.f32 %v5527_v46  ;;  %v5792_v46 = vmul.f32 %v9174_v36, %v12122_v39  ;;  %7106 = vmatpush.bf16.msrb.mxu3 %v8774_v52  ;;  %7163 = vmatpush.bf16.msra.mxu2 %v8798_v24  ;;  %v8828_v39 = vld [vmem:[%s9739_s23 + $0x2b0] sm:$0xff]  ;;  %v5980_v26 = vpack.c.bf16 %v5948_v25, %v12175_v53  ;;  %v5377_v16 = vand.u32 2147483647, %v12203_v21  ;;  %v8837_v52 = vld [vmem:[%s9739_s23 + $0x2f8] sm:$0xff] }
 0xd37   : > { %v9178_v1 = vpop.eup %9177  ;;  %9189 = vpow2.f32 %v5523_v59  ;;  %v12214_v59 = vpop.f32.mrf.mxu3  ;;  %v5776_v18 = vmul.f32 %v12196_v32, %v12113_v8  ;;  %v5981_v23 = vpack.c.bf16 %v5949_v7, %v12183_v47  ;;  %7214 = vmatpush.bf16.msra.mxu1 %v8828_v39  ;;  %v12246_v47 = vmul.f32 %v5867_v37, %v11982_v3 }
 0xd38   : > { %v9180_v31 = vpop.eup %9179  ;;  %9191 = vrcp.f32 %v5586_v56  ;;  %v5777_v49 = vmul.f32 %v9178_v1, %v12119_v45  ;;  %v5856_v25 = vsel %vm5728_vm0, %v9174_v36, %v5792_v46  ;;  %v5557_v45 = vmul.f32 1.442695, %v5440_v42  ;;  %7055 = vmatmul.bf16.gmra.mxu0 %v5980_v26  ;;  %v8819_v36 = vld [vmem:[%s9739_s23 + $0x268] sm:$0xff]  ;;  %v8818_v26 = vld [vmem:[%s9739_s23 + $0x260] sm:$0xff] }
 0xd39   : > { %v12216_v51 = vpop.eup %9181  ;;  %9193 = vpow2.f32 %v5529_v12  ;;  %v5775_v56 = vmul.f32 %v9180_v31, %v12128_v40  ;;  %v12241_v40 = vpop.f32.mrf.mxu0  ;;  %v5870_v12 = vsel %vm5742_vm12, %v12139_v57, %v5806_v4  ;;  %vm5755_vm6 = vcmp.ge.f32.partialorder %v12028_v60, 0.0  ;;  %7074 = vmatmul.bf16.gmra.mxu1 %v5981_v23  ;;  %7196 = vmatpush.bf16.msra.mxu0 %v8819_v36 }
 0xd3a   : > { %v12225_v43 = vpop.eup %9183  ;;  %9195 = vrcp.f32 %v5599_v28  ;;  %vm5711_vm5 = vcmp.ge.f32.partialorder %v12047_v11, 0.0  ;;  %7175 = vmatpush.bf16.msra.mxu3 %v8813_v17  ;;  %v8827_v28 = vld [vmem:[%s9739_s23 + $0x2a8] sm:$0xff]  ;;  %vm5758_vm13 = vcmp.ge.f32.partialorder %v12057_v38, 0.0  ;;  %v5840_v3 = vsel %vm5712_vm15, %v12196_v32, %v5776_v18  ;;  %7232 = vmatpush.bf16.msrb.mxu2 %v8837_v52  ;;  %v8812_v32 = vld [vmem:[%s9739_s23 + $0x230] sm:$0xff] }
 0xd3b   : > { %v9186_v50 = vpop.eup %9185  ;;  %9197 = vrcp.f32 %v5630_v6  ;;  %v5602_v6 = vadd.f32 1.0, %v12216_v51  ;;  %v5841_v57 = vsel %vm5713_vm1, %v9178_v1, %v5777_v49  ;;  %v5616_v24 = vadd.f32 1.0, %v12225_v43  ;;  %7215 = vmatpush.bf16.msra.mxu1 %v8827_v28  ;;  %v8836_v1 = vld [vmem:[%s9739_s23 + $0x2f0] sm:$0xff]  ;;  %v12301_v17 = vld [vmem:[%s9729_s29 + $0x8] sm:$0xff]  ;;  %v5237_v28 = vpop.f32.mrf.mxu2 }
 0xd3c   : > { %v12236_v8 = vpop.eup %9187  ;;  %v5793_v4 = vmul.f32 %v9186_v50, %v12156_v14  ;;  %v5839_v42 = vsel %vm5711_vm5, %v9180_v31, %v5775_v56  ;;  %v12267_v0 = vmul.f32 %v5856_v25, %v12063_v61  ;;  %v5441_v7 = vsub.f32 0.0, %v5377_v16  ;;  %v8826_v56 = vld [vmem:[%s9739_s23 + $0x2a0] sm:$0xff] }
 0xd3d   : > { %v12243_v53 = vpop.eup %9189  ;;  %v5617_v37 = vadd.f32 1.0, %v12236_v8  ;;  %v12275_v14 = vmul.f32 %v5870_v12, %v11989_v19  ;;  %vm5729_vm3 = vcmp.ge.f32.partialorder %v12082_v27, 0.0  ;;  %9199 = vpow2.f32 %v5557_v45  ;;  %v5218_v19 = vpop.f32.mrf.mxu1  ;;  %7197 = vmatpush.bf16.msra.mxu0 %v8818_v26  ;;  %v8835_v45 = vld [vmem:[%s9739_s23 + $0x2e8] sm:$0xff] }
 0xd3e   : > { %v12264_v46 = vpop.eup %9191  ;;  %v5615_v31 = vadd.f32 1.0, %v12243_v53  ;;  %v12282_v39 = vmul.f32 %v5840_v3, %v12037_v62  ;;  %v12285_v18 = vmul.f32 %v5841_v57, %v12043_v20  ;;  %9201 = vrcp.f32 %v5602_v6  ;;  %7176 = vmatpush.bf16.msra.mxu3 %v8812_v32  ;;  %7233 = vmatpush.bf16.msrb.mxu2 %v8836_v1 }
 0xd3f   : > { %v12272_v35 = vpop.eup %9193  ;;  %v12289_v49 = vadd.f32 %v12214_v59, %v12031_v9  ;;  %v12294_v23 = vmul.f32 %v5839_v42, %v12047_v11  ;;  %v12298_v62 = vmul.f32 %v12264_v46, %v12169_v5  ;;  %v5857_v20 = vsel %vm5729_vm3, %v9186_v50, %v5793_v4  ;;  %v5180_v9 = vpop.f32.mrf.mxu3  ;;  %7216 = vmatpush.bf16.msra.mxu1 %v8826_v56  ;;  %v8811_v11 = vld [vmem:[%s9739_s23 + $0x228] sm:$0xff] }
 0xd40   : > { %v12279_v61 = vpop.eup %9195  ;;  %9203 = vrcp.f32 %v5616_v24  ;;  %v5968_v59 = vpack.c.bf16 %v12267_v0, %v12282_v39  ;;  %v5559_v52 = vmul.f32 1.442695, %v5441_v7  ;;  %v12306_v25 = vadd.f32 %v5168_v58, %v12053_v34 }
 0xd41   : > { %v9198_v16 = vpop.eup %9197  ;;  %9205 = vrcp.f32 %v5617_v37  ;;  %vm5727_vm14 = vcmp.ge.f32.partialorder %v12085_v29, 0.0  ;;  %v5791_v5 = vmul.f32 %v12279_v61, %v12180_v54  ;;  %v5618_v50 = vadd.f32 1.0, %v12272_v35 }
 0xd42   : > { %9207 = vrcp.f32 %v5615_v31  ;;  %v5819_v12 = vmul.f32 %v12172_v15, %v12106_v33  ;;  %v5921_v6 = vmul.f32 %v5857_v20, %v12082_v27  ;;  %v5375_v34 = vand.u32 2147483647, %v12289_v49  ;;  %7177 = vmatpush.bf16.msra.mxu3 %v8811_v11  ;;  %7234 = vmatpush.bf16.msrb.mxu2 %v8835_v45 }
 0xd43   : > { %v5822_v58 = vmul.f32 %v9198_v16, %v12147_v10  ;;  %v12320_v36 = vperm.slane %v12301_v17, 1  ;;  %v12322_v3 = vpop.eup %9199  ;;  %v12328_v57 = vperm.slane %v12301_v17, 2  ;;  %v12331_v27 = vperm.slane %v12301_v17, 0  ;;  %v5201_v10 = vpop.f32.mrf.mxu0 }
 0xd44   : > { %v5883_v54 = vsel %vm5755_vm6, %v12172_v15, %v5819_v12  ;;  %v12334_v33 = vperm.slane %v12301_v17, 3  ;;  %v9202_v4 = vpop.eup %9201  ;;  %vm5714_vm8 = vcmp.ge.f32.partialorder %v12067_v63, 0.0  ;;  %v5378_v24 = vand.u32 2147483647, %v12306_v25 }
 0xd45   : > { %v5947_v42 = vmul.f32 %v5883_v54, %v12028_v60  ;;  %v5886_v15 = vsel %vm5758_vm13, %v9198_v16, %v5822_v58  ;;  %v12343_v0 = vadd.f32 %v12241_v40, %v12320_v36  ;;  %vm5730_vm11 = vcmp.ge.f32.partialorder %v12096_v22, 0.0  ;;  %v5220_v11 = vpop.f32.mrf.mxu1 }
 0xd46   : > { %v12345_v37 = vpop.eup %9203  ;;  %v5950_v7 = vmul.f32 %v5886_v15, %v12057_v38  ;;  %v12350_v32 = vadd.f32 %v5218_v19, %v12328_v57  ;;  %v12353_v1 = vadd.f32 %v5180_v9, %v12331_v27  ;;  %v12356_v60 = vadd.f32 %v5237_v28, %v12334_v33 }
 0xd47   : > { %v12358_v31 = vpop.eup %9205  ;;  %v5969_v40 = vpack.c.bf16 %v5921_v6, %v12285_v18  ;;  %v5979_v39 = vpack.c.bf16 %v5947_v42, %v12246_v47  ;;  %v5332_v26 = vand.u32 2147483647, %v12343_v0  ;;  %v12364_v56 = vadd.f32 %v5201_v10, %v12320_v36  ;;  %v8817_v42 = vld [vmem:[%s9739_s23 + $0x258] sm:$0xff] }
 0xd48   : > { %v12366_v38 = vpop.eup %9207  ;;  %9209 = vrcp.f32 %v5618_v50  ;;  %v5982_v19 = vpack.c.bf16 %v5950_v7, %v12275_v14  ;;  %v5333_v16 = vand.u32 2147483647, %v12350_v32  ;;  %v5331_v20 = vand.u32 2147483647, %v12353_v1  ;;  %7126 = vmatmul.bf16.vlgmr.msrb.gmra.mxu0 %v5968_v59  ;;  %v5182_v14 = vpop.f32.mrf.mxu3 }
 0xd49   : > { %v5632_v9 = vadd.f32 1.0, %v12322_v3  ;;  %9211 = vpow2.f32 %v5559_v52  ;;  %v5439_v18 = vsub.f32 0.0, %v5375_v34  ;;  %7036 = vmatmul.bf16.gmra.mxu3 %v5979_v39  ;;  %v5396_v47 = vsub.f32 0.0, %v5332_v26  ;;  %7145 = vmatmul.bf16.vlgmr.msrb.gmra.mxu1 %v5969_v40 }
 0xd4a   : > { %v5442_v45 = vsub.f32 0.0, %v5378_v24  ;;  %7093 = vmatmul.bf16.gmra.mxu2 %v5982_v19  ;;  %v5397_v12 = vsub.f32 0.0, %v5333_v16  ;;  %v5395_v6 = vsub.f32 0.0, %v5331_v20  ;;  %v5334_v50 = vand.u32 2147483647, %v12356_v60  ;;  %v5239_v19 = vpop.f32.mrf.mxu2  ;;  %7198 = vmatpush.bf16.msra.mxu0 %v8817_v42  ;;  %v8810_v16 = vld [vmem:[%s9739_s23 + $0x220] sm:$0xff] }
 0xd4b   : > { %v5855_v58 = vsel %vm5727_vm14, %v12279_v61, %v5791_v5  ;;  %v5794_v52 = vmul.f32 %v9202_v4, %v12216_v51  ;;  %v5469_v34 = vmul.f32 1.442695, %v5396_v47  ;;  %v5348_v28 = vand.u32 2147483647, %v12364_v56  ;;  %v8825_v51 = vld [vmem:[%s9739_s23 + $0x298] sm:$0xff]  ;;  %7178 = vmatpush.bf16.msra.mxu3 %v8810_v16 }
 0xd4c   : > { %vm5744_vm7 = vcmp.ge.f32.partialorder %v12101_v55, 0.0  ;;  %v5471_v54 = vmul.f32 1.442695, %v5397_v12  ;;  %v5467_v10 = vmul.f32 1.442695, %v5395_v6  ;;  %v5398_v24 = vsub.f32 0.0, %v5334_v50  ;;  %7217 = vmatpush.bf16.msra.mxu1 %v8825_v51  ;;  %v5204_v12 = vpop.f32.mrf.mxu0 }
 0xd4d   : > { %v12380_v59 = vadd.f32 %v5220_v11, %v12328_v57  ;;  %v5555_v15 = vmul.f32 1.442695, %v5439_v18  ;;  %9213 = vpow2.f32 %v5469_v34  ;;  %v5412_v7 = vsub.f32 0.0, %v5348_v28  ;;  %v8816_v6 = vld [vmem:[%s9739_s23 + $0x250] sm:$0xff]  ;;  %v8809_v16 = vld [vmem:[%s9739_s23 + $0x218] sm:$0xff] }
 0xd4e   : > { %v12384_v61 = vadd.f32 %v5182_v14, %v12331_v27  ;;  %v12387_v5 = vpop.eup %9209  ;;  %v5842_v40 = vsel %vm5714_vm8, %v12264_v46, %v12298_v62  ;;  %9215 = vrcp.f32 %v5632_v9  ;;  %v5561_v39 = vmul.f32 1.442695, %v5442_v45  ;;  %v8834_v46 = vld [vmem:[%s9739_s23 + $0x2e0] sm:$0xff]  ;;  %v8824_v50 = vld [vmem:[%s9739_s23 + $0x290] sm:$0xff]  ;;  %7199 = vmatpush.bf16.msra.mxu0 %v8816_v6 }
 0xd4f   : > { %v5349_v26 = vand.u32 2147483647, %v12380_v59  ;;  %v12395_v20 = vpop.eup %9211  ;;  %v5858_v18 = vsel %vm5730_vm11, %v9202_v4, %v5794_v52  ;;  %9217 = vpow2.f32 %v5471_v54  ;;  %v5501_v47 = vmul.f32 1.442695, %v5412_v7  ;;  %7235 = vmatpush.bf16.msrb.mxu2 %v8834_v46  ;;  %7179 = vmatpush.bf16.msra.mxu3 %v8809_v16 }
 0xd50   : > { %v5347_v11 = vand.u32 2147483647, %v12384_v61  ;;  %v5919_v62 = vmul.f32 %v5855_v58, %v12085_v29  ;;  %9219 = vpow2.f32 %v5467_v10  ;;  %v5473_v9 = vmul.f32 1.442695, %v5398_v24  ;;  %7218 = vmatpush.bf16.msra.mxu1 %v8824_v50 }
 0xd51   : > { %v5413_v45 = vsub.f32 0.0, %v5349_v26  ;;  %v5808_v14 = vmul.f32 %v12345_v37, %v12225_v43  ;;  %v5809_v4 = vmul.f32 %v12358_v31, %v12236_v8  ;;  %9221 = vpow2.f32 %v5555_v15  ;;  %v5223_v8 = vpop.f32.mrf.mxu1 }
 0xd52   : > { %v5411_v52 = vsub.f32 0.0, %v5347_v11  ;;  %v5922_v34 = vmul.f32 %v5858_v18, %v12096_v22  ;;  %9223 = vpow2.f32 %v5501_v47  ;;  %v12410_v58 = vadd.f32 %v5239_v19, %v12334_v33 }
 0xd53   : > { %v5503_v29 = vmul.f32 1.442695, %v5413_v45  ;;  %v12412_v28 = vpop.eup %9213  ;;  %vm5745_vm2 = vcmp.ge.f32.partialorder %v12109_v30, 0.0  ;;  %vm5743_vm9 = vcmp.ge.f32.partialorder %v12117_v41, 0.0  ;;  %9225 = vpow2.f32 %v5561_v39 }
 0xd54   : > { %v5499_v43 = vmul.f32 1.442695, %v5411_v52  ;;  %v12416_v54 = vpop.eup %9215  ;;  %v5906_v22 = vmul.f32 %v5842_v40, %v12067_v63  ;;  %v5967_v10 = vpack.c.bf16 %v5919_v62, %v12294_v23  ;;  %9227 = vpow2.f32 %v5473_v9  ;;  %v5185_v40 = vpop.f32.mrf.mxu3  ;;  %v8815_v9 = vld [vmem:[%s9739_s23 + $0x248] sm:$0xff] }
 0xd55   : > { %v12421_v24 = vadd.f32 %v5204_v12, %v12320_v36  ;;  %v12423_v42 = vpop.eup %9217  ;;  %v5872_v15 = vsel %vm5744_vm7, %v12345_v37, %v5808_v14  ;;  %v5873_v7 = vsel %vm5745_vm2, %v12358_v31, %v5809_v4  ;;  %v5807_v51 = vmul.f32 %v12366_v38, %v12243_v53  ;;  %v8833_v37 = vld [vmem:[%s9739_s23 + $0x2d8] sm:$0xff]  ;;  %v5242_v62 = vpop.f32.mrf.mxu2  ;;  %v8823_v14 = vld [vmem:[%s9739_s23 + $0x288] sm:$0xff]  ;;  %7200 = vmatpush.bf16.msra.mxu0 %v8815_v9 }
 0xd56   : > { %v5588_v63 = vadd.f32 1.0, %v12412_v28  ;;  %v12432_v39 = vpop.eup %9219  ;;  %v5970_v23 = vpack.c.bf16 %v5922_v34, %v5906_v22  ;;  %v5810_v26 = vmul.f32 %v12387_v5, %v12272_v35  ;;  %9229 = vpow2.f32 %v5503_v29  ;;  %7236 = vmatpush.bf16.msrb.mxu2 %v8833_v37  ;;  %7219 = vmatpush.bf16.msra.mxu1 %v8823_v14  ;;  %v8822_v37 = vld [vmem:[%s9739_s23 + $0x280] sm:$0xff]  ;;  %v8831_v9 = vld [vmem:[%s9739_s23 + $0x2c8] sm:$0xff] }
 0xd57   : > { %v5350_v19 = vand.u32 2147483647, %v12410_v58  ;;  %v12439_v18 = vpop.eup %9221  ;;  %vm5746_vm10 = vcmp.ge.f32.partialorder %v12126_v44, 0.0  ;;  %v5633_v53 = vadd.f32 1.0, %v12395_v20  ;;  %9231 = vpow2.f32 %v5499_v43  ;;  %v8808_v43 = vld [vmem:[%s9739_s23 + $0x210] sm:$0xff] }
 0xd58   : > { %v12444_v31 = vadd.f32 %v5223_v8, %v12328_v57  ;;  %v12446_v47 = vpop.eup %9223  ;;  %vm5760_vm12 = vcmp.ge.f32.partialorder %v12162_v48, 0.0  ;;  %v5589_v35 = vadd.f32 1.0, %v12423_v42  ;;  %v5364_v11 = vand.u32 2147483647, %v12421_v24  ;;  %v8832_v8 = vld [vmem:[%s9739_s23 + $0x2d0] sm:$0xff]  ;;  %7180 = vmatpush.bf16.msra.mxu3 %v8808_v43 }
 0xd59   : > { %v12452_v46 = vadd.f32 %v5185_v40, %v12331_v27  ;;  %v12455_v45 = vpop.eup %9225  ;;  %v12458_v12 = vmul.f32 %v5872_v15, %v12101_v55  ;;  %v12461_v6 = vmul.f32 %v5873_v7, %v12109_v30  ;;  %9233 = vrcp.f32 %v5588_v63  ;;  %7107 = vmatmul.bf16.vlgmr.msrb.gmra.mxu3 %v5967_v10  ;;  %v5206_v30 = vpop.f32.mrf.mxu0  ;;  %v8814_v63 = vld [vmem:[%s9739_s23 + $0x240] sm:$0xff] }
 0xd5a   : > { %v5587_v50 = vadd.f32 1.0, %v12432_v39  ;;  %v12465_v4 = vpop.eup %9227  ;;  %v5871_v52 = vsel %vm5743_vm9, %v12366_v38, %v5807_v51  ;;  %v5874_v34 = vsel %vm5746_vm10, %v12387_v5, %v5810_v26  ;;  %v5631_v55 = vadd.f32 1.0, %v12439_v18  ;;  %7164 = vmatmul.bf16.vlgmr.msra.gmra.mxu2 %v5970_v23  ;;  %7201 = vmatpush.bf16.msra.mxu0 %v8814_v63 }
 0xd5b   : > { %v5414_v29 = vsub.f32 0.0, %v5350_v19  ;;  %9235 = vrcp.f32 %v5633_v53  ;;  %v5604_v22 = vadd.f32 1.0, %v12446_v47  ;;  %v5365_v10 = vand.u32 2147483647, %v12444_v31  ;;  %7237 = vmatpush.bf16.msrb.mxu2 %v8832_v8  ;;  %v5225_v19 = vpop.f32.mrf.mxu1  ;;  %7220 = vmatpush.bf16.msra.mxu1 %v8822_v37  ;;  %v8852_v37 = vld [vmem:[%s9739_s23 + $0x370] sm:$0xff] }
 0xd5c   : > { %v12479_v38 = vadd.f32 %v5242_v62, %v12334_v33  ;;  %v12481_v5 = vpop.eup %9229  ;;  %v5634_v15 = vadd.f32 1.0, %v12455_v45  ;;  %9237 = vrcp.f32 %v5589_v35  ;;  %v5428_v7 = vsub.f32 0.0, %v5364_v11  ;;  %v8807_v62 = vld [vmem:[%s9739_s23 + $0x208] sm:$0xff]  ;;  %v5187_v63 = vpop.f32.mrf.mxu3 }
 0xd5d   : > { %v5363_v51 = vand.u32 2147483647, %v12452_v46  ;;  %v12486_v40 = vpop.eup %9231  ;;  %9239 = vrcp.f32 %v5587_v50  ;;  %v5590_v23 = vadd.f32 1.0, %v12465_v4  ;;  %v12490_v26 = vadd.f32 %v5206_v30, %v12320_v36  ;;  %7181 = vmatpush.bf16.msra.mxu3 %v8807_v62 }
 0xd5e   : > { %v5824_v16 = vmul.f32 %v12416_v54, %v12322_v3  ;;  %v12496_v53 = vmul.f32 %v5871_v52, %v12117_v41  ;;  %v12499_v35 = vmul.f32 %v5874_v34, %v12126_v44  ;;  %9241 = vrcp.f32 %v5631_v55  ;;  %v8853_v34 = vld [vmem:[%s9739_s23 + $0x378] sm:$0xff] }
 0xd5f   : > { %v5505_v11 = vmul.f32 1.442695, %v5414_v29  ;;  %v9234_v36 = vpop.eup %9233  ;;  %vm5761_vm15 = vcmp.ge.f32.partialorder %v12203_v21, 0.0  ;;  %9243 = vrcp.f32 %v5604_v22  ;;  %v5605_v3 = vadd.f32 1.0, %v12481_v5  ;;  %7238 = vmatpush.bf16.msrb.mxu2 %v8831_v9  ;;  %v8861_v55 = vld [vmem:[%s9739_s23 + $0x3b8] sm:$0xff]  ;;  %7270 = vmatpush.bf16.msrb.mxu0 %v8853_v34 }
 0xd60   : > { %v5429_v50 = vsub.f32 0.0, %v5365_v10  ;;  %v5366_v41 = vand.u32 2147483647, %v12479_v38  ;;  %9245 = vrcp.f32 %v5634_v15  ;;  %v5603_v44 = vadd.f32 1.0, %v12486_v40  ;;  %7289 = vmatpush.bf16.msrb.mxu1 %v8861_v55  ;;  %v8806_v10 = vld [vmem:[%s9739_s23 + $0x200] sm:$0xff]  ;;  %v8845_v34 = vld [vmem:[%s9739_s23 + $0x338] sm:$0xff] }
 0xd61   : > { %v5427_v14 = vsub.f32 0.0, %v5363_v51  ;;  %v12508_v52 = vadd.f32 %v5225_v19, %v12328_v57  ;;  %v9236_v29 = vpop.eup %9235  ;;  %9247 = vrcp.f32 %v5590_v23  ;;  %v5533_v30 = vmul.f32 1.442695, %v5428_v7  ;;  %v8830_v15 = vld [vmem:[%s9739_s23 + $0x2c0] sm:$0xff]  ;;  %7182 = vmatpush.bf16.msra.mxu3 %v8806_v10  ;;  %v8859_v10 = vld [vmem:[%s9739_s23 + $0x3a8] sm:$0xff] }
 0xd62   : > { %v5380_v43 = vand.u32 2147483647, %v12490_v26  ;;  %v5888_v8 = vsel %vm5760_vm12, %v12416_v54, %v5824_v16  ;;  %v12516_v22 = vpop.eup %9237  ;;  %vm5716_vm0 = vcmp.ge.f32.partialorder %v12343_v0, 0.0  ;;  %v5780_v57 = vmul.f32 %v9234_v36, %v12412_v28 }
 0xd63   : > { %vm5717_vm1 = vcmp.ge.f32.partialorder %v12350_v32, 0.0  ;;  %9249 = vpow2.f32 %v5505_v11  ;;  %v9240_v7 = vpop.eup %9239  ;;  %vm5715_vm6 = vcmp.ge.f32.partialorder %v12353_v1, 0.0  ;;  %v5535_v54 = vmul.f32 1.442695, %v5429_v50  ;;  %7239 = vmatpush.bf16.msrb.mxu2 %v8830_v15  ;;  %v8860_v11 = vld [vmem:[%s9739_s23 + $0x3b0] sm:$0xff]  ;;  %7271 = vmatpush.bf16.msrb.mxu0 %v8852_v37 }
 0xd64   : > { %9251 = vrcp.f32 %v5605_v3  ;;  %v5430_v51 = vsub.f32 0.0, %v5366_v41  ;;  %v12524_v23 = vpop.eup %9241  ;;  %v5531_v28 = vmul.f32 1.442695, %v5427_v14  ;;  %v5381_v19 = vand.u32 2147483647, %v12508_v52  ;;  %7290 = vmatpush.bf16.msrb.mxu1 %v8860_v11 }
 0xd65   : > { %9253 = vrcp.f32 %v5603_v44  ;;  %v5952_v16 = vmul.f32 %v5888_v8, %v12162_v48  ;;  %v9244_v62 = vpop.eup %9243  ;;  %vm5759_vm5 = vcmp.ge.f32.partialorder %v12289_v49, 0.0  ;;  %v5781_v9 = vmul.f32 %v12516_v22, %v12423_v42  ;;  %v8869_v42 = vld [vmem:[%s9739_s23 + $0x3f8] sm:$0xff]  ;;  %7251 = vmatpush.bf16.msrb.mxu3 %v8845_v34 }
 0xd66   : > { %9255 = vpow2.f32 %v5533_v30  ;;  %v5444_v3 = vsub.f32 0.0, %v5380_v43  ;;  %v5825_v50 = vmul.f32 %v9236_v29, %v12395_v20  ;;  %v12534_v41 = vpop.eup %9245  ;;  %v5844_v48 = vsel %vm5716_vm0, %v9234_v36, %v5780_v57  ;;  %v5244_v36 = vpop.f32.mrf.mxu2  ;;  %v8851_v57 = vld [vmem:[%s9739_s23 + $0x368] sm:$0xff] }
 0xd67   : > { %v5779_v44 = vmul.f32 %v9240_v7, %v12432_v39  ;;  %vm5718_vm13 = vcmp.ge.f32.partialorder %v12356_v60, 0.0  ;;  %v12541_v14 = vadd.f32 %v5187_v63, %v12331_v27  ;;  %v12545_v55 = vpop.eup %9247  ;;  %vm5732_vm3 = vcmp.ge.f32.partialorder %v12364_v56, 0.0  ;;  %7308 = vmatpush.bf16.msra.mxu2 %v8869_v42  ;;  %7272 = vmatpush.bf16.msrb.mxu0 %v8851_v57 }
 0xd68   : > { %vm5733_vm14 = vcmp.ge.f32.partialorder %v12380_v59, 0.0  ;;  %v5537_v20 = vmul.f32 1.442695, %v5430_v51  ;;  %v5984_v39 = vpack.c.bf16 %v5952_v16, %v12458_v12  ;;  %vm5762_vm8 = vcmp.ge.f32.partialorder %v12306_v25, 0.0  ;;  %7291 = vmatpush.bf16.msrb.mxu1 %v8859_v10 }
 0xd69   : > { %v12550_v30 = vpop.eup %9249  ;;  %v5796_v27 = vmul.f32 %v9244_v62, %v12446_v47  ;;  %vm5731_vm11 = vcmp.ge.f32.partialorder %v12384_v61, 0.0  ;;  %9257 = vpow2.f32 %v5535_v54  ;;  %v5445_v43 = vsub.f32 0.0, %v5381_v19 }
 0xd6a   : > { %v5889_v8 = vsel %vm5761_vm15, %v9236_v29, %v5825_v50  ;;  %v9252_v12 = vpop.eup %9251  ;;  %v12560_v15 = vmul.f32 %v5844_v48, %v12343_v0  ;;  %9259 = vpow2.f32 %v5531_v28  ;;  %v5565_v51 = vmul.f32 1.442695, %v5444_v3  ;;  %7131 = vmatmul.bf16.gmra.mxu0 %v5984_v39  ;;  %v12571_v0 = vpop.f32.mrf.mxu0  ;;  %v8868_v28 = vld [vmem:[%s9739_s23 + $0x3f0] sm:$0xff] }
 0xd6b   : > { %v5953_v47 = vmul.f32 %v5889_v8, %v12203_v21  ;;  %v9254_v54 = vpop.eup %9253  ;;  %v5845_v29 = vsel %vm5717_vm1, %v12516_v22, %v5781_v9  ;;  %v5843_v63 = vsel %vm5715_vm6, %v9240_v7, %v5779_v44  ;;  %v5782_v19 = vmul.f32 %v12545_v55, %v12465_v4  ;;  %v8844_v21 = vld [vmem:[%s9739_s23 + $0x330] sm:$0xff]  ;;  %v12582_v4 = vpop.f32.mrf.mxu1  ;;  %7309 = vmatpush.bf16.msra.mxu2 %v8868_v28  ;;  %v8850_v44 = vld [vmem:[%s9739_s23 + $0x360] sm:$0xff] }
 0xd6c   : > { %v5379_v16 = vand.u32 2147483647, %v12541_v14  ;;  %v12575_v37 = vpop.eup %9255  ;;  %v5606_v22 = vadd.f32 1.0, %v12550_v30  ;;  %9261 = vpow2.f32 %v5537_v20  ;;  %v12580_v11 = vadd.f32 %v5244_v36, %v12334_v33  ;;  %7252 = vmatpush.bf16.msrb.mxu3 %v8844_v21  ;;  %7273 = vmatpush.bf16.msrb.mxu0 %v8850_v44  ;;  %v8867_v36 = vld [vmem:[%s9739_s23 + $0x3e8] sm:$0xff] }
 0xd6d   : > { %v5985_v7 = vpack.c.bf16 %v5953_v47, %v12461_v6  ;;  %v5860_v9 = vsel %vm5732_vm3, %v9244_v62, %v5796_v27  ;;  %v5797_v3 = vmul.f32 %v9252_v12, %v12481_v5  ;;  %v5823_v48 = vmul.f32 %v12524_v23, %v12439_v18  ;;  %v8858_v6 = vld [vmem:[%s9739_s23 + $0x3a0] sm:$0xff]  ;;  %v5256_v47 = vpop.f32.mrf.mxu3 }
 0xd6e   : > { %v5443_v50 = vsub.f32 0.0, %v5379_v16  ;;  %v5795_v33 = vmul.f32 %v9254_v54, %v12486_v40  ;;  %v5567_v34 = vmul.f32 1.442695, %v5445_v43  ;;  %v5382_v42 = vand.u32 2147483647, %v12580_v11  ;;  %7292 = vmatpush.bf16.msrb.mxu1 %v8858_v6  ;;  %v8843_v40 = vld [vmem:[%s9739_s23 + $0x328] sm:$0xff] }
 0xd6f   : > { %7150 = vmatmul.bf16.gmra.mxu1 %v5985_v7  ;;  %v5826_v62 = vmul.f32 %v12534_v41, %v12455_v45  ;;  %v12595_v5 = vpop.eup %9257  ;;  %v12598_v20 = vmul.f32 %v5845_v29, %v12350_v32  ;;  %v5620_v18 = vadd.f32 1.0, %v12575_v37  ;;  %9263 = vpow2.f32 %v5565_v51  ;;  %7310 = vmatpush.bf16.msra.mxu2 %v8867_v36  ;;  %v5313_v29 = vpop.f32.mrf.mxu2 }
 0xd70   : > { %v5887_v39 = vsel %vm5759_vm5, %v12524_v23, %v5823_v48  ;;  %v12606_v27 = vpop.eup %9259  ;;  %v5846_v45 = vsel %vm5718_vm13, %v12545_v55, %v5782_v19  ;;  %v5924_v32 = vmul.f32 %v5860_v9, %v12364_v56  ;;  %9265 = vrcp.f32 %v5606_v22  ;;  %7253 = vmatpush.bf16.msrb.mxu3 %v8843_v40 }
 0xd71   : > { %v5563_v43 = vmul.f32 1.442695, %v5443_v50  ;;  %v12613_v8 = vmul.f32 %v5843_v63, %v12353_v1  ;;  %v5861_v23 = vsel %vm5733_vm14, %v9252_v12, %v5797_v3  ;;  %v5446_v57 = vsub.f32 0.0, %v5382_v42 }
 0xd72   : > { %v5951_v10 = vmul.f32 %v5887_v39, %v12289_v49  ;;  %v12618_v51 = vpop.eup %9261  ;;  %v5859_v55 = vsel %vm5731_vm11, %v9254_v54, %v5795_v33  ;;  %v5621_v56 = vadd.f32 1.0, %v12595_v5  ;;  %9267 = vpow2.f32 %v5567_v34 }
 0xd73   : > { %v5890_v1 = vsel %vm5762_vm8, %v12534_v41, %v5826_v62  ;;  %v12627_v12 = vmul.f32 %v5846_v45, %v12356_v60  ;;  %9269 = vrcp.f32 %v5620_v18  ;;  %v5619_v49 = vadd.f32 1.0, %v12606_v27 }
 0xd74   : > { %v5983_v63 = vpack.c.bf16 %v5951_v10, %v12496_v53  ;;  %v5972_v19 = vpack.c.bf16 %v5924_v32, %v12560_v15  ;;  %v12633_v54 = vmul.f32 %v5861_v23, %v12380_v59  ;;  %vm5734_vm7 = vcmp.ge.f32.partialorder %v12410_v58, 0.0  ;;  %v5277_v59 = vpop.f32.mrf.mxu0  ;;  %v8849_v32 = vld [vmem:[%s9739_s23 + $0x358] sm:$0xff] }
 0xd75   : > { %9271 = vpow2.f32 %v5563_v43  ;;  %v5954_v41 = vmul.f32 %v5890_v1, %v12306_v25  ;;  %v12637_v16 = vpop.eup %9263  ;;  %v12640_v60 = vmul.f32 %v5859_v55, %v12384_v61  ;;  %v5569_v21 = vmul.f32 1.442695, %v5446_v57  ;;  %v5296_v61 = vpop.f32.mrf.mxu1  ;;  %v8857_v43 = vld [vmem:[%s9739_s23 + $0x398] sm:$0xff]  ;;  %7274 = vmatpush.bf16.msrb.mxu0 %v8849_v32 }
 0xd76   : > { %7112 = vmatmul.bf16.gmra.mxu3 %v5983_v63  ;;  %v12643_v28 = vperm.slane %v12301_v17, 5  ;;  %v12646_v53 = vperm.slane %v12301_v17, 6  ;;  %v9266_v15 = vpop.eup %9265  ;;  %9273 = vrcp.f32 %v5621_v56  ;;  %v12650_v25 = vperm.slane %v12301_v17, 4  ;;  %v5258_v55 = vpop.f32.mrf.mxu3  ;;  %7293 = vmatpush.bf16.msrb.mxu1 %v8857_v43 }
 0xd77   : > { %v5986_v22 = vpack.c.bf16 %v5954_v41, %v12499_v35  ;;  %v12653_v7 = vperm.slane %v12301_v17, 7  ;;  %9275 = vrcp.f32 %v5619_v49  ;;  %v5622_v9 = vadd.f32 1.0, %v12618_v51  ;;  %v5315_v56 = vpop.f32.mrf.mxu2 }
 0xd78   : > { %v12658_v3 = vadd.f32 %v12571_v0, %v12643_v28  ;;  %v12662_v50 = vadd.f32 %v12582_v4, %v12646_v53  ;;  %v12664_v48 = vpop.eup %9267  ;;  %v5636_v35 = vadd.f32 1.0, %v12637_v16  ;;  %v12668_v17 = vadd.f32 %v5256_v47, %v12650_v25 }
 0xd79   : > { %7169 = vmatmul.bf16.gmra.mxu2 %v5986_v22  ;;  %v12671_v44 = vadd.f32 %v5313_v29, %v12653_v7  ;;  %v12674_v6 = vadd.f32 %v5277_v59, %v12643_v28  ;;  %v12676_v0 = vpop.eup %9269  ;;  %v5798_v4 = vmul.f32 %v9266_v15, %v12550_v30  ;;  %9277 = vpow2.f32 %v5569_v21 }
 0xd7a   : > { %v5336_v33 = vand.u32 2147483647, %v12658_v3  ;;  %v5337_v34 = vand.u32 2147483647, %v12662_v50  ;;  %v5973_v62 = vpack.c.bf16 %v12633_v54, %v12598_v20  ;;  %v5971_v18 = vpack.c.bf16 %v12640_v60, %v12613_v8  ;;  %7202 = vmatmul.bf16.vlgmr.msra.gmra.mxu0 %v5972_v19  ;;  %v8842_v19 = vld [vmem:[%s9739_s23 + $0x320] sm:$0xff] }
 0xd7b   : > { %v12681_v42 = vpop.eup %9271  ;;  %v5335_v39 = vand.u32 2147483647, %v12668_v17  ;;  %v12689_v40 = vadd.f32 %v5296_v61, %v12646_v53  ;;  %9279 = vrcp.f32 %v5622_v9  ;;  %v5637_v30 = vadd.f32 1.0, %v12664_v48  ;;  %7254 = vmatpush.bf16.msrb.mxu3 %v8842_v19  ;;  %v8855_v19 = vld [vmem:[%s9739_s23 + $0x388] sm:$0xff] }
 0xd7c   : > { %v5400_v36 = vsub.f32 0.0, %v5336_v33  ;;  %v5401_v45 = vsub.f32 0.0, %v5337_v34  ;;  %v12694_v23 = vpop.eup %9273  ;;  %9281 = vrcp.f32 %v5636_v35  ;;  %v5338_v57 = vand.u32 2147483647, %v12671_v44  ;;  %v5280_v9 = vpop.f32.mrf.mxu0  ;;  %v8866_v35 = vld [vmem:[%s9739_s23 + $0x3e0] sm:$0xff]  ;;  %v8856_v33 = vld [vmem:[%s9739_s23 + $0x390] sm:$0xff] }
 0xd7d   : > { %v5399_v20 = vsub.f32 0.0, %v5335_v39  ;;  %v5352_v10 = vand.u32 2147483647, %v12674_v6  ;;  %v12698_v1 = vpop.eup %9275  ;;  %v5862_v47 = vsel %vm5734_vm7, %v9266_v15, %v5798_v4  ;;  %v5812_v29 = vmul.f32 %v12676_v0, %v12575_v37  ;;  %v8848_v4 = vld [vmem:[%s9739_s23 + $0x350] sm:$0xff]  ;;  %7311 = vmatpush.bf16.msra.mxu2 %v8866_v35  ;;  %7294 = vmatpush.bf16.msrb.mxu1 %v8856_v33 }
 0xd7e   : > { %v5635_v49 = vadd.f32 1.0, %v12681_v42  ;;  %v5477_v63 = vmul.f32 1.442695, %v5400_v36  ;;  %v5479_v54 = vmul.f32 1.442695, %v5401_v45  ;;  %v5402_v41 = vsub.f32 0.0, %v5338_v57  ;;  %7275 = vmatpush.bf16.msrb.mxu0 %v8848_v4  ;;  %v5261_v33 = vpop.f32.mrf.mxu3 }
 0xd7f   : > { %v5416_v21 = vsub.f32 0.0, %v5352_v10  ;;  %v5353_v59 = vand.u32 2147483647, %v12689_v40  ;;  %7221 = vmatmul.bf16.vlgmr.msra.gmra.mxu1 %v5973_v62  ;;  %v12707_v22 = vpop.eup %9277  ;;  %9283 = vrcp.f32 %v5637_v30  ;;  %v5475_v15 = vmul.f32 1.442695, %v5399_v20  ;;  %v5299_v30 = vpop.f32.mrf.mxu1  ;;  %v8841_v20 = vld [vmem:[%s9739_s23 + $0x318] sm:$0xff] }
 0xd80   : > { %v12710_v37 = vadd.f32 %v5258_v55, %v12650_v25  ;;  %v12713_v61 = vadd.f32 %v5315_v56, %v12653_v7  ;;  %v5926_v34 = vmul.f32 %v5862_v47, %v12410_v58  ;;  %9285 = vpow2.f32 %v5477_v63  ;;  %v8865_v57 = vld [vmem:[%s9739_s23 + $0x3d8] sm:$0xff]  ;;  %7255 = vmatpush.bf16.msrb.mxu3 %v8841_v20  ;;  %v8847_v63 = vld [vmem:[%s9739_s23 + $0x348] sm:$0xff]  ;;  %v8864_v35 = vld [vmem:[%s9739_s23 + $0x3d0] sm:$0xff] }
 0xd81   : > { %v5509_v62 = vmul.f32 1.442695, %v5416_v21  ;;  %v5417_v39 = vsub.f32 0.0, %v5353_v59  ;;  %v12719_v36 = vpop.eup %9279  ;;  %v5813_v45 = vmul.f32 %v12694_v23, %v12595_v5  ;;  %9287 = vrcp.f32 %v5635_v49  ;;  %7312 = vmatpush.bf16.msra.mxu2 %v8865_v57  ;;  %v8840_v21 = vld [vmem:[%s9739_s23 + $0x310] sm:$0xff]  ;;  %7295 = vmatpush.bf16.msrb.mxu1 %v8855_v19 }
 0xd82   : > { %v5481_v32 = vmul.f32 1.442695, %v5402_v41  ;;  %v5351_v43 = vand.u32 2147483647, %v12710_v37  ;;  %v12726_v58 = vpop.eup %9281  ;;  %v5811_v10 = vmul.f32 %v12698_v1, %v12606_v27  ;;  %v5638_v55 = vadd.f32 1.0, %v12707_v22  ;;  %7276 = vmatpush.bf16.msrb.mxu0 %v8847_v63 }
 0xd83   : > { %9289 = vpow2.f32 %v5479_v54  ;;  %v5354_v5 = vand.u32 2147483647, %v12713_v61  ;;  %v5511_v56 = vmul.f32 1.442695, %v5417_v39  ;;  %v12733_v49 = vadd.f32 %v5280_v9, %v12643_v28 }
 0xd84   : > { %9291 = vpow2.f32 %v5475_v15  ;;  %v5415_v47 = vsub.f32 0.0, %v5351_v43  ;;  %v5974_v41 = vpack.c.bf16 %v5926_v34, %v12627_v12  ;;  %vm5748_vm2 = vcmp.ge.f32.partialorder %v12421_v24, 0.0  ;;  %7256 = vmatpush.bf16.msrb.mxu3 %v8840_v21 }
 0xd85   : > { %9293 = vpow2.f32 %v5509_v62  ;;  %v12739_v27 = vpop.eup %9283  ;;  %vm5749_vm9 = vcmp.ge.f32.partialorder %v12444_v31, 0.0  ;;  %vm5747_vm10 = vcmp.ge.f32.partialorder %v12452_v46, 0.0  ;;  %v5876_v59 = vsel %vm5748_vm2, %v12676_v0, %v5812_v29  ;;  %v8846_v0 = vld [vmem:[%s9739_s23 + $0x340] sm:$0xff]  ;;  %v5318_v62 = vpop.f32.mrf.mxu2  ;;  %7313 = vmatpush.bf16.msra.mxu2 %v8864_v35 }
 0xd86   : > { %9295 = vpow2.f32 %v5481_v32  ;;  %v5507_v54 = vmul.f32 1.442695, %v5415_v47  ;;  %7183 = vmatmul.bf16.vlgmr.msra.gmra.mxu3 %v5971_v18  ;;  %v12747_v12 = vpop.eup %9285  ;;  %v5877_v15 = vsel %vm5749_vm9, %v12694_v23, %v5813_v45  ;;  %v5418_v9 = vsub.f32 0.0, %v5354_v5  ;;  %v8854_v23 = vld [vmem:[%s9739_s23 + $0x380] sm:$0xff]  ;;  %v5282_v32 = vpop.f32.mrf.mxu0  ;;  %7277 = vmatpush.bf16.msrb.mxu0 %v8846_v0 }
 0xd87   : > { %9297 = vrcp.f32 %v5638_v55  ;;  %v12752_v4 = vpop.eup %9287  ;;  %v5875_v8 = vsel %vm5747_vm10, %v12698_v1, %v5811_v10  ;;  %v5814_v60 = vmul.f32 %v12719_v36, %v12618_v51  ;;  %v5368_v18 = vand.u32 2147483647, %v12733_v49  ;;  %v5301_v10 = vpop.f32.mrf.mxu1  ;;  %7296 = vmatpush.bf16.msrb.mxu1 %v8854_v23  ;;  %v8863_v55 = vld [vmem:[%s9739_s23 + $0x3c8] sm:$0xff] }
 0xd88   : > { %9299 = vpow2.f32 %v5511_v56  ;;  %v5828_v34 = vmul.f32 %v12726_v58, %v12637_v16  ;;  %v12765_v1 = vadd.f32 %v5299_v30, %v12646_v53  ;;  %v12770_v39 = vmul.f32 %v5876_v59, %v12421_v24  ;;  %v8839_v16 = vld [vmem:[%s9739_s23 + $0x308] sm:$0xff] }
 0xd89   : > { %v12760_v29 = vpop.eup %9289  ;;  %9301 = vpow2.f32 %v5507_v54  ;;  %7240 = vmatmul.bf16.vlgmr.msrb.gmra.mxu2 %v5974_v41  ;;  %vm5750_vm12 = vcmp.ge.f32.partialorder %v12479_v38, 0.0  ;;  %vm5764_vm15 = vcmp.ge.f32.partialorder %v12490_v26, 0.0  ;;  %v5592_v45 = vadd.f32 1.0, %v12747_v12  ;;  %7257 = vmatpush.bf16.msrb.mxu3 %v8839_v16 }
 0xd8a   : > { %v12767_v51 = vpop.eup %9291  ;;  %v12779_v30 = vmul.f32 %v5877_v15, %v12444_v31  ;;  %v12782_v20 = vmul.f32 %v5875_v8, %v12452_v46  ;;  %vm5765_vm0 = vcmp.ge.f32.partialorder %v12508_v52, 0.0  ;;  %v5513_v24 = vmul.f32 1.442695, %v5418_v9  ;;  %7314 = vmatpush.bf16.msra.mxu2 %v8863_v55  ;;  %v8838_v9 = vld [vmem:[%s9739_s23 + $0x300] sm:$0xff] }
 0xd8b   : > { %v12776_v43 = vpop.eup %9293  ;;  %v12786_v57 = vadd.f32 %v5261_v33, %v12650_v25  ;;  %v5878_v31 = vsel %vm5750_vm12, %v12719_v36, %v5814_v60  ;;  %vm5763_vm1 = vcmp.ge.f32.partialorder %v12541_v14, 0.0  ;;  %v5593_v46 = vadd.f32 1.0, %v12760_v29 }
 0xd8c   : > { %v12789_v5 = vpop.eup %9295  ;;  %v5432_v56 = vsub.f32 0.0, %v5368_v18  ;;  %v12797_v47 = vadd.f32 %v5318_v62, %v12653_v7  ;;  %v5892_v19 = vsel %vm5764_vm15, %v12726_v58, %v5828_v34  ;;  %vm5766_vm6 = vcmp.ge.f32.partialorder %v12580_v11, 0.0  ;;  %v8862_v18 = vld [vmem:[%s9739_s23 + $0x3c0] sm:$0xff]  ;;  %s13279_s23 = scalar_lea.vmem %s13098_s15, %s9676_s20 }
 0xd8d   : > { %v9298_v63 = vpop.eup %9297  ;;  %v5591_v36 = vadd.f32 1.0, %v12767_v51  ;;  %v5369_v41 = vand.u32 2147483647, %v12765_v1  ;;  %v12806_v54 = vadd.f32 %v5282_v32, %v12643_v28  ;;  %v5829_v59 = vmul.f32 %v12739_v27, %v12664_v48  ;;  %7258 = vmatpush.bf16.msrb.mxu3 %v8838_v9 }
 0xd8e   : > { %v12808_v21 = vpop.eup %9299  ;;  %9303 = vrcp.f32 %v5592_v45  ;;  %v5608_v15 = vadd.f32 1.0, %v12776_v43  ;;  %v12814_v58 = vadd.f32 %v5301_v10, %v12646_v53  ;;  %v5594_v8 = vadd.f32 1.0, %v12789_v5  ;;  %7315 = vmatpush.bf16.msra.mxu2 %v8862_v18 }
 0xd8f   : > { %v12817_v35 = vpop.eup %9301  ;;  %9305 = vpow2.f32 %v5513_v24  ;;  %v5367_v28 = vand.u32 2147483647, %v12786_v57  ;;  %v5384_v60 = vand.u32 2147483647, %v12806_v54  ;;  %v5827_v48 = vmul.f32 %v12752_v4, %v12681_v42 }
 0xd90   : > { %9307 = vrcp.f32 %v5593_v46  ;;  %v5541_v33 = vmul.f32 1.442695, %v5432_v56  ;;  %v5370_v53 = vand.u32 2147483647, %v12797_v47  ;;  %v5609_v0 = vadd.f32 1.0, %v12808_v21 }
 0xd91   : > { %9309 = vrcp.f32 %v5591_v36  ;;  %v5433_v23 = vsub.f32 0.0, %v5369_v41  ;;  %v5448_v34 = vsub.f32 0.0, %v5384_v60  ;;  %v5830_v62 = vmul.f32 %v9298_v63, %v12707_v22 }
 0xd92   : > { %9311 = vrcp.f32 %v5608_v15  ;;  %v5607_v45 = vadd.f32 1.0, %v12817_v35  ;;  %v5385_v32 = vand.u32 2147483647, %v12814_v58  ;;  %v12831_v42 = vmul.f32 %v5878_v31, %v12479_v38 }
 0xd93   : > { %v5956_v16 = vmul.f32 %v5892_v19, %v12490_v26  ;;  %9313 = vrcp.f32 %v5594_v8  ;;  %v5431_v24 = vsub.f32 0.0, %v5367_v28  ;;  %v5893_v55 = vsel %vm5765_vm0, %v12739_v27, %v5829_v59 }
 0xd94   : > { %v9304_v10 = vpop.eup %9303  ;;  %vm5720_vm5 = vcmp.ge.f32.partialorder %v12658_v3, 0.0  ;;  %9315 = vpow2.f32 %v5541_v33  ;;  %v5434_v22 = vsub.f32 0.0, %v5370_v53  ;;  %v5891_v38 = vsel %vm5763_vm1, %v12752_v4, %v5827_v48  ;;  %v5263_v4 = vpop.f32.mrf.mxu3 }
 0xd95   : > { %v12838_v46 = vpop.eup %9305  ;;  %9317 = vrcp.f32 %v5609_v0  ;;  %v5543_v31 = vmul.f32 1.442695, %v5433_v23  ;;  %v5573_v26 = vmul.f32 1.442695, %v5448_v34  ;;  %v5894_v19 = vsel %vm5766_vm6, %v9298_v63, %v5830_v62  ;;  %v5320_v33 = vpop.f32.mrf.mxu2 }
 0xd96   : > { %v12843_v56 = vpop.eup %9307  ;;  %9319 = vrcp.f32 %v5607_v45  ;;  %v5610_v27 = vadd.f32 1.0, %v12838_v46  ;;  %v5449_v36 = vsub.f32 0.0, %v5385_v32  ;;  %v5957_v59 = vmul.f32 %v5893_v55, %v12508_v52 }
 0xd97   : > { %v12848_v41 = vpop.eup %9309  ;;  %v5784_v15 = vmul.f32 %v9304_v10, %v12747_v12  ;;  %v5539_v9 = vmul.f32 1.442695, %v5431_v24  ;;  %9321 = vpow2.f32 %v5573_v26  ;;  %v5955_v28 = vmul.f32 %v5891_v38, %v12541_v14  ;;  %v12900_v38 = vld [vmem:[%s13279_s23] ss:$0 sm:$0xff] }
 0xd98   : > { %v9312_v8 = vpop.eup %9311  ;;  %9323 = vrcp.f32 %v5610_v27  ;;  %v5545_v60 = vmul.f32 1.442695, %v5434_v22  ;;  %v5575_v18 = vmul.f32 1.442695, %v5449_v36  ;;  %v5958_v48 = vmul.f32 %v5894_v19, %v12580_v11 }
 0xd99   : > { %v12853_v63 = vpop.eup %9313  ;;  %vm5721_vm13 = vcmp.ge.f32.partialorder %v12662_v50, 0.0  ;;  %9325 = vpow2.f32 %v5543_v31  ;;  %v5988_v52 = vpack.c.bf16 %v5956_v16, %v12770_v39  ;;  %v5785_v53 = vmul.f32 %v12843_v56, %v12760_v29 }
 0xd9a   : > { %v12858_v12 = vpop.eup %9315  ;;  %vm5736_vm3 = vcmp.ge.f32.partialorder %v12674_v6, 0.0  ;;  %vm5737_vm14 = vcmp.ge.f32.partialorder %v12689_v40, 0.0  ;;  %9327 = vpow2.f32 %v5575_v18  ;;  %v5848_v11 = vsel %vm5720_vm5, %v9304_v10, %v5784_v15  ;;  %v7070_v15 = vpop.f32.mrf.mxu1 }
 0xd9b   : > { %v9318_v14 = vpop.eup %9317  ;;  %vm5719_vm8 = vcmp.ge.f32.partialorder %v12668_v17, 0.0  ;;  %v5800_v0 = vmul.f32 %v9312_v8, %v12776_v43  ;;  %9329 = vpow2.f32 %v5539_v9  ;;  %7207 = vmatmul.bf16.gmra.mxu0 %v5988_v52  ;;  %v5989_v39 = vpack.c.bf16 %v5957_v59, %v12779_v30 }
 0xd9c   : > { %v9320_v23 = vpop.eup %9319  ;;  %9331 = vpow2.f32 %v5545_v60  ;;  %v12870_v29 = vadd.f32 %v5263_v4, %v12650_v25  ;;  %v12873_v34 = vadd.f32 %v5320_v33, %v12653_v7  ;;  %v5987_v62 = vpack.c.bf16 %v5955_v28, %v12782_v20 }
 0xd9d   : > { %v12876_v45 = vpop.eup %9321  ;;  %vm5722_vm11 = vcmp.ge.f32.partialorder %v12671_v44, 0.0  ;;  %vm5735_vm7 = vcmp.ge.f32.partialorder %v12710_v37, 0.0  ;;  %vm5738_vm2 = vcmp.ge.f32.partialorder %v12713_v61, 0.0  ;;  %v5624_v43 = vadd.f32 1.0, %v12858_v12  ;;  %7226 = vmatmul.bf16.gmra.mxu1 %v5989_v39  ;;  %v7032_v31 = vpop.f32.mrf.mxu3 }
 0xd9e   : > { %v5990_v25 = vpack.c.bf16 %v5958_v48, %v12831_v42  ;;  %v9324_v30 = vpop.eup %9323  ;;  %v5801_v7 = vmul.f32 %v9318_v14, %v12808_v21  ;;  %v5640_v32 = vadd.f32 1.0, %v12876_v45  ;;  %v5383_v20 = vand.u32 2147483647, %v12870_v29  ;;  %7188 = vmatmul.bf16.gmra.mxu3 %v5987_v62  ;;  %v7051_v21 = vpop.f32.mrf.mxu0 }
 0xd9f   : > { %v5386_v16 = vand.u32 2147483647, %v12873_v34  ;;  %v12887_v24 = vpop.eup %9325  ;;  %v5912_v10 = vmul.f32 %v5848_v11, %v12658_v3  ;;  %v5783_v55 = vmul.f32 %v12848_v41, %v12767_v51  ;;  %v5864_v42 = vsel %vm5736_vm3, %v9312_v8, %v5800_v0 }
 0xda0   : > { %v5799_v22 = vmul.f32 %v9320_v23, %v12817_v35  ;;  %7245 = vmatmul.bf16.gmra.mxu2 %v5990_v25  ;;  %v12902_v26 = vpop.eup %9327  ;;  %v5849_v3 = vsel %vm5721_vm13, %v12843_v56, %v5785_v53  ;;  %v5802_v51 = vmul.f32 %v9324_v30, %v12838_v46  ;;  %v5447_v19 = vsub.f32 0.0, %v5383_v20 }
 0xda1   : > { %v5450_v27 = vsub.f32 0.0, %v5386_v16  ;;  %v12908_v35 = vpop.eup %9329  ;;  %v5786_v36 = vmul.f32 %v12853_v63, %v12789_v5  ;;  %9333 = vrcp.f32 %v5624_v43  ;;  %v5641_v59 = vadd.f32 1.0, %v12902_v26  ;;  %v7089_v18 = vpop.f32.mrf.mxu2 }
 0xda2   : > { %v7033_v9 = vadd.f32 %v12900_v38, %v7032_v31  ;;  %v12914_v4 = vpop.eup %9331  ;;  %v5928_v8 = vmul.f32 %v5864_v42, %v12674_v6  ;;  %v5865_v46 = vsel %vm5737_vm14, %v9318_v14, %v5801_v7  ;;  %9335 = vrcp.f32 %v5640_v32 }
 0xda3   : > { %v5571_v56 = vmul.f32 1.442695, %v5447_v19  ;;  %v5863_v28 = vsel %vm5735_vm7, %v9320_v23, %v5799_v22  ;;  %v5625_v5 = vadd.f32 1.0, %v12887_v24  ;;  %9337 = vrcp.f32 %v5641_v59 }
 0xda4   : > { %v5577_v60 = vmul.f32 1.442695, %v5450_v27  ;;  %v5847_v48 = vsel %vm5719_vm8, %v12848_v41, %v5783_v55  ;;  %v5866_v6 = vsel %vm5738_vm2, %v9324_v30, %v5802_v51  ;;  %v5623_v52 = vadd.f32 1.0, %v12908_v35 }
 0xda5   : > { %9339 = vpow2.f32 %v5571_v56  ;;  %v5929_v33 = vmul.f32 %v5865_v46, %v12689_v40  ;;  %v5626_v53 = vadd.f32 1.0, %v12914_v4  ;;  %v7052_v14 = vadd.f32 %v7051_v21, %v7033_v9  ;;  %v7034_v25 = vpop.f32.mrf.mxu3  ;;  %v7072_v21 = vpop.f32.mrf.mxu1 }
 0xda6   : > { %9341 = vpow2.f32 %v5577_v60  ;;  %v5913_v11 = vmul.f32 %v5849_v3, %v12662_v50  ;;  %v5850_v0 = vsel %vm5722_vm11, %v12853_v63, %v5786_v36  ;;  %v5927_v41 = vmul.f32 %v5863_v28, %v12710_v37  ;;  %v7053_v63 = vpop.f32.mrf.mxu0 }
 0xda7   : > { %v9334_v39 = vpop.eup %9333  ;;  %v5976_v23 = vpack.c.bf16 %v5928_v8, %v5912_v10  ;;  %v5930_v62 = vmul.f32 %v5866_v6, %v12713_v61  ;;  %9343 = vrcp.f32 %v5625_v5  ;;  %v7071_v43 = vadd.f32 %v7070_v15, %v7052_v14 }
 0xda8   : > { %v9336_v40 = vpop.eup %9335  ;;  %v5911_v30 = vmul.f32 %v5847_v48, %v12668_v17  ;;  %9345 = vrcp.f32 %v5623_v52  ;;  %v7035_v7 = vadd.f32 %v12900_v38, %v7034_v25  ;;  %v5914_v32 = vmul.f32 %v5850_v0, %v12671_v44 }
 0xda9   : > { %v9338_v50 = vpop.eup %9337  ;;  %v5977_v20 = vpack.c.bf16 %v5929_v33, %v5913_v11  ;;  %9347 = vrcp.f32 %v5626_v53  ;;  %v12939_v37 = vadd.f32 %v7089_v18, %v7071_v43  ;;  %v5832_v17 = vmul.f32 %v9336_v40, %v12876_v45  ;;  %v7091_v44 = vpop.f32.mrf.mxu2 }
 0xdaa   : > { %v5975_v10 = vpack.c.bf16 %v5927_v41, %v5911_v30  ;;  %v7054_v61 = vadd.f32 %v7053_v63, %v7035_v7  ;;  %v5978_v42 = vpack.c.bf16 %v5930_v62, %v5914_v32  ;;  %v5816_v27 = vmul.f32 %v9334_v39, %v12858_v12 }
 0xdab   : > { %v9340_v16 = vpop.eup %9339  ;;  %7278 = vmatmul.bf16.vlgmr.msrb.gmra.mxu0 %v5976_v23  ;;  %v5833_v36 = vmul.f32 %v9338_v50, %v12902_v26  ;;  %vm5768_vm9 = vcmp.ge.f32.partialorder %v12806_v54, 0.0  ;;  %vm5752_vm10 = vcmp.ge.f32.partialorder %v12733_v49, 0.0  ;;  %vm5769_vm12 = vcmp.ge.f32.partialorder %v12814_v58, 0.0 }
 0xdac   : > { %v9342_v55 = vpop.eup %9341  ;;  %v5639_v22 = vadd.f32 1.0, %v9340_v16  ;;  %v7073_v3 = vadd.f32 %v7072_v21, %v7054_v61  ;;  %v5896_v9 = vsel %vm5768_vm9, %v9336_v40, %v5832_v17  ;;  %v5880_v12 = vsel %vm5752_vm10, %v9334_v39, %v5816_v27 }
 0xdad   : > { %v5642_v31 = vadd.f32 1.0, %v9342_v55  ;;  %v9344_v51 = vpop.eup %9343  ;;  %7297 = vmatmul.bf16.vlgmr.msrb.gmra.mxu1 %v5977_v20  ;;  %v5897_v46 = vsel %vm5769_vm12, %v9338_v50, %v5833_v36  ;;  %vm5753_vm15 = vcmp.ge.f32.partialorder %v12765_v1, 0.0  ;;  %vm5751_vm0 = vcmp.ge.f32.partialorder %v12786_v57, 0.0 }
 0xdae   : > { %9349 = vrcp.f32 %v5639_v22  ;;  %v9346_v19 = vpop.eup %9345  ;;  %7259 = vmatmul.bf16.vlgmr.msrb.gmra.mxu3 %v5975_v10  ;;  %v12944_v59 = vadd.f32 %v7091_v44, %v7073_v3  ;;  %v5817_v45 = vmul.f32 %v9344_v51, %v12887_v24  ;;  %v5960_v28 = vmul.f32 %v5896_v9, %v12806_v54 }
 0xdaf   : > { %9351 = vrcp.f32 %v5642_v31  ;;  %v9348_v15 = vpop.eup %9347  ;;  %v5815_v8 = vmul.f32 %v9346_v19, %v12908_v35  ;;  %vm5754_vm1 = vcmp.ge.f32.partialorder %v12797_v47, 0.0  ;;  %vm5767_vm6 = vcmp.ge.f32.partialorder %v12870_v29, 0.0 }
 0xdb0   : > { %7316 = vmatmul.bf16.vlgmr.msra.gmra.mxu2 %v5978_v42  ;;  %v5818_v26 = vmul.f32 %v9348_v15, %v12914_v4  ;;  %v5881_v24 = vsel %vm5753_vm15, %v9344_v51, %v5817_v45  ;;  %v5944_v60 = vmul.f32 %v5880_v12, %v12733_v49  ;;  %v5961_v4 = vmul.f32 %v5897_v46, %v12814_v58 }
 0xdb1   : > { %v5879_v18 = vsel %vm5751_vm0, %v9346_v19, %v5815_v8  ;;  %vm5770_vm5 = vcmp.ge.f32.partialorder %v12873_v34, 0.0  ;;  %v5945_v33 = vmul.f32 %v5881_v24, %v12765_v1 }
 0xdb2   : > { %v5882_v6 = vsel %vm5754_vm1, %v9348_v15, %v5818_v26  ;;  %v5992_v14 = vpack.c.bf16 %v5960_v28, %v5944_v60  ;;  %v5943_v11 = vmul.f32 %v5879_v18, %v12786_v57 }
 0xdb3   : > { %v5946_v49 = vmul.f32 %v5882_v6, %v12797_v47  ;;  %v5993_v41 = vpack.c.bf16 %v5961_v4, %v5945_v33 }
 0xdb4   : > { %v9350_v56 = vpop.eup %9349 }
 0xdb5   : > { %v9352_v5 = vpop.eup %9351  ;;  %v5831_v35 = vmul.f32 %v9350_v56, %v9340_v16  ;;  %v7056_v23 = vpop.f32.mrf.mxu0 }
 0xdb6   : > { %v5834_v48 = vmul.f32 %v9352_v5, %v9342_v55  ;;  %v7075_v62 = vpop.f32.mrf.mxu1 }
 0xdb7   : > { %v5895_v52 = vsel %vm5767_vm6, %v9350_v56, %v5831_v35 }
 0xdb8   : > { %v5959_v54 = vmul.f32 %v5895_v52, %v12870_v29  ;;  %v5898_v53 = vsel %vm5770_vm5, %v9352_v5, %v5834_v48 }
 0xdb9   : > { %v5962_v0 = vmul.f32 %v5898_v53, %v12873_v34 }
 0xdba   : > { %v5991_v39 = vpack.c.bf16 %v5959_v54, %v5943_v11 }
 0xdbb   : > { %7283 = vmatmul.bf16.gmra.mxu0 %v5992_v14  ;;  %v5994_v58 = vpack.c.bf16 %v5962_v0, %v5946_v49 }
 0xdbd   : > { %7302 = vmatmul.bf16.gmra.mxu1 %v5993_v41  ;;  %v7058_v40 = vpop.f32.mrf.mxu0 }
 0xdbe   : > { %7264 = vmatmul.bf16.gmra.mxu3 %v5991_v39  ;;  %v7077_v30 = vpop.f32.mrf.mxu1 }
 0xdc0   : > { %7321 = vmatmul.bf16.gmra.mxu2 %v5994_v58 }
 0xdc5   : > { %v7127_v63 = vpop.f32.mrf.mxu0 }
 0xdc6   : > { %v7146_v10 = vpop.f32.mrf.mxu1 }
 0xdcc   : > { %v7037_v1 = vpop.f32.mrf.mxu3 }
 0xdcd   : > { %v7038_v29 = vadd.f32 %v12900_v38, %v7037_v1  ;;  %v7094_v25 = vpop.f32.mrf.mxu2  ;;  %v7129_v55 = vpop.f32.mrf.mxu0 }
 0xdce   : > { %v7148_v22 = vpop.f32.mrf.mxu1 }
 0xdcf   : > { %v7057_v43 = vadd.f32 %v7056_v23, %v7038_v29 }
 0xdd1   : > { %v7076_v57 = vadd.f32 %v7075_v62, %v7057_v43 }
 0xdd3   : > { %v7095_v34 = vadd.f32 %v7094_v25, %v7076_v57 }
 0xdd4   : > { %v7039_v7 = vpop.f32.mrf.mxu3 }
 0xdd5   : > { %v7040_v47 = vadd.f32 %v12900_v38, %v7039_v7  ;;  %v7096_v20 = vpop.f32.mrf.mxu2 }
 0xdd7   : > { %v7059_v50 = vadd.f32 %v7058_v40, %v7040_v47 }
 0xdd9   : > { %v7078_v32 = vadd.f32 %v7077_v30, %v7059_v50 }
 0xddb   : > { %v7097_v16 = vadd.f32 %v7096_v20, %v7078_v32 }
 0xddc   : > { %v7108_v61 = vpop.f32.mrf.mxu3 }
 0xddd   : > { %v7165_v42 = vpop.f32.mrf.mxu2  ;;  %v7109_v46 = vadd.f32 %v7108_v61, %v12939_v37 }
 0xddf   : > { %v7128_v24 = vadd.f32 %v7127_v63, %v7109_v46 }
 0xde1   : > { %v7147_v60 = vadd.f32 %v7146_v10, %v7128_v24 }
 0xde3   : > { %v7166_v48 = vadd.f32 %v7165_v42, %v7147_v60  ;;  %v13280_v60 = vld [vmem:[#allocation28_spill] sm:$0xff] }
 0xde4   : > { %v7110_v21 = vpop.f32.mrf.mxu3 }
 0xde5   : > { %v7167_v31 = vpop.f32.mrf.mxu2  ;;  %v7111_v18 = vadd.f32 %v7110_v21, %v12944_v59 }
 0xde7   : > { %v7132_v17 = vpop.f32.mrf.mxu0  ;;  %v7130_v6 = vadd.f32 %v7129_v55, %v7111_v18 }
 0xde9   : > { %v7149_v14 = vadd.f32 %v7148_v22, %v7130_v6 }
 0xdeb   : > { %v7168_v37 = vadd.f32 %v7167_v31, %v7149_v14 }
 0xdec   : > { %v7151_v3 = vpop.f32.mrf.mxu1 }
 0xdef   : > { %v7134_v44 = vpop.f32.mrf.mxu0 }
 0xdf4   : > { %v7153_v27 = vpop.f32.mrf.mxu1 }
 0xdf7   : > { %v7203_v15 = vpop.f32.mrf.mxu0 }
 0xdf9   : > { %v7113_v51 = vpop.f32.mrf.mxu3 }
 0xdfa   : > { %v7114_v11 = vadd.f32 %v7113_v51, %v7095_v34 }
 0xdfc   : > { %v7170_v19 = vpop.f32.mrf.mxu2  ;;  %v7222_v45 = vpop.f32.mrf.mxu1  ;;  %v7133_v41 = vadd.f32 %v7132_v17, %v7114_v11 }
 0xdfe   : > { %v7152_v1 = vadd.f32 %v7151_v3, %v7133_v41 }
 0xdff   : > { %v7205_v12 = vpop.f32.mrf.mxu0 }
 0xe00   : > { %v7171_v57 = vadd.f32 %v7170_v19, %v7152_v1 }
 0xe01   : > { %v7115_v36 = vpop.f32.mrf.mxu3 }
 0xe02   : > { %v7116_v29 = vadd.f32 %v7115_v36, %v7097_v16 }
 0xe04   : > { %v7172_v38 = vpop.f32.mrf.mxu2  ;;  %v7224_v26 = vpop.f32.mrf.mxu1  ;;  %v7135_v30 = vadd.f32 %v7134_v44, %v7116_v29 }
 0xe06   : > { %v7154_v20 = vadd.f32 %v7153_v27, %v7135_v30 }
 0xe08   : > { %v7173_v16 = vadd.f32 %v7172_v38, %v7154_v20 }
 0xe09   : > { %v7184_v9 = vpop.f32.mrf.mxu3 }
 0xe0a   : > { %v7185_v54 = vadd.f32 %v7184_v9, %v7166_v48 }
 0xe0c   : > { %v7241_v8 = vpop.f32.mrf.mxu2  ;;  %v7204_v0 = vadd.f32 %v7203_v15, %v7185_v54 }
 0xe0e   : > { %v7223_v58 = vadd.f32 %v7222_v45, %v7204_v0 }
 0xe10   : > { %v7242_v43 = vadd.f32 %v7241_v8, %v7223_v58 }
 0xe11   : > { %v7186_v56 = vpop.f32.mrf.mxu3 }
 0xe12   : > { %v7187_v23 = vadd.f32 %v7186_v56, %v7168_v37 }
 0xe14   : > { %v7243_v28 = vpop.f32.mrf.mxu2  ;;  %v7206_v25 = vadd.f32 %v7205_v12, %v7187_v23 }
 0xe16   : > { %v7225_v50 = vadd.f32 %v7224_v26, %v7206_v25 }
 0xe18   : > { %v7208_v5 = vpop.f32.mrf.mxu0  ;;  %v7244_v61 = vadd.f32 %v7243_v28, %v7225_v50 }
 0xe1a   : > { %v7227_v35 = vpop.f32.mrf.mxu1 }
 0xe20   : > { %v7210_v33 = vpop.f32.mrf.mxu0 }
 0xe21   : > { %v7189_v4 = vpop.f32.mrf.mxu3 }
 0xe22   : > { %v7229_v53 = vpop.f32.mrf.mxu1  ;;  %v7190_v34 = vadd.f32 %v7189_v4, %v7171_v57 }
 0xe23   : > { %v7246_v52 = vpop.f32.mrf.mxu2 }
 0xe24   : > { %v7209_v55 = vadd.f32 %v7208_v5, %v7190_v34 }
 0xe26   : > { %v7228_v51 = vadd.f32 %v7227_v35, %v7209_v55 }
 0xe28   : > { %v7279_v62 = vpop.f32.mrf.mxu0  ;;  %v7247_v15 = vadd.f32 %v7246_v52, %v7228_v51 }
 0xe29   : > { %v7191_v49 = vpop.f32.mrf.mxu3 }
 0xe2a   : > { %v7298_v59 = vpop.f32.mrf.mxu1  ;;  %v7192_v44 = vadd.f32 %v7191_v49, %v7173_v16 }
 0xe2b   : > { %v7248_v39 = vpop.f32.mrf.mxu2 }
 0xe2c   : > { %v7211_v27 = vadd.f32 %v7210_v33, %v7192_v44 }
 0xe2e   : > { %v7230_v38 = vadd.f32 %v7229_v53, %v7211_v27  ;;  %v13281_v53 = vld [vmem:[#allocation42_spill] sm:$0xff] }
 0xe30   : > { %v7281_v10 = vpop.f32.mrf.mxu0  ;;  %v7249_v5 = vadd.f32 %v7248_v39, %v7230_v38 }
 0xe31   : > { %v7260_v40 = vpop.f32.mrf.mxu3 }
 0xe32   : > { %v7261_v7 = vadd.f32 %v7260_v40, %v7242_v43  ;;  %v7300_v22 = vpop.f32.mrf.mxu1 }
 0xe33   : > { %v7317_v47 = vpop.f32.mrf.mxu2 }
 0xe34   : > { %v7280_v32 = vadd.f32 %v7279_v62, %v7261_v7 }
 0xe36   : > { %v7299_v63 = vadd.f32 %v7298_v59, %v7280_v32 }
 0xe38   : > { %v7318_v42 = vadd.f32 %v7317_v47, %v7299_v63  ;;  %v7284_v9 = vpop.f32.mrf.mxu0 }
 0xe39   : > { %v7262_v21 = vpop.f32.mrf.mxu3 }
 0xe3a   : > { %v7327_v17 = vadd.f32 %v7318_v42, %v11586_v13  ;;  %v7263_v31 = vadd.f32 %v7262_v21, %v7244_v61  ;;  %v7303_v46 = vpop.f32.mrf.mxu1 }
 0xe3b   : > { %v7319_v3 = vpop.f32.mrf.mxu2 }
 0xe3c   : > { %7331 = vst.msk [vmem:[#allocation2] sm:$0xff] %vm869_vm4, %v7327_v17  ;;  %v7282_v19 = vadd.f32 %v7281_v10, %v7263_v31 }
 0xe3e   : > { %v7301_v36 = vadd.f32 %v7300_v22, %v7282_v19 }
 0xe40   : > { %v7320_v45 = vadd.f32 %v7319_v3, %v7301_v36  ;;  %v7286_v48 = vpop.f32.mrf.mxu0 }
 0xe41   : > { %v7265_v8 = vpop.f32.mrf.mxu3 }
 0xe42   : > { %v7328_v12 = vadd.f32 %v7320_v45, %v11590_v2  ;;  %v7266_v26 = vadd.f32 %v7265_v8, %v7247_v15  ;;  %v7305_v52 = vpop.f32.mrf.mxu1 }
 0xe43   : > { %v7322_v56 = vpop.f32.mrf.mxu2 }
 0xe44   : > { %7332 = vst.msk [vmem:[#allocation2 + $0x8] sm:$0xff] %vm869_vm4, %v7328_v12  ;;  %v7285_v13 = vadd.f32 %v7284_v9, %v7266_v26 }
 0xe46   : > { %v7304_v28 = vadd.f32 %v7303_v46, %v7285_v13 }
 0xe48   : > { %v7323_v24 = vadd.f32 %v7322_v56, %v7304_v28 }
 0xe49   : > { %v7267_v35 = vpop.f32.mrf.mxu3 }
 0xe4a   : > { %v7329_v18 = vadd.f32 %v7323_v24, %v13280_v60  ;;  %v7268_v4 = vadd.f32 %v7267_v35, %v7249_v5 }
 0xe4b   : > { %v7324_v33 = vpop.f32.mrf.mxu2 }
 0xe4c   : > { %7333 = vst.msk [vmem:[#allocation2 + $0x10] sm:$0xff] %vm869_vm4, %v7329_v18  ;;  %v7287_v6 = vadd.f32 %v7286_v48, %v7268_v4 }
 0xe4e   : > { %v7306_v2 = vadd.f32 %v7305_v52, %v7287_v6 }
 0xe50   : > { %v7325_v54 = vadd.f32 %v7324_v33, %v7306_v2  ;;  %7338 = sbr.rel (%p8659_p1) target bundleno = 3872 (0xf20), region = 100 }
 0xe52   : > { %v7330_v14 = vadd.f32 %v7325_v54, %v13281_v53 }
 0xe54   : > { %7334 = vst.msk [vmem:[#allocation2 + $0x18] sm:$0xff] %vm869_vm4, %v7330_v14 }
 0xe55   : > { %v7359_v11 = vld [vmem:[#allocation4] sm:$0x1]  ;;  %v9504_v0 = vmov 0  }
 0xe56   : > { %9357 = vset.pattern.permute.xlu0 %v9504_v0  ;;  %v9358_v49 = vld [vmem:[%s13282_s1] ss:$0 sm:$0xff] }
 0xe57   : > { %7362 = vperm.xlu0 %9357, %v7359_v11   ;;  %v7346_v37 = vmul.f32 %v9358_v49, %v7330_v14  ;;  %v7344_v41 = vmul.f32 %v9358_v49, %v7328_v12  ;;  %v7345_v23 = vmul.f32 %v9358_v49, %v7329_v18  ;;  %v7343_v1 = vmul.f32 %v9358_v49, %v7327_v17 }
 0xe59   : > { %v7356_v39 = vsel %vm869_vm4, %v7346_v37, 0.0  ;;  %v7350_v58 = vsel %vm869_vm4, %v7344_v41, 0.0  ;;  %v7353_v62 = vsel %vm869_vm4, %v7345_v23, 0.0  ;;  %v7347_v29 = vsel %vm869_vm4, %v7343_v1, 0.0 }
 0xe5a   : > { %7357 = vadd.xlane.f32.xlu2 %v7356_v39  ;;  %7351 = vadd.xlane.f32.xlu1 %v7350_v58  ;;  %v7466_v37 = vlaneseq }
 0xe62   : > { %7354 = vadd.xlane.f32.xlu1 %v7353_v62 }
 0xe81   : > { %7348 = vadd.xlane.f32.xlu0 %v7347_v29 }
 0xec9   : > { %v7363_v43 = vpop.permute.xlu0 %7362 }
 0xeca   : > { %v7365_v25 = vperm.slane %v7363_v43, 0 }
 0xecd   : > { %v7352_v59 = vpop.xlane.xlu1 %7351  ;;  %v7358_v40 = vpop.xlane.xlu2 %7357 }
 0xece   : > { %v12985_v30 = vadd.f32 %v7365_v25, %v7352_v59  ;;  %v12989_v47 = vadd.f32 %v7365_v25, %v7358_v40 }
 0xed0   : > { %v7371_v50 = vand.u32 2147483647, %v12985_v30  ;;  %v7373_v32 = vand.u32 2147483647, %v12989_v47 }
 0xed2   : > { %v7375_v20 = vsub.f32 0.0, %v7371_v50  ;;  %v7377_v10 = vsub.f32 0.0, %v7373_v32 }
 0xed4   : > { %v7380_v61 = vmul.f32 1.442695, %v7375_v20  ;;  %v7384_v42 = vmul.f32 1.442695, %v7377_v10 }
 0xed5   : > { %v7355_v57 = vpop.xlane.xlu1 %7354 }
 0xed6   : > { %v12987_v7 = vadd.f32 %v7365_v25, %v7355_v57  ;;  %9359 = vpow2.f32 %v7380_v61 }
 0xed8   : > { %v7372_v34 = vand.u32 2147483647, %v12987_v7 }
 0xeda   : > { %v7376_v63 = vsub.f32 0.0, %v7372_v34  ;;  %v7467_v34 = vand.u32 127, %v7466_v37 }
 0xedc   : > { %v7382_v55 = vmul.f32 1.442695, %v7376_v63  ;;  %v12994_v22 = vpop.eup %9359 }
 0xedd   : > { %v7387_v17 = vadd.f32 1.0, %v12994_v22 }
 0xede   : > { %9361 = vpow2.f32 %v7382_v55 }
 0xedf   : > { %9363 = vpow2.f32 %v7384_v42  ;;  %vm7410_vm13 = vweird.f32 %v7387_v17  ;;  %v7416_v4 = vand.u32 2147483648, %v7387_v17  ;;  %v7414_v52 = vand.u32 2147483647, %v7387_v17 }
 0xee0   : > { %9365 = vrcp.f32 %v7387_v17 }
 0xee1   : > { %v7417_v58 = vor.u32 1.1754944e-38, %v7416_v4  ;;  %vm7415_vm12 = vcmp.eq.f32.partialorder %v7414_v52, 8.507059e+37 }
 0xee4   : > { %v12996_v21 = vpop.eup %9361 }
 0xee5   : > { %v12998_v16 = vpop.eup %9363  ;;  %v7388_v31 = vadd.f32 1.0, %v12996_v21 }
 0xee6   : > { %v7389_v3 = vadd.f32 1.0, %v12998_v16  ;;  %v9366_v15 = vpop.eup %9365 }
 0xee7   : > { %9367 = vrcp.f32 %v7388_v31  ;;  %v7406_v8 = vmul.f32 %v9366_v15, %v7387_v17  ;;  %vm7411_vm4 = vweird.f32 %v9366_v15  ;;  %v7431_v2 = vand.u32 2147483648, %v7388_v31 }
 0xee8   : > { %9369 = vrcp.f32 %v7389_v3  ;;  %v7444_v60 = vand.u32 2147483647, %v7389_v3  ;;  %v7446_v54 = vand.u32 2147483648, %v7389_v3  ;;  %vm13006_vm8 = vmor %vm7410_vm13, %vm7411_vm4  ;;  %vm7425_vm11 = vweird.f32 %v7388_v31 }
 0xee9   : > { %v7407_v46 = vsub.f32 1.0, %v7406_v8  ;;  %v7429_v14 = vand.u32 2147483647, %v7388_v31  ;;  %vm7440_vm7 = vweird.f32 %v7389_v3  ;;  %v7432_v1 = vor.u32 1.1754944e-38, %v7431_v2 }
 0xeea   : > { %vm13020_vm10 = vcmp.eq.f32.partialorder %v7444_v60, 8.507059e+37  ;;  %v7447_v59 = vor.u32 1.1754944e-38, %v7446_v54  ;;  %v7469_v17 = vadd.s32 4294967288, %v7467_v34  ;;  %vm7451_vm4 = vcmp.ge.f32.partialorder %v12985_v30, 0.0 }
 0xeeb   : > { %v7408_v5 = vmul.f32 %v9366_v15, %v7407_v46  ;;  %vm7430_vm15 = vcmp.eq.f32.partialorder %v7429_v14, 8.507059e+37  ;;  %vm7452_vm13 = vcmp.ge.f32.partialorder %v12987_v7, 0.0 }
 0xeed   : > { %v9368_v27 = vpop.eup %9367  ;;  %v7409_v18 = vadd.f32 %v9366_v15, %v7408_v5 }
 0xeee   : > { %v9370_v9 = vpop.eup %9369  ;;  %v7421_v12 = vmul.f32 %v9368_v27, %v7388_v31  ;;  %vm7426_vm3 = vweird.f32 %v9368_v27 }
 0xeef   : > { %v7436_v26 = vmul.f32 %v9370_v9, %v7389_v3  ;;  %vm7441_vm14 = vweird.f32 %v9370_v9  ;;  %v7413_v11 = vsel %vm13006_vm8, %v9366_v15, %v7409_v18  ;;  %vm13012_vm2 = vmor %vm7425_vm11, %vm7426_vm3  ;;  %vm7453_vm3 = vcmp.ge.f32.partialorder %v12989_v47, 0.0 }
 0xef0   : > { %v7422_v38 = vsub.f32 1.0, %v7421_v12  ;;  %vm13016_vm9 = vmor %vm7440_vm7, %vm7441_vm14  ;;  %v7418_v43 = vsel %vm7415_vm12, %v7417_v58, %v7413_v11  ;;  %vm7471_vm8 = vcmask 130112   ;;  %vm7475_vm11 = vcmask 195712  }
 0xef1   : > { %v7437_v56 = vsub.f32 1.0, %v7436_v26  ;;  %v7455_v20 = vmul.f32 %v12994_v22, %v7418_v43  ;;  %v7477_v22 = vadd.s32 4294967272, %v7467_v34  ;;  %vm7479_vm7 = vcmask 261312  }
 0xef2   : > { %v7423_v24 = vmul.f32 %v9368_v27, %v7422_v38 }
 0xef3   : > { %v7438_v35 = vmul.f32 %v9370_v9, %v7437_v56  ;;  %v7459_v3 = vsel %vm7451_vm4, %v7418_v43, %v7455_v20 }
 0xef4   : > { %v7349_v51 = vpop.xlane.xlu0 %7348  ;;  %v7424_v48 = vadd.f32 %v9368_v27, %v7423_v24  ;;  %v7470_v15 = vperm.slane %v7459_v3, %v7469_v17 }
 0xef5   : > { %v13003_v44 = vadd.f32 %v7365_v25, %v7349_v51  ;;  %v7439_v6 = vadd.f32 %v9370_v9, %v7438_v35  ;;  %v7473_v51 = vadd.s32 4294967280, %v7467_v34 }
 0xef6   : > { %v7428_v23 = vsel %vm13012_vm2, %v9368_v27, %v7424_v48  ;;  %vm7482_vm2 = vcmask 253952  }
 0xef7   : > { %v7370_v19 = vand.u32 2147483647, %v13003_v44  ;;  %v7443_v62 = vsel %vm13016_vm9, %v9370_v9, %v7439_v6  ;;  %v7433_v40 = vsel %vm7430_vm15, %v7432_v1, %v7428_v23  ;;  %vm7450_vm14 = vcmp.ge.f32.partialorder %v13003_v44, 0.0 }
 0xef8   : > { %v7448_v32 = vsel %vm13020_vm10, %v7447_v59, %v7443_v62  ;;  %v7456_v10 = vmul.f32 %v12996_v21, %v7433_v40 }
 0xef9   : > { %v7374_v36 = vsub.f32 0.0, %v7370_v19  ;;  %v7457_v55 = vmul.f32 %v12998_v16, %v7448_v32 }
 0xefa   : > { %v7460_v21 = vsel %vm7452_vm13, %v7433_v40, %v7456_v10 }
 0xefb   : > { %v7378_v45 = vmul.f32 1.442695, %v7374_v36  ;;  %v7461_v36 = vsel %vm7453_vm3, %v7448_v32, %v7457_v55  ;;  %v7474_v30 = vperm.slane %v7460_v21, %v7473_v51 }
 0xefd   : > { %9371 = vpow2.f32 %v7378_v45  ;;  %v7478_v45 = vperm.slane %v7461_v36, %v7477_v22 }
 0xf03   : > { %v9372_v13 = vpop.eup %9371 }
 0xf04   : > { %v7386_v28 = vadd.f32 1.0, %v9372_v13 }
 0xf06   : > { %9373 = vrcp.f32 %v7386_v28  ;;  %v7401_v25 = vand.u32 2147483648, %v7386_v28  ;;  %v7399_v50 = vand.u32 2147483647, %v7386_v28  ;;  %vm7395_vm1 = vweird.f32 %v7386_v28 }
 0xf08   : > { %v7402_v61 = vor.u32 1.1754944e-38, %v7401_v25  ;;  %vm7400_vm5 = vcmp.eq.f32.partialorder %v7399_v50, 8.507059e+37 }
 0xf0c   : > { %v9374_v33 = vpop.eup %9373 }
 0xf0d   : > { %v7391_v49 = vmul.f32 %v9374_v33, %v7386_v28  ;;  %vm7396_vm0 = vweird.f32 %v9374_v33 }
 0xf0e   : > { %vm7397_vm6 = vmor %vm7395_vm1, %vm7396_vm0 }
 0xf0f   : > { %v7392_v29 = vsub.f32 1.0, %v7391_v49 }
 0xf11   : > { %v7393_v57 = vmul.f32 %v9374_v33, %v7392_v29 }
 0xf13   : > { %v7394_v63 = vadd.f32 %v9374_v33, %v7393_v57 }
 0xf15   : > { %v7398_v42 = vsel %vm7397_vm6, %v9374_v33, %v7394_v63 }
 0xf16   : > { %v7403_v31 = vsel %vm7400_vm5, %v7402_v61, %v7398_v42 }
 0xf17   : > { %v7454_v19 = vmul.f32 %v9372_v13, %v7403_v31 }
 0xf19   : > { %v7458_v16 = vsel %vm7450_vm14, %v7403_v31, %v7454_v19 }
 0xf1a   : > { %v7468_v27 = vperm.slane %v7458_v16, %v7467_v34 }
 0xf1c   : > { %v7472_v9 = vsel %vm7471_vm8, %v7470_v15, %v7468_v27 }
 0xf1d   : > { %v7476_v7 = vsel %vm7475_vm11, %v7474_v30, %v7472_v9 }
 0xf1e   : > { %v7480_v8 = vsel %vm7479_vm7, %v7478_v45, %v7476_v7 }
 0xf1f   : > { %7483 = vst.msk [vmem:[%s9743_s6] sm:$0x1] %vm7482_vm2, %v7480_v8 }
 0xf20 PF: > { %s13291_s19 = sld [smem:[#allocation10_spill]]  ;;  %s7495_s25 = sshll.u32 %s9743_s6, 4  ;;  %s7496_s25 = int_to_ptr.vmem [resolvable:$true] %s7495_s25 }
 0xf21   : > { %s13292_s18 = sld [smem:[#allocation76_spill]]  ;;  %s13294_s10 = sand.u32 1, %s9445_s30  }
 0xf22   : > { %s7485_s21 = scalar_lea.sflag [#allocation6], %s13294_s10 }
 0xf27   : > { %s7493_s16 = scalar_lea.hbm %s13292_s18, %s13291_s19  ;;  %s9395_s9 = scalar_lea.hbm %s13292_s18, 2 }
 0xf28   : > { %s7497_s3 = sshll.u32 %s7493_s16, 4  ;;  %s7498_s3 = int_to_ptr.hbm [resolvable:$true] %s7497_s3 }
 0xf29   : > { %s9389_s24 = sshra.s32 %s7498_s3, 4  ;;  %s9390_s24 = int_to_ptr.hbm [resolvable:$true] %s9389_s24 }
 0xf2a   : > { %s9391_s0 = scalar_lea.hbm %s9390_s24, 1  ;;  %p9396_p6 = scmp.lt.s32.totalorder %s9390_s24, %s13292_s18 }
 0xf2b   : > { %p9392_p2 = scmp.ne.s32.totalorder %s9390_s24, %s9391_s0  ;;  %p9397_p7 = scmp.lt.s32.totalorder %s9395_s9, %s9391_s0 }
 0xf2d   : > { %p9393_p4 = pnand %p9392_p2, %p9652_p3  ;;  %p9398_p8 = por %p9397_p7, %p9396_p6 }
 0xf2f   : > { %p9394_p5 = pneg %p9393_p4 }
 0xf31   : > { %p9399_p10 = pnand %p9398_p8, %p9394_p5 }
 0xf33   : > { %9402 = shalt.err (!%p9399_p10)
}
 0xf34   : > { %8870 = dma.vmem_to_hbm [thread:$0]  (%p9652_p3), %s7496_s25, 16, %s7498_s3, %s7485_s21  }
 0xf35 PF: > { %s13295_s6 = sld [smem:[#allocation13_spill]] }
 0xf36   : > { %s13296_s29 = sld [smem:[#allocation8_spill]] }
 0xf3b   : > { %p8876_p11 = scmp.ge.s32.totalorder %s13295_s6, 2 }
 0xf3c   : > { %s7509_s20 = sand.u32 1, %s13296_s29  }
 0xf3d   : > { %p8873_p12 = pnand %p8876_p11, %p9662_p9  ;;  %s7510_s7 = scalar_lea.sflag [#allocation6], %s7509_s20 }
 0xf3f   : > { %p8874_p13 = pneg %p8873_p12 }
 0xf41   : > { %9436 = dma.done.wait (%p8874_p13), %s7510_s7, 16  }
 0xf42   : > { %9438 = vsyncadd (%p8874_p13), %s7510_s7, 4294967280  ;;  %s33_s22 = sadd.s32 1, %s13295_s6   ;;  %s13298_s1 = sld [smem:[#allocation9_spill]] }
 0xf43   : > { %p30_p0 = scmp.ge.s32.totalorder %s33_s22, 6   ;;  %s13299_s0 = sld [smem:[#allocation18_spill]] }
 0xf44   : > { %s13300_s19 = sld [smem:[#allocation11_spill]]  ;;  %s13304_s29 = smov %s9445_s30 }
 0xf45   : > { %s13301_s26 = sld [smem:[#allocation12_spill]] }
 0xf46   : > { %s13302_s20 = sld [smem:[#allocation14_spill]] }
 0xf47   : > { %s13303_s21 = sld [smem:[#allocation16_spill]]  ;;  %32 = sbr.rel (!%p30_p0) target bundleno = 17 (0x11), region = 185 }
 0xf48   : > { %s13305_s30 = smov %s13298_s1 }
 0xf4b   : > { %s13306_s1 = smov %s13301_s26 }
 0xf4c   :  { %7515 = vsyncpa [#allocation6], 1 }
 0xf4d   :  { %7517 = vsyncpa [#allocation6 + $0x1], 1 }

</bundles_post_ra>
